<compile_context>
chip_gen: v5e
topology: v5e:2x2
jax: 0.10.0
libtpu: 0.0.40
codegen_flags: <defaults>
</compile_context>

<pallas_src>
import functools
import math

import jax
import jax.numpy as jnp
from jax.experimental import pallas as pl
from jax.experimental.pallas import tpu as pltpu

BN_EPS = 1e-5
BN_TM = 512  # row tile for the fused BN-apply/ReLU/residual kernel


def _round_up(x, m):
    return (x + m - 1) // m * m


@functools.lru_cache(maxsize=None)
def _vmem_limit_bytes():
    # Leave headroom for compiler scratch / double buffers; v7x only has 64 MiB physical.
    try:
        cap = int(pltpu.get_tpu_info().vmem_capacity_bytes)
    except Exception:
        cap = 64 * 1024 * 1024
    return min(int(cap * 0.7), 100 * 1024 * 1024)


@functools.lru_cache(maxsize=None)
def _mm_tiles():
    # Larger resident tiles on 128-MiB-VMEM parts (v5e/v6e), smaller on v7x (64 MiB).
    big = _vmem_limit_bytes() >= 80 * 1024 * 1024
    return (512, 512, 512) if big else (256, 256, 512)


def _cparams(dimension_semantics):
    return pltpu.CompilerParams(
        dimension_semantics=dimension_semantics,
        vmem_limit_bytes=_vmem_limit_bytes(),
    )


def _pick_tile(dim, max_tile, gran):
    """Largest tile <= max_tile (multiple of gran) dividing round_up(dim, gran)."""
    d = _round_up(dim, gran)
    t = min(max_tile, d)
    t -= t % gran
    while d % t:
        t -= gran
    return t, d


def _pad_rows(a, rows):
    return a if a.shape[0] == rows else jnp.pad(a, ((0, rows - a.shape[0]), (0, 0)))


# --------------------------------------------------------------------------------------
# Tiled MXU matmul with fused per-channel (sum, sum of squares) statistics.
# --------------------------------------------------------------------------------------
def _mm_stats_kernel(a_ref, b_ref, o_ref, st_ref, acc_ref):
    ki = pl.program_id(2)

    @pl.when(ki == 0)
    def _():
        acc_ref[...] = jnp.zeros_like(acc_ref)

    acc_ref[...] += jnp.dot(a_ref[...], b_ref[...], preferred_element_type=jnp.float32)

    @pl.when(ki == pl.num_programs(2) - 1)
    def _():
        acc = acc_ref[...]
        o_ref[...] = acc.astype(o_ref.dtype)
        s1 = jnp.sum(acc, axis=0, keepdims=True)
        s2 = jnp.sum(acc * acc, axis=0, keepdims=True)
        st_ref[0] = jnp.concatenate([s1, s2], axis=0)


def pallas_matmul_stats(a, b):
    """a:(M,K), b:(K,N) -> (y:(M,N) bf16, col:(2,N) f32) with col = [sum, sumsq] over rows."""
    TM, TN, TK = _mm_tiles()
    M, K = a.shape
    K2, N = b.shape
    assert K2 == K
    tn, Np = _pick_tile(N, TN, 128)
    tk, Kp = _pick_tile(K, TK, 128)
    tm = min(TM, _round_up(M, 16))
    Mp = _round_up(M, tm)

    a = a.astype(jnp.bfloat16)
    b = b.astype(jnp.bfloat16)
    if (Mp, Kp) != (M, K):
        a = jnp.pad(a, ((0, Mp - M), (0, Kp - K)))
    if (Kp, Np) != (K, N):
        b = jnp.pad(b, ((0, Kp - K), (0, Np - N)))

    gm, gn, gk = Mp // tm, Np // tn, Kp // tk
    y, stats = pl.pallas_call(
        _mm_stats_kernel,
        grid=(gn, gm, gk),
        in_specs=[
            pl.BlockSpec((tm, tk), lambda ni, mi, ki: (mi, ki)),
            pl.BlockSpec((tk, tn), lambda ni, mi, ki: (ki, ni)),
        ],
        out_specs=[
            pl.BlockSpec((tm, tn), lambda ni, mi, ki: (mi, ni)),
            pl.BlockSpec((1, 2, tn), lambda ni, mi, ki: (mi, 0, ni)),
        ],
        out_shape=[
            jax.ShapeDtypeStruct((Mp, Np), jnp.bfloat16),
            jax.ShapeDtypeStruct((gm, 2, Np), jnp.float32),
        ],
        scratch_shapes=[pltpu.VMEM((tm, tn), jnp.float32)],
        compiler_params=_cparams(("parallel", "parallel", "arbitrary")),
    )(a, b)

    col = jnp.sum(stats, axis=0)  # (2, Np); zero-padded rows contribute nothing
    if Mp != M:
        y = y[:M]
    if Np != N:
        y = y[:, :N]
        col = col[:, :N]
    return y, col


# --------------------------------------------------------------------------------------
# Fused BatchNorm-apply + ReLU (+ residual add) elementwise kernel.
# --------------------------------------------------------------------------------------
def _bn_act_kernel(x_ref, scale_ref, shift_ref, o_ref, *, relu):
    y = x_ref[...].astype(jnp.float32) * scale_ref[...] + shift_ref[...]
    if relu:
        y = jnp.maximum(y, 0.0)
    o_ref[...] = y.astype(o_ref.dtype)


def _bn_act_res_kernel(x_ref, res_ref, scale_ref, shift_ref, o_ref, *, relu):
    y = x_ref[...].astype(jnp.float32) * scale_ref[...] + shift_ref[...]
    y = y + res_ref[...].astype(jnp.float32)
    if relu:
        y = jnp.maximum(y, 0.0)
    o_ref[...] = y.astype(o_ref.dtype)


def pallas_bn_act(x2d, scale, shift, residual, *, relu):
    M, C = x2d.shape
    tm = min(BN_TM, _round_up(M, 16))
    Mp = _round_up(M, tm)
    xp = _pad_rows(x2d, Mp)

    args = [xp]
    in_specs = [pl.BlockSpec((tm, C), lambda i: (i, 0))]
    if residual is not None:
        args.append(_pad_rows(residual.astype(x2d.dtype), Mp))
        in_specs.append(pl.BlockSpec((tm, C), lambda i: (i, 0)))
        kernel = functools.partial(_bn_act_res_kernel, relu=relu)
    else:
        kernel = functools.partial(_bn_act_kernel, relu=relu)
    args += [scale, shift]
    in_specs += [pl.BlockSpec((1, C), lambda i: (0, 0)),
                 pl.BlockSpec((1, C), lambda i: (0, 0))]

    out = pl.pallas_call(
        kernel,
        grid=(Mp // tm,),
        in_specs=in_specs,
        out_specs=pl.BlockSpec((tm, C), lambda i: (i, 0)),
        out_shape=jax.ShapeDtypeStruct((Mp, C), jnp.bfloat16),
        compiler_params=_cparams(("parallel",)),
    )(*args)
    return out[:M] if Mp != M else out


# --------------------------------------------------------------------------------------
# Conv (im2col + fused matmul/stats) + BN + ReLU (+ residual).
# --------------------------------------------------------------------------------------
def _im2col(x, kh, kw, stride, padding):
    B, H, W, C = x.shape
    if padding:
        x = jnp.pad(x, ((0, 0), (padding, padding), (padding, padding), (0, 0)))
    Ho = (H + 2 * padding - kh) // stride + 1
    Wo = (W + 2 * padding - kw) // stride + 1
    cols = []
    for i in range(kh):
        for j in range(kw):
            cols.append(x[:, i:i + stride * Ho:stride, j:j + stride * Wo:stride, :])
    patches = jnp.stack(cols, axis=3)  # (B, Ho, Wo, kh*kw, C)
    return patches.reshape(B * Ho * Wo, kh * kw * C), (B, Ho, Wo)


def conv_bn_act(x, w_hwio, gamma, beta, *, stride, padding, relu, residual=None):
    kh, kw, cin, cout_p = w_hwio.shape
    a, (B, Ho, Wo) = _im2col(x, kh, kw, stride, padding)
    w_mat = w_hwio.reshape(kh * kw * cin, cout_p)

    y2d, col = pallas_matmul_stats(a, w_mat)          # (M, Cout_p) bf16, (2, Cout_p) f32
    M = B * Ho * Wo

    # BatchNorm (training-mode batch statistics, biased variance, like PyTorch default).
    # TODO(synk): running_mean / running_var buffers are not tracked (forward-only).
    mean = col[0] / M
    var = jnp.maximum(col[1] / M - mean * mean, 0.0)
    inv = jax.lax.rsqrt(var + BN_EPS)
    scale = (gamma * inv).astype(jnp.float32).reshape(1, -1)
    shift = (beta - mean * gamma * inv).astype(jnp.float32).reshape(1, -1)

    res2d = None if residual is None else residual.reshape(M, cout_p)
    out2d = pallas_bn_act(y2d, scale, shift, res2d, relu=relu)
    return out2d.reshape(B, Ho, Wo, cout_p)


# --------------------------------------------------------------------------------------
# 3x3 / stride-2 / pad-1 max-pool via stride-phase split (no 9x HBM blow-up).
# --------------------------------------------------------------------------------------
def _maxpool_kernel(ee_ref, eo_ref, oe_ref, oo_ref, o_ref):
    _, Ho, Wo, _ = o_ref.shape
    ee = ee_ref[0]
    eo = eo_ref[0]
    oe = oe_ref[0]
    oo = oo_ref[0]
    m = oo
    m = jnp.maximum(m, ee[0:Ho, 0:Wo, :])
    m = jnp.maximum(m, ee[0:Ho, 1:Wo + 1, :])
    m = jnp.maximum(m, ee[1:Ho + 1, 0:Wo, :])
    m = jnp.maximum(m, ee[1:Ho + 1, 1:Wo + 1, :])
    m = jnp.maximum(m, eo[0:Ho, :, :])
    m = jnp.maximum(m, eo[1:Ho + 1, :, :])
    m = jnp.maximum(m, oe[:, 0:Wo, :])
    m = jnp.maximum(m, oe[:, 1:Wo + 1, :])
    o_ref[0] = m


def maxpool3x3_s2_p1(x):
    B, H, W, C = x.shape
    xp = jnp.pad(x, ((0, 0), (1, 1), (1, 1), (0, 0)), constant_values=-1e30)
    Ho = (H + 2 - 3) // 2 + 1
    Wo = (W + 2 - 3) // 2 + 1
    # even/odd row x column phases (total bytes == input, just a relayout)
    ee = xp[:, 0::2, 0::2, :][:, :Ho + 1, :Wo + 1, :]
    eo = xp[:, 0::2, 1::2, :][:, :Ho + 1, :Wo, :]
    oe = xp[:, 1::2, 0::2, :][:, :Ho, :Wo + 1, :]
    oo = xp[:, 1::2, 1::2, :][:, :Ho, :Wo, :]
    return pl.pallas_call(
        _maxpool_kernel,
        grid=(B,),
        in_specs=[
            pl.BlockSpec((1, Ho + 1, Wo + 1, C), lambda b: (b, 0, 0, 0)),
            pl.BlockSpec((1, Ho + 1, Wo, C), lambda b: (b, 0, 0, 0)),
            pl.BlockSpec((1, Ho, Wo + 1, C), lambda b: (b, 0, 0, 0)),
            pl.BlockSpec((1, Ho, Wo, C), lambda b: (b, 0, 0, 0)),
        ],
        out_specs=pl.BlockSpec((1, Ho, Wo, C), lambda b: (b, 0, 0, 0)),
        out_shape=jax.ShapeDtypeStruct((B, Ho, Wo, C), x.dtype),
        compiler_params=_cparams(("parallel",)),
    )(ee, eo, oe, oo)


# --------------------------------------------------------------------------------------
# Fused head: global avg-pool + ConcreteDropout + Linear.
# --------------------------------------------------------------------------------------
def _head_kernel(x_ref, u_ref, w_ref, b_ref, o_ref, *, p, inv_hw):
    eps = 1e-7
    tmp = 0.1
    feat = jnp.sum(x_ref[0].astype(jnp.float32), axis=0, keepdims=True) * inv_hw  # (1, F)
    u = u_ref[0]                                                                   # (1, F)
    logit_p = math.log(p + eps) - math.log(1.0 - p + eps)
    drop = jax.nn.sigmoid((logit_p + jnp.log(u + eps) - jnp.log(1.0 - u + eps)) / tmp)
    xd = feat * (1.0 - drop) / (1.0 - p)
    y = jnp.dot(xd.astype(jnp.bfloat16), w_ref[...], preferred_element_type=jnp.float32)
    o_ref[0] = y + b_ref[...]


def pallas_head(x_nhwc, u, fc_w, fc_b, p):
    B, H, W, F = x_nhwc.shape
    Np = fc_w.shape[1]
    x3 = x_nhwc.reshape(B, H * W, F)
    u3 = u.astype(jnp.float32).reshape(B, 1, F)
    b2 = fc_b.reshape(1, Np)
    out = pl.pallas_call(
        functools.partial(_head_kernel, p=float(p), inv_hw=1.0 / (H * W)),
        grid=(B,),
        in_specs=[
            pl.BlockSpec((1, H * W, F), lambda b: (b, 0, 0)),
            pl.BlockSpec((1, 1, F), lambda b: (b, 0, 0)),
            pl.BlockSpec((F, Np), lambda b: (0, 0)),
            pl.BlockSpec((1, Np), lambda b: (0, 0)),
        ],
        out_specs=pl.BlockSpec((1, 1, Np), lambda b: (b, 0, 0)),
        out_shape=jax.ShapeDtypeStruct((B, 1, Np), jnp.float32),
        compiler_params=_cparams(("parallel",)),
    )(x3, u3, fc_w.astype(jnp.bfloat16), b2)
    return out.reshape(B, Np)


# --------------------------------------------------------------------------------------
# ResNet blocks / forward.
# --------------------------------------------------------------------------------------
def basic_block(x, prm):
    stride = prm["stride"]
    if "sc_w" in prm:
        sc = conv_bn_act(x, prm["sc_w"], prm["sc_g"], prm["sc_b"],
                         stride=stride, padding=0, relu=False)
    else:
        sc = x
    out = conv_bn_act(x, prm["conv1_w"], prm["bn1_g"], prm["bn1_b"],
                      stride=stride, padding=1, relu=True)
    # bn2 + residual add + relu fused into the second conv's epilogue kernel
    out = conv_bn_act(out, prm["conv2_w"], prm["bn2_g"], prm["bn2_b"],
                      stride=1, padding=1, relu=True, residual=sc)
    return out


def resnet_forward(params, x_nchw, u_noise, p_drop, num_classes):
    x = jnp.transpose(x_nchw, (0, 2, 3, 1)).astype(jnp.bfloat16)  # NCHW -> NHWC
    x = conv_bn_act(x, params["conv1_w"], params["bn1_g"], params["bn1_b"],
                    stride=2, padding=3, relu=True)
    x = maxpool3x3_s2_p1(x)
    for lname in ("layer1", "layer2", "layer3", "layer4"):
        for blk in params[lname]:
            x = basic_block(x, blk)
    logits = pallas_head(x, u_noise, params["fc_w"], params["fc_b"], p_drop)
    # TODO(synk): ConcreteDropout.regularisation (weight/dropout reg side-effect attribute)
    #             is a loss term, not part of the forward return value; omitted here.
    return logits[:, :num_classes]


# --------------------------------------------------------------------------------------
# Parameter init (raw, PyTorch-like) + preparation (channel padding + bf16 cast).
# --------------------------------------------------------------------------------------
def init_params(key, num_blocks=(1, 1, 1, 1), num_classes=7):
    keys = iter(jax.random.split(key, 64))

    def conv_w(kh, kw, cin, cout):
        fan_in = kh * kw * cin
        return (jax.random.normal(next(keys), (kh, kw, cin, cout), jnp.float32)
                * math.sqrt(2.0 / fan_in))

    params = {
        "conv1_w": conv_w(7, 7, 3, 64),
        "bn1_g": jnp.ones((64,), jnp.float32),
        "bn1_b": jnp.zeros((64,), jnp.float32),
    }
    in_planes = 64
    planes_list = (64, 128, 256, 512)
    strides0 = (1, 2, 2, 2)
    for li, (planes, nb, s0) in enumerate(zip(planes_list, num_blocks, strides0), start=1):
        blocks = []
        for s in [s0] + [1] * (nb - 1):
            blk = {"stride": s,
                   "conv1_w": conv_w(3, 3, in_planes, planes),
                   "bn1_g": jnp.ones((planes,), jnp.float32),
                   "bn1_b": jnp.zeros((planes,), jnp.float32),
                   "conv2_w": conv_w(3, 3, planes, planes),
                   "bn2_g": jnp.ones((planes,), jnp.float32),
                   "bn2_b": jnp.zeros((planes,), jnp.float32)}
            if s != 1 or in_planes != planes:
                blk["sc_w"] = conv_w(1, 1, in_planes, planes)
                blk["sc_g"] = jnp.ones((planes,), jnp.float32)
                blk["sc_b"] = jnp.zeros((planes,), jnp.float32)
            in_planes = planes
            blocks.append(blk)
        params[f"layer{li}"] = blocks
    params["fc_w"] = (jax.random.normal(next(keys), (512, num_classes), jnp.float32)
                      / math.sqrt(512.0))
    params["fc_b"] = jnp.zeros((num_classes,), jnp.float32)
    return params


def prepare_params(raw):
    """Pad channels to multiples of 128 (lane-dense) with zeros and cast weights to bf16."""
    def prep_conv(w, cin_pad, cout_pad):
        kh, kw, cin, cout = w.shape
        w = jnp.pad(w, ((0, 0), (0, 0), (0, cin_pad - cin), (0, cout_pad - cout)))
        return w.astype(jnp.bfloat16)

    def prep_vec(v, cpad):
        return jnp.pad(v, (0, cpad - v.shape[0])).astype(jnp.float32)

    p = {"conv1_w": prep_conv(raw["conv1_w"], 3, 128),
         "bn1_g": prep_vec(raw["bn1_g"], 128),
         "bn1_b": prep_vec(raw["bn1_b"], 128)}
    in_pad = 128
    for lname in ("layer1", "layer2", "layer3", "layer4"):
        blocks = []
        for blk in raw[lname]:
            planes = blk["conv1_w"].shape[3]
            out_pad = _round_up(planes, 128)
            nb = {"stride": blk["stride"],
                  "conv1_w": prep_conv(blk["conv1_w"], in_pad, out_pad),
                  "bn1_g": prep_vec(blk["bn1_g"], out_pad),
                  "bn1_b": prep_vec(blk["bn1_b"], out_pad),
                  "conv2_w": prep_conv(blk["conv2_w"], out_pad, out_pad),
                  "bn2_g": prep_vec(blk["bn2_g"], out_pad),
                  "bn2_b": prep_vec(blk["bn2_b"], out_pad)}
            if "sc_w" in blk:
                nb["sc_w"] = prep_conv(blk["sc_w"], in_pad, out_pad)
                nb["sc_g"] = prep_vec(blk["sc_g"], out_pad)
                nb["sc_b"] = prep_vec(blk["sc_b"], out_pad)
            in_pad = out_pad
            blocks.append(nb)
        p[lname] = blocks
    ncls = raw["fc_w"].shape[1]
    ncls_pad = _round_up(ncls, 128)
    p["fc_w"] = jnp.pad(raw["fc_w"], ((0, 0), (0, ncls_pad - ncls))).astype(jnp.bfloat16)
    p["fc_b"] = jnp.pad(raw["fc_b"], (0, ncls_pad - ncls)).astype(jnp.float32)
    return p


if __name__ == "__main__":
    key = jax.random.PRNGKey(0)
    k_x, k_u, k_p = jax.random.split(key, 3)

    # small input consistent with the module: NCHW, 3 channels (conv1 is 3->64)
    x = jax.random.normal(k_x, (2, 3, 32, 32), jnp.float32)
    raw_params = init_params(k_p, num_blocks=(1, 1, 1, 1), num_classes=7)
    params = prepare_params(raw_params)

    # ConcreteDropout: p_logit ~ U(logit(0.1), logit(0.1)) => p = sigmoid(p_logit) = 0.1
    p_drop = 0.1
    # u_noise ~ U[0,1) like torch.rand_like on the flattened 512-d features
    u_noise = jax.random.uniform(k_u, (2, 512), jnp.float32)

    fwd = jax.jit(lambda xx, uu: resnet_forward(params, xx, uu, p_drop, num_classes=7))
    out = jax.block_until_ready(fwd(x, u_noise))
    assert out.shape == (2, 7) and out.dtype == jnp.float32
    print("KERNEL_OK")
</pallas_src>

<mosaic_0001>
module attributes {stable_mosaic.version = 11 : i64} {
  func.func @_mm_stats_kernel(%arg0: i32, %arg1: i32, %arg2: i32, %arg3: memref<256x256xbf16, #tpu.memory_space<vmem>>, %arg4: memref<256x128xbf16, #tpu.memory_space<vmem>>, %arg5: memref<256x128xbf16, #tpu.memory_space<vmem>>, %arg6: memref<1x2x128xf32, #tpu.memory_space<vmem>>, %arg7: memref<256x128xf32, #tpu.memory_space<vmem>>) attributes {dimension_semantics = [#tpu.dimension_semantics<parallel>, #tpu.dimension_semantics<parallel>, #tpu.dimension_semantics<arbitrary>], iteration_bounds = array<i64: 1, 2, 1>, scalar_prefetch = 0 : i64, scratch_operands = 1 : i64, tpu.core_type = #tpu.core_type<tc>, window_params = [{transform_indices = @transform_0, window_bounds = array<i64: 256, 256>}, {transform_indices = @transform_1, window_bounds = array<i64: 256, 128>}, {transform_indices = @transform_2, window_bounds = array<i64: 256, 128>}, {transform_indices = @transform_3, window_bounds = array<i64: 1, 2, 128>}]} {
    %c0_i32 = arith.constant 0 : i32
    %0 = arith.cmpi eq, %arg2, %c0_i32 : i32
    %1 = arith.extui %0 : i1 to i32
    %c0_i32_0 = arith.constant 0 : i32
    %2 = arith.cmpi ne, %1, %c0_i32_0 : i32
    scf.if %2 {
      %cst_10 = arith.constant 0.000000e+00 : f32
      %12 = vector.broadcast %cst_10 : f32 to vector<256x128xf32>
      %c0_11 = arith.constant 0 : index
      %c0_12 = arith.constant 0 : index
      %13 = vector.load %arg7[%c0_11, %c0_12] : memref<256x128xf32, #tpu.memory_space<vmem>>, vector<256x128xf32>
      tpu.vector_store %arg7[%c0_11, %c0_12], %12 {strides = array<i32>} : memref<256x128xf32, #tpu.memory_space<vmem>>, vector<256x128xf32>,
    } else {
    }
    %c0 = arith.constant 0 : index
    %c0_1 = arith.constant 0 : index
    %3 = vector.load %arg7[%c0, %c0_1] : memref<256x128xf32, #tpu.memory_space<vmem>>, vector<256x128xf32>
    %c0_2 = arith.constant 0 : index
    %c0_3 = arith.constant 0 : index
    %4 = vector.load %arg3[%c0_2, %c0_3] : memref<256x256xbf16, #tpu.memory_space<vmem>>, vector<256x256xbf16>
    %c0_4 = arith.constant 0 : index
    %c0_5 = arith.constant 0 : index
    %5 = vector.load %arg4[%c0_4, %c0_5] : memref<256x128xbf16, #tpu.memory_space<vmem>>, vector<256x128xbf16>
    %cst = arith.constant dense<0.000000e+00> : vector<256x128xf32>
    %6 = tpu.matmul %4, %5, %cst {dimension_numbers = #tpu.dot_dimension_numbers<[1], [0], [0], [1], [0, 0, 1, 1], [], []>} : vector<256x256xbf16>, vector<256x128xbf16>, vector<256x128xf32> -> vector<256x128xf32>
    %7 = arith.addf %3, %6 : vector<256x128xf32>
    %c0_6 = arith.constant 0 : index
    %c0_7 = arith.constant 0 : index
    %8 = vector.load %arg7[%c0_6, %c0_7] : memref<256x128xf32, #tpu.memory_space<vmem>>, vector<256x128xf32>
    tpu.vector_store %arg7[%c0_6, %c0_7], %7 {strides = array<i32>} : memref<256x128xf32, #tpu.memory_space<vmem>>, vector<256x128xf32>,
    %c0_i32_8 = arith.constant 0 : i32
    %9 = arith.cmpi eq, %arg2, %c0_i32_8 : i32
    %10 = arith.extui %9 : i1 to i32
    %c0_i32_9 = arith.constant 0 : i32
    %11 = arith.cmpi ne, %10, %c0_i32_9 : i32
    scf.if %11 {
      %c0_10 = arith.constant 0 : index
      %c0_11 = arith.constant 0 : index
      %12 = vector.load %arg7[%c0_10, %c0_11] : memref<256x128xf32, #tpu.memory_space<vmem>>, vector<256x128xf32>
      %13 = arith.truncf %12 : vector<256x128xf32> to vector<256x128xbf16>
      %c0_12 = arith.constant 0 : index
      %c0_13 = arith.constant 0 : index
      %14 = vector.load %arg5[%c0_12, %c0_13] : memref<256x128xbf16, #tpu.memory_space<vmem>>, vector<256x128xbf16>
      tpu.vector_store %arg5[%c0_12, %c0_13], %13 {strides = array<i32>} : memref<256x128xbf16, #tpu.memory_space<vmem>>, vector<256x128xbf16>,
      %cst_14 = arith.constant dense<0.000000e+00> : vector<128xf32>
      %15 = vector.multi_reduction <add>, %12, %cst_14 [0] : vector<256x128xf32> to vector<128xf32>
      %16 = vector.shape_cast %15 : vector<128xf32> to vector<1x128xf32>
      %17 = arith.mulf %12, %12 : vector<256x128xf32>
      %cst_15 = arith.constant dense<0.000000e+00> : vector<128xf32>
      %18 = vector.multi_reduction <add>, %17, %cst_15 [0] : vector<256x128xf32> to vector<128xf32>
      %19 = vector.shape_cast %18 : vector<128xf32> to vector<1x128xf32>
      %20 = tpu.concatenate %16, %19 in 0 : vector<1x128xf32>, vector<1x128xf32> -> vector<2x128xf32>
      %c0_16 = arith.constant 0 : index
      %c0_17 = arith.constant 0 : index
      %c0_18 = arith.constant 0 : index
      %21 = vector.load %arg6[%c0_16, %c0_17, %c0_18] : memref<1x2x128xf32, #tpu.memory_space<vmem>>, vector<1x2x128xf32>
      %22 = vector.shape_cast %21 : vector<1x2x128xf32> to vector<2x128xf32>
      %23 = vector.shape_cast %20 : vector<2x128xf32> to vector<1x2x128xf32>
      tpu.vector_store %arg6[%c0_16, %c0_17, %c0_18], %23 {strides = array<i32>} : memref<1x2x128xf32, #tpu.memory_space<vmem>>, vector<1x2x128xf32>,
    } else {
    }
    return
  }
  func.func @transform_0(%arg0: i32, %arg1: i32, %arg2: i32) -> (i32, i32) {
    %c0_i32 = arith.constant 0 : i32
    return %arg1, %arg2 : i32, i32
  }
  func.func @transform_1(%arg0: i32, %arg1: i32, %arg2: i32) -> (i32, i32) {
    %c0_i32 = arith.constant 0 : i32
    return %arg2, %arg0 : i32, i32
  }
  func.func @transform_2(%arg0: i32, %arg1: i32, %arg2: i32) -> (i32, i32) {
    %c0_i32 = arith.constant 0 : i32
    return %arg1, %arg0 : i32, i32
  }
  func.func @transform_3(%arg0: i32, %arg1: i32, %arg2: i32) -> (i32, i32, i32) {
    %c0_i32 = arith.constant 0 : i32
    %c0_i32_0 = arith.constant 0 : i32
    return %arg1, %c0_i32, %arg0 : i32, i32, i32
  }
}

module attributes {stable_mosaic.version = 11 : i64} {
  func.func @_bn_act_kernel(%arg0: i32, %arg1: memref<512x128xbf16, #tpu.memory_space<vmem>>, %arg2: memref<1x128xf32, #tpu.memory_space<vmem>>, %arg3: memref<1x128xf32, #tpu.memory_space<vmem>>, %arg4: memref<512x128xbf16, #tpu.memory_space<vmem>>) attributes {dimension_semantics = [#tpu.dimension_semantics<parallel>], iteration_bounds = array<i64: 1>, scalar_prefetch = 0 : i64, scratch_operands = 0 : i64, tpu.core_type = #tpu.core_type<tc>, window_params = [{transform_indices = @transform_0, window_bounds = array<i64: 512, 128>}, {pipeline_mode = #tpu.pipeline_mode<synchronous>, transform_indices = @transform_1, window_bounds = array<i64: 1, 128>}, {pipeline_mode = #tpu.pipeline_mode<synchronous>, transform_indices = @transform_2, window_bounds = array<i64: 1, 128>}, {transform_indices = @transform_3, window_bounds = array<i64: 512, 128>}]} {
    %c0 = arith.constant 0 : index
    %c0_0 = arith.constant 0 : index
    %0 = vector.load %arg1[%c0, %c0_0] : memref<512x128xbf16, #tpu.memory_space<vmem>>, vector<512x128xbf16>
    %1 = arith.extf %0 : vector<512x128xbf16> to vector<512x128xf32>
    %c0_1 = arith.constant 0 : index
    %c0_2 = arith.constant 0 : index
    %2 = vector.load %arg2[%c0_1, %c0_2] : memref<1x128xf32, #tpu.memory_space<vmem>>, vector<1x128xf32>
    %3 = vector.broadcast %2 : vector<1x128xf32> to vector<512x128xf32>
    %4 = arith.mulf %1, %3 : vector<512x128xf32>
    %c0_3 = arith.constant 0 : index
    %c0_4 = arith.constant 0 : index
    %5 = vector.load %arg3[%c0_3, %c0_4] : memref<1x128xf32, #tpu.memory_space<vmem>>, vector<1x128xf32>
    %6 = vector.broadcast %5 : vector<1x128xf32> to vector<512x128xf32>
    %7 = arith.addf %4, %6 : vector<512x128xf32>
    %cst = arith.constant 0.000000e+00 : f32
    %8 = vector.broadcast %cst : f32 to vector<512x128xf32>
    %9 = arith.maximumf %7, %8 : vector<512x128xf32>
    %10 = arith.truncf %9 : vector<512x128xf32> to vector<512x128xbf16>
    %c0_5 = arith.constant 0 : index
    %c0_6 = arith.constant 0 : index
    %11 = vector.load %arg4[%c0_5, %c0_6] : memref<512x128xbf16, #tpu.memory_space<vmem>>, vector<512x128xbf16>
    tpu.vector_store %arg4[%c0_5, %c0_6], %10 {strides = array<i32>} : memref<512x128xbf16, #tpu.memory_space<vmem>>, vector<512x128xbf16>,
    return
  }
  func.func @transform_0(%arg0: i32) -> (i32, i32) {
    %c0_i32 = arith.constant 0 : i32
    %c0_i32_0 = arith.constant 0 : i32
    return %arg0, %c0_i32 : i32, i32
  }
  func.func @transform_1(%arg0: i32) -> (i32, i32) {
    %c0_i32 = arith.constant 0 : i32
    %c0_i32_0 = arith.constant 0 : i32
    %c0_i32_1 = arith.constant 0 : i32
    return %c0_i32, %c0_i32_0 : i32, i32
  }
  func.func @transform_2(%arg0: i32) -> (i32, i32) {
    %c0_i32 = arith.constant 0 : i32
    %c0_i32_0 = arith.constant 0 : i32
    %c0_i32_1 = arith.constant 0 : i32
    return %c0_i32, %c0_i32_0 : i32, i32
  }
  func.func @transform_3(%arg0: i32) -> (i32, i32) {
    %c0_i32 = arith.constant 0 : i32
    %c0_i32_0 = arith.constant 0 : i32
    return %arg0, %c0_i32 : i32, i32
  }
}

module attributes {stable_mosaic.version = 11 : i64} {
  func.func @_maxpool_kernel(%arg0: i32, %arg1: memref<1x9x9x128xbf16, #tpu.memory_space<vmem>>, %arg2: memref<1x9x8x128xbf16, #tpu.memory_space<vmem>>, %arg3: memref<1x8x9x128xbf16, #tpu.memory_space<vmem>>, %arg4: memref<1x8x8x128xbf16, #tpu.memory_space<vmem>>, %arg5: memref<1x8x8x128xbf16, #tpu.memory_space<vmem>>) attributes {dimension_semantics = [#tpu.dimension_semantics<parallel>], iteration_bounds = array<i64: 2>, scalar_prefetch = 0 : i64, scratch_operands = 0 : i64, tpu.core_type = #tpu.core_type<tc>, window_params = [{transform_indices = @transform_0, window_bounds = array<i64: 1, 9, 9, 128>}, {transform_indices = @transform_1, window_bounds = array<i64: 1, 9, 8, 128>}, {transform_indices = @transform_2, window_bounds = array<i64: 1, 8, 9, 128>}, {transform_indices = @transform_3, window_bounds = array<i64: 1, 8, 8, 128>}, {transform_indices = @transform_4, window_bounds = array<i64: 1, 8, 8, 128>}]} {
    %c0 = arith.constant 0 : index
    %c0_0 = arith.constant 0 : index
    %c0_1 = arith.constant 0 : index
    %c0_2 = arith.constant 0 : index
    %0 = vector.load %arg1[%c0, %c0_0, %c0_1, %c0_2] : memref<1x9x9x128xbf16, #tpu.memory_space<vmem>>, vector<1x9x9x128xbf16>
    %1 = vector.shape_cast %0 : vector<1x9x9x128xbf16> to vector<9x9x128xbf16>
    %c0_3 = arith.constant 0 : index
    %c0_4 = arith.constant 0 : index
    %c0_5 = arith.constant 0 : index
    %c0_6 = arith.constant 0 : index
    %2 = vector.load %arg2[%c0_3, %c0_4, %c0_5, %c0_6] : memref<1x9x8x128xbf16, #tpu.memory_space<vmem>>, vector<1x9x8x128xbf16>
    %3 = vector.shape_cast %2 : vector<1x9x8x128xbf16> to vector<9x8x128xbf16>
    %c0_7 = arith.constant 0 : index
    %c0_8 = arith.constant 0 : index
    %c0_9 = arith.constant 0 : index
    %c0_10 = arith.constant 0 : index
    %4 = vector.load %arg3[%c0_7, %c0_8, %c0_9, %c0_10] : memref<1x8x9x128xbf16, #tpu.memory_space<vmem>>, vector<1x8x9x128xbf16>
    %5 = vector.shape_cast %4 : vector<1x8x9x128xbf16> to vector<8x9x128xbf16>
    %c0_11 = arith.constant 0 : index
    %c0_12 = arith.constant 0 : index
    %c0_13 = arith.constant 0 : index
    %c0_14 = arith.constant 0 : index
    %6 = vector.load %arg4[%c0_11, %c0_12, %c0_13, %c0_14] : memref<1x8x8x128xbf16, #tpu.memory_space<vmem>>, vector<1x8x8x128xbf16>
    %7 = vector.shape_cast %6 : vector<1x8x8x128xbf16> to vector<8x8x128xbf16>
    %8 = vector.extract_strided_slice %1 {offsets = [0, 0, 0], sizes = [8, 8, 128], strides = [1, 1, 1]} : vector<9x9x128xbf16> to vector<8x8x128xbf16>
    %9 = arith.maximumf %7, %8 : vector<8x8x128xbf16>
    %10 = vector.extract_strided_slice %1 {offsets = [0, 1, 0], sizes = [8, 8, 128], strides = [1, 1, 1]} : vector<9x9x128xbf16> to vector<8x8x128xbf16>
    %11 = arith.maximumf %9, %10 : vector<8x8x128xbf16>
    %12 = vector.extract_strided_slice %1 {offsets = [1, 0, 0], sizes = [8, 8, 128], strides = [1, 1, 1]} : vector<9x9x128xbf16> to vector<8x8x128xbf16>
    %13 = arith.maximumf %11, %12 : vector<8x8x128xbf16>
    %14 = vector.extract_strided_slice %1 {offsets = [1, 1, 0], sizes = [8, 8, 128], strides = [1, 1, 1]} : vector<9x9x128xbf16> to vector<8x8x128xbf16>
    %15 = arith.maximumf %13, %14 : vector<8x8x128xbf16>
    %16 = vector.extract_strided_slice %3 {offsets = [0, 0, 0], sizes = [8, 8, 128], strides = [1, 1, 1]} : vector<9x8x128xbf16> to vector<8x8x128xbf16>
    %17 = arith.maximumf %15, %16 : vector<8x8x128xbf16>
    %18 = vector.extract_strided_slice %3 {offsets = [1, 0, 0], sizes = [8, 8, 128], strides = [1, 1, 1]} : vector<9x8x128xbf16> to vector<8x8x128xbf16>
    %19 = arith.maximumf %17, %18 : vector<8x8x128xbf16>
    %20 = vector.extract_strided_slice %5 {offsets = [0, 0, 0], sizes = [8, 8, 128], strides = [1, 1, 1]} : vector<8x9x128xbf16> to vector<8x8x128xbf16>
    %21 = arith.maximumf %19, %20 : vector<8x8x128xbf16>
    %22 = vector.extract_strided_slice %5 {offsets = [0, 1, 0], sizes = [8, 8, 128], strides = [1, 1, 1]} : vector<8x9x128xbf16> to vector<8x8x128xbf16>
    %23 = arith.maximumf %21, %22 : vector<8x8x128xbf16>
    %c0_15 = arith.constant 0 : index
    %c0_16 = arith.constant 0 : index
    %c0_17 = arith.constant 0 : index
    %c0_18 = arith.constant 0 : index
    %24 = vector.load %arg5[%c0_15, %c0_16, %c0_17, %c0_18] : memref<1x8x8x128xbf16, #tpu.memory_space<vmem>>, vector<1x8x8x128xbf16>
    %25 = vector.shape_cast %24 : vector<1x8x8x128xbf16> to vector<8x8x128xbf16>
    %26 = vector.shape_cast %23 : vector<8x8x128xbf16> to vector<1x8x8x128xbf16>
    tpu.vector_store %arg5[%c0_15, %c0_16, %c0_17, %c0_18], %26 {strides = array<i32>} : memref<1x8x8x128xbf16, #tpu.memory_space<vmem>>, vector<1x8x8x128xbf16>,
    return
  }
  func.func @transform_0(%arg0: i32) -> (i32, i32, i32, i32) {
    %c0_i32 = arith.constant 0 : i32
    %c0_i32_0 = arith.constant 0 : i32
    %c0_i32_1 = arith.constant 0 : i32
    %c0_i32_2 = arith.constant 0 : i32
    return %arg0, %c0_i32, %c0_i32_0, %c0_i32_1 : i32, i32, i32, i32
  }
  func.func @transform_1(%arg0: i32) -> (i32, i32, i32, i32) {
    %c0_i32 = arith.constant 0 : i32
    %c0_i32_0 = arith.constant 0 : i32
    %c0_i32_1 = arith.constant 0 : i32
    %c0_i32_2 = arith.constant 0 : i32
    return %arg0, %c0_i32, %c0_i32_0, %c0_i32_1 : i32, i32, i32, i32
  }
  func.func @transform_2(%arg0: i32) -> (i32, i32, i32, i32) {
    %c0_i32 = arith.constant 0 : i32
    %c0_i32_0 = arith.constant 0 : i32
    %c0_i32_1 = arith.constant 0 : i32
    %c0_i32_2 = arith.constant 0 : i32
    return %arg0, %c0_i32, %c0_i32_0, %c0_i32_1 : i32, i32, i32, i32
  }
  func.func @transform_3(%arg0: i32) -> (i32, i32, i32, i32) {
    %c0_i32 = arith.constant 0 : i32
    %c0_i32_0 = arith.constant 0 : i32
    %c0_i32_1 = arith.constant 0 : i32
    %c0_i32_2 = arith.constant 0 : i32
    return %arg0, %c0_i32, %c0_i32_0, %c0_i32_1 : i32, i32, i32, i32
  }
  func.func @transform_4(%arg0: i32) -> (i32, i32, i32, i32) {
    %c0_i32 = arith.constant 0 : i32
    %c0_i32_0 = arith.constant 0 : i32
    %c0_i32_1 = arith.constant 0 : i32
    %c0_i32_2 = arith.constant 0 : i32
    return %arg0, %c0_i32, %c0_i32_0, %c0_i32_1 : i32, i32, i32, i32
  }
}

module attributes {stable_mosaic.version = 11 : i64} {
  func.func @_bn_act_kernel(%arg0: i32, %arg1: memref<128x128xbf16, #tpu.memory_space<vmem>>, %arg2: memref<1x128xf32, #tpu.memory_space<vmem>>, %arg3: memref<1x128xf32, #tpu.memory_space<vmem>>, %arg4: memref<128x128xbf16, #tpu.memory_space<vmem>>) attributes {dimension_semantics = [#tpu.dimension_semantics<parallel>], iteration_bounds = array<i64: 1>, scalar_prefetch = 0 : i64, scratch_operands = 0 : i64, tpu.core_type = #tpu.core_type<tc>, window_params = [{transform_indices = @transform_0, window_bounds = array<i64: 128, 128>}, {pipeline_mode = #tpu.pipeline_mode<synchronous>, transform_indices = @transform_1, window_bounds = array<i64: 1, 128>}, {pipeline_mode = #tpu.pipeline_mode<synchronous>, transform_indices = @transform_2, window_bounds = array<i64: 1, 128>}, {transform_indices = @transform_3, window_bounds = array<i64: 128, 128>}]} {
    %c0 = arith.constant 0 : index
    %c0_0 = arith.constant 0 : index
    %0 = vector.load %arg1[%c0, %c0_0] : memref<128x128xbf16, #tpu.memory_space<vmem>>, vector<128x128xbf16>
    %1 = arith.extf %0 : vector<128x128xbf16> to vector<128x128xf32>
    %c0_1 = arith.constant 0 : index
    %c0_2 = arith.constant 0 : index
    %2 = vector.load %arg2[%c0_1, %c0_2] : memref<1x128xf32, #tpu.memory_space<vmem>>, vector<1x128xf32>
    %3 = vector.broadcast %2 : vector<1x128xf32> to vector<128x128xf32>
    %4 = arith.mulf %1, %3 : vector<128x128xf32>
    %c0_3 = arith.constant 0 : index
    %c0_4 = arith.constant 0 : index
    %5 = vector.load %arg3[%c0_3, %c0_4] : memref<1x128xf32, #tpu.memory_space<vmem>>, vector<1x128xf32>
    %6 = vector.broadcast %5 : vector<1x128xf32> to vector<128x128xf32>
    %7 = arith.addf %4, %6 : vector<128x128xf32>
    %cst = arith.constant 0.000000e+00 : f32
    %8 = vector.broadcast %cst : f32 to vector<128x128xf32>
    %9 = arith.maximumf %7, %8 : vector<128x128xf32>
    %10 = arith.truncf %9 : vector<128x128xf32> to vector<128x128xbf16>
    %c0_5 = arith.constant 0 : index
    %c0_6 = arith.constant 0 : index
    %11 = vector.load %arg4[%c0_5, %c0_6] : memref<128x128xbf16, #tpu.memory_space<vmem>>, vector<128x128xbf16>
    tpu.vector_store %arg4[%c0_5, %c0_6], %10 {strides = array<i32>} : memref<128x128xbf16, #tpu.memory_space<vmem>>, vector<128x128xbf16>,
    return
  }
  func.func @transform_0(%arg0: i32) -> (i32, i32) {
    %c0_i32 = arith.constant 0 : i32
    %c0_i32_0 = arith.constant 0 : i32
    return %arg0, %c0_i32 : i32, i32
  }
  func.func @transform_1(%arg0: i32) -> (i32, i32) {
    %c0_i32 = arith.constant 0 : i32
    %c0_i32_0 = arith.constant 0 : i32
    %c0_i32_1 = arith.constant 0 : i32
    return %c0_i32, %c0_i32_0 : i32, i32
  }
  func.func @transform_2(%arg0: i32) -> (i32, i32) {
    %c0_i32 = arith.constant 0 : i32
    %c0_i32_0 = arith.constant 0 : i32
    %c0_i32_1 = arith.constant 0 : i32
    return %c0_i32, %c0_i32_0 : i32, i32
  }
  func.func @transform_3(%arg0: i32) -> (i32, i32) {
    %c0_i32 = arith.constant 0 : i32
    %c0_i32_0 = arith.constant 0 : i32
    return %arg0, %c0_i32 : i32, i32
  }
}

module attributes {stable_mosaic.version = 11 : i64} {
  func.func @_mm_stats_kernel(%arg0: i32, %arg1: i32, %arg2: i32, %arg3: memref<128x384xbf16, #tpu.memory_space<vmem>>, %arg4: memref<384x128xbf16, #tpu.memory_space<vmem>>, %arg5: memref<128x128xbf16, #tpu.memory_space<vmem>>, %arg6: memref<1x2x128xf32, #tpu.memory_space<vmem>>, %arg7: memref<128x128xf32, #tpu.memory_space<vmem>>) attributes {dimension_semantics = [#tpu.dimension_semantics<parallel>, #tpu.dimension_semantics<parallel>, #tpu.dimension_semantics<arbitrary>], iteration_bounds = array<i64: 1, 1, 3>, scalar_prefetch = 0 : i64, scratch_operands = 1 : i64, tpu.core_type = #tpu.core_type<tc>, window_params = [{transform_indices = @transform_0, window_bounds = array<i64: 128, 384>}, {transform_indices = @transform_1, window_bounds = array<i64: 384, 128>}, {transform_indices = @transform_2, window_bounds = array<i64: 128, 128>}, {transform_indices = @transform_3, window_bounds = array<i64: 1, 2, 128>}]} {
    %c0_i32 = arith.constant 0 : i32
    %0 = arith.cmpi eq, %arg2, %c0_i32 : i32
    %1 = arith.extui %0 : i1 to i32
    %c0_i32_0 = arith.constant 0 : i32
    %2 = arith.cmpi ne, %1, %c0_i32_0 : i32
    scf.if %2 {
      %cst_9 = arith.constant 0.000000e+00 : f32
      %12 = vector.broadcast %cst_9 : f32 to vector<128x128xf32>
      %c0_10 = arith.constant 0 : index
      %c0_11 = arith.constant 0 : index
      %13 = vector.load %arg7[%c0_10, %c0_11] : memref<128x128xf32, #tpu.memory_space<vmem>>, vector<128x128xf32>
      tpu.vector_store %arg7[%c0_10, %c0_11], %12 {strides = array<i32>} : memref<128x128xf32, #tpu.memory_space<vmem>>, vector<128x128xf32>,
    } else {
    }
    %c0 = arith.constant 0 : index
    %c0_1 = arith.constant 0 : index
    %3 = vector.load %arg7[%c0, %c0_1] : memref<128x128xf32, #tpu.memory_space<vmem>>, vector<128x128xf32>
    %c0_2 = arith.constant 0 : index
    %c0_3 = arith.constant 0 : index
    %4 = vector.load %arg3[%c0_2, %c0_3] : memref<128x384xbf16, #tpu.memory_space<vmem>>, vector<128x384xbf16>
    %c0_4 = arith.constant 0 : index
    %c0_5 = arith.constant 0 : index
    %5 = vector.load %arg4[%c0_4, %c0_5] : memref<384x128xbf16, #tpu.memory_space<vmem>>, vector<384x128xbf16>
    %cst = arith.constant dense<0.000000e+00> : vector<128x128xf32>
    %6 = tpu.matmul %4, %5, %cst {dimension_numbers = #tpu.dot_dimension_numbers<[1], [0], [0], [1], [0, 0, 1, 1], [], []>} : vector<128x384xbf16>, vector<384x128xbf16>, vector<128x128xf32> -> vector<128x128xf32>
    %7 = arith.addf %3, %6 : vector<128x128xf32>
    %c0_6 = arith.constant 0 : index
    %c0_7 = arith.constant 0 : index
    %8 = vector.load %arg7[%c0_6, %c0_7] : memref<128x128xf32, #tpu.memory_space<vmem>>, vector<128x128xf32>
    tpu.vector_store %arg7[%c0_6, %c0_7], %7 {strides = array<i32>} : memref<128x128xf32, #tpu.memory_space<vmem>>, vector<128x128xf32>,
    %c2_i32 = arith.constant 2 : i32
    %9 = arith.cmpi eq, %arg2, %c2_i32 : i32
    %10 = arith.extui %9 : i1 to i32
    %c0_i32_8 = arith.constant 0 : i32
    %11 = arith.cmpi ne, %10, %c0_i32_8 : i32
    scf.if %11 {
      %c0_9 = arith.constant 0 : index
      %c0_10 = arith.constant 0 : index
      %12 = vector.load %arg7[%c0_9, %c0_10] : memref<128x128xf32, #tpu.memory_space<vmem>>, vector<128x128xf32>
      %13 = arith.truncf %12 : vector<128x128xf32> to vector<128x128xbf16>
      %c0_11 = arith.constant 0 : index
      %c0_12 = arith.constant 0 : index
      %14 = vector.load %arg5[%c0_11, %c0_12] : memref<128x128xbf16, #tpu.memory_space<vmem>>, vector<128x128xbf16>
      tpu.vector_store %arg5[%c0_11, %c0_12], %13 {strides = array<i32>} : memref<128x128xbf16, #tpu.memory_space<vmem>>, vector<128x128xbf16>,
      %cst_13 = arith.constant dense<0.000000e+00> : vector<128xf32>
      %15 = vector.multi_reduction <add>, %12, %cst_13 [0] : vector<128x128xf32> to vector<128xf32>
      %16 = vector.shape_cast %15 : vector<128xf32> to vector<1x128xf32>
      %17 = arith.mulf %12, %12 : vector<128x128xf32>
      %cst_14 = arith.constant dense<0.000000e+00> : vector<128xf32>
      %18 = vector.multi_reduction <add>, %17, %cst_14 [0] : vector<128x128xf32> to vector<128xf32>
      %19 = vector.shape_cast %18 : vector<128xf32> to vector<1x128xf32>
      %20 = tpu.concatenate %16, %19 in 0 : vector<1x128xf32>, vector<1x128xf32> -> vector<2x128xf32>
      %c0_15 = arith.constant 0 : index
      %c0_16 = arith.constant 0 : index
      %c0_17 = arith.constant 0 : index
      %21 = vector.load %arg6[%c0_15, %c0_16, %c0_17] : memref<1x2x128xf32, #tpu.memory_space<vmem>>, vector<1x2x128xf32>
      %22 = vector.shape_cast %21 : vector<1x2x128xf32> to vector<2x128xf32>
      %23 = vector.shape_cast %20 : vector<2x128xf32> to vector<1x2x128xf32>
      tpu.vector_store %arg6[%c0_15, %c0_16, %c0_17], %23 {strides = array<i32>} : memref<1x2x128xf32, #tpu.memory_space<vmem>>, vector<1x2x128xf32>,
    } else {
    }
    return
  }
  func.func @transform_0(%arg0: i32, %arg1: i32, %arg2: i32) -> (i32, i32) {
    %c0_i32 = arith.constant 0 : i32
    return %arg1, %arg2 : i32, i32
  }
  func.func @transform_1(%arg0: i32, %arg1: i32, %arg2: i32) -> (i32, i32) {
    %c0_i32 = arith.constant 0 : i32
    return %arg2, %arg0 : i32, i32
  }
  func.func @transform_2(%arg0: i32, %arg1: i32, %arg2: i32) -> (i32, i32) {
    %c0_i32 = arith.constant 0 : i32
    return %arg1, %arg0 : i32, i32
  }
  func.func @transform_3(%arg0: i32, %arg1: i32, %arg2: i32) -> (i32, i32, i32) {
    %c0_i32 = arith.constant 0 : i32
    %c0_i32_0 = arith.constant 0 : i32
    return %arg1, %c0_i32, %arg0 : i32, i32, i32
  }
}

module attributes {stable_mosaic.version = 11 : i64} {
  func.func @_bn_act_res_kernel(%arg0: i32, %arg1: memref<128x128xbf16, #tpu.memory_space<vmem>>, %arg2: memref<128x128xbf16, #tpu.memory_space<vmem>>, %arg3: memref<1x128xf32, #tpu.memory_space<vmem>>, %arg4: memref<1x128xf32, #tpu.memory_space<vmem>>, %arg5: memref<128x128xbf16, #tpu.memory_space<vmem>>) attributes {dimension_semantics = [#tpu.dimension_semantics<parallel>], iteration_bounds = array<i64: 1>, scalar_prefetch = 0 : i64, scratch_operands = 0 : i64, tpu.core_type = #tpu.core_type<tc>, window_params = [{transform_indices = @transform_0, window_bounds = array<i64: 128, 128>}, {transform_indices = @transform_1, window_bounds = array<i64: 128, 128>}, {pipeline_mode = #tpu.pipeline_mode<synchronous>, transform_indices = @transform_2, window_bounds = array<i64: 1, 128>}, {pipeline_mode = #tpu.pipeline_mode<synchronous>, transform_indices = @transform_3, window_bounds = array<i64: 1, 128>}, {transform_indices = @transform_4, window_bounds = array<i64: 128, 128>}]} {
    %c0 = arith.constant 0 : index
    %c0_0 = arith.constant 0 : index
    %0 = vector.load %arg1[%c0, %c0_0] : memref<128x128xbf16, #tpu.memory_space<vmem>>, vector<128x128xbf16>
    %1 = arith.extf %0 : vector<128x128xbf16> to vector<128x128xf32>
    %c0_1 = arith.constant 0 : index
    %c0_2 = arith.constant 0 : index
    %2 = vector.load %arg3[%c0_1, %c0_2] : memref<1x128xf32, #tpu.memory_space<vmem>>, vector<1x128xf32>
    %3 = vector.broadcast %2 : vector<1x128xf32> to vector<128x128xf32>
    %4 = arith.mulf %1, %3 : vector<128x128xf32>
    %c0_3 = arith.constant 0 : index
    %c0_4 = arith.constant 0 : index
    %5 = vector.load %arg4[%c0_3, %c0_4] : memref<1x128xf32, #tpu.memory_space<vmem>>, vector<1x128xf32>
    %6 = vector.broadcast %5 : vector<1x128xf32> to vector<128x128xf32>
    %7 = arith.addf %4, %6 : vector<128x128xf32>
    %c0_5 = arith.constant 0 : index
    %c0_6 = arith.constant 0 : index
    %8 = vector.load %arg2[%c0_5, %c0_6] : memref<128x128xbf16, #tpu.memory_space<vmem>>, vector<128x128xbf16>
    %9 = arith.extf %8 : vector<128x128xbf16> to vector<128x128xf32>
    %10 = arith.addf %7, %9 : vector<128x128xf32>
    %cst = arith.constant 0.000000e+00 : f32
    %11 = vector.broadcast %cst : f32 to vector<128x128xf32>
    %12 = arith.maximumf %10, %11 : vector<128x128xf32>
    %13 = arith.truncf %12 : vector<128x128xf32> to vector<128x128xbf16>
    %c0_7 = arith.constant 0 : index
    %c0_8 = arith.constant 0 : index
    %14 = vector.load %arg5[%c0_7, %c0_8] : memref<128x128xbf16, #tpu.memory_space<vmem>>, vector<128x128xbf16>
    tpu.vector_store %arg5[%c0_7, %c0_8], %13 {strides = array<i32>} : memref<128x128xbf16, #tpu.memory_space<vmem>>, vector<128x128xbf16>,
    return
  }
  func.func @transform_0(%arg0: i32) -> (i32, i32) {
    %c0_i32 = arith.constant 0 : i32
    %c0_i32_0 = arith.constant 0 : i32
    return %arg0, %c0_i32 : i32, i32
  }
  func.func @transform_1(%arg0: i32) -> (i32, i32) {
    %c0_i32 = arith.constant 0 : i32
    %c0_i32_0 = arith.constant 0 : i32
    return %arg0, %c0_i32 : i32, i32
  }
  func.func @transform_2(%arg0: i32) -> (i32, i32) {
    %c0_i32 = arith.constant 0 : i32
    %c0_i32_0 = arith.constant 0 : i32
    %c0_i32_1 = arith.constant 0 : i32
    return %c0_i32, %c0_i32_0 : i32, i32
  }
  func.func @transform_3(%arg0: i32) -> (i32, i32) {
    %c0_i32 = arith.constant 0 : i32
    %c0_i32_0 = arith.constant 0 : i32
    %c0_i32_1 = arith.constant 0 : i32
    return %c0_i32, %c0_i32_0 : i32, i32
  }
  func.func @transform_4(%arg0: i32) -> (i32, i32) {
    %c0_i32 = arith.constant 0 : i32
    %c0_i32_0 = arith.constant 0 : i32
    return %arg0, %c0_i32 : i32, i32
  }
}

module attributes {stable_mosaic.version = 11 : i64} {
  func.func @_mm_stats_kernel(%arg0: i32, %arg1: i32, %arg2: i32, %arg3: memref<32x384xbf16, #tpu.memory_space<vmem>>, %arg4: memref<384x128xbf16, #tpu.memory_space<vmem>>, %arg5: memref<32x128xbf16, #tpu.memory_space<vmem>>, %arg6: memref<1x2x128xf32, #tpu.memory_space<vmem>>, %arg7: memref<32x128xf32, #tpu.memory_space<vmem>>) attributes {dimension_semantics = [#tpu.dimension_semantics<parallel>, #tpu.dimension_semantics<parallel>, #tpu.dimension_semantics<arbitrary>], iteration_bounds = array<i64: 1, 1, 3>, scalar_prefetch = 0 : i64, scratch_operands = 1 : i64, tpu.core_type = #tpu.core_type<tc>, window_params = [{transform_indices = @transform_0, window_bounds = array<i64: 32, 384>}, {transform_indices = @transform_1, window_bounds = array<i64: 384, 128>}, {transform_indices = @transform_2, window_bounds = array<i64: 32, 128>}, {transform_indices = @transform_3, window_bounds = array<i64: 1, 2, 128>}]} {
    %c0_i32 = arith.constant 0 : i32
    %0 = arith.cmpi eq, %arg2, %c0_i32 : i32
    %1 = arith.extui %0 : i1 to i32
    %c0_i32_0 = arith.constant 0 : i32
    %2 = arith.cmpi ne, %1, %c0_i32_0 : i32
    scf.if %2 {
      %cst_9 = arith.constant 0.000000e+00 : f32
      %12 = vector.broadcast %cst_9 : f32 to vector<32x128xf32>
      %c0_10 = arith.constant 0 : index
      %c0_11 = arith.constant 0 : index
      %13 = vector.load %arg7[%c0_10, %c0_11] : memref<32x128xf32, #tpu.memory_space<vmem>>, vector<32x128xf32>
      tpu.vector_store %arg7[%c0_10, %c0_11], %12 {strides = array<i32>} : memref<32x128xf32, #tpu.memory_space<vmem>>, vector<32x128xf32>,
    } else {
    }
    %c0 = arith.constant 0 : index
    %c0_1 = arith.constant 0 : index
    %3 = vector.load %arg7[%c0, %c0_1] : memref<32x128xf32, #tpu.memory_space<vmem>>, vector<32x128xf32>
    %c0_2 = arith.constant 0 : index
    %c0_3 = arith.constant 0 : index
    %4 = vector.load %arg3[%c0_2, %c0_3] : memref<32x384xbf16, #tpu.memory_space<vmem>>, vector<32x384xbf16>
    %c0_4 = arith.constant 0 : index
    %c0_5 = arith.constant 0 : index
    %5 = vector.load %arg4[%c0_4, %c0_5] : memref<384x128xbf16, #tpu.memory_space<vmem>>, vector<384x128xbf16>
    %cst = arith.constant dense<0.000000e+00> : vector<32x128xf32>
    %6 = tpu.matmul %4, %5, %cst {dimension_numbers = #tpu.dot_dimension_numbers<[1], [0], [0], [1], [0, 0, 1, 1], [], []>} : vector<32x384xbf16>, vector<384x128xbf16>, vector<32x128xf32> -> vector<32x128xf32>
    %7 = arith.addf %3, %6 : vector<32x128xf32>
    %c0_6 = arith.constant 0 : index
    %c0_7 = arith.constant 0 : index
    %8 = vector.load %arg7[%c0_6, %c0_7] : memref<32x128xf32, #tpu.memory_space<vmem>>, vector<32x128xf32>
    tpu.vector_store %arg7[%c0_6, %c0_7], %7 {strides = array<i32>} : memref<32x128xf32, #tpu.memory_space<vmem>>, vector<32x128xf32>,
    %c2_i32 = arith.constant 2 : i32
    %9 = arith.cmpi eq, %arg2, %c2_i32 : i32
    %10 = arith.extui %9 : i1 to i32
    %c0_i32_8 = arith.constant 0 : i32
    %11 = arith.cmpi ne, %10, %c0_i32_8 : i32
    scf.if %11 {
      %c0_9 = arith.constant 0 : index
      %c0_10 = arith.constant 0 : index
      %12 = vector.load %arg7[%c0_9, %c0_10] : memref<32x128xf32, #tpu.memory_space<vmem>>, vector<32x128xf32>
      %13 = arith.truncf %12 : vector<32x128xf32> to vector<32x128xbf16>
      %c0_11 = arith.constant 0 : index
      %c0_12 = arith.constant 0 : index
      %14 = vector.load %arg5[%c0_11, %c0_12] : memref<32x128xbf16, #tpu.memory_space<vmem>>, vector<32x128xbf16>
      tpu.vector_store %arg5[%c0_11, %c0_12], %13 {strides = array<i32>} : memref<32x128xbf16, #tpu.memory_space<vmem>>, vector<32x128xbf16>,
      %cst_13 = arith.constant dense<0.000000e+00> : vector<128xf32>
      %15 = vector.multi_reduction <add>, %12, %cst_13 [0] : vector<32x128xf32> to vector<128xf32>
      %16 = vector.shape_cast %15 : vector<128xf32> to vector<1x128xf32>
      %17 = arith.mulf %12, %12 : vector<32x128xf32>
      %cst_14 = arith.constant dense<0.000000e+00> : vector<128xf32>
      %18 = vector.multi_reduction <add>, %17, %cst_14 [0] : vector<32x128xf32> to vector<128xf32>
      %19 = vector.shape_cast %18 : vector<128xf32> to vector<1x128xf32>
      %20 = tpu.concatenate %16, %19 in 0 : vector<1x128xf32>, vector<1x128xf32> -> vector<2x128xf32>
      %c0_15 = arith.constant 0 : index
      %c0_16 = arith.constant 0 : index
      %c0_17 = arith.constant 0 : index
      %21 = vector.load %arg6[%c0_15, %c0_16, %c0_17] : memref<1x2x128xf32, #tpu.memory_space<vmem>>, vector<1x2x128xf32>
      %22 = vector.shape_cast %21 : vector<1x2x128xf32> to vector<2x128xf32>
      %23 = vector.shape_cast %20 : vector<2x128xf32> to vector<1x2x128xf32>
      tpu.vector_store %arg6[%c0_15, %c0_16, %c0_17], %23 {strides = array<i32>} : memref<1x2x128xf32, #tpu.memory_space<vmem>>, vector<1x2x128xf32>,
    } else {
    }
    return
  }
  func.func @transform_0(%arg0: i32, %arg1: i32, %arg2: i32) -> (i32, i32) {
    %c0_i32 = arith.constant 0 : i32
    return %arg1, %arg2 : i32, i32
  }
  func.func @transform_1(%arg0: i32, %arg1: i32, %arg2: i32) -> (i32, i32) {
    %c0_i32 = arith.constant 0 : i32
    return %arg2, %arg0 : i32, i32
  }
  func.func @transform_2(%arg0: i32, %arg1: i32, %arg2: i32) -> (i32, i32) {
    %c0_i32 = arith.constant 0 : i32
    return %arg1, %arg0 : i32, i32
  }
  func.func @transform_3(%arg0: i32, %arg1: i32, %arg2: i32) -> (i32, i32, i32) {
    %c0_i32 = arith.constant 0 : i32
    %c0_i32_0 = arith.constant 0 : i32
    return %arg1, %c0_i32, %arg0 : i32, i32, i32
  }
}

module attributes {stable_mosaic.version = 11 : i64} {
  func.func @_bn_act_kernel(%arg0: i32, %arg1: memref<32x128xbf16, #tpu.memory_space<vmem>>, %arg2: memref<1x128xf32, #tpu.memory_space<vmem>>, %arg3: memref<1x128xf32, #tpu.memory_space<vmem>>, %arg4: memref<32x128xbf16, #tpu.memory_space<vmem>>) attributes {dimension_semantics = [#tpu.dimension_semantics<parallel>], iteration_bounds = array<i64: 1>, scalar_prefetch = 0 : i64, scratch_operands = 0 : i64, tpu.core_type = #tpu.core_type<tc>, window_params = [{transform_indices = @transform_0, window_bounds = array<i64: 32, 128>}, {pipeline_mode = #tpu.pipeline_mode<synchronous>, transform_indices = @transform_1, window_bounds = array<i64: 1, 128>}, {pipeline_mode = #tpu.pipeline_mode<synchronous>, transform_indices = @transform_2, window_bounds = array<i64: 1, 128>}, {transform_indices = @transform_3, window_bounds = array<i64: 32, 128>}]} {
    %c0 = arith.constant 0 : index
    %c0_0 = arith.constant 0 : index
    %0 = vector.load %arg1[%c0, %c0_0] : memref<32x128xbf16, #tpu.memory_space<vmem>>, vector<32x128xbf16>
    %1 = arith.extf %0 : vector<32x128xbf16> to vector<32x128xf32>
    %c0_1 = arith.constant 0 : index
    %c0_2 = arith.constant 0 : index
    %2 = vector.load %arg2[%c0_1, %c0_2] : memref<1x128xf32, #tpu.memory_space<vmem>>, vector<1x128xf32>
    %3 = vector.broadcast %2 : vector<1x128xf32> to vector<32x128xf32>
    %4 = arith.mulf %1, %3 : vector<32x128xf32>
    %c0_3 = arith.constant 0 : index
    %c0_4 = arith.constant 0 : index
    %5 = vector.load %arg3[%c0_3, %c0_4] : memref<1x128xf32, #tpu.memory_space<vmem>>, vector<1x128xf32>
    %6 = vector.broadcast %5 : vector<1x128xf32> to vector<32x128xf32>
    %7 = arith.addf %4, %6 : vector<32x128xf32>
    %cst = arith.constant 0.000000e+00 : f32
    %8 = vector.broadcast %cst : f32 to vector<32x128xf32>
    %9 = arith.maximumf %7, %8 : vector<32x128xf32>
    %10 = arith.truncf %9 : vector<32x128xf32> to vector<32x128xbf16>
    %c0_5 = arith.constant 0 : index
    %c0_6 = arith.constant 0 : index
    %11 = vector.load %arg4[%c0_5, %c0_6] : memref<32x128xbf16, #tpu.memory_space<vmem>>, vector<32x128xbf16>
    tpu.vector_store %arg4[%c0_5, %c0_6], %10 {strides = array<i32>} : memref<32x128xbf16, #tpu.memory_space<vmem>>, vector<32x128xbf16>,
    return
  }
  func.func @transform_0(%arg0: i32) -> (i32, i32) {
    %c0_i32 = arith.constant 0 : i32
    %c0_i32_0 = arith.constant 0 : i32
    return %arg0, %c0_i32 : i32, i32
  }
  func.func @transform_1(%arg0: i32) -> (i32, i32) {
    %c0_i32 = arith.constant 0 : i32
    %c0_i32_0 = arith.constant 0 : i32
    %c0_i32_1 = arith.constant 0 : i32
    return %c0_i32, %c0_i32_0 : i32, i32
  }
  func.func @transform_2(%arg0: i32) -> (i32, i32) {
    %c0_i32 = arith.constant 0 : i32
    %c0_i32_0 = arith.constant 0 : i32
    %c0_i32_1 = arith.constant 0 : i32
    return %c0_i32, %c0_i32_0 : i32, i32
  }
  func.func @transform_3(%arg0: i32) -> (i32, i32) {
    %c0_i32 = arith.constant 0 : i32
    %c0_i32_0 = arith.constant 0 : i32
    return %arg0, %c0_i32 : i32, i32
  }
}

module attributes {stable_mosaic.version = 11 : i64} {
  func.func @_mm_stats_kernel(%arg0: i32, %arg1: i32, %arg2: i32, %arg3: memref<32x128xbf16, #tpu.memory_space<vmem>>, %arg4: memref<128x128xbf16, #tpu.memory_space<vmem>>, %arg5: memref<32x128xbf16, #tpu.memory_space<vmem>>, %arg6: memref<1x2x128xf32, #tpu.memory_space<vmem>>, %arg7: memref<32x128xf32, #tpu.memory_space<vmem>>) attributes {dimension_semantics = [#tpu.dimension_semantics<parallel>, #tpu.dimension_semantics<parallel>, #tpu.dimension_semantics<arbitrary>], iteration_bounds = array<i64: 1, 1, 1>, scalar_prefetch = 0 : i64, scratch_operands = 1 : i64, tpu.core_type = #tpu.core_type<tc>, window_params = [{transform_indices = @transform_0, window_bounds = array<i64: 32, 128>}, {transform_indices = @transform_1, window_bounds = array<i64: 128, 128>}, {transform_indices = @transform_2, window_bounds = array<i64: 32, 128>}, {transform_indices = @transform_3, window_bounds = array<i64: 1, 2, 128>}]} {
    %c0_i32 = arith.constant 0 : i32
    %0 = arith.cmpi eq, %arg2, %c0_i32 : i32
    %1 = arith.extui %0 : i1 to i32
    %c0_i32_0 = arith.constant 0 : i32
    %2 = arith.cmpi ne, %1, %c0_i32_0 : i32
    scf.if %2 {
      %cst_10 = arith.constant 0.000000e+00 : f32
      %12 = vector.broadcast %cst_10 : f32 to vector<32x128xf32>
      %c0_11 = arith.constant 0 : index
      %c0_12 = arith.constant 0 : index
      %13 = vector.load %arg7[%c0_11, %c0_12] : memref<32x128xf32, #tpu.memory_space<vmem>>, vector<32x128xf32>
      tpu.vector_store %arg7[%c0_11, %c0_12], %12 {strides = array<i32>} : memref<32x128xf32, #tpu.memory_space<vmem>>, vector<32x128xf32>,
    } else {
    }
    %c0 = arith.constant 0 : index
    %c0_1 = arith.constant 0 : index
    %3 = vector.load %arg7[%c0, %c0_1] : memref<32x128xf32, #tpu.memory_space<vmem>>, vector<32x128xf32>
    %c0_2 = arith.constant 0 : index
    %c0_3 = arith.constant 0 : index
    %4 = vector.load %arg3[%c0_2, %c0_3] : memref<32x128xbf16, #tpu.memory_space<vmem>>, vector<32x128xbf16>
    %c0_4 = arith.constant 0 : index
    %c0_5 = arith.constant 0 : index
    %5 = vector.load %arg4[%c0_4, %c0_5] : memref<128x128xbf16, #tpu.memory_space<vmem>>, vector<128x128xbf16>
    %cst = arith.constant dense<0.000000e+00> : vector<32x128xf32>
    %6 = tpu.matmul %4, %5, %cst {dimension_numbers = #tpu.dot_dimension_numbers<[1], [0], [0], [1], [0, 0, 1, 1], [], []>} : vector<32x128xbf16>, vector<128x128xbf16>, vector<32x128xf32> -> vector<32x128xf32>
    %7 = arith.addf %3, %6 : vector<32x128xf32>
    %c0_6 = arith.constant 0 : index
    %c0_7 = arith.constant 0 : index
    %8 = vector.load %arg7[%c0_6, %c0_7] : memref<32x128xf32, #tpu.memory_space<vmem>>, vector<32x128xf32>
    tpu.vector_store %arg7[%c0_6, %c0_7], %7 {strides = array<i32>} : memref<32x128xf32, #tpu.memory_space<vmem>>, vector<32x128xf32>,
    %c0_i32_8 = arith.constant 0 : i32
    %9 = arith.cmpi eq, %arg2, %c0_i32_8 : i32
    %10 = arith.extui %9 : i1 to i32
    %c0_i32_9 = arith.constant 0 : i32
    %11 = arith.cmpi ne, %10, %c0_i32_9 : i32
    scf.if %11 {
      %c0_10 = arith.constant 0 : index
      %c0_11 = arith.constant 0 : index
      %12 = vector.load %arg7[%c0_10, %c0_11] : memref<32x128xf32, #tpu.memory_space<vmem>>, vector<32x128xf32>
      %13 = arith.truncf %12 : vector<32x128xf32> to vector<32x128xbf16>
      %c0_12 = arith.constant 0 : index
      %c0_13 = arith.constant 0 : index
      %14 = vector.load %arg5[%c0_12, %c0_13] : memref<32x128xbf16, #tpu.memory_space<vmem>>, vector<32x128xbf16>
      tpu.vector_store %arg5[%c0_12, %c0_13], %13 {strides = array<i32>} : memref<32x128xbf16, #tpu.memory_space<vmem>>, vector<32x128xbf16>,
      %cst_14 = arith.constant dense<0.000000e+00> : vector<128xf32>
      %15 = vector.multi_reduction <add>, %12, %cst_14 [0] : vector<32x128xf32> to vector<128xf32>
      %16 = vector.shape_cast %15 : vector<128xf32> to vector<1x128xf32>
      %17 = arith.mulf %12, %12 : vector<32x128xf32>
      %cst_15 = arith.constant dense<0.000000e+00> : vector<128xf32>
      %18 = vector.multi_reduction <add>, %17, %cst_15 [0] : vector<32x128xf32> to vector<128xf32>
      %19 = vector.shape_cast %18 : vector<128xf32> to vector<1x128xf32>
      %20 = tpu.concatenate %16, %19 in 0 : vector<1x128xf32>, vector<1x128xf32> -> vector<2x128xf32>
      %c0_16 = arith.constant 0 : index
      %c0_17 = arith.constant 0 : index
      %c0_18 = arith.constant 0 : index
      %21 = vector.load %arg6[%c0_16, %c0_17, %c0_18] : memref<1x2x128xf32, #tpu.memory_space<vmem>>, vector<1x2x128xf32>
      %22 = vector.shape_cast %21 : vector<1x2x128xf32> to vector<2x128xf32>
      %23 = vector.shape_cast %20 : vector<2x128xf32> to vector<1x2x128xf32>
      tpu.vector_store %arg6[%c0_16, %c0_17, %c0_18], %23 {strides = array<i32>} : memref<1x2x128xf32, #tpu.memory_space<vmem>>, vector<1x2x128xf32>,
    } else {
    }
    return
  }
  func.func @transform_0(%arg0: i32, %arg1: i32, %arg2: i32) -> (i32, i32) {
    %c0_i32 = arith.constant 0 : i32
    return %arg1, %arg2 : i32, i32
  }
  func.func @transform_1(%arg0: i32, %arg1: i32, %arg2: i32) -> (i32, i32) {
    %c0_i32 = arith.constant 0 : i32
    return %arg2, %arg0 : i32, i32
  }
  func.func @transform_2(%arg0: i32, %arg1: i32, %arg2: i32) -> (i32, i32) {
    %c0_i32 = arith.constant 0 : i32
    return %arg1, %arg0 : i32, i32
  }
  func.func @transform_3(%arg0: i32, %arg1: i32, %arg2: i32) -> (i32, i32, i32) {
    %c0_i32 = arith.constant 0 : i32
    %c0_i32_0 = arith.constant 0 : i32
    return %arg1, %c0_i32, %arg0 : i32, i32, i32
  }
}

module attributes {stable_mosaic.version = 11 : i64} {
  func.func @_bn_act_kernel(%arg0: i32, %arg1: memref<32x128xbf16, #tpu.memory_space<vmem>>, %arg2: memref<1x128xf32, #tpu.memory_space<vmem>>, %arg3: memref<1x128xf32, #tpu.memory_space<vmem>>, %arg4: memref<32x128xbf16, #tpu.memory_space<vmem>>) attributes {dimension_semantics = [#tpu.dimension_semantics<parallel>], iteration_bounds = array<i64: 1>, scalar_prefetch = 0 : i64, scratch_operands = 0 : i64, tpu.core_type = #tpu.core_type<tc>, window_params = [{transform_indices = @transform_0, window_bounds = array<i64: 32, 128>}, {pipeline_mode = #tpu.pipeline_mode<synchronous>, transform_indices = @transform_1, window_bounds = array<i64: 1, 128>}, {pipeline_mode = #tpu.pipeline_mode<synchronous>, transform_indices = @transform_2, window_bounds = array<i64: 1, 128>}, {transform_indices = @transform_3, window_bounds = array<i64: 32, 128>}]} {
    %c0 = arith.constant 0 : index
    %c0_0 = arith.constant 0 : index
    %0 = vector.load %arg1[%c0, %c0_0] : memref<32x128xbf16, #tpu.memory_space<vmem>>, vector<32x128xbf16>
    %1 = arith.extf %0 : vector<32x128xbf16> to vector<32x128xf32>
    %c0_1 = arith.constant 0 : index
    %c0_2 = arith.constant 0 : index
    %2 = vector.load %arg2[%c0_1, %c0_2] : memref<1x128xf32, #tpu.memory_space<vmem>>, vector<1x128xf32>
    %3 = vector.broadcast %2 : vector<1x128xf32> to vector<32x128xf32>
    %4 = arith.mulf %1, %3 : vector<32x128xf32>
    %c0_3 = arith.constant 0 : index
    %c0_4 = arith.constant 0 : index
    %5 = vector.load %arg3[%c0_3, %c0_4] : memref<1x128xf32, #tpu.memory_space<vmem>>, vector<1x128xf32>
    %6 = vector.broadcast %5 : vector<1x128xf32> to vector<32x128xf32>
    %7 = arith.addf %4, %6 : vector<32x128xf32>
    %8 = arith.truncf %7 : vector<32x128xf32> to vector<32x128xbf16>
    %c0_5 = arith.constant 0 : index
    %c0_6 = arith.constant 0 : index
    %9 = vector.load %arg4[%c0_5, %c0_6] : memref<32x128xbf16, #tpu.memory_space<vmem>>, vector<32x128xbf16>
    tpu.vector_store %arg4[%c0_5, %c0_6], %8 {strides = array<i32>} : memref<32x128xbf16, #tpu.memory_space<vmem>>, vector<32x128xbf16>,
    return
  }
  func.func @transform_0(%arg0: i32) -> (i32, i32) {
    %c0_i32 = arith.constant 0 : i32
    %c0_i32_0 = arith.constant 0 : i32
    return %arg0, %c0_i32 : i32, i32
  }
  func.func @transform_1(%arg0: i32) -> (i32, i32) {
    %c0_i32 = arith.constant 0 : i32
    %c0_i32_0 = arith.constant 0 : i32
    %c0_i32_1 = arith.constant 0 : i32
    return %c0_i32, %c0_i32_0 : i32, i32
  }
  func.func @transform_2(%arg0: i32) -> (i32, i32) {
    %c0_i32 = arith.constant 0 : i32
    %c0_i32_0 = arith.constant 0 : i32
    %c0_i32_1 = arith.constant 0 : i32
    return %c0_i32, %c0_i32_0 : i32, i32
  }
  func.func @transform_3(%arg0: i32) -> (i32, i32) {
    %c0_i32 = arith.constant 0 : i32
    %c0_i32_0 = arith.constant 0 : i32
    return %arg0, %c0_i32 : i32, i32
  }
}

module attributes {stable_mosaic.version = 11 : i64} {
  func.func @_bn_act_res_kernel(%arg0: i32, %arg1: memref<32x128xbf16, #tpu.memory_space<vmem>>, %arg2: memref<32x128xbf16, #tpu.memory_space<vmem>>, %arg3: memref<1x128xf32, #tpu.memory_space<vmem>>, %arg4: memref<1x128xf32, #tpu.memory_space<vmem>>, %arg5: memref<32x128xbf16, #tpu.memory_space<vmem>>) attributes {dimension_semantics = [#tpu.dimension_semantics<parallel>], iteration_bounds = array<i64: 1>, scalar_prefetch = 0 : i64, scratch_operands = 0 : i64, tpu.core_type = #tpu.core_type<tc>, window_params = [{transform_indices = @transform_0, window_bounds = array<i64: 32, 128>}, {transform_indices = @transform_1, window_bounds = array<i64: 32, 128>}, {pipeline_mode = #tpu.pipeline_mode<synchronous>, transform_indices = @transform_2, window_bounds = array<i64: 1, 128>}, {pipeline_mode = #tpu.pipeline_mode<synchronous>, transform_indices = @transform_3, window_bounds = array<i64: 1, 128>}, {transform_indices = @transform_4, window_bounds = array<i64: 32, 128>}]} {
    %c0 = arith.constant 0 : index
    %c0_0 = arith.constant 0 : index
    %0 = vector.load %arg1[%c0, %c0_0] : memref<32x128xbf16, #tpu.memory_space<vmem>>, vector<32x128xbf16>
    %1 = arith.extf %0 : vector<32x128xbf16> to vector<32x128xf32>
    %c0_1 = arith.constant 0 : index
    %c0_2 = arith.constant 0 : index
    %2 = vector.load %arg3[%c0_1, %c0_2] : memref<1x128xf32, #tpu.memory_space<vmem>>, vector<1x128xf32>
    %3 = vector.broadcast %2 : vector<1x128xf32> to vector<32x128xf32>
    %4 = arith.mulf %1, %3 : vector<32x128xf32>
    %c0_3 = arith.constant 0 : index
    %c0_4 = arith.constant 0 : index
    %5 = vector.load %arg4[%c0_3, %c0_4] : memref<1x128xf32, #tpu.memory_space<vmem>>, vector<1x128xf32>
    %6 = vector.broadcast %5 : vector<1x128xf32> to vector<32x128xf32>
    %7 = arith.addf %4, %6 : vector<32x128xf32>
    %c0_5 = arith.constant 0 : index
    %c0_6 = arith.constant 0 : index
    %8 = vector.load %arg2[%c0_5, %c0_6] : memref<32x128xbf16, #tpu.memory_space<vmem>>, vector<32x128xbf16>
    %9 = arith.extf %8 : vector<32x128xbf16> to vector<32x128xf32>
    %10 = arith.addf %7, %9 : vector<32x128xf32>
    %cst = arith.constant 0.000000e+00 : f32
    %11 = vector.broadcast %cst : f32 to vector<32x128xf32>
    %12 = arith.maximumf %10, %11 : vector<32x128xf32>
    %13 = arith.truncf %12 : vector<32x128xf32> to vector<32x128xbf16>
    %c0_7 = arith.constant 0 : index
    %c0_8 = arith.constant 0 : index
    %14 = vector.load %arg5[%c0_7, %c0_8] : memref<32x128xbf16, #tpu.memory_space<vmem>>, vector<32x128xbf16>
    tpu.vector_store %arg5[%c0_7, %c0_8], %13 {strides = array<i32>} : memref<32x128xbf16, #tpu.memory_space<vmem>>, vector<32x128xbf16>,
    return
  }
  func.func @transform_0(%arg0: i32) -> (i32, i32) {
    %c0_i32 = arith.constant 0 : i32
    %c0_i32_0 = arith.constant 0 : i32
    return %arg0, %c0_i32 : i32, i32
  }
  func.func @transform_1(%arg0: i32) -> (i32, i32) {
    %c0_i32 = arith.constant 0 : i32
    %c0_i32_0 = arith.constant 0 : i32
    return %arg0, %c0_i32 : i32, i32
  }
  func.func @transform_2(%arg0: i32) -> (i32, i32) {
    %c0_i32 = arith.constant 0 : i32
    %c0_i32_0 = arith.constant 0 : i32
    %c0_i32_1 = arith.constant 0 : i32
    return %c0_i32, %c0_i32_0 : i32, i32
  }
  func.func @transform_3(%arg0: i32) -> (i32, i32) {
    %c0_i32 = arith.constant 0 : i32
    %c0_i32_0 = arith.constant 0 : i32
    %c0_i32_1 = arith.constant 0 : i32
    return %c0_i32, %c0_i32_0 : i32, i32
  }
  func.func @transform_4(%arg0: i32) -> (i32, i32) {
    %c0_i32 = arith.constant 0 : i32
    %c0_i32_0 = arith.constant 0 : i32
    return %arg0, %c0_i32 : i32, i32
  }
}

module attributes {stable_mosaic.version = 11 : i64} {
  func.func @_mm_stats_kernel(%arg0: i32, %arg1: i32, %arg2: i32, %arg3: memref<16x384xbf16, #tpu.memory_space<vmem>>, %arg4: memref<384x256xbf16, #tpu.memory_space<vmem>>, %arg5: memref<16x256xbf16, #tpu.memory_space<vmem>>, %arg6: memref<1x2x256xf32, #tpu.memory_space<vmem>>, %arg7: memref<16x256xf32, #tpu.memory_space<vmem>>) attributes {dimension_semantics = [#tpu.dimension_semantics<parallel>, #tpu.dimension_semantics<parallel>, #tpu.dimension_semantics<arbitrary>], iteration_bounds = array<i64: 1, 1, 3>, scalar_prefetch = 0 : i64, scratch_operands = 1 : i64, tpu.core_type = #tpu.core_type<tc>, window_params = [{transform_indices = @transform_0, window_bounds = array<i64: 16, 384>}, {transform_indices = @transform_1, window_bounds = array<i64: 384, 256>}, {transform_indices = @transform_2, window_bounds = array<i64: 16, 256>}, {transform_indices = @transform_3, window_bounds = array<i64: 1, 2, 256>}]} {
    %c0_i32 = arith.constant 0 : i32
    %0 = arith.cmpi eq, %arg2, %c0_i32 : i32
    %1 = arith.extui %0 : i1 to i32
    %c0_i32_0 = arith.constant 0 : i32
    %2 = arith.cmpi ne, %1, %c0_i32_0 : i32
    scf.if %2 {
      %cst_9 = arith.constant 0.000000e+00 : f32
      %12 = vector.broadcast %cst_9 : f32 to vector<16x256xf32>
      %c0_10 = arith.constant 0 : index
      %c0_11 = arith.constant 0 : index
      %13 = vector.load %arg7[%c0_10, %c0_11] : memref<16x256xf32, #tpu.memory_space<vmem>>, vector<16x256xf32>
      tpu.vector_store %arg7[%c0_10, %c0_11], %12 {strides = array<i32>} : memref<16x256xf32, #tpu.memory_space<vmem>>, vector<16x256xf32>,
    } else {
    }
    %c0 = arith.constant 0 : index
    %c0_1 = arith.constant 0 : index
    %3 = vector.load %arg7[%c0, %c0_1] : memref<16x256xf32, #tpu.memory_space<vmem>>, vector<16x256xf32>
    %c0_2 = arith.constant 0 : index
    %c0_3 = arith.constant 0 : index
    %4 = vector.load %arg3[%c0_2, %c0_3] : memref<16x384xbf16, #tpu.memory_space<vmem>>, vector<16x384xbf16>
    %c0_4 = arith.constant 0 : index
    %c0_5 = arith.constant 0 : index
    %5 = vector.load %arg4[%c0_4, %c0_5] : memref<384x256xbf16, #tpu.memory_space<vmem>>, vector<384x256xbf16>
    %cst = arith.constant dense<0.000000e+00> : vector<16x256xf32>
    %6 = tpu.matmul %4, %5, %cst {dimension_numbers = #tpu.dot_dimension_numbers<[1], [0], [0], [1], [0, 0, 1, 1], [], []>} : vector<16x384xbf16>, vector<384x256xbf16>, vector<16x256xf32> -> vector<16x256xf32>
    %7 = arith.addf %3, %6 : vector<16x256xf32>
    %c0_6 = arith.constant 0 : index
    %c0_7 = arith.constant 0 : index
    %8 = vector.load %arg7[%c0_6, %c0_7] : memref<16x256xf32, #tpu.memory_space<vmem>>, vector<16x256xf32>
    tpu.vector_store %arg7[%c0_6, %c0_7], %7 {strides = array<i32>} : memref<16x256xf32, #tpu.memory_space<vmem>>, vector<16x256xf32>,
    %c2_i32 = arith.constant 2 : i32
    %9 = arith.cmpi eq, %arg2, %c2_i32 : i32
    %10 = arith.extui %9 : i1 to i32
    %c0_i32_8 = arith.constant 0 : i32
    %11 = arith.cmpi ne, %10, %c0_i32_8 : i32
    scf.if %11 {
      %c0_9 = arith.constant 0 : index
      %c0_10 = arith.constant 0 : index
      %12 = vector.load %arg7[%c0_9, %c0_10] : memref<16x256xf32, #tpu.memory_space<vmem>>, vector<16x256xf32>
      %13 = arith.truncf %12 : vector<16x256xf32> to vector<16x256xbf16>
      %c0_11 = arith.constant 0 : index
      %c0_12 = arith.constant 0 : index
      %14 = vector.load %arg5[%c0_11, %c0_12] : memref<16x256xbf16, #tpu.memory_space<vmem>>, vector<16x256xbf16>
      tpu.vector_store %arg5[%c0_11, %c0_12], %13 {strides = array<i32>} : memref<16x256xbf16, #tpu.memory_space<vmem>>, vector<16x256xbf16>,
      %cst_13 = arith.constant dense<0.000000e+00> : vector<256xf32>
      %15 = vector.multi_reduction <add>, %12, %cst_13 [0] : vector<16x256xf32> to vector<256xf32>
      %16 = vector.shape_cast %15 : vector<256xf32> to vector<1x256xf32>
      %17 = arith.mulf %12, %12 : vector<16x256xf32>
      %cst_14 = arith.constant dense<0.000000e+00> : vector<256xf32>
      %18 = vector.multi_reduction <add>, %17, %cst_14 [0] : vector<16x256xf32> to vector<256xf32>
      %19 = vector.shape_cast %18 : vector<256xf32> to vector<1x256xf32>
      %20 = tpu.concatenate %16, %19 in 0 : vector<1x256xf32>, vector<1x256xf32> -> vector<2x256xf32>
      %c0_15 = arith.constant 0 : index
      %c0_16 = arith.constant 0 : index
      %c0_17 = arith.constant 0 : index
      %21 = vector.load %arg6[%c0_15, %c0_16, %c0_17] : memref<1x2x256xf32, #tpu.memory_space<vmem>>, vector<1x2x256xf32>
      %22 = vector.shape_cast %21 : vector<1x2x256xf32> to vector<2x256xf32>
      %23 = vector.shape_cast %20 : vector<2x256xf32> to vector<1x2x256xf32>
      tpu.vector_store %arg6[%c0_15, %c0_16, %c0_17], %23 {strides = array<i32>} : memref<1x2x256xf32, #tpu.memory_space<vmem>>, vector<1x2x256xf32>,
    } else {
    }
    return
  }
  func.func @transform_0(%arg0: i32, %arg1: i32, %arg2: i32) -> (i32, i32) {
    %c0_i32 = arith.constant 0 : i32
    return %arg1, %arg2 : i32, i32
  }
  func.func @transform_1(%arg0: i32, %arg1: i32, %arg2: i32) -> (i32, i32) {
    %c0_i32 = arith.constant 0 : i32
    return %arg2, %arg0 : i32, i32
  }
  func.func @transform_2(%arg0: i32, %arg1: i32, %arg2: i32) -> (i32, i32) {
    %c0_i32 = arith.constant 0 : i32
    return %arg1, %arg0 : i32, i32
  }
  func.func @transform_3(%arg0: i32, %arg1: i32, %arg2: i32) -> (i32, i32, i32) {
    %c0_i32 = arith.constant 0 : i32
    %c0_i32_0 = arith.constant 0 : i32
    return %arg1, %c0_i32, %arg0 : i32, i32, i32
  }
}

module attributes {stable_mosaic.version = 11 : i64} {
  func.func @_mm_stats_kernel(%arg0: i32, %arg1: i32, %arg2: i32, %arg3: memref<16x128xbf16, #tpu.memory_space<vmem>>, %arg4: memref<128x256xbf16, #tpu.memory_space<vmem>>, %arg5: memref<16x256xbf16, #tpu.memory_space<vmem>>, %arg6: memref<1x2x256xf32, #tpu.memory_space<vmem>>, %arg7: memref<16x256xf32, #tpu.memory_space<vmem>>) attributes {dimension_semantics = [#tpu.dimension_semantics<parallel>, #tpu.dimension_semantics<parallel>, #tpu.dimension_semantics<arbitrary>], iteration_bounds = array<i64: 1, 1, 1>, scalar_prefetch = 0 : i64, scratch_operands = 1 : i64, tpu.core_type = #tpu.core_type<tc>, window_params = [{transform_indices = @transform_0, window_bounds = array<i64: 16, 128>}, {transform_indices = @transform_1, window_bounds = array<i64: 128, 256>}, {transform_indices = @transform_2, window_bounds = array<i64: 16, 256>}, {transform_indices = @transform_3, window_bounds = array<i64: 1, 2, 256>}]} {
    %c0_i32 = arith.constant 0 : i32
    %0 = arith.cmpi eq, %arg2, %c0_i32 : i32
    %1 = arith.extui %0 : i1 to i32
    %c0_i32_0 = arith.constant 0 : i32
    %2 = arith.cmpi ne, %1, %c0_i32_0 : i32
    scf.if %2 {
      %cst_10 = arith.constant 0.000000e+00 : f32
      %12 = vector.broadcast %cst_10 : f32 to vector<16x256xf32>
      %c0_11 = arith.constant 0 : index
      %c0_12 = arith.constant 0 : index
      %13 = vector.load %arg7[%c0_11, %c0_12] : memref<16x256xf32, #tpu.memory_space<vmem>>, vector<16x256xf32>
      tpu.vector_store %arg7[%c0_11, %c0_12], %12 {strides = array<i32>} : memref<16x256xf32, #tpu.memory_space<vmem>>, vector<16x256xf32>,
    } else {
    }
    %c0 = arith.constant 0 : index
    %c0_1 = arith.constant 0 : index
    %3 = vector.load %arg7[%c0, %c0_1] : memref<16x256xf32, #tpu.memory_space<vmem>>, vector<16x256xf32>
    %c0_2 = arith.constant 0 : index
    %c0_3 = arith.constant 0 : index
    %4 = vector.load %arg3[%c0_2, %c0_3] : memref<16x128xbf16, #tpu.memory_space<vmem>>, vector<16x128xbf16>
    %c0_4 = arith.constant 0 : index
    %c0_5 = arith.constant 0 : index
    %5 = vector.load %arg4[%c0_4, %c0_5] : memref<128x256xbf16, #tpu.memory_space<vmem>>, vector<128x256xbf16>
    %cst = arith.constant dense<0.000000e+00> : vector<16x256xf32>
    %6 = tpu.matmul %4, %5, %cst {dimension_numbers = #tpu.dot_dimension_numbers<[1], [0], [0], [1], [0, 0, 1, 1], [], []>} : vector<16x128xbf16>, vector<128x256xbf16>, vector<16x256xf32> -> vector<16x256xf32>
    %7 = arith.addf %3, %6 : vector<16x256xf32>
    %c0_6 = arith.constant 0 : index
    %c0_7 = arith.constant 0 : index
    %8 = vector.load %arg7[%c0_6, %c0_7] : memref<16x256xf32, #tpu.memory_space<vmem>>, vector<16x256xf32>
    tpu.vector_store %arg7[%c0_6, %c0_7], %7 {strides = array<i32>} : memref<16x256xf32, #tpu.memory_space<vmem>>, vector<16x256xf32>,
    %c0_i32_8 = arith.constant 0 : i32
    %9 = arith.cmpi eq, %arg2, %c0_i32_8 : i32
    %10 = arith.extui %9 : i1 to i32
    %c0_i32_9 = arith.constant 0 : i32
    %11 = arith.cmpi ne, %10, %c0_i32_9 : i32
    scf.if %11 {
      %c0_10 = arith.constant 0 : index
      %c0_11 = arith.constant 0 : index
      %12 = vector.load %arg7[%c0_10, %c0_11] : memref<16x256xf32, #tpu.memory_space<vmem>>, vector<16x256xf32>
      %13 = arith.truncf %12 : vector<16x256xf32> to vector<16x256xbf16>
      %c0_12 = arith.constant 0 : index
      %c0_13 = arith.constant 0 : index
      %14 = vector.load %arg5[%c0_12, %c0_13] : memref<16x256xbf16, #tpu.memory_space<vmem>>, vector<16x256xbf16>
      tpu.vector_store %arg5[%c0_12, %c0_13], %13 {strides = array<i32>} : memref<16x256xbf16, #tpu.memory_space<vmem>>, vector<16x256xbf16>,
      %cst_14 = arith.constant dense<0.000000e+00> : vector<256xf32>
      %15 = vector.multi_reduction <add>, %12, %cst_14 [0] : vector<16x256xf32> to vector<256xf32>
      %16 = vector.shape_cast %15 : vector<256xf32> to vector<1x256xf32>
      %17 = arith.mulf %12, %12 : vector<16x256xf32>
      %cst_15 = arith.constant dense<0.000000e+00> : vector<256xf32>
      %18 = vector.multi_reduction <add>, %17, %cst_15 [0] : vector<16x256xf32> to vector<256xf32>
      %19 = vector.shape_cast %18 : vector<256xf32> to vector<1x256xf32>
      %20 = tpu.concatenate %16, %19 in 0 : vector<1x256xf32>, vector<1x256xf32> -> vector<2x256xf32>
      %c0_16 = arith.constant 0 : index
      %c0_17 = arith.constant 0 : index
      %c0_18 = arith.constant 0 : index
      %21 = vector.load %arg6[%c0_16, %c0_17, %c0_18] : memref<1x2x256xf32, #tpu.memory_space<vmem>>, vector<1x2x256xf32>
      %22 = vector.shape_cast %21 : vector<1x2x256xf32> to vector<2x256xf32>
      %23 = vector.shape_cast %20 : vector<2x256xf32> to vector<1x2x256xf32>
      tpu.vector_store %arg6[%c0_16, %c0_17, %c0_18], %23 {strides = array<i32>} : memref<1x2x256xf32, #tpu.memory_space<vmem>>, vector<1x2x256xf32>,
    } else {
    }
    return
  }
  func.func @transform_0(%arg0: i32, %arg1: i32, %arg2: i32) -> (i32, i32) {
    %c0_i32 = arith.constant 0 : i32
    return %arg1, %arg2 : i32, i32
  }
  func.func @transform_1(%arg0: i32, %arg1: i32, %arg2: i32) -> (i32, i32) {
    %c0_i32 = arith.constant 0 : i32
    return %arg2, %arg0 : i32, i32
  }
  func.func @transform_2(%arg0: i32, %arg1: i32, %arg2: i32) -> (i32, i32) {
    %c0_i32 = arith.constant 0 : i32
    return %arg1, %arg0 : i32, i32
  }
  func.func @transform_3(%arg0: i32, %arg1: i32, %arg2: i32) -> (i32, i32, i32) {
    %c0_i32 = arith.constant 0 : i32
    %c0_i32_0 = arith.constant 0 : i32
    return %arg1, %c0_i32, %arg0 : i32, i32, i32
  }
}

module attributes {stable_mosaic.version = 11 : i64} {
  func.func @_bn_act_kernel(%arg0: i32, %arg1: memref<16x256xbf16, #tpu.memory_space<vmem>>, %arg2: memref<1x256xf32, #tpu.memory_space<vmem>>, %arg3: memref<1x256xf32, #tpu.memory_space<vmem>>, %arg4: memref<16x256xbf16, #tpu.memory_space<vmem>>) attributes {dimension_semantics = [#tpu.dimension_semantics<parallel>], iteration_bounds = array<i64: 1>, scalar_prefetch = 0 : i64, scratch_operands = 0 : i64, tpu.core_type = #tpu.core_type<tc>, window_params = [{transform_indices = @transform_0, window_bounds = array<i64: 16, 256>}, {pipeline_mode = #tpu.pipeline_mode<synchronous>, transform_indices = @transform_1, window_bounds = array<i64: 1, 256>}, {pipeline_mode = #tpu.pipeline_mode<synchronous>, transform_indices = @transform_2, window_bounds = array<i64: 1, 256>}, {transform_indices = @transform_3, window_bounds = array<i64: 16, 256>}]} {
    %c0 = arith.constant 0 : index
    %c0_0 = arith.constant 0 : index
    %0 = vector.load %arg1[%c0, %c0_0] : memref<16x256xbf16, #tpu.memory_space<vmem>>, vector<16x256xbf16>
    %1 = arith.extf %0 : vector<16x256xbf16> to vector<16x256xf32>
    %c0_1 = arith.constant 0 : index
    %c0_2 = arith.constant 0 : index
    %2 = vector.load %arg2[%c0_1, %c0_2] : memref<1x256xf32, #tpu.memory_space<vmem>>, vector<1x256xf32>
    %3 = vector.broadcast %2 : vector<1x256xf32> to vector<16x256xf32>
    %4 = arith.mulf %1, %3 : vector<16x256xf32>
    %c0_3 = arith.constant 0 : index
    %c0_4 = arith.constant 0 : index
    %5 = vector.load %arg3[%c0_3, %c0_4] : memref<1x256xf32, #tpu.memory_space<vmem>>, vector<1x256xf32>
    %6 = vector.broadcast %5 : vector<1x256xf32> to vector<16x256xf32>
    %7 = arith.addf %4, %6 : vector<16x256xf32>
    %8 = arith.truncf %7 : vector<16x256xf32> to vector<16x256xbf16>
    %c0_5 = arith.constant 0 : index
    %c0_6 = arith.constant 0 : index
    %9 = vector.load %arg4[%c0_5, %c0_6] : memref<16x256xbf16, #tpu.memory_space<vmem>>, vector<16x256xbf16>
    tpu.vector_store %arg4[%c0_5, %c0_6], %8 {strides = array<i32>} : memref<16x256xbf16, #tpu.memory_space<vmem>>, vector<16x256xbf16>,
    return
  }
  func.func @transform_0(%arg0: i32) -> (i32, i32) {
    %c0_i32 = arith.constant 0 : i32
    %c0_i32_0 = arith.constant 0 : i32
    return %arg0, %c0_i32 : i32, i32
  }
  func.func @transform_1(%arg0: i32) -> (i32, i32) {
    %c0_i32 = arith.constant 0 : i32
    %c0_i32_0 = arith.constant 0 : i32
    %c0_i32_1 = arith.constant 0 : i32
    return %c0_i32, %c0_i32_0 : i32, i32
  }
  func.func @transform_2(%arg0: i32) -> (i32, i32) {
    %c0_i32 = arith.constant 0 : i32
    %c0_i32_0 = arith.constant 0 : i32
    %c0_i32_1 = arith.constant 0 : i32
    return %c0_i32, %c0_i32_0 : i32, i32
  }
  func.func @transform_3(%arg0: i32) -> (i32, i32) {
    %c0_i32 = arith.constant 0 : i32
    %c0_i32_0 = arith.constant 0 : i32
    return %arg0, %c0_i32 : i32, i32
  }
}

module attributes {stable_mosaic.version = 11 : i64} {
  func.func @_bn_act_kernel(%arg0: i32, %arg1: memref<16x256xbf16, #tpu.memory_space<vmem>>, %arg2: memref<1x256xf32, #tpu.memory_space<vmem>>, %arg3: memref<1x256xf32, #tpu.memory_space<vmem>>, %arg4: memref<16x256xbf16, #tpu.memory_space<vmem>>) attributes {dimension_semantics = [#tpu.dimension_semantics<parallel>], iteration_bounds = array<i64: 1>, scalar_prefetch = 0 : i64, scratch_operands = 0 : i64, tpu.core_type = #tpu.core_type<tc>, window_params = [{transform_indices = @transform_0, window_bounds = array<i64: 16, 256>}, {pipeline_mode = #tpu.pipeline_mode<synchronous>, transform_indices = @transform_1, window_bounds = array<i64: 1, 256>}, {pipeline_mode = #tpu.pipeline_mode<synchronous>, transform_indices = @transform_2, window_bounds = array<i64: 1, 256>}, {transform_indices = @transform_3, window_bounds = array<i64: 16, 256>}]} {
    %c0 = arith.constant 0 : index
    %c0_0 = arith.constant 0 : index
    %0 = vector.load %arg1[%c0, %c0_0] : memref<16x256xbf16, #tpu.memory_space<vmem>>, vector<16x256xbf16>
    %1 = arith.extf %0 : vector<16x256xbf16> to vector<16x256xf32>
    %c0_1 = arith.constant 0 : index
    %c0_2 = arith.constant 0 : index
    %2 = vector.load %arg2[%c0_1, %c0_2] : memref<1x256xf32, #tpu.memory_space<vmem>>, vector<1x256xf32>
    %3 = vector.broadcast %2 : vector<1x256xf32> to vector<16x256xf32>
    %4 = arith.mulf %1, %3 : vector<16x256xf32>
    %c0_3 = arith.constant 0 : index
    %c0_4 = arith.constant 0 : index
    %5 = vector.load %arg3[%c0_3, %c0_4] : memref<1x256xf32, #tpu.memory_space<vmem>>, vector<1x256xf32>
    %6 = vector.broadcast %5 : vector<1x256xf32> to vector<16x256xf32>
    %7 = arith.addf %4, %6 : vector<16x256xf32>
    %cst = arith.constant 0.000000e+00 : f32
    %8 = vector.broadcast %cst : f32 to vector<16x256xf32>
    %9 = arith.maximumf %7, %8 : vector<16x256xf32>
    %10 = arith.truncf %9 : vector<16x256xf32> to vector<16x256xbf16>
    %c0_5 = arith.constant 0 : index
    %c0_6 = arith.constant 0 : index
    %11 = vector.load %arg4[%c0_5, %c0_6] : memref<16x256xbf16, #tpu.memory_space<vmem>>, vector<16x256xbf16>
    tpu.vector_store %arg4[%c0_5, %c0_6], %10 {strides = array<i32>} : memref<16x256xbf16, #tpu.memory_space<vmem>>, vector<16x256xbf16>,
    return
  }
  func.func @transform_0(%arg0: i32) -> (i32, i32) {
    %c0_i32 = arith.constant 0 : i32
    %c0_i32_0 = arith.constant 0 : i32
    return %arg0, %c0_i32 : i32, i32
  }
  func.func @transform_1(%arg0: i32) -> (i32, i32) {
    %c0_i32 = arith.constant 0 : i32
    %c0_i32_0 = arith.constant 0 : i32
    %c0_i32_1 = arith.constant 0 : i32
    return %c0_i32, %c0_i32_0 : i32, i32
  }
  func.func @transform_2(%arg0: i32) -> (i32, i32) {
    %c0_i32 = arith.constant 0 : i32
    %c0_i32_0 = arith.constant 0 : i32
    %c0_i32_1 = arith.constant 0 : i32
    return %c0_i32, %c0_i32_0 : i32, i32
  }
  func.func @transform_3(%arg0: i32) -> (i32, i32) {
    %c0_i32 = arith.constant 0 : i32
    %c0_i32_0 = arith.constant 0 : i32
    return %arg0, %c0_i32 : i32, i32
  }
}

module attributes {stable_mosaic.version = 11 : i64} {
  func.func @_bn_act_res_kernel(%arg0: i32, %arg1: memref<16x256xbf16, #tpu.memory_space<vmem>>, %arg2: memref<16x256xbf16, #tpu.memory_space<vmem>>, %arg3: memref<1x256xf32, #tpu.memory_space<vmem>>, %arg4: memref<1x256xf32, #tpu.memory_space<vmem>>, %arg5: memref<16x256xbf16, #tpu.memory_space<vmem>>) attributes {dimension_semantics = [#tpu.dimension_semantics<parallel>], iteration_bounds = array<i64: 1>, scalar_prefetch = 0 : i64, scratch_operands = 0 : i64, tpu.core_type = #tpu.core_type<tc>, window_params = [{transform_indices = @transform_0, window_bounds = array<i64: 16, 256>}, {transform_indices = @transform_1, window_bounds = array<i64: 16, 256>}, {pipeline_mode = #tpu.pipeline_mode<synchronous>, transform_indices = @transform_2, window_bounds = array<i64: 1, 256>}, {pipeline_mode = #tpu.pipeline_mode<synchronous>, transform_indices = @transform_3, window_bounds = array<i64: 1, 256>}, {transform_indices = @transform_4, window_bounds = array<i64: 16, 256>}]} {
    %c0 = arith.constant 0 : index
    %c0_0 = arith.constant 0 : index
    %0 = vector.load %arg1[%c0, %c0_0] : memref<16x256xbf16, #tpu.memory_space<vmem>>, vector<16x256xbf16>
    %1 = arith.extf %0 : vector<16x256xbf16> to vector<16x256xf32>
    %c0_1 = arith.constant 0 : index
    %c0_2 = arith.constant 0 : index
    %2 = vector.load %arg3[%c0_1, %c0_2] : memref<1x256xf32, #tpu.memory_space<vmem>>, vector<1x256xf32>
    %3 = vector.broadcast %2 : vector<1x256xf32> to vector<16x256xf32>
    %4 = arith.mulf %1, %3 : vector<16x256xf32>
    %c0_3 = arith.constant 0 : index
    %c0_4 = arith.constant 0 : index
    %5 = vector.load %arg4[%c0_3, %c0_4] : memref<1x256xf32, #tpu.memory_space<vmem>>, vector<1x256xf32>
    %6 = vector.broadcast %5 : vector<1x256xf32> to vector<16x256xf32>
    %7 = arith.addf %4, %6 : vector<16x256xf32>
    %c0_5 = arith.constant 0 : index
    %c0_6 = arith.constant 0 : index
    %8 = vector.load %arg2[%c0_5, %c0_6] : memref<16x256xbf16, #tpu.memory_space<vmem>>, vector<16x256xbf16>
    %9 = arith.extf %8 : vector<16x256xbf16> to vector<16x256xf32>
    %10 = arith.addf %7, %9 : vector<16x256xf32>
    %cst = arith.constant 0.000000e+00 : f32
    %11 = vector.broadcast %cst : f32 to vector<16x256xf32>
    %12 = arith.maximumf %10, %11 : vector<16x256xf32>
    %13 = arith.truncf %12 : vector<16x256xf32> to vector<16x256xbf16>
    %c0_7 = arith.constant 0 : index
    %c0_8 = arith.constant 0 : index
    %14 = vector.load %arg5[%c0_7, %c0_8] : memref<16x256xbf16, #tpu.memory_space<vmem>>, vector<16x256xbf16>
    tpu.vector_store %arg5[%c0_7, %c0_8], %13 {strides = array<i32>} : memref<16x256xbf16, #tpu.memory_space<vmem>>, vector<16x256xbf16>,
    return
  }
  func.func @transform_0(%arg0: i32) -> (i32, i32) {
    %c0_i32 = arith.constant 0 : i32
    %c0_i32_0 = arith.constant 0 : i32
    return %arg0, %c0_i32 : i32, i32
  }
  func.func @transform_1(%arg0: i32) -> (i32, i32) {
    %c0_i32 = arith.constant 0 : i32
    %c0_i32_0 = arith.constant 0 : i32
    return %arg0, %c0_i32 : i32, i32
  }
  func.func @transform_2(%arg0: i32) -> (i32, i32) {
    %c0_i32 = arith.constant 0 : i32
    %c0_i32_0 = arith.constant 0 : i32
    %c0_i32_1 = arith.constant 0 : i32
    return %c0_i32, %c0_i32_0 : i32, i32
  }
  func.func @transform_3(%arg0: i32) -> (i32, i32) {
    %c0_i32 = arith.constant 0 : i32
    %c0_i32_0 = arith.constant 0 : i32
    %c0_i32_1 = arith.constant 0 : i32
    return %c0_i32, %c0_i32_0 : i32, i32
  }
  func.func @transform_4(%arg0: i32) -> (i32, i32) {
    %c0_i32 = arith.constant 0 : i32
    %c0_i32_0 = arith.constant 0 : i32
    return %arg0, %c0_i32 : i32, i32
  }
}

module attributes {stable_mosaic.version = 11 : i64} {
  func.func @_mm_stats_kernel(%arg0: i32, %arg1: i32, %arg2: i32, %arg3: memref<16x384xbf16, #tpu.memory_space<vmem>>, %arg4: memref<384x256xbf16, #tpu.memory_space<vmem>>, %arg5: memref<16x256xbf16, #tpu.memory_space<vmem>>, %arg6: memref<1x2x256xf32, #tpu.memory_space<vmem>>, %arg7: memref<16x256xf32, #tpu.memory_space<vmem>>) attributes {dimension_semantics = [#tpu.dimension_semantics<parallel>, #tpu.dimension_semantics<parallel>, #tpu.dimension_semantics<arbitrary>], iteration_bounds = array<i64: 1, 1, 6>, scalar_prefetch = 0 : i64, scratch_operands = 1 : i64, tpu.core_type = #tpu.core_type<tc>, window_params = [{transform_indices = @transform_0, window_bounds = array<i64: 16, 384>}, {transform_indices = @transform_1, window_bounds = array<i64: 384, 256>}, {transform_indices = @transform_2, window_bounds = array<i64: 16, 256>}, {transform_indices = @transform_3, window_bounds = array<i64: 1, 2, 256>}]} {
    %c0_i32 = arith.constant 0 : i32
    %0 = arith.cmpi eq, %arg2, %c0_i32 : i32
    %1 = arith.extui %0 : i1 to i32
    %c0_i32_0 = arith.constant 0 : i32
    %2 = arith.cmpi ne, %1, %c0_i32_0 : i32
    scf.if %2 {
      %cst_9 = arith.constant 0.000000e+00 : f32
      %12 = vector.broadcast %cst_9 : f32 to vector<16x256xf32>
      %c0_10 = arith.constant 0 : index
      %c0_11 = arith.constant 0 : index
      %13 = vector.load %arg7[%c0_10, %c0_11] : memref<16x256xf32, #tpu.memory_space<vmem>>, vector<16x256xf32>
      tpu.vector_store %arg7[%c0_10, %c0_11], %12 {strides = array<i32>} : memref<16x256xf32, #tpu.memory_space<vmem>>, vector<16x256xf32>,
    } else {
    }
    %c0 = arith.constant 0 : index
    %c0_1 = arith.constant 0 : index
    %3 = vector.load %arg7[%c0, %c0_1] : memref<16x256xf32, #tpu.memory_space<vmem>>, vector<16x256xf32>
    %c0_2 = arith.constant 0 : index
    %c0_3 = arith.constant 0 : index
    %4 = vector.load %arg3[%c0_2, %c0_3] : memref<16x384xbf16, #tpu.memory_space<vmem>>, vector<16x384xbf16>
    %c0_4 = arith.constant 0 : index
    %c0_5 = arith.constant 0 : index
    %5 = vector.load %arg4[%c0_4, %c0_5] : memref<384x256xbf16, #tpu.memory_space<vmem>>, vector<384x256xbf16>
    %cst = arith.constant dense<0.000000e+00> : vector<16x256xf32>
    %6 = tpu.matmul %4, %5, %cst {dimension_numbers = #tpu.dot_dimension_numbers<[1], [0], [0], [1], [0, 0, 1, 1], [], []>} : vector<16x384xbf16>, vector<384x256xbf16>, vector<16x256xf32> -> vector<16x256xf32>
    %7 = arith.addf %3, %6 : vector<16x256xf32>
    %c0_6 = arith.constant 0 : index
    %c0_7 = arith.constant 0 : index
    %8 = vector.load %arg7[%c0_6, %c0_7] : memref<16x256xf32, #tpu.memory_space<vmem>>, vector<16x256xf32>
    tpu.vector_store %arg7[%c0_6, %c0_7], %7 {strides = array<i32>} : memref<16x256xf32, #tpu.memory_space<vmem>>, vector<16x256xf32>,
    %c5_i32 = arith.constant 5 : i32
    %9 = arith.cmpi eq, %arg2, %c5_i32 : i32
    %10 = arith.extui %9 : i1 to i32
    %c0_i32_8 = arith.constant 0 : i32
    %11 = arith.cmpi ne, %10, %c0_i32_8 : i32
    scf.if %11 {
      %c0_9 = arith.constant 0 : index
      %c0_10 = arith.constant 0 : index
      %12 = vector.load %arg7[%c0_9, %c0_10] : memref<16x256xf32, #tpu.memory_space<vmem>>, vector<16x256xf32>
      %13 = arith.truncf %12 : vector<16x256xf32> to vector<16x256xbf16>
      %c0_11 = arith.constant 0 : index
      %c0_12 = arith.constant 0 : index
      %14 = vector.load %arg5[%c0_11, %c0_12] : memref<16x256xbf16, #tpu.memory_space<vmem>>, vector<16x256xbf16>
      tpu.vector_store %arg5[%c0_11, %c0_12], %13 {strides = array<i32>} : memref<16x256xbf16, #tpu.memory_space<vmem>>, vector<16x256xbf16>,
      %cst_13 = arith.constant dense<0.000000e+00> : vector<256xf32>
      %15 = vector.multi_reduction <add>, %12, %cst_13 [0] : vector<16x256xf32> to vector<256xf32>
      %16 = vector.shape_cast %15 : vector<256xf32> to vector<1x256xf32>
      %17 = arith.mulf %12, %12 : vector<16x256xf32>
      %cst_14 = arith.constant dense<0.000000e+00> : vector<256xf32>
      %18 = vector.multi_reduction <add>, %17, %cst_14 [0] : vector<16x256xf32> to vector<256xf32>
      %19 = vector.shape_cast %18 : vector<256xf32> to vector<1x256xf32>
      %20 = tpu.concatenate %16, %19 in 0 : vector<1x256xf32>, vector<1x256xf32> -> vector<2x256xf32>
      %c0_15 = arith.constant 0 : index
      %c0_16 = arith.constant 0 : index
      %c0_17 = arith.constant 0 : index
      %21 = vector.load %arg6[%c0_15, %c0_16, %c0_17] : memref<1x2x256xf32, #tpu.memory_space<vmem>>, vector<1x2x256xf32>
      %22 = vector.shape_cast %21 : vector<1x2x256xf32> to vector<2x256xf32>
      %23 = vector.shape_cast %20 : vector<2x256xf32> to vector<1x2x256xf32>
      tpu.vector_store %arg6[%c0_15, %c0_16, %c0_17], %23 {strides = array<i32>} : memref<1x2x256xf32, #tpu.memory_space<vmem>>, vector<1x2x256xf32>,
    } else {
    }
    return
  }
  func.func @transform_0(%arg0: i32, %arg1: i32, %arg2: i32) -> (i32, i32) {
    %c0_i32 = arith.constant 0 : i32
    return %arg1, %arg2 : i32, i32
  }
  func.func @transform_1(%arg0: i32, %arg1: i32, %arg2: i32) -> (i32, i32) {
    %c0_i32 = arith.constant 0 : i32
    return %arg2, %arg0 : i32, i32
  }
  func.func @transform_2(%arg0: i32, %arg1: i32, %arg2: i32) -> (i32, i32) {
    %c0_i32 = arith.constant 0 : i32
    return %arg1, %arg0 : i32, i32
  }
  func.func @transform_3(%arg0: i32, %arg1: i32, %arg2: i32) -> (i32, i32, i32) {
    %c0_i32 = arith.constant 0 : i32
    %c0_i32_0 = arith.constant 0 : i32
    return %arg1, %c0_i32, %arg0 : i32, i32, i32
  }
}

module attributes {stable_mosaic.version = 11 : i64} {
  func.func @_mm_stats_kernel(%arg0: i32, %arg1: i32, %arg2: i32, %arg3: memref<16x384xbf16, #tpu.memory_space<vmem>>, %arg4: memref<384x256xbf16, #tpu.memory_space<vmem>>, %arg5: memref<16x256xbf16, #tpu.memory_space<vmem>>, %arg6: memref<1x2x256xf32, #tpu.memory_space<vmem>>, %arg7: memref<16x256xf32, #tpu.memory_space<vmem>>) attributes {dimension_semantics = [#tpu.dimension_semantics<parallel>, #tpu.dimension_semantics<parallel>, #tpu.dimension_semantics<arbitrary>], iteration_bounds = array<i64: 2, 1, 6>, scalar_prefetch = 0 : i64, scratch_operands = 1 : i64, tpu.core_type = #tpu.core_type<tc>, window_params = [{transform_indices = @transform_0, window_bounds = array<i64: 16, 384>}, {transform_indices = @transform_1, window_bounds = array<i64: 384, 256>}, {transform_indices = @transform_2, window_bounds = array<i64: 16, 256>}, {transform_indices = @transform_3, window_bounds = array<i64: 1, 2, 256>}]} {
    %c0_i32 = arith.constant 0 : i32
    %0 = arith.cmpi eq, %arg2, %c0_i32 : i32
    %1 = arith.extui %0 : i1 to i32
    %c0_i32_0 = arith.constant 0 : i32
    %2 = arith.cmpi ne, %1, %c0_i32_0 : i32
    scf.if %2 {
      %cst_9 = arith.constant 0.000000e+00 : f32
      %12 = vector.broadcast %cst_9 : f32 to vector<16x256xf32>
      %c0_10 = arith.constant 0 : index
      %c0_11 = arith.constant 0 : index
      %13 = vector.load %arg7[%c0_10, %c0_11] : memref<16x256xf32, #tpu.memory_space<vmem>>, vector<16x256xf32>
      tpu.vector_store %arg7[%c0_10, %c0_11], %12 {strides = array<i32>} : memref<16x256xf32, #tpu.memory_space<vmem>>, vector<16x256xf32>,
    } else {
    }
    %c0 = arith.constant 0 : index
    %c0_1 = arith.constant 0 : index
    %3 = vector.load %arg7[%c0, %c0_1] : memref<16x256xf32, #tpu.memory_space<vmem>>, vector<16x256xf32>
    %c0_2 = arith.constant 0 : index
    %c0_3 = arith.constant 0 : index
    %4 = vector.load %arg3[%c0_2, %c0_3] : memref<16x384xbf16, #tpu.memory_space<vmem>>, vector<16x384xbf16>
    %c0_4 = arith.constant 0 : index
    %c0_5 = arith.constant 0 : index
    %5 = vector.load %arg4[%c0_4, %c0_5] : memref<384x256xbf16, #tpu.memory_space<vmem>>, vector<384x256xbf16>
    %cst = arith.constant dense<0.000000e+00> : vector<16x256xf32>
    %6 = tpu.matmul %4, %5, %cst {dimension_numbers = #tpu.dot_dimension_numbers<[1], [0], [0], [1], [0, 0, 1, 1], [], []>} : vector<16x384xbf16>, vector<384x256xbf16>, vector<16x256xf32> -> vector<16x256xf32>
    %7 = arith.addf %3, %6 : vector<16x256xf32>
    %c0_6 = arith.constant 0 : index
    %c0_7 = arith.constant 0 : index
    %8 = vector.load %arg7[%c0_6, %c0_7] : memref<16x256xf32, #tpu.memory_space<vmem>>, vector<16x256xf32>
    tpu.vector_store %arg7[%c0_6, %c0_7], %7 {strides = array<i32>} : memref<16x256xf32, #tpu.memory_space<vmem>>, vector<16x256xf32>,
    %c5_i32 = arith.constant 5 : i32
    %9 = arith.cmpi eq, %arg2, %c5_i32 : i32
    %10 = arith.extui %9 : i1 to i32
    %c0_i32_8 = arith.constant 0 : i32
    %11 = arith.cmpi ne, %10, %c0_i32_8 : i32
    scf.if %11 {
      %c0_9 = arith.constant 0 : index
      %c0_10 = arith.constant 0 : index
      %12 = vector.load %arg7[%c0_9, %c0_10] : memref<16x256xf32, #tpu.memory_space<vmem>>, vector<16x256xf32>
      %13 = arith.truncf %12 : vector<16x256xf32> to vector<16x256xbf16>
      %c0_11 = arith.constant 0 : index
      %c0_12 = arith.constant 0 : index
      %14 = vector.load %arg5[%c0_11, %c0_12] : memref<16x256xbf16, #tpu.memory_space<vmem>>, vector<16x256xbf16>
      tpu.vector_store %arg5[%c0_11, %c0_12], %13 {strides = array<i32>} : memref<16x256xbf16, #tpu.memory_space<vmem>>, vector<16x256xbf16>,
      %cst_13 = arith.constant dense<0.000000e+00> : vector<256xf32>
      %15 = vector.multi_reduction <add>, %12, %cst_13 [0] : vector<16x256xf32> to vector<256xf32>
      %16 = vector.shape_cast %15 : vector<256xf32> to vector<1x256xf32>
      %17 = arith.mulf %12, %12 : vector<16x256xf32>
      %cst_14 = arith.constant dense<0.000000e+00> : vector<256xf32>
      %18 = vector.multi_reduction <add>, %17, %cst_14 [0] : vector<16x256xf32> to vector<256xf32>
      %19 = vector.shape_cast %18 : vector<256xf32> to vector<1x256xf32>
      %20 = tpu.concatenate %16, %19 in 0 : vector<1x256xf32>, vector<1x256xf32> -> vector<2x256xf32>
      %c0_15 = arith.constant 0 : index
      %c0_16 = arith.constant 0 : index
      %c0_17 = arith.constant 0 : index
      %21 = vector.load %arg6[%c0_15, %c0_16, %c0_17] : memref<1x2x256xf32, #tpu.memory_space<vmem>>, vector<1x2x256xf32>
      %22 = vector.shape_cast %21 : vector<1x2x256xf32> to vector<2x256xf32>
      %23 = vector.shape_cast %20 : vector<2x256xf32> to vector<1x2x256xf32>
      tpu.vector_store %arg6[%c0_15, %c0_16, %c0_17], %23 {strides = array<i32>} : memref<1x2x256xf32, #tpu.memory_space<vmem>>, vector<1x2x256xf32>,
    } else {
    }
    return
  }
  func.func @transform_0(%arg0: i32, %arg1: i32, %arg2: i32) -> (i32, i32) {
    %c0_i32 = arith.constant 0 : i32
    return %arg1, %arg2 : i32, i32
  }
  func.func @transform_1(%arg0: i32, %arg1: i32, %arg2: i32) -> (i32, i32) {
    %c0_i32 = arith.constant 0 : i32
    return %arg2, %arg0 : i32, i32
  }
  func.func @transform_2(%arg0: i32, %arg1: i32, %arg2: i32) -> (i32, i32) {
    %c0_i32 = arith.constant 0 : i32
    return %arg1, %arg0 : i32, i32
  }
  func.func @transform_3(%arg0: i32, %arg1: i32, %arg2: i32) -> (i32, i32, i32) {
    %c0_i32 = arith.constant 0 : i32
    %c0_i32_0 = arith.constant 0 : i32
    return %arg1, %c0_i32, %arg0 : i32, i32, i32
  }
}

module attributes {stable_mosaic.version = 11 : i64} {
  func.func @_mm_stats_kernel(%arg0: i32, %arg1: i32, %arg2: i32, %arg3: memref<16x256xbf16, #tpu.memory_space<vmem>>, %arg4: memref<256x256xbf16, #tpu.memory_space<vmem>>, %arg5: memref<16x256xbf16, #tpu.memory_space<vmem>>, %arg6: memref<1x2x256xf32, #tpu.memory_space<vmem>>, %arg7: memref<16x256xf32, #tpu.memory_space<vmem>>) attributes {dimension_semantics = [#tpu.dimension_semantics<parallel>, #tpu.dimension_semantics<parallel>, #tpu.dimension_semantics<arbitrary>], iteration_bounds = array<i64: 2, 1, 1>, scalar_prefetch = 0 : i64, scratch_operands = 1 : i64, tpu.core_type = #tpu.core_type<tc>, window_params = [{transform_indices = @transform_0, window_bounds = array<i64: 16, 256>}, {transform_indices = @transform_1, window_bounds = array<i64: 256, 256>}, {transform_indices = @transform_2, window_bounds = array<i64: 16, 256>}, {transform_indices = @transform_3, window_bounds = array<i64: 1, 2, 256>}]} {
    %c0_i32 = arith.constant 0 : i32
    %0 = arith.cmpi eq, %arg2, %c0_i32 : i32
    %1 = arith.extui %0 : i1 to i32
    %c0_i32_0 = arith.constant 0 : i32
    %2 = arith.cmpi ne, %1, %c0_i32_0 : i32
    scf.if %2 {
      %cst_10 = arith.constant 0.000000e+00 : f32
      %12 = vector.broadcast %cst_10 : f32 to vector<16x256xf32>
      %c0_11 = arith.constant 0 : index
      %c0_12 = arith.constant 0 : index
      %13 = vector.load %arg7[%c0_11, %c0_12] : memref<16x256xf32, #tpu.memory_space<vmem>>, vector<16x256xf32>
      tpu.vector_store %arg7[%c0_11, %c0_12], %12 {strides = array<i32>} : memref<16x256xf32, #tpu.memory_space<vmem>>, vector<16x256xf32>,
    } else {
    }
    %c0 = arith.constant 0 : index
    %c0_1 = arith.constant 0 : index
    %3 = vector.load %arg7[%c0, %c0_1] : memref<16x256xf32, #tpu.memory_space<vmem>>, vector<16x256xf32>
    %c0_2 = arith.constant 0 : index
    %c0_3 = arith.constant 0 : index
    %4 = vector.load %arg3[%c0_2, %c0_3] : memref<16x256xbf16, #tpu.memory_space<vmem>>, vector<16x256xbf16>
    %c0_4 = arith.constant 0 : index
    %c0_5 = arith.constant 0 : index
    %5 = vector.load %arg4[%c0_4, %c0_5] : memref<256x256xbf16, #tpu.memory_space<vmem>>, vector<256x256xbf16>
    %cst = arith.constant dense<0.000000e+00> : vector<16x256xf32>
    %6 = tpu.matmul %4, %5, %cst {dimension_numbers = #tpu.dot_dimension_numbers<[1], [0], [0], [1], [0, 0, 1, 1], [], []>} : vector<16x256xbf16>, vector<256x256xbf16>, vector<16x256xf32> -> vector<16x256xf32>
    %7 = arith.addf %3, %6 : vector<16x256xf32>
    %c0_6 = arith.constant 0 : index
    %c0_7 = arith.constant 0 : index
    %8 = vector.load %arg7[%c0_6, %c0_7] : memref<16x256xf32, #tpu.memory_space<vmem>>, vector<16x256xf32>
    tpu.vector_store %arg7[%c0_6, %c0_7], %7 {strides = array<i32>} : memref<16x256xf32, #tpu.memory_space<vmem>>, vector<16x256xf32>,
    %c0_i32_8 = arith.constant 0 : i32
    %9 = arith.cmpi eq, %arg2, %c0_i32_8 : i32
    %10 = arith.extui %9 : i1 to i32
    %c0_i32_9 = arith.constant 0 : i32
    %11 = arith.cmpi ne, %10, %c0_i32_9 : i32
    scf.if %11 {
      %c0_10 = arith.constant 0 : index
      %c0_11 = arith.constant 0 : index
      %12 = vector.load %arg7[%c0_10, %c0_11] : memref<16x256xf32, #tpu.memory_space<vmem>>, vector<16x256xf32>
      %13 = arith.truncf %12 : vector<16x256xf32> to vector<16x256xbf16>
      %c0_12 = arith.constant 0 : index
      %c0_13 = arith.constant 0 : index
      %14 = vector.load %arg5[%c0_12, %c0_13] : memref<16x256xbf16, #tpu.memory_space<vmem>>, vector<16x256xbf16>
      tpu.vector_store %arg5[%c0_12, %c0_13], %13 {strides = array<i32>} : memref<16x256xbf16, #tpu.memory_space<vmem>>, vector<16x256xbf16>,
      %cst_14 = arith.constant dense<0.000000e+00> : vector<256xf32>
      %15 = vector.multi_reduction <add>, %12, %cst_14 [0] : vector<16x256xf32> to vector<256xf32>
      %16 = vector.shape_cast %15 : vector<256xf32> to vector<1x256xf32>
      %17 = arith.mulf %12, %12 : vector<16x256xf32>
      %cst_15 = arith.constant dense<0.000000e+00> : vector<256xf32>
      %18 = vector.multi_reduction <add>, %17, %cst_15 [0] : vector<16x256xf32> to vector<256xf32>
      %19 = vector.shape_cast %18 : vector<256xf32> to vector<1x256xf32>
      %20 = tpu.concatenate %16, %19 in 0 : vector<1x256xf32>, vector<1x256xf32> -> vector<2x256xf32>
      %c0_16 = arith.constant 0 : index
      %c0_17 = arith.constant 0 : index
      %c0_18 = arith.constant 0 : index
      %21 = vector.load %arg6[%c0_16, %c0_17, %c0_18] : memref<1x2x256xf32, #tpu.memory_space<vmem>>, vector<1x2x256xf32>
      %22 = vector.shape_cast %21 : vector<1x2x256xf32> to vector<2x256xf32>
      %23 = vector.shape_cast %20 : vector<2x256xf32> to vector<1x2x256xf32>
      tpu.vector_store %arg6[%c0_16, %c0_17, %c0_18], %23 {strides = array<i32>} : memref<1x2x256xf32, #tpu.memory_space<vmem>>, vector<1x2x256xf32>,
    } else {
    }
    return
  }
  func.func @transform_0(%arg0: i32, %arg1: i32, %arg2: i32) -> (i32, i32) {
    %c0_i32 = arith.constant 0 : i32
    return %arg1, %arg2 : i32, i32
  }
  func.func @transform_1(%arg0: i32, %arg1: i32, %arg2: i32) -> (i32, i32) {
    %c0_i32 = arith.constant 0 : i32
    return %arg2, %arg0 : i32, i32
  }
  func.func @transform_2(%arg0: i32, %arg1: i32, %arg2: i32) -> (i32, i32) {
    %c0_i32 = arith.constant 0 : i32
    return %arg1, %arg0 : i32, i32
  }
  func.func @transform_3(%arg0: i32, %arg1: i32, %arg2: i32) -> (i32, i32, i32) {
    %c0_i32 = arith.constant 0 : i32
    %c0_i32_0 = arith.constant 0 : i32
    return %arg1, %c0_i32, %arg0 : i32, i32, i32
  }
}

module attributes {stable_mosaic.version = 11 : i64} {
  func.func @_bn_act_kernel(%arg0: i32, %arg1: memref<16x512xbf16, #tpu.memory_space<vmem>>, %arg2: memref<1x512xf32, #tpu.memory_space<vmem>>, %arg3: memref<1x512xf32, #tpu.memory_space<vmem>>, %arg4: memref<16x512xbf16, #tpu.memory_space<vmem>>) attributes {dimension_semantics = [#tpu.dimension_semantics<parallel>], iteration_bounds = array<i64: 1>, scalar_prefetch = 0 : i64, scratch_operands = 0 : i64, tpu.core_type = #tpu.core_type<tc>, window_params = [{transform_indices = @transform_0, window_bounds = array<i64: 16, 512>}, {pipeline_mode = #tpu.pipeline_mode<synchronous>, transform_indices = @transform_1, window_bounds = array<i64: 1, 512>}, {pipeline_mode = #tpu.pipeline_mode<synchronous>, transform_indices = @transform_2, window_bounds = array<i64: 1, 512>}, {transform_indices = @transform_3, window_bounds = array<i64: 16, 512>}]} {
    %c0 = arith.constant 0 : index
    %c0_0 = arith.constant 0 : index
    %0 = vector.load %arg1[%c0, %c0_0] : memref<16x512xbf16, #tpu.memory_space<vmem>>, vector<16x512xbf16>
    %1 = arith.extf %0 : vector<16x512xbf16> to vector<16x512xf32>
    %c0_1 = arith.constant 0 : index
    %c0_2 = arith.constant 0 : index
    %2 = vector.load %arg2[%c0_1, %c0_2] : memref<1x512xf32, #tpu.memory_space<vmem>>, vector<1x512xf32>
    %3 = vector.broadcast %2 : vector<1x512xf32> to vector<16x512xf32>
    %4 = arith.mulf %1, %3 : vector<16x512xf32>
    %c0_3 = arith.constant 0 : index
    %c0_4 = arith.constant 0 : index
    %5 = vector.load %arg3[%c0_3, %c0_4] : memref<1x512xf32, #tpu.memory_space<vmem>>, vector<1x512xf32>
    %6 = vector.broadcast %5 : vector<1x512xf32> to vector<16x512xf32>
    %7 = arith.addf %4, %6 : vector<16x512xf32>
    %8 = arith.truncf %7 : vector<16x512xf32> to vector<16x512xbf16>
    %c0_5 = arith.constant 0 : index
    %c0_6 = arith.constant 0 : index
    %9 = vector.load %arg4[%c0_5, %c0_6] : memref<16x512xbf16, #tpu.memory_space<vmem>>, vector<16x512xbf16>
    tpu.vector_store %arg4[%c0_5, %c0_6], %8 {strides = array<i32>} : memref<16x512xbf16, #tpu.memory_space<vmem>>, vector<16x512xbf16>,
    return
  }
  func.func @transform_0(%arg0: i32) -> (i32, i32) {
    %c0_i32 = arith.constant 0 : i32
    %c0_i32_0 = arith.constant 0 : i32
    return %arg0, %c0_i32 : i32, i32
  }
  func.func @transform_1(%arg0: i32) -> (i32, i32) {
    %c0_i32 = arith.constant 0 : i32
    %c0_i32_0 = arith.constant 0 : i32
    %c0_i32_1 = arith.constant 0 : i32
    return %c0_i32, %c0_i32_0 : i32, i32
  }
  func.func @transform_2(%arg0: i32) -> (i32, i32) {
    %c0_i32 = arith.constant 0 : i32
    %c0_i32_0 = arith.constant 0 : i32
    %c0_i32_1 = arith.constant 0 : i32
    return %c0_i32, %c0_i32_0 : i32, i32
  }
  func.func @transform_3(%arg0: i32) -> (i32, i32) {
    %c0_i32 = arith.constant 0 : i32
    %c0_i32_0 = arith.constant 0 : i32
    return %arg0, %c0_i32 : i32, i32
  }
}

module attributes {stable_mosaic.version = 11 : i64} {
  func.func @_bn_act_kernel(%arg0: i32, %arg1: memref<16x512xbf16, #tpu.memory_space<vmem>>, %arg2: memref<1x512xf32, #tpu.memory_space<vmem>>, %arg3: memref<1x512xf32, #tpu.memory_space<vmem>>, %arg4: memref<16x512xbf16, #tpu.memory_space<vmem>>) attributes {dimension_semantics = [#tpu.dimension_semantics<parallel>], iteration_bounds = array<i64: 1>, scalar_prefetch = 0 : i64, scratch_operands = 0 : i64, tpu.core_type = #tpu.core_type<tc>, window_params = [{transform_indices = @transform_0, window_bounds = array<i64: 16, 512>}, {pipeline_mode = #tpu.pipeline_mode<synchronous>, transform_indices = @transform_1, window_bounds = array<i64: 1, 512>}, {pipeline_mode = #tpu.pipeline_mode<synchronous>, transform_indices = @transform_2, window_bounds = array<i64: 1, 512>}, {transform_indices = @transform_3, window_bounds = array<i64: 16, 512>}]} {
    %c0 = arith.constant 0 : index
    %c0_0 = arith.constant 0 : index
    %0 = vector.load %arg1[%c0, %c0_0] : memref<16x512xbf16, #tpu.memory_space<vmem>>, vector<16x512xbf16>
    %1 = arith.extf %0 : vector<16x512xbf16> to vector<16x512xf32>
    %c0_1 = arith.constant 0 : index
    %c0_2 = arith.constant 0 : index
    %2 = vector.load %arg2[%c0_1, %c0_2] : memref<1x512xf32, #tpu.memory_space<vmem>>, vector<1x512xf32>
    %3 = vector.broadcast %2 : vector<1x512xf32> to vector<16x512xf32>
    %4 = arith.mulf %1, %3 : vector<16x512xf32>
    %c0_3 = arith.constant 0 : index
    %c0_4 = arith.constant 0 : index
    %5 = vector.load %arg3[%c0_3, %c0_4] : memref<1x512xf32, #tpu.memory_space<vmem>>, vector<1x512xf32>
    %6 = vector.broadcast %5 : vector<1x512xf32> to vector<16x512xf32>
    %7 = arith.addf %4, %6 : vector<16x512xf32>
    %cst = arith.constant 0.000000e+00 : f32
    %8 = vector.broadcast %cst : f32 to vector<16x512xf32>
    %9 = arith.maximumf %7, %8 : vector<16x512xf32>
    %10 = arith.truncf %9 : vector<16x512xf32> to vector<16x512xbf16>
    %c0_5 = arith.constant 0 : index
    %c0_6 = arith.constant 0 : index
    %11 = vector.load %arg4[%c0_5, %c0_6] : memref<16x512xbf16, #tpu.memory_space<vmem>>, vector<16x512xbf16>
    tpu.vector_store %arg4[%c0_5, %c0_6], %10 {strides = array<i32>} : memref<16x512xbf16, #tpu.memory_space<vmem>>, vector<16x512xbf16>,
    return
  }
  func.func @transform_0(%arg0: i32) -> (i32, i32) {
    %c0_i32 = arith.constant 0 : i32
    %c0_i32_0 = arith.constant 0 : i32
    return %arg0, %c0_i32 : i32, i32
  }
  func.func @transform_1(%arg0: i32) -> (i32, i32) {
    %c0_i32 = arith.constant 0 : i32
    %c0_i32_0 = arith.constant 0 : i32
    %c0_i32_1 = arith.constant 0 : i32
    return %c0_i32, %c0_i32_0 : i32, i32
  }
  func.func @transform_2(%arg0: i32) -> (i32, i32) {
    %c0_i32 = arith.constant 0 : i32
    %c0_i32_0 = arith.constant 0 : i32
    %c0_i32_1 = arith.constant 0 : i32
    return %c0_i32, %c0_i32_0 : i32, i32
  }
  func.func @transform_3(%arg0: i32) -> (i32, i32) {
    %c0_i32 = arith.constant 0 : i32
    %c0_i32_0 = arith.constant 0 : i32
    return %arg0, %c0_i32 : i32, i32
  }
}

module attributes {stable_mosaic.version = 11 : i64} {
  func.func @_mm_stats_kernel(%arg0: i32, %arg1: i32, %arg2: i32, %arg3: memref<16x512xbf16, #tpu.memory_space<vmem>>, %arg4: memref<512x256xbf16, #tpu.memory_space<vmem>>, %arg5: memref<16x256xbf16, #tpu.memory_space<vmem>>, %arg6: memref<1x2x256xf32, #tpu.memory_space<vmem>>, %arg7: memref<16x256xf32, #tpu.memory_space<vmem>>) attributes {dimension_semantics = [#tpu.dimension_semantics<parallel>, #tpu.dimension_semantics<parallel>, #tpu.dimension_semantics<arbitrary>], iteration_bounds = array<i64: 2, 1, 9>, scalar_prefetch = 0 : i64, scratch_operands = 1 : i64, tpu.core_type = #tpu.core_type<tc>, window_params = [{transform_indices = @transform_0, window_bounds = array<i64: 16, 512>}, {transform_indices = @transform_1, window_bounds = array<i64: 512, 256>}, {transform_indices = @transform_2, window_bounds = array<i64: 16, 256>}, {transform_indices = @transform_3, window_bounds = array<i64: 1, 2, 256>}]} {
    %c0_i32 = arith.constant 0 : i32
    %0 = arith.cmpi eq, %arg2, %c0_i32 : i32
    %1 = arith.extui %0 : i1 to i32
    %c0_i32_0 = arith.constant 0 : i32
    %2 = arith.cmpi ne, %1, %c0_i32_0 : i32
    scf.if %2 {
      %cst_9 = arith.constant 0.000000e+00 : f32
      %12 = vector.broadcast %cst_9 : f32 to vector<16x256xf32>
      %c0_10 = arith.constant 0 : index
      %c0_11 = arith.constant 0 : index
      %13 = vector.load %arg7[%c0_10, %c0_11] : memref<16x256xf32, #tpu.memory_space<vmem>>, vector<16x256xf32>
      tpu.vector_store %arg7[%c0_10, %c0_11], %12 {strides = array<i32>} : memref<16x256xf32, #tpu.memory_space<vmem>>, vector<16x256xf32>,
    } else {
    }
    %c0 = arith.constant 0 : index
    %c0_1 = arith.constant 0 : index
    %3 = vector.load %arg7[%c0, %c0_1] : memref<16x256xf32, #tpu.memory_space<vmem>>, vector<16x256xf32>
    %c0_2 = arith.constant 0 : index
    %c0_3 = arith.constant 0 : index
    %4 = vector.load %arg3[%c0_2, %c0_3] : memref<16x512xbf16, #tpu.memory_space<vmem>>, vector<16x512xbf16>
    %c0_4 = arith.constant 0 : index
    %c0_5 = arith.constant 0 : index
    %5 = vector.load %arg4[%c0_4, %c0_5] : memref<512x256xbf16, #tpu.memory_space<vmem>>, vector<512x256xbf16>
    %cst = arith.constant dense<0.000000e+00> : vector<16x256xf32>
    %6 = tpu.matmul %4, %5, %cst {dimension_numbers = #tpu.dot_dimension_numbers<[1], [0], [0], [1], [0, 0, 1, 1], [], []>} : vector<16x512xbf16>, vector<512x256xbf16>, vector<16x256xf32> -> vector<16x256xf32>
    %7 = arith.addf %3, %6 : vector<16x256xf32>
    %c0_6 = arith.constant 0 : index
    %c0_7 = arith.constant 0 : index
    %8 = vector.load %arg7[%c0_6, %c0_7] : memref<16x256xf32, #tpu.memory_space<vmem>>, vector<16x256xf32>
    tpu.vector_store %arg7[%c0_6, %c0_7], %7 {strides = array<i32>} : memref<16x256xf32, #tpu.memory_space<vmem>>, vector<16x256xf32>,
    %c8_i32 = arith.constant 8 : i32
    %9 = arith.cmpi eq, %arg2, %c8_i32 : i32
    %10 = arith.extui %9 : i1 to i32
    %c0_i32_8 = arith.constant 0 : i32
    %11 = arith.cmpi ne, %10, %c0_i32_8 : i32
    scf.if %11 {
      %c0_9 = arith.constant 0 : index
      %c0_10 = arith.constant 0 : index
      %12 = vector.load %arg7[%c0_9, %c0_10] : memref<16x256xf32, #tpu.memory_space<vmem>>, vector<16x256xf32>
      %13 = arith.truncf %12 : vector<16x256xf32> to vector<16x256xbf16>
      %c0_11 = arith.constant 0 : index
      %c0_12 = arith.constant 0 : index
      %14 = vector.load %arg5[%c0_11, %c0_12] : memref<16x256xbf16, #tpu.memory_space<vmem>>, vector<16x256xbf16>
      tpu.vector_store %arg5[%c0_11, %c0_12], %13 {strides = array<i32>} : memref<16x256xbf16, #tpu.memory_space<vmem>>, vector<16x256xbf16>,
      %cst_13 = arith.constant dense<0.000000e+00> : vector<256xf32>
      %15 = vector.multi_reduction <add>, %12, %cst_13 [0] : vector<16x256xf32> to vector<256xf32>
      %16 = vector.shape_cast %15 : vector<256xf32> to vector<1x256xf32>
      %17 = arith.mulf %12, %12 : vector<16x256xf32>
      %cst_14 = arith.constant dense<0.000000e+00> : vector<256xf32>
      %18 = vector.multi_reduction <add>, %17, %cst_14 [0] : vector<16x256xf32> to vector<256xf32>
      %19 = vector.shape_cast %18 : vector<256xf32> to vector<1x256xf32>
      %20 = tpu.concatenate %16, %19 in 0 : vector<1x256xf32>, vector<1x256xf32> -> vector<2x256xf32>
      %c0_15 = arith.constant 0 : index
      %c0_16 = arith.constant 0 : index
      %c0_17 = arith.constant 0 : index
      %21 = vector.load %arg6[%c0_15, %c0_16, %c0_17] : memref<1x2x256xf32, #tpu.memory_space<vmem>>, vector<1x2x256xf32>
      %22 = vector.shape_cast %21 : vector<1x2x256xf32> to vector<2x256xf32>
      %23 = vector.shape_cast %20 : vector<2x256xf32> to vector<1x2x256xf32>
      tpu.vector_store %arg6[%c0_15, %c0_16, %c0_17], %23 {strides = array<i32>} : memref<1x2x256xf32, #tpu.memory_space<vmem>>, vector<1x2x256xf32>,
    } else {
    }
    return
  }
  func.func @transform_0(%arg0: i32, %arg1: i32, %arg2: i32) -> (i32, i32) {
    %c0_i32 = arith.constant 0 : i32
    return %arg1, %arg2 : i32, i32
  }
  func.func @transform_1(%arg0: i32, %arg1: i32, %arg2: i32) -> (i32, i32) {
    %c0_i32 = arith.constant 0 : i32
    return %arg2, %arg0 : i32, i32
  }
  func.func @transform_2(%arg0: i32, %arg1: i32, %arg2: i32) -> (i32, i32) {
    %c0_i32 = arith.constant 0 : i32
    return %arg1, %arg0 : i32, i32
  }
  func.func @transform_3(%arg0: i32, %arg1: i32, %arg2: i32) -> (i32, i32, i32) {
    %c0_i32 = arith.constant 0 : i32
    %c0_i32_0 = arith.constant 0 : i32
    return %arg1, %c0_i32, %arg0 : i32, i32, i32
  }
}

module attributes {stable_mosaic.version = 11 : i64} {
  func.func @_bn_act_res_kernel(%arg0: i32, %arg1: memref<16x512xbf16, #tpu.memory_space<vmem>>, %arg2: memref<16x512xbf16, #tpu.memory_space<vmem>>, %arg3: memref<1x512xf32, #tpu.memory_space<vmem>>, %arg4: memref<1x512xf32, #tpu.memory_space<vmem>>, %arg5: memref<16x512xbf16, #tpu.memory_space<vmem>>) attributes {dimension_semantics = [#tpu.dimension_semantics<parallel>], iteration_bounds = array<i64: 1>, scalar_prefetch = 0 : i64, scratch_operands = 0 : i64, tpu.core_type = #tpu.core_type<tc>, window_params = [{transform_indices = @transform_0, window_bounds = array<i64: 16, 512>}, {transform_indices = @transform_1, window_bounds = array<i64: 16, 512>}, {pipeline_mode = #tpu.pipeline_mode<synchronous>, transform_indices = @transform_2, window_bounds = array<i64: 1, 512>}, {pipeline_mode = #tpu.pipeline_mode<synchronous>, transform_indices = @transform_3, window_bounds = array<i64: 1, 512>}, {transform_indices = @transform_4, window_bounds = array<i64: 16, 512>}]} {
    %c0 = arith.constant 0 : index
    %c0_0 = arith.constant 0 : index
    %0 = vector.load %arg1[%c0, %c0_0] : memref<16x512xbf16, #tpu.memory_space<vmem>>, vector<16x512xbf16>
    %1 = arith.extf %0 : vector<16x512xbf16> to vector<16x512xf32>
    %c0_1 = arith.constant 0 : index
    %c0_2 = arith.constant 0 : index
    %2 = vector.load %arg3[%c0_1, %c0_2] : memref<1x512xf32, #tpu.memory_space<vmem>>, vector<1x512xf32>
    %3 = vector.broadcast %2 : vector<1x512xf32> to vector<16x512xf32>
    %4 = arith.mulf %1, %3 : vector<16x512xf32>
    %c0_3 = arith.constant 0 : index
    %c0_4 = arith.constant 0 : index
    %5 = vector.load %arg4[%c0_3, %c0_4] : memref<1x512xf32, #tpu.memory_space<vmem>>, vector<1x512xf32>
    %6 = vector.broadcast %5 : vector<1x512xf32> to vector<16x512xf32>
    %7 = arith.addf %4, %6 : vector<16x512xf32>
    %c0_5 = arith.constant 0 : index
    %c0_6 = arith.constant 0 : index
    %8 = vector.load %arg2[%c0_5, %c0_6] : memref<16x512xbf16, #tpu.memory_space<vmem>>, vector<16x512xbf16>
    %9 = arith.extf %8 : vector<16x512xbf16> to vector<16x512xf32>
    %10 = arith.addf %7, %9 : vector<16x512xf32>
    %cst = arith.constant 0.000000e+00 : f32
    %11 = vector.broadcast %cst : f32 to vector<16x512xf32>
    %12 = arith.maximumf %10, %11 : vector<16x512xf32>
    %13 = arith.truncf %12 : vector<16x512xf32> to vector<16x512xbf16>
    %c0_7 = arith.constant 0 : index
    %c0_8 = arith.constant 0 : index
    %14 = vector.load %arg5[%c0_7, %c0_8] : memref<16x512xbf16, #tpu.memory_space<vmem>>, vector<16x512xbf16>
    tpu.vector_store %arg5[%c0_7, %c0_8], %13 {strides = array<i32>} : memref<16x512xbf16, #tpu.memory_space<vmem>>, vector<16x512xbf16>,
    return
  }
  func.func @transform_0(%arg0: i32) -> (i32, i32) {
    %c0_i32 = arith.constant 0 : i32
    %c0_i32_0 = arith.constant 0 : i32
    return %arg0, %c0_i32 : i32, i32
  }
  func.func @transform_1(%arg0: i32) -> (i32, i32) {
    %c0_i32 = arith.constant 0 : i32
    %c0_i32_0 = arith.constant 0 : i32
    return %arg0, %c0_i32 : i32, i32
  }
  func.func @transform_2(%arg0: i32) -> (i32, i32) {
    %c0_i32 = arith.constant 0 : i32
    %c0_i32_0 = arith.constant 0 : i32
    %c0_i32_1 = arith.constant 0 : i32
    return %c0_i32, %c0_i32_0 : i32, i32
  }
  func.func @transform_3(%arg0: i32) -> (i32, i32) {
    %c0_i32 = arith.constant 0 : i32
    %c0_i32_0 = arith.constant 0 : i32
    %c0_i32_1 = arith.constant 0 : i32
    return %c0_i32, %c0_i32_0 : i32, i32
  }
  func.func @transform_4(%arg0: i32) -> (i32, i32) {
    %c0_i32 = arith.constant 0 : i32
    %c0_i32_0 = arith.constant 0 : i32
    return %arg0, %c0_i32 : i32, i32
  }
}

module attributes {stable_mosaic.version = 11 : i64} {
  func.func @_head_kernel(%arg0: i32, %arg1: memref<1x1x512xbf16, #tpu.memory_space<vmem>>, %arg2: memref<1x1x512xf32, #tpu.memory_space<vmem>>, %arg3: memref<512x128xbf16, #tpu.memory_space<vmem>>, %arg4: memref<1x128xf32, #tpu.memory_space<vmem>>, %arg5: memref<1x1x128xf32, #tpu.memory_space<vmem>>) attributes {dimension_semantics = [#tpu.dimension_semantics<parallel>], iteration_bounds = array<i64: 2>, scalar_prefetch = 0 : i64, scratch_operands = 0 : i64, tpu.core_type = #tpu.core_type<tc>, window_params = [{transform_indices = @transform_0, window_bounds = array<i64: 1, 1, 512>}, {transform_indices = @transform_1, window_bounds = array<i64: 1, 1, 512>}, {pipeline_mode = #tpu.pipeline_mode<synchronous>, transform_indices = @transform_2, window_bounds = array<i64: 512, 128>}, {pipeline_mode = #tpu.pipeline_mode<synchronous>, transform_indices = @transform_3, window_bounds = array<i64: 1, 128>}, {transform_indices = @transform_4, window_bounds = array<i64: 1, 1, 128>}]} {
    %c0 = arith.constant 0 : index
    %c0_0 = arith.constant 0 : index
    %c0_1 = arith.constant 0 : index
    %0 = vector.load %arg1[%c0, %c0_0, %c0_1] : memref<1x1x512xbf16, #tpu.memory_space<vmem>>, vector<1x1x512xbf16>
    %1 = vector.shape_cast %0 : vector<1x1x512xbf16> to vector<1x512xbf16>
    %2 = arith.extf %1 : vector<1x512xbf16> to vector<1x512xf32>
    %cst = arith.constant dense<0.000000e+00> : vector<512xf32>
    %3 = vector.multi_reduction <add>, %2, %cst [0] : vector<1x512xf32> to vector<512xf32>
    %4 = vector.shape_cast %3 : vector<512xf32> to vector<1x512xf32>
    %cst_2 = arith.constant 1.000000e+00 : f32
    %5 = vector.broadcast %cst_2 : f32 to vector<1x512xf32>
    %6 = arith.mulf %4, %5 : vector<1x512xf32>
    %c0_3 = arith.constant 0 : index
    %c0_4 = arith.constant 0 : index
    %c0_5 = arith.constant 0 : index
    %7 = vector.load %arg2[%c0_3, %c0_4, %c0_5] : memref<1x1x512xf32, #tpu.memory_space<vmem>>, vector<1x1x512xf32>
    %8 = vector.shape_cast %7 : vector<1x1x512xf32> to vector<1x512xf32>
    %cst_6 = arith.constant 1.000000e-07 : f32
    %9 = vector.broadcast %cst_6 : f32 to vector<1x512xf32>
    %10 = arith.addf %8, %9 : vector<1x512xf32>
    %11 = math.log %10 : vector<1x512xf32>
    %cst_7 = arith.constant -2.19722366 : f32
    %12 = vector.broadcast %cst_7 : f32 to vector<1x512xf32>
    %13 = arith.addf %12, %11 : vector<1x512xf32>
    %cst_8 = arith.constant 1.000000e+00 : f32
    %14 = vector.broadcast %cst_8 : f32 to vector<1x512xf32>
    %15 = arith.subf %14, %8 : vector<1x512xf32>
    %cst_9 = arith.constant 1.000000e-07 : f32
    %16 = vector.broadcast %cst_9 : f32 to vector<1x512xf32>
    %17 = arith.addf %15, %16 : vector<1x512xf32>
    %18 = math.log %17 : vector<1x512xf32>
    %19 = arith.subf %13, %18 : vector<1x512xf32>
    %cst_10 = arith.constant 1.000000e-01 : f32
    %20 = vector.broadcast %cst_10 : f32 to vector<1x512xf32>
    %21 = arith.divf %19, %20 : vector<1x512xf32>
    %22 = arith.negf %21 : vector<1x512xf32>
    %23 = math.exp %22 : vector<1x512xf32>
    %cst_11 = arith.constant 1.000000e+00 : f32
    %24 = vector.broadcast %cst_11 : f32 to vector<1x512xf32>
    %25 = arith.addf %24, %23 : vector<1x512xf32>
    %26 = arith.divf %24, %25 : vector<1x512xf32>
    %cst_12 = arith.constant 1.000000e+00 : f32
    %27 = vector.broadcast %cst_12 : f32 to vector<1x512xf32>
    %28 = arith.subf %27, %26 : vector<1x512xf32>
    %29 = arith.mulf %6, %28 : vector<1x512xf32>
    %cst_13 = arith.constant 0.899999976 : f32
    %30 = vector.broadcast %cst_13 : f32 to vector<1x512xf32>
    %31 = arith.divf %29, %30 : vector<1x512xf32>
    %32 = arith.truncf %31 : vector<1x512xf32> to vector<1x512xbf16>
    %c0_14 = arith.constant 0 : index
    %c0_15 = arith.constant 0 : index
    %33 = vector.load %arg3[%c0_14, %c0_15] : memref<512x128xbf16, #tpu.memory_space<vmem>>, vector<512x128xbf16>
    %cst_16 = arith.constant dense<0.000000e+00> : vector<1x128xf32>
    %34 = tpu.matmul %32, %33, %cst_16 {dimension_numbers = #tpu.dot_dimension_numbers<[1], [0], [0], [1], [0, 0, 1, 1], [], []>} : vector<1x512xbf16>, vector<512x128xbf16>, vector<1x128xf32> -> vector<1x128xf32>
    %c0_17 = arith.constant 0 : index
    %c0_18 = arith.constant 0 : index
    %35 = vector.load %arg4[%c0_17, %c0_18] : memref<1x128xf32, #tpu.memory_space<vmem>>, vector<1x128xf32>
    %36 = arith.addf %34, %35 : vector<1x128xf32>
    %c0_19 = arith.constant 0 : index
    %c0_20 = arith.constant 0 : index
    %c0_21 = arith.constant 0 : index
    %37 = vector.load %arg5[%c0_19, %c0_20, %c0_21] : memref<1x1x128xf32, #tpu.memory_space<vmem>>, vector<1x1x128xf32>
    %38 = vector.shape_cast %37 : vector<1x1x128xf32> to vector<1x128xf32>
    %39 = vector.shape_cast %36 : vector<1x128xf32> to vector<1x1x128xf32>
    tpu.vector_store %arg5[%c0_19, %c0_20, %c0_21], %39 {strides = array<i32>} : memref<1x1x128xf32, #tpu.memory_space<vmem>>, vector<1x1x128xf32>,
    return
  }
  func.func @transform_0(%arg0: i32) -> (i32, i32, i32) {
    %c0_i32 = arith.constant 0 : i32
    %c0_i32_0 = arith.constant 0 : i32
    %c0_i32_1 = arith.constant 0 : i32
    return %arg0, %c0_i32, %c0_i32_0 : i32, i32, i32
  }
  func.func @transform_1(%arg0: i32) -> (i32, i32, i32) {
    %c0_i32 = arith.constant 0 : i32
    %c0_i32_0 = arith.constant 0 : i32
    %c0_i32_1 = arith.constant 0 : i32
    return %arg0, %c0_i32, %c0_i32_0 : i32, i32, i32
  }
  func.func @transform_2(%arg0: i32) -> (i32, i32) {
    %c0_i32 = arith.constant 0 : i32
    %c0_i32_0 = arith.constant 0 : i32
    %c0_i32_1 = arith.constant 0 : i32
    return %c0_i32, %c0_i32_0 : i32, i32
  }
  func.func @transform_3(%arg0: i32) -> (i32, i32) {
    %c0_i32 = arith.constant 0 : i32
    %c0_i32_0 = arith.constant 0 : i32
    %c0_i32_1 = arith.constant 0 : i32
    return %c0_i32, %c0_i32_0 : i32, i32
  }
  func.func @transform_4(%arg0: i32) -> (i32, i32, i32) {
    %c0_i32 = arith.constant 0 : i32
    %c0_i32_0 = arith.constant 0 : i32
    %c0_i32_1 = arith.constant 0 : i32
    return %arg0, %c0_i32, %c0_i32_0 : i32, i32, i32
  }
}

</mosaic_0001>

<bundles_post_ra>
// kernel: _lambda_.26
= control target key start
LH: loop header
LB: loop body
LE: loop exit
PB: predicated region body
PF: predicated region fallthrough
CT: control target
= control target key end

     0   :  { %s1687_s12 = smov 0   ;;  %s1689_s13 = smov 0   ;;  %s1960_s0 = inlined_call_operand.vmem [shape: bf16[512,256], index: 0, kind: input, shape index: {}]   ;;  %s1961_s1 = inlined_call_operand.vmem [shape: bf16[256,128], index: 1, kind: input, shape index: {}]   ;;  %s1962_s2 = inlined_call_operand.vmem [shape: bf16[512,128], index: 2, kind: output, shape index: {0}]   ;;  %s1963_s3 = inlined_call_operand.vmem [shape: f32[2,2,128], index: 3, kind: output, shape index: {1}]  }
   0x1   :  { %s1691_s14 = smov 0  }
   0x2 LB: > { %s29_s15 = sadd.s32 1, %s1661_s13  ;;  %p1258_p0 = scmp.ge.s32.totalorder %s1665_s14, 1  ;;  %s1665_s14 = sphi %s1691_s14, %s14_s14   ;;  %s1661_s13 = sphi %s1689_s13, %s1965_s13   ;;  %s1657_s12 = sphi %s1687_s12, %s1964_s12  }
   0x3   : > { %p31_p1 = scmp.ge.s32.totalorder %s29_s15, 2  ;;  %p188_p2 = scmp.lt.s32.totalorder %s1665_s14, 3 }
   0x5   : > { %s1967_s15 = smov (%p31_p1, %s29_s15), 0  ;;  %p189_p3 = pnand %p1258_p0, %p188_p2 }
   0x6   : > { %s1259_s28 = sshll.u32 (!%p189_p3), %s1657_s12, 5  ;;  %p265_p5 = scmp.lt.s32.totalorder (!%p189_p3), %s1657_s12, 1 }
   0x7   : > { %192 = sbr.rel (%p189_p3) target bundleno = 343 (0x157), region = 28  ;;  %p237_p4 = scmp.lt.s32.totalorder (!%p189_p3), %s1259_s28, 63 }
   0xc   : > { %v1499_v0 = vld [vmem:[%s1961_s1 + $0x38] sm:$0xff]  ;;  %v1498_v2 = vld [vmem:[%s1961_s1 + $0x30] sm:$0xff]  ;;  %v1497_v4 = vld [vmem:[%s1961_s1 + $0x28] sm:$0xff]  ;;  %s1969_s28 = smov (!%p237_p4, %s1259_s28), 63  ;;  %s1971_s12 = smov (!%p265_p5, %s1657_s12), 1  ;;  %vm1107_vm0 = vcmask 1040384  }
   0xd   : > { %v1507_v1 = vld [vmem:[%s1961_s1 + $0x78] sm:$0xff]  ;;  %660 = vmatpush.bf16.msra.mxu0 %v1499_v0  ;;  %v1506_v3 = vld [vmem:[%s1961_s1 + $0x70] sm:$0xff]  ;;  %1603 = vmatpush.bf16.msra.mxu2 %v1499_v0  ;;  %v1505_v5 = vld [vmem:[%s1961_s1 + $0x68] sm:$0xff]  ;;  %s1459_s18 = sshll.u32 %s1969_s28, 3  ;;  %s1263_s4 = sshll.u32 %s1969_s28, 2 }
   0xe   : > { %749 = vmatpush.bf16.msra.mxu1 %v1507_v1  ;;  %1611 = vmatpush.bf16.msra.mxu3 %v1507_v1  ;;  %v1496_v6 = vld [vmem:[%s1961_s1 + $0x20] sm:$0xff]  ;;  %v1495_v8 = vld [vmem:[%s1961_s1 + $0x18] sm:$0xff]  ;;  %v1494_v10 = vld [vmem:[%s1961_s1 + $0x10] sm:$0xff]  ;;  %s1756_s25 = scalar_lea.vmem %s1960_s0, %s1459_s18  ;;  %s1832_s7 = scalar_lea.vmem %s1962_s2, %s1263_s4 }
   0xf   : > { %v1504_v7 = vld [vmem:[%s1961_s1 + $0x60] sm:$0xff]  ;;  %v1503_v9 = vld [vmem:[%s1961_s1 + $0x58] sm:$0xff]  ;;  %v1502_v11 = vld [vmem:[%s1961_s1 + $0x50] sm:$0xff]  ;;  %s1264_s28 = sshll.u32 %s1971_s12, 1 }
  0x10   : > { %v1493_v12 = vld [vmem:[%s1961_s1 + $0x8] sm:$0xff]  ;;  %v1492_v14 = vld [vmem:[%s1961_s1] sm:$0xff]  ;;  %v1275_v28 = vld [vmem:[%s1756_s25 + $0x10] sm:$0xf]  ;;  %s271_s10 = scalar_lea.vmem %s1963_s3, %s1264_s28 }
  0x11   : > { %661 = vmatpush.bf16.msra.mxu0 %v1498_v2  ;;  %1604 = vmatpush.bf16.msra.mxu2 %v1498_v2  ;;  %v1501_v13 = vld [vmem:[%s1961_s1 + $0x48] sm:$0xff]  ;;  %v1500_v15 = vld [vmem:[%s1961_s1 + $0x40] sm:$0xff]  ;;  %v1463_v29 = vld [vmem:[%s1756_s25 + $0x14] sm:$0xf0] }
  0x12   : > { %750 = vmatpush.bf16.msra.mxu1 %v1506_v3  ;;  %1612 = vmatpush.bf16.msra.mxu3 %v1506_v3  ;;  %v1267_v16 = vld [vmem:[%s1756_s25] sm:$0xf]  ;;  %v1461_v17 = vld [vmem:[%s1756_s25 + $0x4] sm:$0xf0]  ;;  %v1460_v18 = vld [vmem:[%s1756_s25 + $0x4] sm:$0xf]  ;;  %v1276_v36 = vor.u32 %v1463_v29, %v1275_v28 }
  0x13   : > { %v1269_v19 = vld [vmem:[%s1756_s25 + $0x8] sm:$0xf0]  ;;  %v1331_v20 = vld [vmem:[%s1756_s25 + $0x80] sm:$0xf]  ;;  %v1477_v21 = vld [vmem:[%s1756_s25 + $0x84] sm:$0xf0]  ;;  %v1268_v24 = vor.u32 %v1461_v17, %v1267_v16 }
  0x14   : > { %v1476_v22 = vld [vmem:[%s1756_s25 + $0x84] sm:$0xf]  ;;  %v1333_v23 = vld [vmem:[%s1756_s25 + $0x88] sm:$0xf0]  ;;  %v1272_v25 = vor.u32 %v1460_v18, %v1269_v19  ;;  %v1332_v26 = vor.u32 %v1477_v21, %v1331_v20  ;;  %v1462_v30 = vld [vmem:[%s1756_s25 + $0x14] sm:$0xf] }
  0x15   : > { %662 = vmatpush.bf16.msra.mxu0 %v1497_v4  ;;  %1605 = vmatpush.bf16.msra.mxu2 %v1497_v4  ;;  %v1336_v27 = vor.u32 %v1476_v22, %v1333_v23  ;;  %v1277_v31 = vld [vmem:[%s1756_s25 + $0x18] sm:$0xf0]  ;;  %v1339_v32 = vld [vmem:[%s1756_s25 + $0x90] sm:$0xf]  ;;  %v1479_v33 = vld [vmem:[%s1756_s25 + $0x94] sm:$0xf0] }
  0x16   : > { %751 = vmatpush.bf16.msra.mxu1 %v1505_v5  ;;  %1613 = vmatpush.bf16.msra.mxu3 %v1505_v5  ;;  %v1478_v34 = vld [vmem:[%s1756_s25 + $0x94] sm:$0xf]  ;;  %v1341_v35 = vld [vmem:[%s1756_s25 + $0x98] sm:$0xf0]  ;;  %v1280_v37 = vor.u32 %v1462_v30, %v1277_v31  ;;  %v1340_v38 = vor.u32 %v1479_v33, %v1339_v32  ;;  %v1283_v40 = vld [vmem:[%s1756_s25 + $0x20] sm:$0xf] }
  0x17   : > { %v1344_v39 = vor.u32 %v1478_v34, %v1341_v35  ;;  %v1465_v41 = vld [vmem:[%s1756_s25 + $0x24] sm:$0xf0]  ;;  %v1464_v42 = vld [vmem:[%s1756_s25 + $0x24] sm:$0xf]  ;;  %v1285_v43 = vld [vmem:[%s1756_s25 + $0x28] sm:$0xf0] }
  0x18   : > { %v1347_v44 = vld [vmem:[%s1756_s25 + $0xa0] sm:$0xf]  ;;  %v1481_v45 = vld [vmem:[%s1756_s25 + $0xa4] sm:$0xf0]  ;;  %v1480_v46 = vld [vmem:[%s1756_s25 + $0xa4] sm:$0xf]  ;;  %v1284_v48 = vor.u32 %v1465_v41, %v1283_v40  ;;  %v1288_v49 = vor.u32 %v1464_v42, %v1285_v43 }
  0x19   : > { %663 = vmatpush.bf16.msra.mxu0 %v1496_v6  ;;  %1606 = vmatpush.bf16.msra.mxu2 %v1496_v6  ;;  %v1349_v47 = vld [vmem:[%s1756_s25 + $0xa8] sm:$0xf0]  ;;  %v1348_v50 = vor.u32 %v1481_v45, %v1347_v44  ;;  %v1291_v52 = vld [vmem:[%s1756_s25 + $0x30] sm:$0xf]  ;;  %v1467_v53 = vld [vmem:[%s1756_s25 + $0x34] sm:$0xf0] }
  0x1a   : > { %752 = vmatpush.bf16.msra.mxu1 %v1504_v7  ;;  %1614 = vmatpush.bf16.msra.mxu3 %v1504_v7  ;;  %v1352_v51 = vor.u32 %v1480_v46, %v1349_v47  ;;  %v1466_v54 = vld [vmem:[%s1756_s25 + $0x34] sm:$0xf]  ;;  %v1293_v55 = vld [vmem:[%s1756_s25 + $0x38] sm:$0xf0]  ;;  %v1355_v56 = vld [vmem:[%s1756_s25 + $0xb0] sm:$0xf]  ;;  %v1292_v60 = vor.u32 %v1467_v53, %v1291_v52 }
  0x1b   : > { %v1483_v57 = vld [vmem:[%s1756_s25 + $0xb4] sm:$0xf0]  ;;  %v1482_v58 = vld [vmem:[%s1756_s25 + $0xb4] sm:$0xf]  ;;  %v1357_v59 = vld [vmem:[%s1756_s25 + $0xb8] sm:$0xf0]  ;;  %v1296_v61 = vor.u32 %v1466_v54, %v1293_v55 }
  0x1c   : > { %v1356_v62 = vor.u32 %v1483_v57, %v1355_v56  ;;  %v1360_v63 = vor.u32 %v1482_v58, %v1357_v59  ;;  %v1299_v0 = vld [vmem:[%s1756_s25 + $0x40] sm:$0xf]  ;;  %v1469_v1 = vld [vmem:[%s1756_s25 + $0x44] sm:$0xf0]  ;;  %v1468_v2 = vld [vmem:[%s1756_s25 + $0x44] sm:$0xf] }
  0x1d   : > { %664 = vmatpush.bf16.msra.mxu0 %v1495_v8  ;;  %1607 = vmatpush.bf16.msra.mxu2 %v1495_v8  ;;  %v1301_v3 = vld [vmem:[%s1756_s25 + $0x48] sm:$0xf0]  ;;  %v1363_v4 = vld [vmem:[%s1756_s25 + $0xc0] sm:$0xf]  ;;  %v1485_v5 = vld [vmem:[%s1756_s25 + $0xc4] sm:$0xf0]  ;;  %v1300_v8 = vor.u32 %v1469_v1, %v1299_v0 }
  0x1e   : > { %753 = vmatpush.bf16.msra.mxu1 %v1503_v9  ;;  %1615 = vmatpush.bf16.msra.mxu3 %v1503_v9  ;;  %v1484_v6 = vld [vmem:[%s1756_s25 + $0xc4] sm:$0xf]  ;;  %v1365_v7 = vld [vmem:[%s1756_s25 + $0xc8] sm:$0xf0]  ;;  %v1304_v9 = vor.u32 %v1468_v2, %v1301_v3  ;;  %v1371_v16 = vld [vmem:[%s1756_s25 + $0xd0] sm:$0xf] }
  0x1f   : > { %v1487_v17 = vld [vmem:[%s1756_s25 + $0xd4] sm:$0xf0]  ;;  %v1486_v18 = vld [vmem:[%s1756_s25 + $0xd4] sm:$0xf]  ;;  %v1373_v19 = vld [vmem:[%s1756_s25 + $0xd8] sm:$0xf0] }
  0x20   : > { %v1372_v22 = vor.u32 %v1487_v17, %v1371_v16  ;;  %v1376_v23 = vor.u32 %v1486_v18, %v1373_v19  ;;  %v1379_v28 = vld [vmem:[%s1756_s25 + $0xe0] sm:$0xf]  ;;  %v1489_v29 = vld [vmem:[%s1756_s25 + $0xe4] sm:$0xf0]  ;;  %v1488_v30 = vld [vmem:[%s1756_s25 + $0xe4] sm:$0xf] }
  0x21   : > { %665 = vmatpush.bf16.msra.mxu0 %v1494_v10  ;;  %1608 = vmatpush.bf16.msra.mxu2 %v1494_v10  ;;  %v1364_v10 = vor.u32 %v1485_v5, %v1363_v4  ;;  %v1381_v31 = vld [vmem:[%s1756_s25 + $0xe8] sm:$0xf0]  ;;  %v1380_v34 = vor.u32 %v1489_v29, %v1379_v28  ;;  %v1387_v40 = vld [vmem:[%s1756_s25 + $0xf0] sm:$0xf]  ;;  %v1491_v41 = vld [vmem:[%s1756_s25 + $0xf4] sm:$0xf0] }
  0x22   : > { %754 = vmatpush.bf16.msra.mxu1 %v1502_v11  ;;  %1616 = vmatpush.bf16.msra.mxu3 %v1502_v11  ;;  %v1368_v11 = vor.u32 %v1484_v6, %v1365_v7  ;;  %v1384_v35 = vor.u32 %v1488_v30, %v1381_v31  ;;  %v1490_v42 = vld [vmem:[%s1756_s25 + $0xf4] sm:$0xf]  ;;  %v1389_v43 = vld [vmem:[%s1756_s25 + $0xf8] sm:$0xf0]  ;;  %v1388_v46 = vor.u32 %v1491_v41, %v1387_v40 }
  0x23   : > { %v1392_v47 = vor.u32 %v1490_v42, %v1389_v43 }
  0x25   : > { %666 = vmatpush.bf16.msra.mxu0 %v1493_v12  ;;  %1609 = vmatpush.bf16.msra.mxu2 %v1493_v12  ;;  %v1307_v12 = vld [vmem:[%s1756_s25 + $0x50] sm:$0xf] }
  0x26   : > { %755 = vmatpush.bf16.msra.mxu1 %v1501_v13  ;;  %1617 = vmatpush.bf16.msra.mxu3 %v1501_v13  ;;  %v1471_v13 = vld [vmem:[%s1756_s25 + $0x54] sm:$0xf0] }
  0x27   : > { %v1308_v20 = vor.u32 %v1471_v13, %v1307_v12 }
  0x29   : > { %667 = vmatpush.bf16.msra.mxu0 %v1492_v14  ;;  %1610 = vmatpush.bf16.msra.mxu2 %v1492_v14  ;;  %v1470_v14 = vld [vmem:[%s1756_s25 + $0x54] sm:$0xf] }
  0x2a   : > { %756 = vmatpush.bf16.msra.mxu1 %v1500_v15  ;;  %1618 = vmatpush.bf16.msra.mxu3 %v1500_v15  ;;  %v1309_v15 = vld [vmem:[%s1756_s25 + $0x58] sm:$0xf0] }
  0x2b   : > { %v1312_v21 = vor.u32 %v1470_v14, %v1309_v15 }
  0x2c   : > { %668 = vmatmul.bf16.vlgmr.msra.gmra.mxu0 %v1268_v24  ;;  %708 = vmatmul.bf16.vlgmr.msra.gmra.mxu2 %v1332_v26  ;;  %v1315_v24 = vld [vmem:[%s1756_s25 + $0x60] sm:$0xf]  ;;  %v1472_v26 = vld [vmem:[%s1756_s25 + $0x64] sm:$0xf] }
  0x2d   : > { %757 = vmatmul.bf16.vlgmr.msra.gmra.mxu1 %v1272_v25  ;;  %797 = vmatmul.bf16.vlgmr.msra.gmra.mxu3 %v1336_v27  ;;  %v1473_v25 = vld [vmem:[%s1756_s25 + $0x64] sm:$0xf0]  ;;  %v1317_v27 = vld [vmem:[%s1756_s25 + $0x68] sm:$0xf0] }
  0x2e   : > { %v1316_v32 = vor.u32 %v1473_v25, %v1315_v24  ;;  %v1320_v33 = vor.u32 %v1472_v26, %v1317_v27 }
  0x3c   : > { %673 = vmatmul.bf16.gmra.mxu0 %v1276_v36  ;;  %713 = vmatmul.bf16.gmra.mxu2 %v1340_v38  ;;  %v1323_v36 = vld [vmem:[%s1756_s25 + $0x70] sm:$0xf]  ;;  %v1474_v38 = vld [vmem:[%s1756_s25 + $0x74] sm:$0xf] }
  0x3d   : > { %762 = vmatmul.bf16.gmra.mxu1 %v1280_v37  ;;  %802 = vmatmul.bf16.gmra.mxu3 %v1344_v39  ;;  %v1475_v37 = vld [vmem:[%s1756_s25 + $0x74] sm:$0xf0]  ;;  %v1325_v39 = vld [vmem:[%s1756_s25 + $0x78] sm:$0xf0] }
  0x3e   : > { %v1324_v44 = vor.u32 %v1475_v37, %v1323_v36  ;;  %v1328_v45 = vor.u32 %v1474_v38, %v1325_v39 }
  0x4c   : > { %678 = vmatmul.bf16.gmra.mxu0 %v1284_v48  ;;  %718 = vmatmul.bf16.gmra.mxu2 %v1348_v50 }
  0x4d   : > { %767 = vmatmul.bf16.gmra.mxu1 %v1288_v49  ;;  %807 = vmatmul.bf16.gmra.mxu3 %v1352_v51 }
  0x5c   : > { %683 = vmatmul.bf16.gmra.mxu0 %v1292_v60  ;;  %723 = vmatmul.bf16.gmra.mxu2 %v1356_v62 }
  0x5d   : > { %772 = vmatmul.bf16.gmra.mxu1 %v1296_v61  ;;  %812 = vmatmul.bf16.gmra.mxu3 %v1360_v63 }
  0x6c   : > { %688 = vmatmul.bf16.gmra.mxu0 %v1300_v8  ;;  %728 = vmatmul.bf16.gmra.mxu2 %v1364_v10 }
  0x6d   : > { %777 = vmatmul.bf16.gmra.mxu1 %v1304_v9  ;;  %817 = vmatmul.bf16.gmra.mxu3 %v1368_v11 }
  0x7c   : > { %693 = vmatmul.bf16.gmra.mxu0 %v1308_v20  ;;  %733 = vmatmul.bf16.gmra.mxu2 %v1372_v22 }
  0x7d   : > { %782 = vmatmul.bf16.gmra.mxu1 %v1312_v21  ;;  %822 = vmatmul.bf16.gmra.mxu3 %v1376_v23 }
  0x8c   : > { %698 = vmatmul.bf16.gmra.mxu0 %v1316_v32  ;;  %738 = vmatmul.bf16.gmra.mxu2 %v1380_v34 }
  0x8d   : > { %787 = vmatmul.bf16.gmra.mxu1 %v1320_v33  ;;  %827 = vmatmul.bf16.gmra.mxu3 %v1384_v35 }
  0x9c   : > { %703 = vmatmul.bf16.gmra.mxu0 %v1324_v44  ;;  %743 = vmatmul.bf16.gmra.mxu2 %v1388_v46 }
  0x9d   : > { %792 = vmatmul.bf16.gmra.mxu1 %v1328_v45  ;;  %832 = vmatmul.bf16.gmra.mxu3 %v1392_v47 }
  0xa9   : > { %v669_v48 = vpop.f32.mrf.mxu0 }
  0xaa   : > { %v758_v49 = vpop.f32.mrf.mxu1 }
  0xab   : > { %v759_v50 = vadd.f32 %v758_v49, %v669_v48 }
  0xad   : > { %v1038_v56 = vmul.f32 %v759_v50, %v759_v50 }
  0xaf   : > { %v709_v51 = vpop.f32.mrf.mxu2 }
  0xb0   : > { %v798_v52 = vpop.f32.mrf.mxu3 }
  0xb1   : > { %v671_v53 = vpop.f32.mrf.mxu0  ;;  %v1835_v61 = vadd.f32 %v798_v52, %v709_v51 }
  0xb2   : > { %v760_v54 = vpop.f32.mrf.mxu1 }
  0xb3   : > { %v761_v55 = vadd.f32 %v760_v54, %v671_v53 }
  0xb5   : > { %v1511_v57 = vpack.c.bf16 %v761_v55, %v759_v50  ;;  %v1001_v58 = vadd.f32 %v761_v55, %v759_v50  ;;  %v1039_v59 = vmul.f32 %v761_v55, %v761_v55 }
  0xb7   : > { %1512 = vst [vmem:[%s1832_s7] sm:$0xff] %v1511_v57   ;;  %v1070_v60 = vadd.f32 %v1039_v59, %v1038_v56  ;;  %v711_v62 = vpop.f32.mrf.mxu2 }
  0xb8   : > { %v800_v63 = vpop.f32.mrf.mxu3 }
  0xb9   : > { %v674_v0 = vpop.f32.mrf.mxu0  ;;  %v1837_v2 = vadd.f32 %v800_v63, %v711_v62 }
  0xba   : > { %v763_v1 = vpop.f32.mrf.mxu1 }
  0xbb   : > { %v764_v3 = vadd.f32 %v763_v1, %v674_v0  ;;  %v1551_v4 = vpack.c.bf16 %v1837_v2, %v1835_v61 }
  0xbd   : > { %v1002_v5 = vadd.f32 %v1001_v58, %v764_v3  ;;  %v1040_v6 = vmul.f32 %v764_v3, %v764_v3  ;;  %1595 = vst [vmem:[%s1832_s7 + $0x40] sm:$0xff] %v1551_v4  }
  0xbf   : > { %v1071_v7 = vadd.f32 %v1070_v60, %v1040_v6  ;;  %v714_v8 = vpop.f32.mrf.mxu2 }
  0xc0   : > { %v803_v9 = vpop.f32.mrf.mxu3 }
  0xc1   : > { %v676_v10 = vpop.f32.mrf.mxu0  ;;  %v1847_v17 = vadd.f32 %v803_v9, %v714_v8 }
  0xc2   : > { %v765_v11 = vpop.f32.mrf.mxu1 }
  0xc3   : > { %v766_v12 = vadd.f32 %v765_v11, %v676_v10 }
  0xc5   : > { %v1516_v13 = vpack.c.bf16 %v766_v12, %v764_v3  ;;  %v1842_v14 = vadd.f32 %v1002_v5, %v766_v12  ;;  %v1041_v15 = vmul.f32 %v766_v12, %v766_v12 }
  0xc7   : > { %1588 = vst [vmem:[%s1832_s7 + $0x8] sm:$0xff] %v1516_v13   ;;  %v1845_v16 = vadd.f32 %v1071_v7, %v1041_v15  ;;  %v716_v18 = vpop.f32.mrf.mxu2 }
  0xc8   : > { %v805_v19 = vpop.f32.mrf.mxu3 }
  0xc9   : > { %v679_v20 = vpop.f32.mrf.mxu0  ;;  %v1849_v22 = vadd.f32 %v805_v19, %v716_v18 }
  0xca   : > { %v768_v21 = vpop.f32.mrf.mxu1 }
  0xcb   : > { %v1556_v23 = vpack.c.bf16 %v1849_v22, %v1847_v17  ;;  %v769_v28 = vadd.f32 %v768_v21, %v679_v20 }
  0xcd   : > { %1596 = vst [vmem:[%s1832_s7 + $0x48] sm:$0xff] %v1556_v23   ;;  %v1042_v20 = vmul.f32 %v769_v28, %v769_v28 }
  0xcf   : > { %v719_v24 = vpop.f32.mrf.mxu2 }
  0xd0   : > { %v808_v25 = vpop.f32.mrf.mxu3 }
  0xd1   : > { %v681_v26 = vpop.f32.mrf.mxu0  ;;  %v1858_v31 = vadd.f32 %v808_v25, %v719_v24  ;;  %v1004_v24 = vadd.f32 %v1842_v14, %v769_v28  ;;  %v1073_v25 = vadd.f32 %v1845_v16, %v1042_v20 }
  0xd2   : > { %v770_v27 = vpop.f32.mrf.mxu1 }
  0xd3   : > { %v1854_v29 = vadd.f32 %v770_v27, %v681_v26 }
  0xd5   : > { %v1521_v30 = vpack.c.bf16 %v1854_v29, %v769_v28  ;;  %v1043_v23 = vmul.f32 %v1854_v29, %v1854_v29  ;;  %v1005_v26 = vadd.f32 %v1004_v24, %v1854_v29 }
  0xd7   : > { %1589 = vst [vmem:[%s1832_s7 + $0x10] sm:$0xff] %v1521_v30   ;;  %v721_v32 = vpop.f32.mrf.mxu2 }
  0xd8   : > { %v810_v33 = vpop.f32.mrf.mxu3 }
  0xd9   : > { %v684_v34 = vpop.f32.mrf.mxu0  ;;  %v1860_v36 = vadd.f32 %v810_v33, %v721_v32  ;;  %v1074_v33 = vadd.f32 %v1073_v25, %v1043_v23 }
  0xda   : > { %v773_v35 = vpop.f32.mrf.mxu1 }
  0xdb   : > { %v1561_v37 = vpack.c.bf16 %v1860_v36, %v1858_v31  ;;  %v774_v42 = vadd.f32 %v773_v35, %v684_v34 }
  0xdd   : > { %1597 = vst [vmem:[%s1832_s7 + $0x50] sm:$0xff] %v1561_v37   ;;  %v1044_v27 = vmul.f32 %v774_v42, %v774_v42  ;;  %v1006_v37 = vadd.f32 %v1005_v26, %v774_v42  ;;  %v1054_v26 = vmul.f32 %v1835_v61, %v1835_v61 }
  0xdf   : > { %v724_v38 = vpop.f32.mrf.mxu2 }
  0xe0   : > { %v813_v39 = vpop.f32.mrf.mxu3 }
  0xe1   : > { %v686_v40 = vpop.f32.mrf.mxu0  ;;  %v1866_v45 = vadd.f32 %v813_v39, %v724_v38 }
  0xe2   : > { %v775_v41 = vpop.f32.mrf.mxu1 }
  0xe3   : > { %v776_v43 = vadd.f32 %v775_v41, %v686_v40  ;;  %v1075_v41 = vadd.f32 %v1074_v33, %v1044_v27  ;;  %v1055_v33 = vmul.f32 %v1837_v2, %v1837_v2 }
  0xe5   : > { %v1526_v44 = vpack.c.bf16 %v776_v43, %v774_v42  ;;  %v1045_v38 = vmul.f32 %v776_v43, %v776_v43 }
  0xe7   : > { %1590 = vst [vmem:[%s1832_s7 + $0x18] sm:$0xff] %v1526_v44   ;;  %v726_v46 = vpop.f32.mrf.mxu2  ;;  %v1007_v44 = vadd.f32 %v1006_v37, %v776_v43  ;;  %v1076_v14 = vadd.f32 %v1075_v41, %v1045_v38 }
  0xe8   : > { %v815_v47 = vpop.f32.mrf.mxu3 }
  0xe9   : > { %v689_v48 = vpop.f32.mrf.mxu0  ;;  %v1868_v50 = vadd.f32 %v815_v47, %v726_v46 }
  0xea   : > { %v778_v49 = vpop.f32.mrf.mxu1 }
  0xeb   : > { %v1566_v51 = vpack.c.bf16 %v1868_v50, %v1866_v45  ;;  %v779_v56 = vadd.f32 %v778_v49, %v689_v48 }
  0xed   : > { %1598 = vst [vmem:[%s1832_s7 + $0x58] sm:$0xff] %v1566_v51   ;;  %v1046_v46 = vmul.f32 %v779_v56, %v779_v56  ;;  %v1008_v28 = vadd.f32 %v1007_v44, %v779_v56 }
  0xef   : > { %v729_v52 = vpop.f32.mrf.mxu2  ;;  %v1077_v48 = vadd.f32 %v1076_v14, %v1046_v46 }
  0xf0   : > { %v818_v53 = vpop.f32.mrf.mxu3 }
  0xf1   : > { %v691_v54 = vpop.f32.mrf.mxu0  ;;  %v1874_v59 = vadd.f32 %v818_v53, %v729_v52 }
  0xf2   : > { %v780_v55 = vpop.f32.mrf.mxu1 }
  0xf3   : > { %v781_v57 = vadd.f32 %v780_v55, %v691_v54 }
  0xf5   : > { %v1531_v58 = vpack.c.bf16 %v781_v57, %v779_v56  ;;  %v1047_v16 = vmul.f32 %v781_v57, %v781_v57  ;;  %v1009_v49 = vadd.f32 %v1008_v28, %v781_v57 }
  0xf7   : > { %1591 = vst [vmem:[%s1832_s7 + $0x20] sm:$0xff] %v1531_v58   ;;  %v731_v60 = vpop.f32.mrf.mxu2  ;;  %v1078_v58 = vadd.f32 %v1077_v48, %v1047_v16  ;;  %v1059_v48 = vmul.f32 %v1860_v36, %v1860_v36 }
  0xf8   : > { %v820_v62 = vpop.f32.mrf.mxu3 }
  0xf9   : > { %v694_v63 = vpop.f32.mrf.mxu0  ;;  %v1876_v1 = vadd.f32 %v820_v62, %v731_v60 }
  0xfa   : > { %v783_v0 = vpop.f32.mrf.mxu1 }
  0xfb   : > { %v1571_v3 = vpack.c.bf16 %v1876_v1, %v1874_v59  ;;  %v784_v8 = vadd.f32 %v783_v0, %v694_v63 }
  0xfd   : > { %1599 = vst [vmem:[%s1832_s7 + $0x60] sm:$0xff] %v1571_v3   ;;  %v1048_v51 = vmul.f32 %v784_v8, %v784_v8  ;;  %v1010_v43 = vadd.f32 %v1009_v49, %v784_v8 }
  0xff   : > { %v734_v4 = vpop.f32.mrf.mxu2  ;;  %v1079_v62 = vadd.f32 %v1078_v58, %v1048_v51  ;;  %v1060_v51 = vmul.f32 %v1866_v45, %v1866_v45 }
 0x100   : > { %v823_v5 = vpop.f32.mrf.mxu3 }
 0x101   : > { %v696_v6 = vpop.f32.mrf.mxu0  ;;  %v1882_v11 = vadd.f32 %v823_v5, %v734_v4 }
 0x102   : > { %v785_v7 = vpop.f32.mrf.mxu1 }
 0x103   : > { %v786_v9 = vadd.f32 %v785_v7, %v696_v6 }
 0x105   : > { %v1536_v10 = vpack.c.bf16 %v786_v9, %v784_v8  ;;  %v1049_v60 = vmul.f32 %v786_v9, %v786_v9  ;;  %v1011_v63 = vadd.f32 %v1010_v43, %v786_v9 }
 0x107   : > { %1592 = vst [vmem:[%s1832_s7 + $0x28] sm:$0xff] %v1536_v10   ;;  %v736_v12 = vpop.f32.mrf.mxu2  ;;  %v1080_v4 = vadd.f32 %v1079_v62, %v1049_v60 }
 0x108   : > { %v825_v13 = vpop.f32.mrf.mxu3 }
 0x109   : > { %v699_v15 = vpop.f32.mrf.mxu0  ;;  %v1884_v19 = vadd.f32 %v825_v13, %v736_v12 }
 0x10a   : > { %v788_v18 = vpop.f32.mrf.mxu1 }
 0x10b   : > { %v1576_v21 = vpack.c.bf16 %v1884_v19, %v1882_v11  ;;  %v789_v39 = vadd.f32 %v788_v18, %v699_v15 }
 0x10d   : > { %1600 = vst [vmem:[%s1832_s7 + $0x68] sm:$0xff] %v1576_v21   ;;  %v1050_v0 = vmul.f32 %v789_v39, %v789_v39  ;;  %v1012_v57 = vadd.f32 %v1011_v63, %v789_v39 }
 0x10f   : > { %v739_v30 = vpop.f32.mrf.mxu2  ;;  %v1081_v6 = vadd.f32 %v1080_v4, %v1050_v0 }
 0x110   : > { %v828_v32 = vpop.f32.mrf.mxu3 }
 0x111   : > { %v701_v34 = vpop.f32.mrf.mxu0  ;;  %v1895_v29 = vadd.f32 %v828_v32, %v739_v30 }
 0x112   : > { %v790_v35 = vpop.f32.mrf.mxu1 }
 0x113   : > { %v791_v40 = vadd.f32 %v790_v35, %v701_v34  ;;  %v1066_v4 = vmul.f32 %v1895_v29, %v1895_v29 }
 0x115   : > { %v1541_v47 = vpack.c.bf16 %v791_v40, %v789_v39  ;;  %v1051_v5 = vmul.f32 %v791_v40, %v791_v40  ;;  %v1013_v7 = vadd.f32 %v1012_v57, %v791_v40  ;;  %v1056_v40 = vmul.f32 %v1847_v17, %v1847_v17 }
 0x117   : > { %1593 = vst [vmem:[%s1832_s7 + $0x30] sm:$0xff] %v1541_v47   ;;  %v741_v52 = vpop.f32.mrf.mxu2  ;;  %v1082_v18 = vadd.f32 %v1081_v6, %v1051_v5 }
 0x118   : > { %v830_v53 = vpop.f32.mrf.mxu3 }
 0x119   : > { %v704_v42 = vpop.f32.mrf.mxu0  ;;  %v1897_v55 = vadd.f32 %v830_v53, %v741_v52  ;;  %v1061_v53 = vmul.f32 %v1868_v50, %v1868_v50 }
 0x11a   : > { %v793_v54 = vpop.f32.mrf.mxu1 }
 0x11b   : > { %v1581_v56 = vpack.c.bf16 %v1897_v55, %v1895_v29  ;;  %v794_v3 = vadd.f32 %v793_v54, %v704_v42 }
 0x11d   : > { %1601 = vst [vmem:[%s1832_s7 + $0x70] sm:$0xff] %v1581_v56   ;;  %v1052_v10 = vmul.f32 %v794_v3, %v794_v3  ;;  %v1014_v20 = vadd.f32 %v1013_v7, %v794_v3 }
 0x11f   : > { %v744_v12 = vpop.f32.mrf.mxu2  ;;  %v1083_v23 = vadd.f32 %v1082_v18, %v1052_v10 }
 0x120   : > { %v833_v13 = vpop.f32.mrf.mxu3 }
 0x121   : > { %v706_v15 = vpop.f32.mrf.mxu0  ;;  %v834_v32 = vadd.f32 %v833_v13, %v744_v12 }
 0x122   : > { %v795_v8 = vpop.f32.mrf.mxu1 }
 0x123   : > { %v796_v21 = vadd.f32 %v795_v8, %v706_v15  ;;  %v1068_v10 = vmul.f32 %v834_v32, %v834_v32 }
 0x125   : > { %v1546_v24 = vpack.c.bf16 %v796_v21, %v794_v3  ;;  %v1015_v9 = vadd.f32 %v1014_v20, %v796_v21  ;;  %v1053_v25 = vmul.f32 %v796_v21, %v796_v21 }
 0x127   : > { %1594 = vst [vmem:[%s1832_s7 + $0x38] sm:$0xff] %v1546_v24   ;;  %v1016_v27 = vadd.f32 %v1015_v9, %v1835_v61  ;;  %v1084_v30 = vadd.f32 %v1083_v23, %v1053_v25  ;;  %v746_v37 = vpop.f32.mrf.mxu2  ;;  %v1057_v61 = vmul.f32 %v1849_v22, %v1849_v22 }
 0x128   : > { %v835_v38 = vpop.f32.mrf.mxu3 }
 0x129   : > { %v1017_v34 = vadd.f32 %v1016_v27, %v1837_v2  ;;  %v1085_v35 = vadd.f32 %v1084_v30, %v1054_v26  ;;  %v836_v39 = vadd.f32 %v835_v38, %v746_v37  ;;  %v1058_v2 = vmul.f32 %v1858_v31, %v1858_v31 }
 0x12b   : > { %v1018_v41 = vadd.f32 %v1017_v34, %v1847_v17  ;;  %v1086_v44 = vadd.f32 %v1085_v35, %v1055_v33  ;;  %v1586_v46 = vpack.c.bf16 %v836_v39, %v834_v32  ;;  %v1069_v13 = vmul.f32 %v836_v39, %v836_v39 }
 0x12d   : > { %v1019_v47 = vadd.f32 %v1018_v41, %v1849_v22  ;;  %v1087_v14 = vadd.f32 %v1086_v44, %v1056_v40  ;;  %1602 = vst [vmem:[%s1832_s7 + $0x78] sm:$0xff] %v1586_v46  }
 0x12f   : > { %v1020_v28 = vadd.f32 %v1019_v47, %v1858_v31  ;;  %v1088_v16 = vadd.f32 %v1087_v14, %v1057_v61  ;;  %v1062_v31 = vmul.f32 %v1874_v59, %v1874_v59 }
 0x131   : > { %v1021_v17 = vadd.f32 %v1020_v28, %v1860_v36  ;;  %v1089_v49 = vadd.f32 %v1088_v16, %v1058_v2  ;;  %v1063_v36 = vmul.f32 %v1876_v1, %v1876_v1 }
 0x133   : > { %v1090_v52 = vadd.f32 %v1089_v49, %v1059_v48  ;;  %v1022_v22 = vadd.f32 %v1021_v17, %v1866_v45  ;;  %v1064_v45 = vmul.f32 %v1882_v11, %v1882_v11 }
 0x135   : > { %v1023_v42 = vadd.f32 %v1022_v22, %v1868_v50  ;;  %v1091_v54 = vadd.f32 %v1090_v52, %v1060_v51  ;;  %v1065_v50 = vmul.f32 %v1884_v19, %v1884_v19 }
 0x137   : > { %v1024_v58 = vadd.f32 %v1023_v42, %v1874_v59  ;;  %v1092_v43 = vadd.f32 %v1091_v54, %v1061_v53 }
 0x139   : > { %v1025_v60 = vadd.f32 %v1024_v58, %v1876_v1  ;;  %v1093_v56 = vadd.f32 %v1092_v43, %v1062_v31 }
 0x13b   : > { %v1026_v62 = vadd.f32 %v1025_v60, %v1882_v11  ;;  %v1094_v63 = vadd.f32 %v1093_v56, %v1063_v36  ;;  %v1067_v11 = vmul.f32 %v1897_v55, %v1897_v55 }
 0x13d   : > { %v1027_v0 = vadd.f32 %v1026_v62, %v1884_v19  ;;  %v1095_v59 = vadd.f32 %v1094_v63, %v1064_v45 }
 0x13f   : > { %v1028_v3 = vadd.f32 %v1027_v0, %v1895_v29  ;;  %v1096_v1 = vadd.f32 %v1095_v59, %v1065_v50 }
 0x141   : > { %v1097_v57 = vadd.f32 %v1096_v1, %v1066_v4  ;;  %v1029_v5 = vadd.f32 %v1028_v3, %v1897_v55 }
 0x143   : > { %v1098_v6 = vadd.f32 %v1097_v57, %v1067_v11  ;;  %v1030_v7 = vadd.f32 %v1029_v5, %v834_v32 }
 0x145   : > { %v1099_v12 = vadd.f32 %v1098_v6, %v1068_v10  ;;  %v1031_v19 = vadd.f32 %v1030_v7, %v836_v39 }
 0x147   : > { %v1032_v15 = vrot.slane %v1031_v19, 4  ;;  %v1100_v8 = vadd.f32 %v1099_v12, %v1069_v13 }
 0x149   : > { %v1033_v18 = vadd.f32 %v1032_v15, %v1031_v19  ;;  %v1101_v20 = vrot.slane %v1100_v8, 4 }
 0x14b   : > { %v1034_v29 = vrot.slane %v1033_v18, 2  ;;  %v1102_v21 = vadd.f32 %v1101_v20, %v1100_v8 }
 0x14d   : > { %v1035_v23 = vadd.f32 %v1034_v29, %v1033_v18  ;;  %v1103_v24 = vrot.slane %v1102_v21, 2 }
 0x14f   : > { %v1036_v9 = vrot.slane %v1035_v23, 1  ;;  %v1104_v25 = vadd.f32 %v1103_v24, %v1102_v21 }
 0x151   : > { %v1105_v55 = vrot.slane %v1104_v25, 1  ;;  %v1037_v26 = vadd.f32 %v1036_v9, %v1035_v23 }
 0x153   : > { %v1106_v27 = vadd.f32 %v1105_v55, %v1104_v25 }
 0x155   : > { %v1108_v30 = vsel %vm1107_vm0, %v1037_v26, %v1106_v27 }
 0x156   : > { %1109 = vst [vmem:[%s271_s10] sm:$0x3] %v1108_v30 }
 0x157 PF: > { %s14_s14 = sadd.s32 1, %s1665_s14   ;;  %s1964_s12 = smov %s1661_s13 }
 0x158   : > { %p11_p6 = scmp.ge.s32.totalorder %s14_s14, 4   ;;  %s1965_s13 = smov %s1967_s15 }
 0x15a   :  { %13 = sbr.rel (!%p11_p6) target bundleno = 2 (0x2), region = 81 }

// kernel: _lambda_.27
= control target key start
LH: loop header
LB: loop body
LE: loop exit
PB: predicated region body
PF: predicated region fallthrough
CT: control target
= control target key end

     0   :  { %s1176_s0 = inlined_call_operand.vmem [shape: bf16[512,128], index: 0, kind: input, shape index: {}]   ;;  %s1177_s1 = inlined_call_operand.vmem [shape: f32[1,128], index: 1, kind: input, shape index: {}]   ;;  %s1178_s2 = inlined_call_operand.vmem [shape: f32[1,128], index: 2, kind: input, shape index: {}]   ;;  %s1179_s3 = inlined_call_operand.vmem [shape: bf16[512,128], index: 3, kind: output, shape index: {}]  }
   0x1   :  { %v475_v0 = vld [vmem:[%s1176_s0] sm:$0xff]   ;;  %v762_v5 = vld [vmem:[%s1176_s0 + $0x8] sm:$0xff]   ;;  %v763_v8 = vld [vmem:[%s1176_s0 + $0x10] sm:$0xff]  }
   0x2   :  { %v852_v1 = vld [vmem:[%s1177_s1] ss:$0 sm:$0xff]  ;;  %v476_v2 = vunpack.c.l.bf16 %v475_v0  ;;  %v477_v3 = vunpack.c.h.bf16 %v475_v0  ;;  %v480_v6 = vunpack.c.l.bf16 %v762_v5  ;;  %v481_v7 = vunpack.c.h.bf16 %v762_v5  ;;  %v764_v9 = vld [vmem:[%s1176_s0 + $0x18] sm:$0xff]   ;;  %v766_v35 = vld [vmem:[%s1176_s0 + $0x28] sm:$0xff]  }
   0x3   :  { %v857_v4 = vld [vmem:[%s1178_s2] ss:$0 sm:$0xff]  ;;  %v484_v12 = vunpack.c.l.bf16 %v763_v8  ;;  %v485_v13 = vunpack.c.h.bf16 %v763_v8  ;;  %v488_v16 = vunpack.c.l.bf16 %v764_v9  ;;  %v489_v17 = vunpack.c.h.bf16 %v764_v9  ;;  %v767_v40 = vld [vmem:[%s1176_s0 + $0x30] sm:$0xff]   ;;  %v768_v45 = vld [vmem:[%s1176_s0 + $0x38] sm:$0xff]  }
   0x4   :  { %v146_v10 = vmul.f32 %v852_v1, %v476_v2  ;;  %v147_v11 = vmul.f32 %v852_v1, %v477_v3  ;;  %v148_v14 = vmul.f32 %v852_v1, %v480_v6  ;;  %v149_v15 = vmul.f32 %v852_v1, %v481_v7  ;;  %v765_v26 = vld [vmem:[%s1176_s0 + $0x20] sm:$0xff]  }
   0x5   :  { %v150_v20 = vmul.f32 %v852_v1, %v484_v12  ;;  %v151_v21 = vmul.f32 %v852_v1, %v485_v13  ;;  %v152_v24 = vmul.f32 %v852_v1, %v488_v16  ;;  %v153_v25 = vmul.f32 %v852_v1, %v489_v17  ;;  %v769_v62 = vld [vmem:[%s1176_s0 + $0x40] sm:$0xff]   ;;  %v770_v13 = vld [vmem:[%s1176_s0 + $0x48] sm:$0xff]  }
   0x6   :  { %v214_v18 = vadd.f32 %v857_v4, %v146_v10  ;;  %v215_v19 = vadd.f32 %v857_v4, %v147_v11  ;;  %v216_v22 = vadd.f32 %v857_v4, %v148_v14  ;;  %v217_v23 = vadd.f32 %v857_v4, %v149_v15 }
   0x7   :  { %v218_v29 = vadd.f32 %v857_v4, %v150_v20  ;;  %v219_v30 = vadd.f32 %v857_v4, %v151_v21  ;;  %v220_v33 = vadd.f32 %v857_v4, %v152_v24  ;;  %v221_v34 = vadd.f32 %v857_v4, %v153_v25 }
   0x8   :  { %v278_v27 = vmax.f32 %v214_v18, 0.0  ;;  %v279_v28 = vmax.f32 %v215_v19, 0.0  ;;  %v280_v31 = vmax.f32 %v216_v22, 0.0  ;;  %v281_v32 = vmax.f32 %v217_v23, 0.0  ;;  %v771_v18 = vld [vmem:[%s1176_s0 + $0x50] sm:$0xff]   ;;  %v772_v23 = vld [vmem:[%s1176_s0 + $0x58] sm:$0xff]  }
   0x9   :  { %v282_v37 = vmax.f32 %v218_v29, 0.0  ;;  %v283_v38 = vmax.f32 %v219_v30, 0.0  ;;  %v492_v39 = vunpack.c.l.bf16 %v765_v26  ;;  %v284_v42 = vmax.f32 %v220_v33, 0.0 }
   0xa   :  { %v605_v36 = vpack.c.bf16 %v279_v28, %v278_v27  ;;  %v610_v41 = vpack.c.bf16 %v281_v32, %v280_v31  ;;  %v285_v43 = vmax.f32 %v221_v34, 0.0  ;;  %v493_v44 = vunpack.c.h.bf16 %v765_v26 }
   0xb   :  { %v615_v46 = vpack.c.bf16 %v283_v38, %v282_v37  ;;  %v154_v47 = vmul.f32 %v852_v1, %v492_v39  ;;  %v496_v48 = vunpack.c.l.bf16 %v766_v35  ;;  %v497_v49 = vunpack.c.h.bf16 %v766_v35 }
   0xc   :  { %606 = vst [vmem:[%s1179_s3] sm:$0xff] %v605_v36   ;;  %v620_v50 = vpack.c.bf16 %v285_v43, %v284_v42  ;;  %v155_v51 = vmul.f32 %v852_v1, %v493_v44  ;;  %v500_v52 = vunpack.c.l.bf16 %v767_v40  ;;  %v501_v53 = vunpack.c.h.bf16 %v767_v40  ;;  %v773_v36 = vld [vmem:[%s1176_s0 + $0x60] sm:$0xff]  }
   0xd   :  { %793 = vst [vmem:[%s1179_s3 + $0x8] sm:$0xff] %v610_v41   ;;  %v222_v54 = vadd.f32 %v857_v4, %v154_v47  ;;  %v156_v55 = vmul.f32 %v852_v1, %v496_v48  ;;  %v157_v56 = vmul.f32 %v852_v1, %v497_v49  ;;  %v504_v57 = vunpack.c.l.bf16 %v768_v45 }
   0xe   :  { %794 = vst [vmem:[%s1179_s3 + $0x10] sm:$0xff] %v615_v46   ;;  %v223_v58 = vadd.f32 %v857_v4, %v155_v51  ;;  %v158_v59 = vmul.f32 %v852_v1, %v500_v52  ;;  %v159_v60 = vmul.f32 %v852_v1, %v501_v53  ;;  %v505_v61 = vunpack.c.h.bf16 %v768_v45  ;;  %v774_v53 = vld [vmem:[%s1176_s0 + $0x68] sm:$0xff]  }
   0xf   :  { %795 = vst [vmem:[%s1179_s3 + $0x18] sm:$0xff] %v620_v50   ;;  %v286_v63 = vmax.f32 %v222_v54, 0.0  ;;  %v224_v0 = vadd.f32 %v857_v4, %v156_v55  ;;  %v225_v2 = vadd.f32 %v857_v4, %v157_v56  ;;  %v160_v3 = vmul.f32 %v852_v1, %v504_v57 }
  0x10   :  { %v287_v5 = vmax.f32 %v223_v58, 0.0  ;;  %v226_v6 = vadd.f32 %v857_v4, %v158_v59  ;;  %v227_v7 = vadd.f32 %v857_v4, %v159_v60  ;;  %v161_v8 = vmul.f32 %v852_v1, %v505_v61  ;;  %v775_v58 = vld [vmem:[%s1176_s0 + $0x70] sm:$0xff]  }
  0x11   :  { %v288_v9 = vmax.f32 %v224_v0, 0.0  ;;  %v289_v10 = vmax.f32 %v225_v2, 0.0  ;;  %v228_v11 = vadd.f32 %v857_v4, %v160_v3  ;;  %v508_v12 = vunpack.c.l.bf16 %v769_v62 }
  0x12   :  { %v625_v14 = vpack.c.bf16 %v287_v5, %v286_v63  ;;  %v290_v15 = vmax.f32 %v226_v6, 0.0  ;;  %v291_v16 = vmax.f32 %v227_v7, 0.0  ;;  %v229_v17 = vadd.f32 %v857_v4, %v161_v8  ;;  %v776_v63 = vld [vmem:[%s1176_s0 + $0x78] sm:$0xff]  }
  0x13   :  { %v630_v19 = vpack.c.bf16 %v289_v10, %v288_v9  ;;  %v292_v20 = vmax.f32 %v228_v11, 0.0  ;;  %v509_v21 = vunpack.c.h.bf16 %v769_v62  ;;  %v162_v22 = vmul.f32 %v852_v1, %v508_v12 }
  0x14   :  { %796 = vst [vmem:[%s1179_s3 + $0x20] sm:$0xff] %v625_v14   ;;  %v635_v24 = vpack.c.bf16 %v291_v16, %v290_v15  ;;  %v293_v25 = vmax.f32 %v229_v17, 0.0  ;;  %v512_v26 = vunpack.c.l.bf16 %v770_v13  ;;  %v513_v27 = vunpack.c.h.bf16 %v770_v13  ;;  %v777_v14 = vld [vmem:[%s1176_s0 + $0x80] sm:$0xff]  }
  0x15   :  { %797 = vst [vmem:[%s1179_s3 + $0x28] sm:$0xff] %v630_v19   ;;  %v163_v28 = vmul.f32 %v852_v1, %v509_v21  ;;  %v230_v29 = vadd.f32 %v857_v4, %v162_v22  ;;  %v516_v30 = vunpack.c.l.bf16 %v771_v18  ;;  %v517_v31 = vunpack.c.h.bf16 %v771_v18 }
  0x16   :  { %798 = vst [vmem:[%s1179_s3 + $0x30] sm:$0xff] %v635_v24   ;;  %v640_v32 = vpack.c.bf16 %v293_v25, %v292_v20  ;;  %v164_v33 = vmul.f32 %v852_v1, %v512_v26  ;;  %v165_v34 = vmul.f32 %v852_v1, %v513_v27  ;;  %v520_v35 = vunpack.c.l.bf16 %v772_v23  ;;  %v778_v27 = vld [vmem:[%s1176_s0 + $0x88] sm:$0xff]  }
  0x17   :  { %v231_v37 = vadd.f32 %v857_v4, %v163_v28  ;;  %v294_v38 = vmax.f32 %v230_v29, 0.0  ;;  %v166_v39 = vmul.f32 %v852_v1, %v516_v30  ;;  %v167_v40 = vmul.f32 %v852_v1, %v517_v31 }
  0x18   :  { %799 = vst [vmem:[%s1179_s3 + $0x38] sm:$0xff] %v640_v32   ;;  %v232_v41 = vadd.f32 %v857_v4, %v164_v33  ;;  %v233_v42 = vadd.f32 %v857_v4, %v165_v34  ;;  %v521_v43 = vunpack.c.h.bf16 %v772_v23  ;;  %v168_v44 = vmul.f32 %v852_v1, %v520_v35 }
  0x19   :  { %v295_v45 = vmax.f32 %v231_v37, 0.0  ;;  %v234_v46 = vadd.f32 %v857_v4, %v166_v39  ;;  %v235_v47 = vadd.f32 %v857_v4, %v167_v40  ;;  %v524_v48 = vunpack.c.l.bf16 %v773_v36 }
  0x1a   :  { %v296_v49 = vmax.f32 %v232_v41, 0.0  ;;  %v297_v50 = vmax.f32 %v233_v42, 0.0  ;;  %v169_v51 = vmul.f32 %v852_v1, %v521_v43  ;;  %v236_v52 = vadd.f32 %v857_v4, %v168_v44  ;;  %v780_v41 = vld [vmem:[%s1176_s0 + $0x98] sm:$0xff]  }
  0x1b   :  { %v645_v54 = vpack.c.bf16 %v295_v45, %v294_v38  ;;  %v298_v55 = vmax.f32 %v234_v46, 0.0  ;;  %v299_v56 = vmax.f32 %v235_v47, 0.0  ;;  %v525_v57 = vunpack.c.h.bf16 %v773_v36  ;;  %v779_v36 = vld [vmem:[%s1176_s0 + $0x90] sm:$0xff]  }
  0x1c   :  { %v650_v59 = vpack.c.bf16 %v297_v50, %v296_v49  ;;  %v237_v60 = vadd.f32 %v857_v4, %v169_v51  ;;  %v300_v61 = vmax.f32 %v236_v52, 0.0  ;;  %v170_v62 = vmul.f32 %v852_v1, %v524_v48 }
  0x1d   :  { %800 = vst [vmem:[%s1179_s3 + $0x40] sm:$0xff] %v645_v54   ;;  %v655_v0 = vpack.c.bf16 %v299_v56, %v298_v55  ;;  %v171_v2 = vmul.f32 %v852_v1, %v525_v57  ;;  %v528_v3 = vunpack.c.l.bf16 %v774_v53  ;;  %v529_v5 = vunpack.c.h.bf16 %v774_v53  ;;  %v781_v54 = vld [vmem:[%s1176_s0 + $0xa0] sm:$0xff]  }
  0x1e   :  { %801 = vst [vmem:[%s1179_s3 + $0x48] sm:$0xff] %v650_v59   ;;  %v301_v6 = vmax.f32 %v237_v60, 0.0  ;;  %v238_v7 = vadd.f32 %v857_v4, %v170_v62  ;;  %v532_v8 = vunpack.c.l.bf16 %v775_v58  ;;  %v533_v9 = vunpack.c.h.bf16 %v775_v58 }
  0x1f   :  { %802 = vst [vmem:[%s1179_s3 + $0x50] sm:$0xff] %v655_v0   ;;  %v239_v10 = vadd.f32 %v857_v4, %v171_v2  ;;  %v172_v11 = vmul.f32 %v852_v1, %v528_v3  ;;  %v173_v12 = vmul.f32 %v852_v1, %v529_v5  ;;  %v536_v13 = vunpack.c.l.bf16 %v776_v63  ;;  %v782_v5 = vld [vmem:[%s1176_s0 + $0xa8] sm:$0xff]  }
  0x20   :  { %v660_v15 = vpack.c.bf16 %v301_v6, %v300_v61  ;;  %v302_v16 = vmax.f32 %v238_v7, 0.0  ;;  %v174_v17 = vmul.f32 %v852_v1, %v532_v8  ;;  %v175_v18 = vmul.f32 %v852_v1, %v533_v9 }
  0x21   :  { %v303_v19 = vmax.f32 %v239_v10, 0.0  ;;  %v240_v20 = vadd.f32 %v857_v4, %v172_v11  ;;  %v241_v21 = vadd.f32 %v857_v4, %v173_v12  ;;  %v537_v22 = vunpack.c.h.bf16 %v776_v63 }
  0x22   :  { %803 = vst [vmem:[%s1179_s3 + $0x58] sm:$0xff] %v660_v15   ;;  %v242_v23 = vadd.f32 %v857_v4, %v174_v17  ;;  %v243_v24 = vadd.f32 %v857_v4, %v175_v18  ;;  %v176_v25 = vmul.f32 %v852_v1, %v536_v13  ;;  %v540_v26 = vunpack.c.l.bf16 %v777_v14 }
  0x23   :  { %v665_v28 = vpack.c.bf16 %v303_v19, %v302_v16  ;;  %v304_v29 = vmax.f32 %v240_v20, 0.0  ;;  %v305_v30 = vmax.f32 %v241_v21, 0.0  ;;  %v177_v31 = vmul.f32 %v852_v1, %v537_v22 }
  0x24   :  { %v306_v32 = vmax.f32 %v242_v23, 0.0  ;;  %v307_v33 = vmax.f32 %v243_v24, 0.0  ;;  %v244_v34 = vadd.f32 %v857_v4, %v176_v25  ;;  %v541_v35 = vunpack.c.h.bf16 %v777_v14  ;;  %v783_v14 = vld [vmem:[%s1176_s0 + $0xb0] sm:$0xff]   ;;  %v784_v23 = vld [vmem:[%s1176_s0 + $0xb8] sm:$0xff]  }
  0x25   :  { %804 = vst [vmem:[%s1179_s3 + $0x60] sm:$0xff] %v665_v28   ;;  %v670_v37 = vpack.c.bf16 %v305_v30, %v304_v29  ;;  %v245_v38 = vadd.f32 %v857_v4, %v177_v31  ;;  %v178_v39 = vmul.f32 %v852_v1, %v540_v26  ;;  %v544_v40 = vunpack.c.l.bf16 %v778_v27 }
  0x26   :  { %v675_v42 = vpack.c.bf16 %v307_v33, %v306_v32  ;;  %v308_v43 = vmax.f32 %v244_v34, 0.0  ;;  %v179_v44 = vmul.f32 %v852_v1, %v541_v35  ;;  %v545_v45 = vunpack.c.h.bf16 %v778_v27  ;;  %v785_v32 = vld [vmem:[%s1176_s0 + $0xc0] sm:$0xff]  }
  0x27   :  { %805 = vst [vmem:[%s1179_s3 + $0x68] sm:$0xff] %v670_v37   ;;  %v309_v46 = vmax.f32 %v245_v38, 0.0  ;;  %v246_v47 = vadd.f32 %v857_v4, %v178_v39  ;;  %v180_v48 = vmul.f32 %v852_v1, %v544_v40  ;;  %v548_v49 = vunpack.c.l.bf16 %v779_v36 }
  0x28   :  { %806 = vst [vmem:[%s1179_s3 + $0x70] sm:$0xff] %v675_v42   ;;  %v247_v50 = vadd.f32 %v857_v4, %v179_v44  ;;  %v181_v51 = vmul.f32 %v852_v1, %v545_v45  ;;  %v549_v52 = vunpack.c.h.bf16 %v779_v36  ;;  %v552_v53 = vunpack.c.l.bf16 %v780_v41  ;;  %v786_v45 = vld [vmem:[%s1176_s0 + $0xc8] sm:$0xff]  }
  0x29   :  { %v680_v55 = vpack.c.bf16 %v309_v46, %v308_v43  ;;  %v310_v56 = vmax.f32 %v246_v47, 0.0  ;;  %v248_v57 = vadd.f32 %v857_v4, %v180_v48  ;;  %v182_v58 = vmul.f32 %v852_v1, %v548_v49 }
  0x2a   :  { %v311_v59 = vmax.f32 %v247_v50, 0.0  ;;  %v249_v60 = vadd.f32 %v857_v4, %v181_v51  ;;  %v183_v61 = vmul.f32 %v852_v1, %v549_v52  ;;  %v553_v62 = vunpack.c.h.bf16 %v780_v41 }
  0x2b   :  { %807 = vst [vmem:[%s1179_s3 + $0x78] sm:$0xff] %v680_v55   ;;  %v312_v63 = vmax.f32 %v248_v57, 0.0  ;;  %v250_v0 = vadd.f32 %v857_v4, %v182_v58  ;;  %v184_v2 = vmul.f32 %v852_v1, %v552_v53  ;;  %v556_v3 = vunpack.c.l.bf16 %v781_v54 }
  0x2c   :  { %v685_v6 = vpack.c.bf16 %v311_v59, %v310_v56  ;;  %v313_v7 = vmax.f32 %v249_v60, 0.0  ;;  %v251_v8 = vadd.f32 %v857_v4, %v183_v61  ;;  %v185_v9 = vmul.f32 %v852_v1, %v553_v62 }
  0x2d   :  { %v314_v10 = vmax.f32 %v250_v0, 0.0  ;;  %v252_v11 = vadd.f32 %v857_v4, %v184_v2  ;;  %v557_v12 = vunpack.c.h.bf16 %v781_v54  ;;  %v186_v13 = vmul.f32 %v852_v1, %v556_v3  ;;  %v787_v54 = vld [vmem:[%s1176_s0 + $0xd0] sm:$0xff]  }
  0x2e   :  { %808 = vst [vmem:[%s1179_s3 + $0x80] sm:$0xff] %v685_v6   ;;  %v690_v15 = vpack.c.bf16 %v313_v7, %v312_v63  ;;  %v315_v16 = vmax.f32 %v251_v8, 0.0  ;;  %v253_v17 = vadd.f32 %v857_v4, %v185_v9  ;;  %v560_v18 = vunpack.c.l.bf16 %v782_v5  ;;  %v788_v63 = vld [vmem:[%s1176_s0 + $0xd8] sm:$0xff]  }
  0x2f   :  { %v316_v19 = vmax.f32 %v252_v11, 0.0  ;;  %v187_v20 = vmul.f32 %v852_v1, %v557_v12  ;;  %v254_v21 = vadd.f32 %v857_v4, %v186_v13  ;;  %v561_v22 = vunpack.c.h.bf16 %v782_v5 }
  0x30   :  { %809 = vst [vmem:[%s1179_s3 + $0x88] sm:$0xff] %v690_v15   ;;  %v695_v24 = vpack.c.bf16 %v315_v16, %v314_v10  ;;  %v317_v25 = vmax.f32 %v253_v17, 0.0  ;;  %v188_v26 = vmul.f32 %v852_v1, %v560_v18  ;;  %v564_v27 = vunpack.c.l.bf16 %v783_v14  ;;  %v789_v10 = vld [vmem:[%s1176_s0 + $0xe0] sm:$0xff]  }
  0x31   :  { %v255_v28 = vadd.f32 %v857_v4, %v187_v20  ;;  %v318_v29 = vmax.f32 %v254_v21, 0.0  ;;  %v189_v30 = vmul.f32 %v852_v1, %v561_v22  ;;  %v565_v31 = vunpack.c.h.bf16 %v783_v14 }
  0x32   :  { %810 = vst [vmem:[%s1179_s3 + $0x90] sm:$0xff] %v695_v24   ;;  %v700_v33 = vpack.c.bf16 %v317_v25, %v316_v19  ;;  %v256_v34 = vadd.f32 %v857_v4, %v188_v26  ;;  %v190_v35 = vmul.f32 %v852_v1, %v564_v27  ;;  %v568_v36 = vunpack.c.l.bf16 %v784_v23 }
  0x33   :  { %v319_v37 = vmax.f32 %v255_v28, 0.0  ;;  %v257_v38 = vadd.f32 %v857_v4, %v189_v30  ;;  %v191_v39 = vmul.f32 %v852_v1, %v565_v31  ;;  %v569_v40 = vunpack.c.h.bf16 %v784_v23  ;;  %v790_v23 = vld [vmem:[%s1176_s0 + $0xe8] sm:$0xff]  }
  0x34   :  { %811 = vst [vmem:[%s1179_s3 + $0x98] sm:$0xff] %v700_v33   ;;  %v320_v41 = vmax.f32 %v256_v34, 0.0  ;;  %v258_v42 = vadd.f32 %v857_v4, %v190_v35  ;;  %v192_v43 = vmul.f32 %v852_v1, %v568_v36  ;;  %v572_v44 = vunpack.c.l.bf16 %v785_v32 }
  0x35   :  { %v705_v46 = vpack.c.bf16 %v319_v37, %v318_v29  ;;  %v321_v47 = vmax.f32 %v257_v38, 0.0  ;;  %v259_v48 = vadd.f32 %v857_v4, %v191_v39  ;;  %v193_v49 = vmul.f32 %v852_v1, %v569_v40 }
  0x36   :  { %v322_v50 = vmax.f32 %v258_v42, 0.0  ;;  %v260_v51 = vadd.f32 %v857_v4, %v192_v43  ;;  %v573_v52 = vunpack.c.h.bf16 %v785_v32  ;;  %v194_v53 = vmul.f32 %v852_v1, %v572_v44  ;;  %v791_v32 = vld [vmem:[%s1176_s0 + $0xf0] sm:$0xff]  }
  0x37   :  { %812 = vst [vmem:[%s1179_s3 + $0xa0] sm:$0xff] %v705_v46   ;;  %v710_v55 = vpack.c.bf16 %v321_v47, %v320_v41  ;;  %v323_v56 = vmax.f32 %v259_v48, 0.0  ;;  %v261_v57 = vadd.f32 %v857_v4, %v193_v49  ;;  %v576_v58 = vunpack.c.l.bf16 %v786_v45  ;;  %v792_v41 = vld [vmem:[%s1176_s0 + $0xf8] sm:$0xff]  }
  0x38   :  { %v324_v59 = vmax.f32 %v260_v51, 0.0  ;;  %v195_v60 = vmul.f32 %v852_v1, %v573_v52  ;;  %v262_v61 = vadd.f32 %v857_v4, %v194_v53  ;;  %v577_v62 = vunpack.c.h.bf16 %v786_v45 }
  0x39   :  { %813 = vst [vmem:[%s1179_s3 + $0xa8] sm:$0xff] %v710_v55   ;;  %v715_v0 = vpack.c.bf16 %v323_v56, %v322_v50  ;;  %v325_v2 = vmax.f32 %v261_v57, 0.0  ;;  %v196_v3 = vmul.f32 %v852_v1, %v576_v58  ;;  %v580_v5 = vunpack.c.l.bf16 %v787_v54 }
  0x3a   :  { %v263_v6 = vadd.f32 %v857_v4, %v195_v60  ;;  %v326_v7 = vmax.f32 %v262_v61, 0.0  ;;  %v197_v8 = vmul.f32 %v852_v1, %v577_v62  ;;  %v581_v9 = vunpack.c.h.bf16 %v787_v54 }
  0x3b   :  { %814 = vst [vmem:[%s1179_s3 + $0xb0] sm:$0xff] %v715_v0   ;;  %v720_v11 = vpack.c.bf16 %v325_v2, %v324_v59  ;;  %v264_v12 = vadd.f32 %v857_v4, %v196_v3  ;;  %v198_v13 = vmul.f32 %v852_v1, %v580_v5  ;;  %v584_v14 = vunpack.c.l.bf16 %v788_v63 }
  0x3c   :  { %v327_v15 = vmax.f32 %v263_v6, 0.0  ;;  %v265_v16 = vadd.f32 %v857_v4, %v197_v8  ;;  %v199_v17 = vmul.f32 %v852_v1, %v581_v9  ;;  %v585_v18 = vunpack.c.h.bf16 %v788_v63 }
  0x3d   :  { %815 = vst [vmem:[%s1179_s3 + $0xb8] sm:$0xff] %v720_v11   ;;  %v328_v19 = vmax.f32 %v264_v12, 0.0  ;;  %v266_v20 = vadd.f32 %v857_v4, %v198_v13  ;;  %v200_v21 = vmul.f32 %v852_v1, %v584_v14  ;;  %v588_v22 = vunpack.c.l.bf16 %v789_v10 }
  0x3e   :  { %v725_v24 = vpack.c.bf16 %v327_v15, %v326_v7  ;;  %v329_v25 = vmax.f32 %v265_v16, 0.0  ;;  %v267_v26 = vadd.f32 %v857_v4, %v199_v17  ;;  %v201_v27 = vmul.f32 %v852_v1, %v585_v18 }
  0x3f   :  { %v330_v28 = vmax.f32 %v266_v20, 0.0  ;;  %v268_v29 = vadd.f32 %v857_v4, %v200_v21  ;;  %v589_v30 = vunpack.c.h.bf16 %v789_v10  ;;  %v202_v31 = vmul.f32 %v852_v1, %v588_v22 }
  0x40   :  { %816 = vst [vmem:[%s1179_s3 + $0xc0] sm:$0xff] %v725_v24   ;;  %v730_v33 = vpack.c.bf16 %v329_v25, %v328_v19  ;;  %v331_v34 = vmax.f32 %v267_v26, 0.0  ;;  %v269_v35 = vadd.f32 %v857_v4, %v201_v27  ;;  %v592_v36 = vunpack.c.l.bf16 %v790_v23 }
  0x41   :  { %v332_v37 = vmax.f32 %v268_v29, 0.0  ;;  %v203_v38 = vmul.f32 %v852_v1, %v589_v30  ;;  %v270_v39 = vadd.f32 %v857_v4, %v202_v31  ;;  %v593_v40 = vunpack.c.h.bf16 %v790_v23 }
  0x42   :  { %817 = vst [vmem:[%s1179_s3 + $0xc8] sm:$0xff] %v730_v33   ;;  %v735_v42 = vpack.c.bf16 %v331_v34, %v330_v28  ;;  %v333_v43 = vmax.f32 %v269_v35, 0.0  ;;  %v204_v44 = vmul.f32 %v852_v1, %v592_v36  ;;  %v596_v45 = vunpack.c.l.bf16 %v791_v32 }
  0x43   :  { %v271_v46 = vadd.f32 %v857_v4, %v203_v38  ;;  %v334_v47 = vmax.f32 %v270_v39, 0.0  ;;  %v205_v48 = vmul.f32 %v852_v1, %v593_v40  ;;  %v597_v49 = vunpack.c.h.bf16 %v791_v32 }
  0x44   :  { %818 = vst [vmem:[%s1179_s3 + $0xd0] sm:$0xff] %v735_v42   ;;  %v740_v50 = vpack.c.bf16 %v333_v43, %v332_v37  ;;  %v272_v51 = vadd.f32 %v857_v4, %v204_v44  ;;  %v206_v52 = vmul.f32 %v852_v1, %v596_v45  ;;  %v600_v53 = vunpack.c.l.bf16 %v792_v41 }
  0x45   :  { %v335_v54 = vmax.f32 %v271_v46, 0.0  ;;  %v273_v55 = vadd.f32 %v857_v4, %v205_v48  ;;  %v207_v56 = vmul.f32 %v852_v1, %v597_v49  ;;  %v601_v57 = vunpack.c.h.bf16 %v792_v41 }
  0x46   :  { %819 = vst [vmem:[%s1179_s3 + $0xd8] sm:$0xff] %v740_v50   ;;  %v336_v58 = vmax.f32 %v272_v51, 0.0  ;;  %v274_v59 = vadd.f32 %v857_v4, %v206_v52  ;;  %v208_v60 = vmul.f32 %v852_v1, %v600_v53 }
  0x47   :  { %v745_v61 = vpack.c.bf16 %v335_v54, %v334_v47  ;;  %v337_v62 = vmax.f32 %v273_v55, 0.0  ;;  %v275_v63 = vadd.f32 %v857_v4, %v207_v56  ;;  %v209_v0 = vmul.f32 %v852_v1, %v601_v57 }
  0x48   :  { %v338_v2 = vmax.f32 %v274_v59, 0.0  ;;  %v276_v3 = vadd.f32 %v857_v4, %v208_v60 }
  0x49   :  { %820 = vst [vmem:[%s1179_s3 + $0xe0] sm:$0xff] %v745_v61   ;;  %v750_v5 = vpack.c.bf16 %v337_v62, %v336_v58  ;;  %v339_v6 = vmax.f32 %v275_v63, 0.0  ;;  %v277_v7 = vadd.f32 %v857_v4, %v209_v0 }
  0x4a   :  { %v340_v8 = vmax.f32 %v276_v3, 0.0 }
  0x4b   :  { %821 = vst [vmem:[%s1179_s3 + $0xe8] sm:$0xff] %v750_v5   ;;  %v755_v9 = vpack.c.bf16 %v339_v6, %v338_v2  ;;  %v341_v10 = vmax.f32 %v277_v7, 0.0 }
  0x4d   :  { %822 = vst [vmem:[%s1179_s3 + $0xf0] sm:$0xff] %v755_v9   ;;  %v760_v1 = vpack.c.bf16 %v341_v10, %v340_v8 }
  0x4f   :  { %823 = vst [vmem:[%s1179_s3 + $0xf8] sm:$0xff] %v760_v1  }

// kernel: _lambda_.28
= control target key start
LH: loop header
LB: loop body
LE: loop exit
PB: predicated region body
PF: predicated region fallthrough
CT: control target
= control target key end

     0   :  { %s868_s15 = smov 0   ;;  %s1050_s0 = inlined_call_operand.vmem [shape: bf16[2,9,9,128], index: 0, kind: input, shape index: {}]   ;;  %s1051_s1 = inlined_call_operand.vmem [shape: bf16[2,9,8,128], index: 1, kind: input, shape index: {}]   ;;  %s1052_s2 = inlined_call_operand.vmem [shape: bf16[2,8,9,128], index: 2, kind: input, shape index: {}]   ;;  %s1053_s3 = inlined_call_operand.vmem [shape: bf16[2,8,8,128], index: 3, kind: input, shape index: {}]   ;;  %s1054_s4 = inlined_call_operand.vmem [shape: bf16[2,8,8,128], index: 4, kind: output, shape index: {}]  }
   0x1 LB: > { %s746_s16 = sadd.s32 4294967295, %s841_s15   ;;  %p750_p0 = scmp.ge.s32.totalorder %s841_s15, 1  ;;  %s841_s15 = sphi %s868_s15, %s14_s15  }
   0x2   : > { %p192_p1 = scmp.lt.s32.totalorder %s841_s15, 3 }
   0x4   : > { %p193_p2 = pnand %p750_p0, %p192_p1 }
   0x5   : > { %p233_p3 = scmp.lt.s32.totalorder (!%p193_p2), %s746_s16, 1 }
   0x6   : > { %196 = sbr.rel (%p193_p2) target bundleno = 68 (0x44), region = 36 }
   0xb   : > { %s1056_s16 = smov (!%p233_p3, %s746_s16), 1  ;;  %vm373_vm0 = vcmask 1046528  }
   0xc   : > { %s825_s17 = smul.u32 72, %s1056_s16  ;;  %s761_s18 = sshll.u32 %s1056_s16, 6 }
   0xd   : > { %s826_s19 = smul.u32 36, %s1056_s16  ;;  %s884_s22 = scalar_lea.vmem %s1052_s2, %s761_s18 }
   0xe   : > { %s889_s25 = scalar_lea.vmem %s1050_s0, %s825_s17  ;;  %s762_s26 = sshll.u32 %s1056_s16, 5  ;;  %v893_v0 = vld [vmem:[%s884_s22] sm:$0xf]  ;;  %v896_v1 = vld [vmem:[%s884_s22 + $0x4] sm:$0x1] }
   0xf   : > { %s901_s29 = scalar_lea.vmem %s1051_s1, %s826_s19  ;;  %v258_v2 = vld [vmem:[%s889_s25] sm:$0xf]  ;;  %v259_v3 = vld [vmem:[%s889_s25 + $0x4] sm:$0x1]  ;;  %v260_v4 = vld [vmem:[%s889_s25 + $0x8] sm:$0xf]  ;;  %s252_s6 = scalar_lea.vmem %s1053_s3, %s762_s26  ;;  %v543_v18 = vunpack.c.l.bf16 %v893_v0  ;;  %v575_v19 = vunpack.c.l.bf16 %v896_v1 }
  0x10   : > { %v261_v5 = vld [vmem:[%s889_s25 + $0xc] sm:$0x1]  ;;  %v262_v6 = vld [vmem:[%s889_s25 + $0x10] sm:$0xf]  ;;  %v263_v7 = vld [vmem:[%s889_s25 + $0x14] sm:$0x1]  ;;  %v317_v8 = vunpack.c.l.bf16 %v258_v2  ;;  %v318_v9 = vunpack.c.l.bf16 %v260_v4  ;;  %v349_v10 = vunpack.c.l.bf16 %v259_v3  ;;  %s1001_s9 = scalar_lea.vmem %s1054_s4, %s762_s26 }
  0x11   : > { %v264_v11 = vld [vmem:[%s889_s25 + $0x18] sm:$0xf]  ;;  %v266_v12 = vld [vmem:[%s889_s25 + $0x20] sm:$0xf]  ;;  %v268_v13 = vld [vmem:[%s889_s25 + $0x28] sm:$0xf]  ;;  %v350_v14 = vunpack.c.l.bf16 %v261_v5  ;;  %v319_v16 = vunpack.c.l.bf16 %v262_v6  ;;  %v351_v17 = vunpack.c.l.bf16 %v263_v7 }
  0x12   : > { %v918_v15 = vld [vmem:[%s901_s29] sm:$0xff]   ;;  %v270_v20 = vld [vmem:[%s889_s25 + $0x30] sm:$0xf]  ;;  %v272_v21 = vld [vmem:[%s889_s25 + $0x38] sm:$0xf]  ;;  %v927_v23 = vunpack.c.l.bf16 %v264_v11  ;;  %v929_v24 = vunpack.c.l.bf16 %v266_v12  ;;  %v931_v25 = vunpack.c.l.bf16 %v268_v13  ;;  %v374_v26 = vrot.slane %v317_v8, 1 }
  0x13   : > { %v925_v22 = vld [vmem:[%s901_s29 + $0x8] sm:$0xff]   ;;  %v766_v27 = vunpack.c.l.bf16 %v918_v15  ;;  %v781_v28 = vld [vmem:[%s252_s6] sm:$0xff]   ;;  %v820_v30 = vld [vmem:[%s252_s6 + $0x10] sm:$0xff]   ;;  %v375_v31 = vrot.slane %v349_v10, 1  ;;  %v377_v32 = vrot.slane %v318_v9, 1  ;;  %v378_v33 = vrot.slane %v350_v14, 1 }
  0x14   : > { %v819_v29 = vld [vmem:[%s252_s6 + $0x8] sm:$0xff]   ;;  %v782_v34 = vunpack.c.l.bf16 %v781_v28  ;;  %v783_v35 = vunpack.c.h.bf16 %v781_v28  ;;  %v934_v38 = vld [vmem:[%s252_s6 + $0x18] sm:$0xff]   ;;  %v767_v39 = vunpack.c.h.bf16 %v918_v15  ;;  %v770_v40 = vunpack.c.l.bf16 %v925_v22  ;;  %v267_v3 = vld [vmem:[%s889_s25 + $0x24] sm:$0x1] }
  0x15   : > { %v786_v36 = vunpack.c.l.bf16 %v819_v29  ;;  %v787_v37 = vunpack.c.h.bf16 %v819_v29  ;;  %v938_v41 = vunpack.c.l.bf16 %v270_v20  ;;  %v940_v42 = vunpack.c.l.bf16 %v272_v21  ;;  %v943_v43 = vld [vmem:[%s884_s22 + $0x8] sm:$0xf]  ;;  %v288_v44 = vld [vmem:[%s884_s22 + $0xc] sm:$0x1]  ;;  %v265_v61 = vld [vmem:[%s889_s25 + $0x1c] sm:$0x1] }
  0x16   : > { %v790_v45 = vunpack.c.l.bf16 %v820_v30  ;;  %v791_v46 = vunpack.c.h.bf16 %v820_v30  ;;  %v325_v47 = vmax.f32 %v782_v34, %v317_v8  ;;  %v326_v48 = vmax.f32 %v783_v35, %v318_v9  ;;  %v289_v12 = vld [vmem:[%s884_s22 + $0x10] sm:$0xf]  ;;  %v969_v20 = vld [vmem:[%s884_s22 + $0x18] sm:$0xf] }
  0x17   : > { %v794_v49 = vunpack.c.l.bf16 %v934_v38  ;;  %v795_v50 = vunpack.c.h.bf16 %v934_v38  ;;  %v327_v51 = vmax.f32 %v786_v36, %v319_v16  ;;  %v328_v52 = vmax.f32 %v787_v37, %v927_v23 }
  0x18   : > { %v376_v53 = vsel %vm373_vm0, %v374_v26, %v375_v31  ;;  %v379_v54 = vsel %vm373_vm0, %v377_v32, %v378_v33  ;;  %v380_v55 = vrot.slane %v319_v16, 1  ;;  %v381_v56 = vrot.slane %v351_v17, 1  ;;  %v290_v17 = vld [vmem:[%s884_s22 + $0x14] sm:$0x1]  ;;  %v292_v31 = vld [vmem:[%s884_s22 + $0x1c] sm:$0x1] }
  0x19   : > { %v406_v57 = vmax.f32 %v325_v47, %v376_v53  ;;  %v407_v58 = vmax.f32 %v326_v48, %v379_v54  ;;  %v544_v59 = vunpack.c.l.bf16 %v943_v43  ;;  %v576_v60 = vunpack.c.l.bf16 %v288_v44 }
  0x1a   : > { %v954_v62 = vmax.f32 %v790_v45, %v929_v24  ;;  %v382_v63 = vsel %vm373_vm0, %v380_v55, %v381_v56  ;;  %v599_v1 = vrot.slane %v543_v18, 1  ;;  %v600_v2 = vrot.slane %v575_v19, 1  ;;  %v982_v45 = vld [vmem:[%s901_s29 + $0x10] sm:$0xff]   ;;  %v269_v55 = vld [vmem:[%s889_s25 + $0x2c] sm:$0x1] }
  0x1b   : > { %v961_v4 = vmax.f32 %v791_v46, %v931_v25  ;;  %v408_v5 = vmax.f32 %v327_v51, %v382_v63  ;;  %v431_v6 = vmax.f32 %v406_v57, %v318_v9  ;;  %v432_v7 = vmax.f32 %v407_v58, %v319_v16  ;;  %v271_v56 = vld [vmem:[%s889_s25 + $0x34] sm:$0x1] }
  0x1c   : > { %v964_v8 = vmax.f32 %v794_v49, %v938_v41  ;;  %v602_v10 = vrot.slane %v544_v59, 1  ;;  %v603_v11 = vrot.slane %v576_v60, 1  ;;  %v352_v13 = vunpack.c.l.bf16 %v265_v61 }
  0x1d   : > { %v462_v14 = vmax.f32 %v431_v6, %v379_v54  ;;  %v463_v15 = vmax.f32 %v432_v7, %v382_v63  ;;  %v353_v19 = vunpack.c.l.bf16 %v267_v3  ;;  %v383_v21 = vrot.slane %v927_v23, 1 }
  0x1e   : > { %v601_v9 = vsel %vm373_vm0, %v599_v1, %v600_v2  ;;  %v384_v16 = vrot.slane %v352_v13, 1  ;;  %v386_v26 = vrot.slane %v929_v24, 1  ;;  %v433_v28 = vmax.f32 %v408_v5, %v927_v23  ;;  %v1006_v5 = vld [vmem:[%s884_s22 + $0x28] sm:$0xf] }
  0x1f   : > { %v494_v29 = vmax.f32 %v462_v14, %v766_v27  ;;  %v495_v30 = vmax.f32 %v463_v15, %v767_v39  ;;  %v387_v32 = vrot.slane %v353_v19, 1  ;;  %v545_v33 = vunpack.c.l.bf16 %v289_v12 }
  0x20   : > { %v604_v34 = vsel %vm373_vm0, %v602_v10, %v603_v11  ;;  %v385_v35 = vsel %vm373_vm0, %v383_v21, %v384_v16  ;;  %v546_v36 = vunpack.c.l.bf16 %v969_v20  ;;  %v577_v37 = vunpack.c.l.bf16 %v290_v17  ;;  %v296_v17 = vld [vmem:[%s884_s22 + $0x2c] sm:$0x1] }
  0x21   : > { %v519_v43 = vmax.f32 %v494_v29, %v767_v39  ;;  %v520_v44 = vmax.f32 %v495_v30, %v770_v40  ;;  %v388_v23 = vsel %vm373_vm0, %v386_v26, %v387_v32  ;;  %v409_v27 = vmax.f32 %v328_v52, %v385_v35  ;;  %v273_v30 = vld [vmem:[%s889_s25 + $0x3c] sm:$0x1] }
  0x22   : > { %v464_v46 = vmax.f32 %v433_v28, %v385_v35  ;;  %v578_v47 = vunpack.c.l.bf16 %v292_v31  ;;  %v605_v48 = vrot.slane %v545_v33, 1  ;;  %v606_v49 = vrot.slane %v577_v37, 1  ;;  %v818_v28 = vld [vmem:[%s901_s29 + $0x18] sm:$0xff]   ;;  %v274_v35 = vld [vmem:[%s889_s25 + $0x40] sm:$0xf] }
  0x23   : > { %v551_v51 = vmax.f32 %v519_v43, %v543_v18  ;;  %v552_v53 = vmax.f32 %v520_v44, %v544_v59  ;;  %v771_v39 = vunpack.c.h.bf16 %v925_v22  ;;  %v434_v54 = vmax.f32 %v409_v27, %v929_v24  ;;  %v294_v22 = vld [vmem:[%s884_s22 + $0x24] sm:$0x1] }
  0x24   : > { %v774_v57 = vunpack.c.l.bf16 %v982_v45  ;;  %v410_v52 = vmax.f32 %v954_v62, %v388_v23  ;;  %v496_v58 = vmax.f32 %v464_v46, %v770_v40  ;;  %v608_v60 = vrot.slane %v546_v36, 1  ;;  %v293_v62 = vld [vmem:[%s884_s22 + $0x20] sm:$0xf] }
  0x25   : > { %v631_v0 = vmax.f32 %v551_v51, %v601_v9  ;;  %v632_v18 = vmax.f32 %v552_v53, %v604_v34  ;;  %v465_v59 = vmax.f32 %v434_v54, %v388_v23  ;;  %v607_v61 = vsel %vm373_vm0, %v605_v48, %v606_v49  ;;  %v275_v23 = vld [vmem:[%s889_s25 + $0x44] sm:$0x1]  ;;  %v297_v49 = vld [vmem:[%s884_s22 + $0x30] sm:$0xf]  ;;  %v298_v51 = vld [vmem:[%s884_s22 + $0x34] sm:$0x1] }
  0x26   : > { %v521_v24 = vmax.f32 %v496_v58, %v771_v39  ;;  %v609_v63 = vrot.slane %v578_v47, 1  ;;  %v354_v1 = vunpack.c.l.bf16 %v269_v55  ;;  %v355_v40 = vunpack.c.l.bf16 %v271_v56  ;;  %v299_v58 = vld [vmem:[%s884_s22 + $0x38] sm:$0xf] }
  0x27   : > { %v799_v2 = vpack.c.bf16 %v632_v18, %v631_v0  ;;  %v497_v3 = vmax.f32 %v465_v59, %v771_v39  ;;  %v389_v6 = vrot.slane %v931_v25, 1  ;;  %v392_v7 = vrot.slane %v938_v41, 1 }
  0x28   : > { %v553_v10 = vmax.f32 %v521_v24, %v545_v33  ;;  %v390_v11 = vrot.slane %v354_v1, 1  ;;  %v393_v12 = vrot.slane %v355_v40, 1  ;;  %v435_v13 = vmax.f32 %v410_v52, %v931_v25  ;;  %v284_v40 = vld [vmem:[%s901_s29 + $0x20] sm:$0xf] }
  0x29   : > { %v1014_v14 = vmax.f32 %v795_v50, %v940_v42  ;;  %800 = vst [vmem:[%s1001_s9] sm:$0xff] %v799_v2   ;;  %v522_v15 = vmax.f32 %v497_v3, %v774_v57  ;;  %v547_v20 = vunpack.c.l.bf16 %v293_v62  ;;  %v579_v19 = vunpack.c.l.bf16 %v294_v22 }
  0x2a   : > { %v610_v21 = vsel %vm373_vm0, %v608_v60, %v609_v63  ;;  %v391_v9 = vsel %vm373_vm0, %v389_v6, %v390_v11  ;;  %v394_v16 = vsel %vm373_vm0, %v392_v7, %v393_v12  ;;  %v548_v25 = vunpack.c.l.bf16 %v1006_v5  ;;  %v300_v60 = vld [vmem:[%s884_s22 + $0x3c] sm:$0x1] }
  0x2b   : > { %v554_v26 = vmax.f32 %v522_v15, %v546_v36  ;;  %v633_v38 = vmax.f32 %v553_v10, %v607_v61  ;;  %v411_v50 = vmax.f32 %v961_v4, %v391_v9  ;;  %v466_v29 = vmax.f32 %v435_v13, %v391_v9 }
  0x2c   : > { %v775_v31 = vunpack.c.h.bf16 %v982_v45  ;;  %v412_v32 = vmax.f32 %v964_v8, %v394_v16  ;;  %v580_v33 = vunpack.c.l.bf16 %v296_v17  ;;  %v611_v34 = vrot.slane %v547_v20, 1 }
  0x2d   : > { %v634_v37 = vmax.f32 %v554_v26, %v610_v21  ;;  %v436_v43 = vmax.f32 %v411_v50, %v938_v41  ;;  %v498_v44 = vmax.f32 %v466_v29, %v774_v57  ;;  %v612_v36 = vrot.slane %v579_v19, 1 }
  0x2e   : > { %v778_v27 = vunpack.c.l.bf16 %v818_v28  ;;  %v614_v4 = vrot.slane %v548_v25, 1  ;;  %v356_v46 = vunpack.c.l.bf16 %v273_v30  ;;  %v395_v45 = vrot.slane %v940_v42, 1 }
  0x2f   : > { %v804_v8 = vpack.c.bf16 %v634_v37, %v633_v38  ;;  %v467_v47 = vmax.f32 %v436_v43, %v394_v16  ;;  %v523_v48 = vmax.f32 %v498_v44, %v775_v31  ;;  %v430_v53 = vunpack.c.l.bf16 %v274_v35 }
  0x30   : > { %v615_v39 = vrot.slane %v580_v33, 1  ;;  %v396_v54 = vrot.slane %v356_v46, 1  ;;  %v437_v41 = vmax.f32 %v412_v32, %v940_v42  ;;  %v455_v55 = vunpack.c.l.bf16 %v275_v23 }
  0x31   : > { %822 = vst [vmem:[%s1001_s9 + $0x8] sm:$0xff] %v804_v8   ;;  %v499_v56 = vmax.f32 %v467_v47, %v775_v31  ;;  %v555_v57 = vmax.f32 %v523_v48, %v547_v20  ;;  %v613_v52 = vsel %vm373_vm0, %v611_v34, %v612_v36  ;;  %v458_v0 = vrot.slane %v430_v53, 1 }
  0x32   : > { %v397_v18 = vsel %vm373_vm0, %v395_v45, %v396_v54  ;;  %v459_v59 = vrot.slane %v455_v55, 1  ;;  %v549_v61 = vunpack.c.l.bf16 %v297_v49  ;;  %v581_v24 = vunpack.c.l.bf16 %v298_v51 }
  0x33   : > { %v524_v63 = vmax.f32 %v499_v56, %v778_v27  ;;  %v779_v62 = vunpack.c.h.bf16 %v818_v28  ;;  %v413_v22 = vmax.f32 %v1014_v14, %v397_v18  ;;  %v468_v42 = vmax.f32 %v437_v41, %v397_v18 }
  0x34   : > { %v616_v1 = vsel %vm373_vm0, %v614_v4, %v615_v39  ;;  %v460_v2 = vsel %vm373_vm0, %v458_v0, %v459_v59  ;;  %v550_v3 = vunpack.c.l.bf16 %v299_v58  ;;  %v582_v5 = vunpack.c.l.bf16 %v300_v60 }
  0x35   : > { %v556_v6 = vmax.f32 %v524_v63, %v548_v25  ;;  %v635_v7 = vmax.f32 %v555_v57, %v613_v52  ;;  %v438_v10 = vmax.f32 %v413_v22, %v430_v53  ;;  %v500_v11 = vmax.f32 %v468_v42, %v778_v27 }
  0x36   : > { %v617_v12 = vrot.slane %v549_v61, 1  ;;  %v618_v13 = vrot.slane %v581_v24, 1  ;;  %v518_v20 = vunpack.c.l.bf16 %v284_v40  ;;  %v620_v19 = vrot.slane %v550_v3, 1 }
  0x37   : > { %v636_v15 = vmax.f32 %v556_v6, %v616_v1  ;;  %v469_v17 = vmax.f32 %v438_v10, %v460_v2  ;;  %v525_v14 = vmax.f32 %v500_v11, %v779_v62  ;;  %v621_v21 = vrot.slane %v582_v5, 1 }
  0x38   : > { %v619_v38 = vsel %vm373_vm0, %v617_v12, %v618_v13 }
  0x39   : > { %v809_v9 = vpack.c.bf16 %v636_v15, %v635_v7  ;;  %v501_v16 = vmax.f32 %v469_v17, %v779_v62  ;;  %v557_v26 = vmax.f32 %v525_v14, %v549_v61  ;;  %v622_v28 = vsel %vm373_vm0, %v620_v19, %v621_v21 }
  0x3b   : > { %823 = vst [vmem:[%s1001_s9 + $0x10] sm:$0xff] %v809_v9   ;;  %v526_v25 = vmax.f32 %v501_v16, %v518_v20  ;;  %v637_v29 = vmax.f32 %v557_v26, %v619_v38 }
  0x3d   : > { %v558_v50 = vmax.f32 %v526_v25, %v550_v3 }
  0x3f   : > { %v638_v30 = vmax.f32 %v558_v50, %v622_v28 }
  0x41   : > { %v814_v31 = vpack.c.bf16 %v638_v30, %v637_v29 }
  0x43   : > { %824 = vst [vmem:[%s1001_s9 + $0x18] sm:$0xff] %v814_v31  }
  0x44 PF: > { %s14_s15 = sadd.s32 1, %s841_s15  }
  0x45   : > { %p11_p4 = scmp.ge.s32.totalorder %s14_s15, 4  }
  0x47   :  { %13 = sbr.rel (!%p11_p4) target bundleno = 1 (0x1), region = 75 }

// kernel: _lambda_.30
= control target key start
LH: loop header
LB: loop body
LE: loop exit
PB: predicated region body
PF: predicated region fallthrough
CT: control target
= control target key end

     0   :  { %s336_s0 = inlined_call_operand.vmem [shape: bf16[128,128], index: 0, kind: input, shape index: {}]   ;;  %s337_s1 = inlined_call_operand.vmem [shape: f32[1,128], index: 1, kind: input, shape index: {}]   ;;  %s338_s2 = inlined_call_operand.vmem [shape: f32[1,128], index: 2, kind: input, shape index: {}]   ;;  %s339_s3 = inlined_call_operand.vmem [shape: bf16[128,128], index: 3, kind: output, shape index: {}]  }
   0x1   :  { %v139_v0 = vld [vmem:[%s336_s0] sm:$0xff]   ;;  %v210_v5 = vld [vmem:[%s336_s0 + $0x8] sm:$0xff]   ;;  %v211_v8 = vld [vmem:[%s336_s0 + $0x10] sm:$0xff]  }
   0x2   :  { %v252_v1 = vld [vmem:[%s337_s1] ss:$0 sm:$0xff]  ;;  %v140_v2 = vunpack.c.l.bf16 %v139_v0  ;;  %v141_v3 = vunpack.c.h.bf16 %v139_v0  ;;  %v144_v6 = vunpack.c.l.bf16 %v210_v5  ;;  %v145_v7 = vunpack.c.h.bf16 %v210_v5  ;;  %v212_v9 = vld [vmem:[%s336_s0 + $0x18] sm:$0xff]   ;;  %v214_v35 = vld [vmem:[%s336_s0 + $0x28] sm:$0xff]  }
   0x3   :  { %v257_v4 = vld [vmem:[%s338_s2] ss:$0 sm:$0xff]  ;;  %v148_v12 = vunpack.c.l.bf16 %v211_v8  ;;  %v149_v13 = vunpack.c.h.bf16 %v211_v8  ;;  %v152_v16 = vunpack.c.l.bf16 %v212_v9  ;;  %v153_v17 = vunpack.c.h.bf16 %v212_v9  ;;  %v215_v40 = vld [vmem:[%s336_s0 + $0x30] sm:$0xff]   ;;  %v216_v45 = vld [vmem:[%s336_s0 + $0x38] sm:$0xff]  }
   0x4   :  { %v50_v10 = vmul.f32 %v252_v1, %v140_v2  ;;  %v51_v11 = vmul.f32 %v252_v1, %v141_v3  ;;  %v52_v14 = vmul.f32 %v252_v1, %v144_v6  ;;  %v53_v15 = vmul.f32 %v252_v1, %v145_v7  ;;  %v213_v26 = vld [vmem:[%s336_s0 + $0x20] sm:$0xff]  }
   0x5   :  { %v54_v20 = vmul.f32 %v252_v1, %v148_v12  ;;  %v55_v21 = vmul.f32 %v252_v1, %v149_v13  ;;  %v56_v24 = vmul.f32 %v252_v1, %v152_v16  ;;  %v57_v25 = vmul.f32 %v252_v1, %v153_v17 }
   0x6   :  { %v70_v18 = vadd.f32 %v257_v4, %v50_v10  ;;  %v71_v19 = vadd.f32 %v257_v4, %v51_v11  ;;  %v72_v22 = vadd.f32 %v257_v4, %v52_v14  ;;  %v73_v23 = vadd.f32 %v257_v4, %v53_v15 }
   0x7   :  { %v74_v29 = vadd.f32 %v257_v4, %v54_v20  ;;  %v75_v30 = vadd.f32 %v257_v4, %v55_v21  ;;  %v76_v33 = vadd.f32 %v257_v4, %v56_v24  ;;  %v77_v34 = vadd.f32 %v257_v4, %v57_v25 }
   0x8   :  { %v86_v27 = vmax.f32 %v70_v18, 0.0  ;;  %v87_v28 = vmax.f32 %v71_v19, 0.0  ;;  %v88_v31 = vmax.f32 %v72_v22, 0.0  ;;  %v89_v32 = vmax.f32 %v73_v23, 0.0 }
   0x9   :  { %v90_v37 = vmax.f32 %v74_v29, 0.0  ;;  %v91_v38 = vmax.f32 %v75_v30, 0.0  ;;  %v156_v39 = vunpack.c.l.bf16 %v213_v26  ;;  %v92_v42 = vmax.f32 %v76_v33, 0.0 }
   0xa   :  { %v173_v36 = vpack.c.bf16 %v87_v28, %v86_v27  ;;  %v178_v41 = vpack.c.bf16 %v89_v32, %v88_v31  ;;  %v93_v43 = vmax.f32 %v77_v34, 0.0  ;;  %v157_v44 = vunpack.c.h.bf16 %v213_v26 }
   0xb   :  { %v183_v46 = vpack.c.bf16 %v91_v38, %v90_v37  ;;  %v58_v47 = vmul.f32 %v252_v1, %v156_v39  ;;  %v160_v48 = vunpack.c.l.bf16 %v214_v35  ;;  %v161_v49 = vunpack.c.h.bf16 %v214_v35 }
   0xc   :  { %174 = vst [vmem:[%s339_s3] sm:$0xff] %v173_v36   ;;  %v188_v50 = vpack.c.bf16 %v93_v43, %v92_v42  ;;  %v59_v51 = vmul.f32 %v252_v1, %v157_v44  ;;  %v164_v52 = vunpack.c.l.bf16 %v215_v40  ;;  %v165_v53 = vunpack.c.h.bf16 %v215_v40 }
   0xd   :  { %217 = vst [vmem:[%s339_s3 + $0x8] sm:$0xff] %v178_v41   ;;  %v78_v54 = vadd.f32 %v257_v4, %v58_v47  ;;  %v60_v55 = vmul.f32 %v252_v1, %v160_v48  ;;  %v61_v56 = vmul.f32 %v252_v1, %v161_v49  ;;  %v168_v57 = vunpack.c.l.bf16 %v216_v45 }
   0xe   :  { %218 = vst [vmem:[%s339_s3 + $0x10] sm:$0xff] %v183_v46   ;;  %v79_v58 = vadd.f32 %v257_v4, %v59_v51  ;;  %v62_v59 = vmul.f32 %v252_v1, %v164_v52  ;;  %v63_v60 = vmul.f32 %v252_v1, %v165_v53  ;;  %v169_v61 = vunpack.c.h.bf16 %v216_v45 }
   0xf   :  { %219 = vst [vmem:[%s339_s3 + $0x18] sm:$0xff] %v188_v50   ;;  %v94_v62 = vmax.f32 %v78_v54, 0.0  ;;  %v80_v63 = vadd.f32 %v257_v4, %v60_v55  ;;  %v81_v0 = vadd.f32 %v257_v4, %v61_v56  ;;  %v64_v2 = vmul.f32 %v252_v1, %v168_v57 }
  0x10   :  { %v95_v3 = vmax.f32 %v79_v58, 0.0  ;;  %v82_v5 = vadd.f32 %v257_v4, %v62_v59  ;;  %v83_v6 = vadd.f32 %v257_v4, %v63_v60  ;;  %v65_v7 = vmul.f32 %v252_v1, %v169_v61 }
  0x11   :  { %v96_v8 = vmax.f32 %v80_v63, 0.0  ;;  %v97_v9 = vmax.f32 %v81_v0, 0.0  ;;  %v84_v10 = vadd.f32 %v257_v4, %v64_v2 }
  0x12   :  { %v193_v11 = vpack.c.bf16 %v95_v3, %v94_v62  ;;  %v98_v12 = vmax.f32 %v82_v5, 0.0  ;;  %v99_v13 = vmax.f32 %v83_v6, 0.0  ;;  %v85_v14 = vadd.f32 %v257_v4, %v65_v7 }
  0x13   :  { %v198_v15 = vpack.c.bf16 %v97_v9, %v96_v8  ;;  %v100_v16 = vmax.f32 %v84_v10, 0.0 }
  0x14   :  { %220 = vst [vmem:[%s339_s3 + $0x20] sm:$0xff] %v193_v11   ;;  %v203_v17 = vpack.c.bf16 %v99_v13, %v98_v12  ;;  %v101_v18 = vmax.f32 %v85_v14, 0.0 }
  0x15   :  { %221 = vst [vmem:[%s339_s3 + $0x28] sm:$0xff] %v198_v15  }
  0x16   :  { %222 = vst [vmem:[%s339_s3 + $0x30] sm:$0xff] %v203_v17   ;;  %v208_v1 = vpack.c.bf16 %v101_v18, %v100_v16 }
  0x18   :  { %223 = vst [vmem:[%s339_s3 + $0x38] sm:$0xff] %v208_v1  }

// kernel: _lambda_.29
= control target key start
LH: loop header
LB: loop body
LE: loop exit
PB: predicated region body
PF: predicated region fallthrough
CT: control target
= control target key end

     0   :  { %s1632_s12 = smov 0   ;;  %s1634_s13 = smov 0   ;;  %s1922_s0 = inlined_call_operand.vmem [shape: bf16[128,1152], index: 0, kind: input, shape index: {}]   ;;  %s1923_s1 = inlined_call_operand.vmem [shape: bf16[1152,128], index: 1, kind: input, shape index: {}]   ;;  %s1924_s2 = inlined_call_operand.vmem [shape: bf16[128,128], index: 2, kind: output, shape index: {0}]   ;;  %s1925_s3 = inlined_call_operand.vmem [shape: f32[1,2,128], index: 3, kind: output, shape index: {1}]  }
   0x1   :  { %s1636_s14 = smov 0   ;;  %s1638_s15 = smov 0  }
   0x2   :  { %s1640_s16 = smov 0  }
   0x3 LB: > { %s26_s17 = sadd.s32 1, %s1605_s15  ;;  %p49_p1 = scmp.ne.s32.totalorder %s1597_s13, %s1593_s12  ;;  %s1609_s16 = sphi %s1640_s16, %s14_s16   ;;  %s1605_s15 = sphi %s1638_s15, %s1929_s15   ;;  %s1601_s14 = sphi %s1636_s14, %s1928_s14   ;;  %s1597_s13 = sphi %s1634_s13, %s1927_s13   ;;  %s1593_s12 = sphi %s1632_s12, %s1926_s12  }
   0x4   : > { %p27_p0 = scmp.ge.s32.totalorder %s26_s17, 3  ;;  %p50_p2 = scmp.eq.s32.totalorder %s1609_s16, 0 }
   0x5   : > { %s42_s19 = sadd.s32 1, %s1597_s13  ;;  %p1173_p5 = scmp.ge.s32.totalorder %s1609_s16, 3 }
   0x6   : > { %s1931_s17 = smov (%p27_p0, %s26_s17), 0  ;;  %p51_p3 = por %p50_p2, %p49_p1 }
   0x7   : > { %s38_s18 = ssub.s32 %s1605_s15, %s1931_s17  ;;  %159 = sbr.rel (%p1173_p5) target bundleno = 49 (0x31), region = 16 }
   0x8   : > { %p40_p4 = scmp.eq.s32.totalorder %s38_s18, 0 }
   0xa   : > { %s1667_s20 = scalar_select %p40_p4, %s1597_s13, %s42_s19  }
   0xc   : > { %162 = sbr.rel (!%p51_p3) target bundleno = 49 (0x31), region = 20  ;;  %s164_s21 = sand.u32 (%p51_p3), 1, %s1597_s13  }
   0xd   : > { %s1408_s22 = smul.u32 (%p51_p3), 12, %s1605_s15 }
   0xe   : > { %s1528_s23 = smul.u32 (%p51_p3), 192, %s164_s21 }
   0xf   : > { %s1675_s26 = scalar_lea.vmem (%p51_p3), %s1922_s0, %s1408_s22 }
  0x10   : > { %v187_v0 = vld [vmem:[%s1675_s26] sm:$0xff] (%p51_p3)  ;;  %v191_v2 = vld [vmem:[%s1675_s26 + $0x48] sm:$0xff] (%p51_p3)  ;;  %s1680_s27 = scalar_lea.vmem (%p51_p3), [#allocation3], %s1528_s23  ;;  %v195_v4 = vld [vmem:[%s1675_s26 + $0x90] sm:$0xff] (%p51_p3) }
  0x11   : > { %v189_v1 = vld [vmem:[%s1675_s26 + $0x24] sm:$0xff]  ;;  %188 = vst [vmem:[%s1680_s27] sm:$0xff] %v187_v0  ;;  %v193_v3 = vld [vmem:[%s1675_s26 + $0x6c] sm:$0xff]  ;;  %v197_v5 = vld [vmem:[%s1675_s26 + $0xb4] sm:$0xff] }
  0x12   : > { %190 = vst [vmem:[%s1680_s27 + $0xc] sm:$0xff] %v189_v1  ;;  %v199_v6 = vld [vmem:[%s1675_s26 + $0xd8] sm:$0xff]  ;;  %v203_v8 = vld [vmem:[%s1675_s26 + $0x120] sm:$0xff]  ;;  %v207_v10 = vld [vmem:[%s1675_s26 + $0x168] sm:$0xff] }
  0x13   : > { %192 = vst [vmem:[%s1680_s27 + $0x18] sm:$0xff] %v191_v2  ;;  %v201_v7 = vld [vmem:[%s1675_s26 + $0xfc] sm:$0xff]  ;;  %v205_v9 = vld [vmem:[%s1675_s26 + $0x144] sm:$0xff]  ;;  %v209_v11 = vld [vmem:[%s1675_s26 + $0x18c] sm:$0xff] }
  0x14   : > { %194 = vst [vmem:[%s1680_s27 + $0x24] sm:$0xff] %v193_v3  ;;  %v211_v12 = vld [vmem:[%s1675_s26 + $0x1b0] sm:$0xff]  ;;  %v215_v14 = vld [vmem:[%s1675_s26 + $0x1f8] sm:$0xff]  ;;  %v1175_v16 = vld [vmem:[%s1675_s26 + $0x8] sm:$0xf] }
  0x15   : > { %196 = vst [vmem:[%s1680_s27 + $0x30] sm:$0xff] %v195_v4  ;;  %v213_v13 = vld [vmem:[%s1675_s26 + $0x1d4] sm:$0xff]  ;;  %v217_v15 = vld [vmem:[%s1675_s26 + $0x21c] sm:$0xff]  ;;  %v1177_v17 = vld [vmem:[%s1675_s26 + $0x2c] sm:$0xf] }
  0x16   : > { %198 = vst [vmem:[%s1680_s27 + $0x3c] sm:$0xff] %v197_v5  ;;  %v1179_v18 = vld [vmem:[%s1675_s26 + $0x50] sm:$0xf]  ;;  %v1181_v19 = vld [vmem:[%s1675_s26 + $0x74] sm:$0xf] }
  0x17   : > { %200 = vst [vmem:[%s1680_s27 + $0x48] sm:$0xff] %v199_v6  ;;  %v1183_v20 = vld [vmem:[%s1675_s26 + $0x98] sm:$0xf]  ;;  %v1185_v21 = vld [vmem:[%s1675_s26 + $0xbc] sm:$0xf] }
  0x18   : > { %202 = vst [vmem:[%s1680_s27 + $0x54] sm:$0xff] %v201_v7  ;;  %v1187_v22 = vld [vmem:[%s1675_s26 + $0xe0] sm:$0xf]  ;;  %v1189_v23 = vld [vmem:[%s1675_s26 + $0x104] sm:$0xf] }
  0x19   : > { %204 = vst [vmem:[%s1680_s27 + $0x60] sm:$0xff] %v203_v8  ;;  %v1191_v24 = vld [vmem:[%s1675_s26 + $0x128] sm:$0xf]  ;;  %v1193_v25 = vld [vmem:[%s1675_s26 + $0x14c] sm:$0xf] }
  0x1a   : > { %206 = vst [vmem:[%s1680_s27 + $0x6c] sm:$0xff] %v205_v9  ;;  %v1195_v26 = vld [vmem:[%s1675_s26 + $0x170] sm:$0xf]  ;;  %v1197_v27 = vld [vmem:[%s1675_s26 + $0x194] sm:$0xf] }
  0x1b   : > { %208 = vst [vmem:[%s1680_s27 + $0x78] sm:$0xff] %v207_v10  ;;  %v1199_v28 = vld [vmem:[%s1675_s26 + $0x1b8] sm:$0xf]  ;;  %v1201_v29 = vld [vmem:[%s1675_s26 + $0x1dc] sm:$0xf] }
  0x1c   : > { %210 = vst [vmem:[%s1680_s27 + $0x84] sm:$0xff] %v209_v11  ;;  %v1203_v30 = vld [vmem:[%s1675_s26 + $0x200] sm:$0xf]  ;;  %v1205_v31 = vld [vmem:[%s1675_s26 + $0x224] sm:$0xf] }
  0x1d   : > { %212 = vst [vmem:[%s1680_s27 + $0x90] sm:$0xff] %v211_v12 }
  0x1e   : > { %214 = vst [vmem:[%s1680_s27 + $0x9c] sm:$0xff] %v213_v13 }
  0x1f   : > { %216 = vst [vmem:[%s1680_s27 + $0xa8] sm:$0xff] %v215_v14 }
  0x20   : > { %218 = vst [vmem:[%s1680_s27 + $0xb4] sm:$0xff] %v217_v15 }
  0x21   : > { %1176 = vst [vmem:[%s1680_s27 + $0x8] sm:$0xf] %v1175_v16 }
  0x22   : > { %1178 = vst [vmem:[%s1680_s27 + $0x14] sm:$0xf] %v1177_v17 }
  0x23   : > { %1180 = vst [vmem:[%s1680_s27 + $0x20] sm:$0xf] %v1179_v18 }
  0x24   : > { %1182 = vst [vmem:[%s1680_s27 + $0x2c] sm:$0xf] %v1181_v19 }
  0x25   : > { %1184 = vst [vmem:[%s1680_s27 + $0x38] sm:$0xf] %v1183_v20 }
  0x26   : > { %1186 = vst [vmem:[%s1680_s27 + $0x44] sm:$0xf] %v1185_v21 }
  0x27   : > { %1188 = vst [vmem:[%s1680_s27 + $0x50] sm:$0xf] %v1187_v22 }
  0x28   : > { %1190 = vst [vmem:[%s1680_s27 + $0x5c] sm:$0xf] %v1189_v23 }
  0x29   : > { %1192 = vst [vmem:[%s1680_s27 + $0x68] sm:$0xf] %v1191_v24 }
  0x2a   : > { %1194 = vst [vmem:[%s1680_s27 + $0x74] sm:$0xf] %v1193_v25 }
  0x2b   : > { %1196 = vst [vmem:[%s1680_s27 + $0x80] sm:$0xf] %v1195_v26 }
  0x2c   : > { %1198 = vst [vmem:[%s1680_s27 + $0x8c] sm:$0xf] %v1197_v27 }
  0x2d   : > { %1200 = vst [vmem:[%s1680_s27 + $0x98] sm:$0xf] %v1199_v28 }
  0x2e   : > { %1202 = vst [vmem:[%s1680_s27 + $0xa4] sm:$0xf] %v1201_v29 }
  0x2f   : > { %1204 = vst [vmem:[%s1680_s27 + $0xb0] sm:$0xf] %v1203_v30 }
  0x30   : > { %1206 = vst [vmem:[%s1680_s27 + $0xbc] sm:$0xf] %v1205_v31 }
  0x31 PF: > { %p1207_p6 = scmp.ge.s32.totalorder %s1609_s16, 1  ;;  %p275_p7 = scmp.lt.s32.totalorder %s1609_s16, 4 }
  0x33   : > { %p276_p8 = pnand %p1207_p6, %p275_p7 }
  0x34   : > { %s282_s28 = sand.u32 (!%p276_p8), 1, %s1593_s12   ;;  %s325_s29 = smul.u32 (!%p276_p8), 48, %s1601_s14 }
  0x35   : > { %279 = sbr.rel (%p276_p8) target bundleno = 386 (0x182), region = 50  ;;  %p1209_p10 = scmp.ne.s32.totalorder (!%p276_p8), %s1601_s14, 0 }
  0x36   : > { %s1529_s30 = smul.u32 (!%p276_p8), 192, %s282_s28  ;;  %p326_p9 = scmp.lt.s32.totalorder (!%p276_p8), %s325_s29, 143 }
  0x38   : > { %s1752_s8 = scalar_lea.vmem (!%p276_p8), [#allocation3], %s1529_s30 }
  0x3a   : > { %s1933_s29 = smov (!%p326_p9, %s325_s29), 143  ;;  %353 = sbr.rel (%p1209_p10) target bundleno = 80 (0x50), region = 58 }
  0x3b   : > { %s1208_s4 = sshll.u32 %s1933_s29, 2 }
  0x3c   : > { %s1750_s7 = scalar_lea.vmem %s1923_s1, %s1208_s4 }
  0x3f   : > { %v1611_v32 = vmov 0.0  }
  0x40   : > { %354 = vst [vmem:[#allocation2 + $0x30] sm:$0xff] %v1611_v32 }
  0x41   : > { %355 = vst [vmem:[#allocation2] sm:$0xff] %v1611_v32 }
  0x42   : > { %356 = vst [vmem:[#allocation2 + $0x58] sm:$0xff] %v1611_v32 }
  0x43   : > { %357 = vst [vmem:[#allocation2 + $0x18] sm:$0xff] %v1611_v32 }
  0x44   : > { %358 = vst [vmem:[#allocation2 + $0x50] sm:$0xff] %v1611_v32 }
  0x45   : > { %359 = vst [vmem:[#allocation2 + $0x68] sm:$0xff] %v1611_v32 }
  0x46   : > { %360 = vst [vmem:[#allocation2 + $0x8] sm:$0xff] %v1611_v32 }
  0x47   : > { %361 = vst [vmem:[#allocation2 + $0x48] sm:$0xff] %v1611_v32 }
  0x48   : > { %362 = vst [vmem:[#allocation2 + $0x40] sm:$0xff] %v1611_v32 }
  0x49   : > { %363 = vst [vmem:[#allocation2 + $0x20] sm:$0xff] %v1611_v32 }
  0x4a   : > { %364 = vst [vmem:[#allocation2 + $0x10] sm:$0xff] %v1611_v32 }
  0x4b   : > { %365 = vst [vmem:[#allocation2 + $0x38] sm:$0xff] %v1611_v32 }
  0x4c   : > { %366 = vst [vmem:[#allocation2 + $0x60] sm:$0xff] %v1611_v32 }
  0x4d   : > { %367 = vst [vmem:[#allocation2 + $0x70] sm:$0xff] %v1611_v32 }
  0x4e   : > { %368 = vst [vmem:[#allocation2 + $0x78] sm:$0xff] %v1611_v32 }
  0x4f   : > { %369 = vst [vmem:[#allocation2 + $0x28] sm:$0xff] %v1611_v32 }
  0x50 PF: > { %v1440_v33 = vld [vmem:[%s1750_s7 + $0x38] sm:$0xff]  ;;  %v1439_v36 = vld [vmem:[%s1750_s7 + $0x30] sm:$0xff]  ;;  %v1438_v39 = vld [vmem:[%s1750_s7 + $0x28] sm:$0xff]  ;;  %p1402_p11 = scmp.ne.s32.totalorder %s1601_s14, 2 }
  0x51   : > { %v1757_v34 = vld [vmem:[%s1750_s7 + $0x78] sm:$0xff]  ;;  %738 = vmatpush.bf16.msra.mxu0 %v1440_v33  ;;  %1504 = vmatpush.bf16.msra.mxu3 %v1440_v33  ;;  %v1766_v37 = vld [vmem:[%s1750_s7 + $0x70] sm:$0xff]  ;;  %v1446_v40 = vld [vmem:[%s1750_s7 + $0x68] sm:$0xff] }
  0x52   : > { %v1760_v35 = vld [vmem:[%s1750_s7 + $0xb8] sm:$0xff]  ;;  %787 = vmatpush.bf16.msra.mxu1 %v1757_v34  ;;  %v1769_v38 = vld [vmem:[%s1750_s7 + $0xb0] sm:$0xff]  ;;  %v1776_v41 = vld [vmem:[%s1750_s7 + $0xa8] sm:$0xff] }
  0x53   : > { %836 = vmatpush.bf16.msra.mxu2 %v1760_v35  ;;  %v1437_v42 = vld [vmem:[%s1750_s7 + $0x20] sm:$0xff]  ;;  %v1436_v45 = vld [vmem:[%s1750_s7 + $0x18] sm:$0xff]  ;;  %v1435_v48 = vld [vmem:[%s1750_s7 + $0x10] sm:$0xff] }
  0x54   : > { %v1445_v43 = vld [vmem:[%s1750_s7 + $0x60] sm:$0xff]  ;;  %v1444_v46 = vld [vmem:[%s1750_s7 + $0x58] sm:$0xff]  ;;  %v1443_v49 = vld [vmem:[%s1750_s7 + $0x50] sm:$0xff] }
  0x55   : > { %739 = vmatpush.bf16.msra.mxu0 %v1439_v36  ;;  %1505 = vmatpush.bf16.msra.mxu3 %v1439_v36  ;;  %v1782_v44 = vld [vmem:[%s1750_s7 + $0xa0] sm:$0xff]  ;;  %v1788_v47 = vld [vmem:[%s1750_s7 + $0x98] sm:$0xff]  ;;  %v1794_v50 = vld [vmem:[%s1750_s7 + $0x90] sm:$0xff] }
  0x56   : > { %788 = vmatpush.bf16.msra.mxu1 %v1766_v37  ;;  %v1434_v51 = vld [vmem:[%s1750_s7 + $0x8] sm:$0xff]  ;;  %v1433_v54 = vld [vmem:[%s1750_s7] sm:$0xff]  ;;  %v1284_v59 = vld [vmem:[%s1752_s8 + $0x90] sm:$0xf] }
  0x57   : > { %837 = vmatpush.bf16.msra.mxu2 %v1769_v38  ;;  %v1442_v52 = vld [vmem:[%s1750_s7 + $0x48] sm:$0xff]  ;;  %v1441_v55 = vld [vmem:[%s1750_s7 + $0x40] sm:$0xff]  ;;  %v1428_v60 = vld [vmem:[%s1752_s8 + $0x98] sm:$0xf0] }
  0x58   : > { %v1800_v53 = vld [vmem:[%s1750_s7 + $0x88] sm:$0xff]  ;;  %v1805_v56 = vld [vmem:[%s1750_s7 + $0x80] sm:$0xff]  ;;  %v1214_v62 = vld [vmem:[%s1752_s8 + $0xc] sm:$0xf0]  ;;  %v1285_v2 = vor.u32 %v1428_v60, %v1284_v59 }
  0x59   : > { %740 = vmatpush.bf16.msra.mxu0 %v1438_v39  ;;  %1506 = vmatpush.bf16.msra.mxu3 %v1438_v39  ;;  %v1212_v57 = vld [vmem:[%s1752_s8] sm:$0xf]  ;;  %v1410_v58 = vld [vmem:[%s1752_s8 + $0x8] sm:$0xf0]  ;;  %v1409_v61 = vld [vmem:[%s1752_s8 + $0x4] sm:$0xf] }
  0x5a   : > { %789 = vmatpush.bf16.msra.mxu1 %v1446_v40  ;;  %v1220_v63 = vld [vmem:[%s1752_s8 + $0x8] sm:$0xf]  ;;  %v1411_v0 = vld [vmem:[%s1752_s8 + $0x10] sm:$0xf0]  ;;  %v1213_v1 = vor.u32 %v1410_v58, %v1212_v57  ;;  %v1217_v3 = vor.u32 %v1409_v61, %v1214_v62  ;;  %v1224_v5 = vld [vmem:[%s1752_s8 + $0x18] sm:$0xf] }
  0x5b   : > { %838 = vmatpush.bf16.msra.mxu2 %v1776_v41  ;;  %v1221_v4 = vor.u32 %v1411_v0, %v1220_v63  ;;  %v1413_v6 = vld [vmem:[%s1752_s8 + $0x20] sm:$0xf0]  ;;  %v1296_v7 = vld [vmem:[%s1752_s8 + $0xa8] sm:$0xf]  ;;  %v1431_v8 = vld [vmem:[%s1752_s8 + $0xb0] sm:$0xf0] }
  0x5c   : > { %v1412_v9 = vld [vmem:[%s1752_s8 + $0x1c] sm:$0xf]  ;;  %v1226_v10 = vld [vmem:[%s1752_s8 + $0x24] sm:$0xf0]  ;;  %v1232_v11 = vld [vmem:[%s1752_s8 + $0x20] sm:$0xf]  ;;  %v1225_v13 = vor.u32 %v1413_v6, %v1224_v5  ;;  %v1297_v14 = vor.u32 %v1431_v8, %v1296_v7 }
  0x5d   : > { %741 = vmatpush.bf16.msra.mxu0 %v1437_v42  ;;  %1507 = vmatpush.bf16.msra.mxu3 %v1437_v42  ;;  %v1414_v12 = vld [vmem:[%s1752_s8 + $0x28] sm:$0xf0]  ;;  %v1229_v15 = vor.u32 %v1412_v9, %v1226_v10  ;;  %v1236_v17 = vld [vmem:[%s1752_s8 + $0x30] sm:$0xf]  ;;  %v1416_v18 = vld [vmem:[%s1752_s8 + $0x38] sm:$0xf0] }
  0x5e   : > { %790 = vmatpush.bf16.msra.mxu1 %v1445_v43  ;;  %v1233_v16 = vor.u32 %v1414_v12, %v1232_v11  ;;  %v1415_v19 = vld [vmem:[%s1752_s8 + $0x34] sm:$0xf]  ;;  %v1286_v21 = vld [vmem:[%s1752_s8 + $0x9c] sm:$0xf0]  ;;  %v1244_v23 = vld [vmem:[%s1752_s8 + $0x38] sm:$0xf]  ;;  %v1237_v25 = vor.u32 %v1416_v18, %v1236_v17 }
  0x5f   : > { %839 = vmatpush.bf16.msra.mxu2 %v1782_v44  ;;  %v1427_v20 = vld [vmem:[%s1752_s8 + $0x94] sm:$0xf]  ;;  %v1238_v22 = vld [vmem:[%s1752_s8 + $0x3c] sm:$0xf0]  ;;  %v1417_v24 = vld [vmem:[%s1752_s8 + $0x40] sm:$0xf0] }
  0x60   : > { %v1289_v26 = vor.u32 %v1427_v20, %v1286_v21  ;;  %v1241_v27 = vor.u32 %v1415_v19, %v1238_v22  ;;  %v1245_v28 = vor.u32 %v1417_v24, %v1244_v23  ;;  %v1248_v29 = vld [vmem:[%s1752_s8 + $0x48] sm:$0xf]  ;;  %v1419_v30 = vld [vmem:[%s1752_s8 + $0x50] sm:$0xf0]  ;;  %v1418_v31 = vld [vmem:[%s1752_s8 + $0x4c] sm:$0xf] }
  0x61   : > { %742 = vmatpush.bf16.msra.mxu0 %v1436_v45  ;;  %1508 = vmatpush.bf16.msra.mxu3 %v1436_v45  ;;  %v1430_v32 = vld [vmem:[%s1752_s8 + $0xac] sm:$0xf]  ;;  %v1298_v33 = vld [vmem:[%s1752_s8 + $0xb4] sm:$0xf0]  ;;  %v1420_v36 = vld [vmem:[%s1752_s8 + $0x58] sm:$0xf0] }
  0x62   : > { %791 = vmatpush.bf16.msra.mxu1 %v1444_v46  ;;  %v1301_v39 = vor.u32 %v1430_v32, %v1298_v33  ;;  %v1422_v42 = vld [vmem:[%s1752_s8 + $0x68] sm:$0xf0]  ;;  %v1429_v45 = vld [vmem:[%s1752_s8 + $0xa0] sm:$0xf0]  ;;  %v1304_v57 = vld [vmem:[%s1752_s8 + $0xb0] sm:$0xf] }
  0x63   : > { %840 = vmatpush.bf16.msra.mxu2 %v1788_v47  ;;  %v1274_v58 = vld [vmem:[%s1752_s8 + $0x84] sm:$0xf0]  ;;  %v1280_v59 = vld [vmem:[%s1752_s8 + $0x80] sm:$0xf]  ;;  %v1426_v60 = vld [vmem:[%s1752_s8 + $0x88] sm:$0xf0] }
  0x64   : > { %v1281_v0 = vor.u32 %v1426_v60, %v1280_v59  ;;  %v370_v5 = vld [vmem:[#allocation2 + $0x30] sm:$0xff]  ;;  %v372_v21 = vld [vmem:[#allocation2 + $0x58] sm:$0xff] }
  0x65   : > { %743 = vmatpush.bf16.msra.mxu0 %v1435_v48  ;;  %1509 = vmatpush.bf16.msra.mxu3 %v1435_v48  ;;  %v1423_v48 = vld [vmem:[%s1752_s8 + $0x70] sm:$0xf0] }
  0x66   : > { %792 = vmatpush.bf16.msra.mxu1 %v1443_v49 }
  0x67   : > { %841 = vmatpush.bf16.msra.mxu2 %v1794_v50 }
  0x69   : > { %744 = vmatpush.bf16.msra.mxu0 %v1434_v51  ;;  %1510 = vmatpush.bf16.msra.mxu3 %v1434_v51 }
  0x6a   : > { %793 = vmatpush.bf16.msra.mxu1 %v1442_v52 }
  0x6b   : > { %842 = vmatpush.bf16.msra.mxu2 %v1800_v53 }
  0x6d   : > { %745 = vmatpush.bf16.msra.mxu0 %v1433_v54  ;;  %1511 = vmatpush.bf16.msra.mxu3 %v1433_v54  ;;  %v1425_v54 = vld [vmem:[%s1752_s8 + $0x80] sm:$0xf0] }
  0x6e   : > { %794 = vmatpush.bf16.msra.mxu1 %v1441_v55 }
  0x6f   : > { %843 = vmatpush.bf16.msra.mxu2 %v1805_v56 }
  0x70   : > { %746 = vmatmul.bf16.vlgmr.msra.gmra.mxu0 %v1213_v1  ;;  %776 = vmatmul.bf16.vlgmr.msra.gmra.mxu3 %v1285_v2 }
  0x71   : > { %1512 = vmatpush.bf16.msrb.mxu3 %v1757_v34  ;;  %795 = vmatmul.bf16.vlgmr.msra.gmra.mxu1 %v1217_v3  ;;  %v1250_v34 = vld [vmem:[%s1752_s8 + $0x54] sm:$0xf0] }
  0x72   : > { %844 = vmatmul.bf16.vlgmr.msra.gmra.mxu2 %v1221_v4 }
  0x75   : > { %1513 = vmatpush.bf16.msrb.mxu3 %v1766_v37  ;;  %v1249_v37 = vor.u32 %v1419_v30, %v1248_v29  ;;  %v373_v29 = vld [vmem:[#allocation2 + $0x18] sm:$0xff] }
  0x79   : > { %1514 = vmatpush.bf16.msrb.mxu3 %v1446_v40 }
  0x7d   : > { %1515 = vmatpush.bf16.msrb.mxu3 %v1445_v43  ;;  %v1421_v43 = vld [vmem:[%s1752_s8 + $0x64] sm:$0xf] }
  0x80   : > { %751 = vmatmul.bf16.gmra.mxu0 %v1225_v13  ;;  %781 = vmatmul.bf16.gmra.mxu3 %v1297_v14  ;;  %v371_v13 = vld [vmem:[#allocation2] sm:$0xff] }
  0x81   : > { %1516 = vmatpush.bf16.msrb.mxu3 %v1444_v46  ;;  %800 = vmatmul.bf16.gmra.mxu1 %v1229_v15  ;;  %v1262_v46 = vld [vmem:[%s1752_s8 + $0x6c] sm:$0xf0] }
  0x82   : > { %849 = vmatmul.bf16.gmra.mxu2 %v1233_v16  ;;  %v1265_v51 = vor.u32 %v1421_v43, %v1262_v46 }
  0x85   : > { %1517 = vmatpush.bf16.msrb.mxu3 %v1443_v49 }
  0x89   : > { %1518 = vmatpush.bf16.msrb.mxu3 %v1442_v52 }
  0x8d   : > { %1519 = vmatpush.bf16.msrb.mxu3 %v1441_v55  ;;  %v1424_v55 = vld [vmem:[%s1752_s8 + $0x7c] sm:$0xf] }
  0x8e   : > { %v1277_v63 = vor.u32 %v1424_v55, %v1274_v58 }
  0x90   : > { %756 = vmatmul.bf16.gmra.mxu0 %v1237_v25  ;;  %825 = vmatmul.bf16.vlgmr.msrb.gmra.mxu3 %v1289_v26 }
  0x91   : > { %1520 = vmatpush.bf16.msra.mxu3 %v1760_v35  ;;  %805 = vmatmul.bf16.gmra.mxu1 %v1241_v27  ;;  %v1256_v35 = vld [vmem:[%s1752_s8 + $0x50] sm:$0xf] }
  0x92   : > { %854 = vmatmul.bf16.gmra.mxu2 %v1245_v28  ;;  %v1257_v40 = vor.u32 %v1420_v36, %v1256_v35 }
  0x95   : > { %1521 = vmatpush.bf16.msra.mxu3 %v1769_v38  ;;  %v1253_v38 = vor.u32 %v1418_v31, %v1250_v34 }
  0x99   : > { %1522 = vmatpush.bf16.msra.mxu3 %v1776_v41  ;;  %v1260_v41 = vld [vmem:[%s1752_s8 + $0x60] sm:$0xf] }
  0x9a   : > { %v1261_v49 = vor.u32 %v1422_v42, %v1260_v41 }
  0x9d   : > { %1523 = vmatpush.bf16.msra.mxu3 %v1782_v44  ;;  %v1292_v44 = vld [vmem:[%s1752_s8 + $0x98] sm:$0xf] }
  0xa0   : > { %761 = vmatmul.bf16.gmra.mxu0 %v1249_v37  ;;  %830 = vmatmul.bf16.gmra.mxu3 %v1301_v39  ;;  %v374_v37 = vld [vmem:[#allocation2 + $0x50] sm:$0xff] }
  0xa1   : > { %1524 = vmatpush.bf16.msra.mxu3 %v1788_v47  ;;  %810 = vmatmul.bf16.gmra.mxu1 %v1253_v38  ;;  %v1268_v47 = vld [vmem:[%s1752_s8 + $0x68] sm:$0xf] }
  0xa2   : > { %859 = vmatmul.bf16.gmra.mxu2 %v1257_v40  ;;  %v1269_v52 = vor.u32 %v1423_v48, %v1268_v47 }
  0xa5   : > { %1525 = vmatpush.bf16.msra.mxu3 %v1794_v50  ;;  %v1293_v50 = vor.u32 %v1429_v45, %v1292_v44  ;;  %v375_v45 = vld [vmem:[#allocation2 + $0x68] sm:$0xff] }
  0xa9   : > { %1526 = vmatpush.bf16.msra.mxu3 %v1800_v53  ;;  %v1272_v53 = vld [vmem:[%s1752_s8 + $0x78] sm:$0xf] }
  0xaa   : > { %v1273_v61 = vor.u32 %v1425_v54, %v1272_v53  ;;  %v376_v53 = vld [vmem:[#allocation2 + $0x8] sm:$0xff] }
  0xad   : > { %1527 = vmatpush.bf16.msra.mxu3 %v1805_v56  ;;  %v1432_v56 = vld [vmem:[%s1752_s8 + $0xb8] sm:$0xf0] }
  0xae   : > { %v1305_v62 = vor.u32 %v1432_v56, %v1304_v57 }
  0xb0   : > { %766 = vmatmul.bf16.gmra.mxu0 %v1261_v49  ;;  %874 = vmatmul.bf16.vlgmr.msra.gmra.mxu3 %v1293_v50 }
  0xb1   : > { %815 = vmatmul.bf16.gmra.mxu1 %v1265_v51 }
  0xb2   : > { %864 = vmatmul.bf16.gmra.mxu2 %v1269_v52 }
  0xc0   : > { %771 = vmatmul.bf16.gmra.mxu0 %v1273_v61  ;;  %879 = vmatmul.bf16.gmra.mxu3 %v1305_v62  ;;  %v377_v61 = vld [vmem:[#allocation2 + $0x48] sm:$0xff] }
  0xc1   : > { %820 = vmatmul.bf16.gmra.mxu1 %v1277_v63 }
  0xc2   : > { %869 = vmatmul.bf16.gmra.mxu2 %v1281_v0 }
  0xed   : > { %v747_v1 = vpop.f32.mrf.mxu0 }
  0xee   : > { %v796_v2 = vpop.f32.mrf.mxu1 }
  0xef   : > { %v797_v3 = vadd.f32 %v796_v2, %v747_v1 }
  0xf3   : > { %v1867_v4 = vpop.f32.mrf.mxu3 }
  0xf5   : > { %v845_v6 = vpop.f32.mrf.mxu2  ;;  %v749_v8 = vpop.f32.mrf.mxu0 }
  0xf6   : > { %v846_v7 = vadd.f32 %v845_v6, %v797_v3  ;;  %v798_v9 = vpop.f32.mrf.mxu1  ;;  %v382_v6 = vld [vmem:[#allocation2 + $0x60] sm:$0xff] }
  0xf7   : > { %v799_v11 = vadd.f32 %v798_v9, %v749_v8  ;;  %v378_v8 = vld [vmem:[#allocation2 + $0x40] sm:$0xff] }
  0xf8   : > { %v885_v10 = vadd.f32 %v846_v7, %v370_v5 }
  0xfa   : > { %901 = vst [vmem:[#allocation2 + $0x30] sm:$0xff] %v885_v10 }
  0xfb   : > { %v1869_v12 = vpop.f32.mrf.mxu3 }
  0xfd   : > { %v847_v14 = vpop.f32.mrf.mxu2  ;;  %v752_v16 = vpop.f32.mrf.mxu0 }
  0xfe   : > { %v848_v15 = vadd.f32 %v847_v14, %v799_v11  ;;  %v801_v17 = vpop.f32.mrf.mxu1 }
  0xff   : > { %v802_v19 = vadd.f32 %v801_v17, %v752_v16 }
 0x100   : > { %v886_v18 = vadd.f32 %v848_v15, %v371_v13 }
 0x102   : > { %902 = vst [vmem:[#allocation2] sm:$0xff] %v886_v18 }
 0x103   : > { %v1871_v20 = vpop.f32.mrf.mxu3 }
 0x105   : > { %v850_v22 = vpop.f32.mrf.mxu2  ;;  %v754_v24 = vpop.f32.mrf.mxu0 }
 0x106   : > { %v851_v23 = vadd.f32 %v850_v22, %v802_v19  ;;  %v803_v25 = vpop.f32.mrf.mxu1  ;;  %v383_v19 = vld [vmem:[#allocation2 + $0x70] sm:$0xff]  ;;  %v379_v22 = vld [vmem:[#allocation2 + $0x20] sm:$0xff] }
 0x107   : > { %v804_v27 = vadd.f32 %v803_v25, %v754_v24 }
 0x108   : > { %v887_v26 = vadd.f32 %v851_v23, %v372_v21 }
 0x10a   : > { %903 = vst [vmem:[#allocation2 + $0x58] sm:$0xff] %v887_v26 }
 0x10b   : > { %v1873_v28 = vpop.f32.mrf.mxu3 }
 0x10d   : > { %v852_v30 = vpop.f32.mrf.mxu2  ;;  %v757_v32 = vpop.f32.mrf.mxu0 }
 0x10e   : > { %v853_v31 = vadd.f32 %v852_v30, %v804_v27  ;;  %v806_v33 = vpop.f32.mrf.mxu1 }
 0x10f   : > { %v807_v35 = vadd.f32 %v806_v33, %v757_v32  ;;  %v384_v32 = vld [vmem:[#allocation2 + $0x78] sm:$0xff] }
 0x110   : > { %v888_v34 = vadd.f32 %v853_v31, %v373_v29 }
 0x112   : > { %904 = vst [vmem:[#allocation2 + $0x18] sm:$0xff] %v888_v34  ;;  %v380_v34 = vld [vmem:[#allocation2 + $0x10] sm:$0xff] }
 0x113   : > { %v826_v36 = vpop.f32.mrf.mxu3 }
 0x114   : > { %v827_v5 = vadd.f32 %v826_v36, %v1867_v4 }
 0x115   : > { %v855_v39 = vpop.f32.mrf.mxu2  ;;  %v759_v40 = vpop.f32.mrf.mxu0 }
 0x116   : > { %v856_v38 = vadd.f32 %v855_v39, %v807_v35  ;;  %v808_v41 = vpop.f32.mrf.mxu1 }
 0x117   : > { %v809_v43 = vadd.f32 %v808_v41, %v759_v40 }
 0x118   : > { %v889_v42 = vadd.f32 %v856_v38, %v374_v37 }
 0x11a   : > { %905 = vst [vmem:[#allocation2 + $0x50] sm:$0xff] %v889_v42 }
 0x11b   : > { %v828_v44 = vpop.f32.mrf.mxu3 }
 0x11c   : > { %v829_v17 = vadd.f32 %v828_v44, %v1869_v12 }
 0x11d   : > { %v857_v46 = vpop.f32.mrf.mxu2  ;;  %v762_v48 = vpop.f32.mrf.mxu0 }
 0x11e   : > { %v858_v47 = vadd.f32 %v857_v46, %v809_v43  ;;  %v811_v49 = vpop.f32.mrf.mxu1  ;;  %v385_v43 = vld [vmem:[#allocation2 + $0x28] sm:$0xff] }
 0x11f   : > { %v812_v51 = vadd.f32 %v811_v49, %v762_v48 }
 0x120   : > { %v890_v50 = vadd.f32 %v858_v47, %v375_v45  ;;  %v381_v45 = vld [vmem:[#allocation2 + $0x38] sm:$0xff] }
 0x122   : > { %906 = vst [vmem:[#allocation2 + $0x68] sm:$0xff] %v890_v50 }
 0x123   : > { %v831_v52 = vpop.f32.mrf.mxu3 }
 0x124   : > { %v832_v31 = vadd.f32 %v831_v52, %v1871_v20 }
 0x125   : > { %v860_v54 = vpop.f32.mrf.mxu2  ;;  %v764_v57 = vpop.f32.mrf.mxu0 }
 0x126   : > { %v861_v55 = vadd.f32 %v860_v54, %v812_v51  ;;  %v813_v56 = vpop.f32.mrf.mxu1 }
 0x127   : > { %v814_v59 = vadd.f32 %v813_v56, %v764_v57 }
 0x128   : > { %v891_v58 = vadd.f32 %v861_v55, %v376_v53 }
 0x12a   : > { %907 = vst [vmem:[#allocation2 + $0x8] sm:$0xff] %v891_v58 }
 0x12b   : > { %v833_v60 = vpop.f32.mrf.mxu3 }
 0x12c   : > { %v834_v41 = vadd.f32 %v833_v60, %v1873_v28 }
 0x12d   : > { %v862_v62 = vpop.f32.mrf.mxu2  ;;  %v767_v0 = vpop.f32.mrf.mxu0 }
 0x12e   : > { %v863_v63 = vadd.f32 %v862_v62, %v814_v59  ;;  %v816_v1 = vpop.f32.mrf.mxu1 }
 0x12f   : > { %v817_v3 = vadd.f32 %v816_v1, %v767_v0 }
 0x130   : > { %v892_v2 = vadd.f32 %v863_v63, %v377_v61 }
 0x132   : > { %908 = vst [vmem:[#allocation2 + $0x48] sm:$0xff] %v892_v2 }
 0x133   : > { %v875_v7 = vpop.f32.mrf.mxu3 }
 0x134   : > { %v876_v10 = vadd.f32 %v875_v7, %v827_v5 }
 0x135   : > { %v865_v9 = vpop.f32.mrf.mxu2  ;;  %v769_v13 = vpop.f32.mrf.mxu0 }
 0x136   : > { %v866_v11 = vadd.f32 %v865_v9, %v817_v3  ;;  %v897_v14 = vadd.f32 %v876_v10, %v382_v6  ;;  %v818_v15 = vpop.f32.mrf.mxu1 }
 0x137   : > { %v819_v18 = vadd.f32 %v818_v15, %v769_v13 }
 0x138   : > { %v893_v16 = vadd.f32 %v866_v11, %v378_v8  ;;  %913 = vst [vmem:[#allocation2 + $0x60] sm:$0xff] %v897_v14 }
 0x13a   : > { %909 = vst [vmem:[#allocation2 + $0x40] sm:$0xff] %v893_v16 }
 0x13b   : > { %v877_v21 = vpop.f32.mrf.mxu3 }
 0x13c   : > { %v878_v4 = vadd.f32 %v877_v21, %v829_v17 }
 0x13d   : > { %v867_v23 = vpop.f32.mrf.mxu2  ;;  %v772_v26 = vpop.f32.mrf.mxu0 }
 0x13e   : > { %v868_v24 = vadd.f32 %v867_v23, %v819_v18  ;;  %v898_v25 = vadd.f32 %v878_v4, %v383_v19  ;;  %v821_v27 = vpop.f32.mrf.mxu1 }
 0x13f   : > { %v822_v30 = vadd.f32 %v821_v27, %v772_v26 }
 0x140   : > { %v894_v29 = vadd.f32 %v868_v24, %v379_v22  ;;  %914 = vst [vmem:[#allocation2 + $0x70] sm:$0xff] %v898_v25 }
 0x142   : > { %910 = vst [vmem:[#allocation2 + $0x20] sm:$0xff] %v894_v29 }
 0x143   : > { %v880_v33 = vpop.f32.mrf.mxu3 }
 0x144   : > { %v881_v35 = vadd.f32 %v880_v33, %v832_v31 }
 0x145   : > { %v870_v12 = vpop.f32.mrf.mxu2  ;;  %v774_v38 = vpop.f32.mrf.mxu0 }
 0x146   : > { %v871_v36 = vadd.f32 %v870_v12, %v822_v30  ;;  %v899_v37 = vadd.f32 %v881_v35, %v384_v32  ;;  %v823_v40 = vpop.f32.mrf.mxu1 }
 0x147   : > { %v824_v42 = vadd.f32 %v823_v40, %v774_v38 }
 0x148   : > { %v895_v39 = vadd.f32 %v871_v36, %v380_v34  ;;  %915 = vst [vmem:[#allocation2 + $0x78] sm:$0xff] %v899_v37 }
 0x14a   : > { %911 = vst [vmem:[#allocation2 + $0x10] sm:$0xff] %v895_v39 }
 0x14b   : > { %v882_v44 = vpop.f32.mrf.mxu3 }
 0x14c   : > { %v883_v20 = vadd.f32 %v882_v44, %v834_v41 }
 0x14d   : > { %v872_v46 = vpop.f32.mrf.mxu2 }
 0x14e   : > { %v873_v47 = vadd.f32 %v872_v46, %v824_v42  ;;  %v900_v48 = vadd.f32 %v883_v20, %v385_v43  ;;  %920 = sbr.rel (%p1402_p11) target bundleno = 386 (0x182), region = 62 }
 0x150   : > { %v896_v49 = vadd.f32 %v873_v47, %v381_v45  ;;  %916 = vst [vmem:[#allocation2 + $0x28] sm:$0xff] %v900_v48 }
 0x152   : > { %912 = vst [vmem:[#allocation2 + $0x38] sm:$0xff] %v896_v49 }
 0x153   : > { %v921_v50 = vld [vmem:[#allocation2 + $0x30] sm:$0xff]  ;;  %v922_v51 = vld [vmem:[#allocation2] sm:$0xff]  ;;  %v923_v52 = vld [vmem:[#allocation2 + $0x58] sm:$0xff]  ;;  %vm1027_vm0 = vcmask 1040384  }
 0x154   : > { %v1460_v53 = vpack.c.bf16 %v922_v51, %v921_v50  ;;  %v969_v54 = vadd.f32 %v922_v51, %v921_v50  ;;  %v990_v28 = vmul.f32 %v921_v50, %v921_v50  ;;  %v991_v55 = vmul.f32 %v922_v51, %v922_v51  ;;  %v924_v57 = vld [vmem:[#allocation2 + $0x18] sm:$0xff]  ;;  %v925_v56 = vld [vmem:[#allocation2 + $0x50] sm:$0xff]  ;;  %v926_v58 = vld [vmem:[#allocation2 + $0x68] sm:$0xff] }
 0x155   : > { %v1465_v59 = vpack.c.bf16 %v924_v57, %v923_v52  ;;  %v992_v60 = vmul.f32 %v923_v52, %v923_v52  ;;  %v1470_v61 = vpack.c.bf16 %v926_v58, %v925_v56  ;;  %v927_v62 = vld [vmem:[#allocation2 + $0x8] sm:$0xff]  ;;  %v993_v1 = vmul.f32 %v924_v57, %v924_v57  ;;  %v929_v3 = vld [vmem:[#allocation2 + $0x40] sm:$0xff]  ;;  %v931_v8 = vld [vmem:[#allocation2 + $0x10] sm:$0xff] }
 0x156   : > { %1461 = vst [vmem:[%s1924_s2] sm:$0xff] %v1460_v53   ;;  %v1006_v63 = vadd.f32 %v991_v55, %v990_v28  ;;  %v970_v0 = vadd.f32 %v969_v54, %v923_v52  ;;  %v928_v2 = vld [vmem:[#allocation2 + $0x48] sm:$0xff]  ;;  %v930_v5 = vld [vmem:[#allocation2 + $0x20] sm:$0xff]  ;;  %v994_v11 = vmul.f32 %v925_v56, %v925_v56  ;;  %v934_v15 = vld [vmem:[#allocation2 + $0x70] sm:$0xff]  ;;  %v995_v21 = vmul.f32 %v926_v58, %v926_v58 }
 0x157   : > { %1497 = vst [vmem:[%s1924_s2 + $0x8] sm:$0xff] %v1465_v59   ;;  %v1475_v6 = vpack.c.bf16 %v928_v2, %v927_v62  ;;  %v1480_v7 = vpack.c.bf16 %v930_v5, %v929_v3  ;;  %v933_v14 = vld [vmem:[#allocation2 + $0x60] sm:$0xff]  ;;  %v935_v22 = vld [vmem:[#allocation2 + $0x78] sm:$0xff]  ;;  %v936_v23 = vld [vmem:[#allocation2 + $0x28] sm:$0xff]  ;;  %v996_v26 = vmul.f32 %v927_v62, %v927_v62  ;;  %v997_v30 = vmul.f32 %v928_v2, %v928_v2 }
 0x158   : > { %v971_v9 = vadd.f32 %v970_v0, %v924_v57  ;;  %v1007_v10 = vadd.f32 %v1006_v63, %v992_v60  ;;  %1498 = vst [vmem:[%s1924_s2 + $0x10] sm:$0xff] %v1470_v61   ;;  %v1490_v17 = vpack.c.bf16 %v934_v15, %v933_v14  ;;  %v1495_v4 = vpack.c.bf16 %v936_v23, %v935_v22 }
 0x159   : > { %v932_v13 = vld [vmem:[#allocation2 + $0x38] sm:$0xff]  ;;  %1499 = vst [vmem:[%s1924_s2 + $0x18] sm:$0xff] %v1475_v6   ;;  %v998_v33 = vmul.f32 %v929_v3, %v929_v3  ;;  %v999_v35 = vmul.f32 %v930_v5, %v930_v5  ;;  %v1000_v39 = vmul.f32 %v931_v8, %v931_v8  ;;  %v1002_v44 = vmul.f32 %v933_v14, %v933_v14 }
 0x15a   : > { %v1485_v16 = vpack.c.bf16 %v932_v13, %v931_v8  ;;  %v1008_v18 = vadd.f32 %v1007_v10, %v993_v1  ;;  %v972_v19 = vadd.f32 %v971_v9, %v925_v56  ;;  %1500 = vst [vmem:[%s1924_s2 + $0x20] sm:$0xff] %v1480_v7   ;;  %v1001_v41 = vmul.f32 %v932_v13, %v932_v13 }
 0x15b   : > { %1502 = vst [vmem:[%s1924_s2 + $0x30] sm:$0xff] %v1490_v17   ;;  %v1003_v20 = vmul.f32 %v934_v15, %v934_v15  ;;  %v1004_v49 = vmul.f32 %v935_v22, %v935_v22  ;;  %v1005_v52 = vmul.f32 %v936_v23, %v936_v23 }
 0x15c   : > { %1501 = vst [vmem:[%s1924_s2 + $0x28] sm:$0xff] %v1485_v16   ;;  %v973_v24 = vadd.f32 %v972_v19, %v926_v58  ;;  %v1009_v25 = vadd.f32 %v1008_v18, %v994_v11 }
 0x15d   : > { %1503 = vst [vmem:[%s1924_s2 + $0x38] sm:$0xff] %v1495_v4  }
 0x15e   : > { %v1010_v27 = vadd.f32 %v1009_v25, %v995_v21  ;;  %v974_v29 = vadd.f32 %v973_v24, %v927_v62 }
 0x160   : > { %v975_v31 = vadd.f32 %v974_v29, %v928_v2  ;;  %v1011_v32 = vadd.f32 %v1010_v27, %v996_v26 }
 0x162   : > { %v1012_v34 = vadd.f32 %v1011_v32, %v997_v30  ;;  %v976_v12 = vadd.f32 %v975_v31, %v929_v3 }
 0x164   : > { %v977_v36 = vadd.f32 %v976_v12, %v930_v5  ;;  %v1013_v37 = vadd.f32 %v1012_v34, %v998_v33 }
 0x166   : > { %v1014_v38 = vadd.f32 %v1013_v37, %v999_v35  ;;  %v978_v40 = vadd.f32 %v977_v36, %v931_v8 }
 0x168   : > { %v979_v42 = vadd.f32 %v978_v40, %v932_v13  ;;  %v1015_v43 = vadd.f32 %v1014_v38, %v1000_v39 }
 0x16a   : > { %v1016_v45 = vadd.f32 %v1015_v43, %v1001_v41  ;;  %v980_v46 = vadd.f32 %v979_v42, %v933_v14 }
 0x16c   : > { %v981_v47 = vadd.f32 %v980_v46, %v934_v15  ;;  %v1017_v48 = vadd.f32 %v1016_v45, %v1002_v44 }
 0x16e   : > { %v1018_v50 = vadd.f32 %v1017_v48, %v1003_v20  ;;  %v982_v51 = vadd.f32 %v981_v47, %v935_v22 }
 0x170   : > { %v983_v53 = vadd.f32 %v982_v51, %v936_v23  ;;  %v1019_v54 = vadd.f32 %v1018_v50, %v1004_v49 }
 0x172   : > { %v984_v28 = vrot.slane %v983_v53, 4  ;;  %v1020_v55 = vadd.f32 %v1019_v54, %v1005_v52 }
 0x174   : > { %v985_v57 = vadd.f32 %v984_v28, %v983_v53  ;;  %v1021_v56 = vrot.slane %v1020_v55, 4 }
 0x176   : > { %v986_v58 = vrot.slane %v985_v57, 2  ;;  %v1022_v59 = vadd.f32 %v1021_v56, %v1020_v55 }
 0x178   : > { %v987_v60 = vadd.f32 %v986_v58, %v985_v57  ;;  %v1023_v61 = vrot.slane %v1022_v59, 2 }
 0x17a   : > { %v988_v62 = vrot.slane %v987_v60, 1  ;;  %v1024_v63 = vadd.f32 %v1023_v61, %v1022_v59 }
 0x17c   : > { %v989_v0 = vadd.f32 %v988_v62, %v987_v60  ;;  %v1025_v1 = vrot.slane %v1024_v63, 1 }
 0x17e   : > { %v1026_v2 = vadd.f32 %v1025_v1, %v1024_v63 }
 0x180   : > { %v1028_v3 = vsel %vm1027_vm0, %v989_v0, %v1026_v2 }
 0x181   : > { %1029 = vst [vmem:[%s1925_s3] sm:$0x3] %v1028_v3 }
 0x182 PF: > { %s14_s16 = sadd.s32 1, %s1609_s16   ;;  %s1926_s12 = smov %s1597_s13 }
 0x183   : > { %p11_p12 = scmp.ge.s32.totalorder %s14_s16, 5   ;;  %s1927_s13 = smov %s1667_s20 }
 0x184   : > { %s1928_s14 = smov %s1605_s15  ;;  %s1929_s15 = smov %s1931_s17 }
 0x185   :  { %13 = sbr.rel (!%p11_p12) target bundleno = 3 (0x3), region = 118 }

// kernel: _lambda_.32
= control target key start
LH: loop header
LB: loop body
LE: loop exit
PB: predicated region body
PF: predicated region fallthrough
CT: control target
= control target key end

     0   :  { %s455_s0 = inlined_call_operand.vmem [shape: bf16[128,128], index: 0, kind: input, shape index: {}]   ;;  %s456_s1 = inlined_call_operand.vmem [shape: bf16[128,128], index: 1, kind: input, shape index: {}]   ;;  %s457_s2 = inlined_call_operand.vmem [shape: f32[1,128], index: 2, kind: input, shape index: {}]   ;;  %s458_s3 = inlined_call_operand.vmem [shape: f32[1,128], index: 3, kind: input, shape index: {}]   ;;  %s459_s4 = inlined_call_operand.vmem [shape: bf16[128,128], index: 4, kind: output, shape index: {}]  }
   0x1   :  { %v190_v0 = vld [vmem:[%s455_s0] sm:$0xff]   ;;  %v293_v8 = vld [vmem:[%s455_s0 + $0x8] sm:$0xff]   ;;  %v294_v10 = vld [vmem:[%s455_s0 + $0x10] sm:$0xff]  }
   0x2   :  { %v347_v1 = vld [vmem:[%s457_s2] ss:$0 sm:$0xff]  ;;  %v191_v2 = vunpack.c.l.bf16 %v190_v0  ;;  %v192_v3 = vunpack.c.h.bf16 %v190_v0  ;;  %v300_v9 = vld [vmem:[%s456_s1 + $0x8] sm:$0xff]   ;;  %v195_v13 = vunpack.c.l.bf16 %v293_v8  ;;  %v196_v14 = vunpack.c.h.bf16 %v293_v8  ;;  %v301_v15 = vld [vmem:[%s456_s1 + $0x10] sm:$0xff]  }
   0x3   :  { %v352_v4 = vld [vmem:[%s458_s3] ss:$0 sm:$0xff]  ;;  %v227_v16 = vunpack.c.l.bf16 %v300_v9  ;;  %v228_v17 = vunpack.c.h.bf16 %v300_v9  ;;  %v199_v18 = vunpack.c.l.bf16 %v294_v10  ;;  %v200_v19 = vunpack.c.h.bf16 %v294_v10  ;;  %v295_v24 = vld [vmem:[%s455_s0 + $0x18] sm:$0xff]   ;;  %v297_v56 = vld [vmem:[%s455_s0 + $0x28] sm:$0xff]  }
   0x4   :  { %v222_v5 = vld [vmem:[%s456_s1] sm:$0xff]   ;;  %v53_v11 = vmul.f32 %v347_v1, %v191_v2  ;;  %v54_v12 = vmul.f32 %v347_v1, %v192_v3  ;;  %v55_v22 = vmul.f32 %v347_v1, %v195_v13  ;;  %v56_v23 = vmul.f32 %v347_v1, %v196_v14  ;;  %v302_v37 = vld [vmem:[%s456_s1 + $0x18] sm:$0xff]   ;;  %v304_v61 = vld [vmem:[%s456_s1 + $0x28] sm:$0xff]  }
   0x5   :  { %v223_v6 = vunpack.c.l.bf16 %v222_v5  ;;  %v224_v7 = vunpack.c.h.bf16 %v222_v5  ;;  %v57_v25 = vmul.f32 %v347_v1, %v199_v18  ;;  %v58_v26 = vmul.f32 %v347_v1, %v200_v19  ;;  %v296_v46 = vld [vmem:[%s455_s0 + $0x20] sm:$0xff]   ;;  %v298_v8 = vld [vmem:[%s455_s0 + $0x30] sm:$0xff]  }
   0x6   :  { %v73_v20 = vadd.f32 %v352_v4, %v53_v11  ;;  %v74_v21 = vadd.f32 %v352_v4, %v54_v12  ;;  %v231_v27 = vunpack.c.l.bf16 %v301_v15  ;;  %v232_v28 = vunpack.c.h.bf16 %v301_v15  ;;  %v303_v51 = vld [vmem:[%s456_s1 + $0x20] sm:$0xff]   ;;  %v305_v9 = vld [vmem:[%s456_s1 + $0x30] sm:$0xff]  }
   0x7   :  { %v75_v31 = vadd.f32 %v352_v4, %v55_v22  ;;  %v76_v32 = vadd.f32 %v352_v4, %v56_v23  ;;  %v77_v33 = vadd.f32 %v352_v4, %v57_v25  ;;  %v78_v34 = vadd.f32 %v352_v4, %v58_v26  ;;  %v299_v22 = vld [vmem:[%s455_s0 + $0x38] sm:$0xff]  }
   0x8   :  { %v121_v29 = vadd.f32 %v223_v6, %v73_v20  ;;  %v122_v30 = vadd.f32 %v224_v7, %v74_v21  ;;  %v203_v35 = vunpack.c.l.bf16 %v295_v24  ;;  %v204_v36 = vunpack.c.h.bf16 %v295_v24 }
   0x9   :  { %v123_v40 = vadd.f32 %v227_v16, %v75_v31  ;;  %v124_v41 = vadd.f32 %v228_v17, %v76_v32  ;;  %v125_v42 = vadd.f32 %v231_v27, %v77_v33  ;;  %v126_v43 = vadd.f32 %v232_v28, %v78_v34  ;;  %v306_v31 = vld [vmem:[%s456_s1 + $0x38] sm:$0xff]  }
   0xa   :  { %v137_v38 = vmax.f32 %v121_v29, 0.0  ;;  %v138_v39 = vmax.f32 %v122_v30, 0.0  ;;  %v59_v44 = vmul.f32 %v347_v1, %v203_v35  ;;  %v60_v45 = vmul.f32 %v347_v1, %v204_v36 }
   0xb   :  { %v139_v48 = vmax.f32 %v123_v40, 0.0  ;;  %v140_v49 = vmax.f32 %v124_v41, 0.0  ;;  %v235_v50 = vunpack.c.l.bf16 %v302_v37  ;;  %v141_v52 = vmax.f32 %v125_v42, 0.0 }
   0xc   :  { %v256_v47 = vpack.c.bf16 %v138_v39, %v137_v38  ;;  %v142_v53 = vmax.f32 %v126_v43, 0.0  ;;  %v79_v54 = vadd.f32 %v352_v4, %v59_v44  ;;  %v80_v55 = vadd.f32 %v352_v4, %v60_v45 }
   0xd   :  { %v261_v57 = vpack.c.bf16 %v140_v49, %v139_v48  ;;  %v236_v58 = vunpack.c.h.bf16 %v302_v37  ;;  %v207_v59 = vunpack.c.l.bf16 %v296_v46  ;;  %v208_v60 = vunpack.c.h.bf16 %v296_v46 }
   0xe   :  { %257 = vst [vmem:[%s459_s4] sm:$0xff] %v256_v47   ;;  %v266_v62 = vpack.c.bf16 %v142_v53, %v141_v52  ;;  %v127_v63 = vadd.f32 %v235_v50, %v79_v54  ;;  %v239_v0 = vunpack.c.l.bf16 %v303_v51  ;;  %v240_v2 = vunpack.c.h.bf16 %v303_v51 }
   0xf   :  { %307 = vst [vmem:[%s459_s4 + $0x8] sm:$0xff] %v261_v57   ;;  %v128_v3 = vadd.f32 %v236_v58, %v80_v55  ;;  %v61_v5 = vmul.f32 %v347_v1, %v207_v59  ;;  %v62_v6 = vmul.f32 %v347_v1, %v208_v60  ;;  %v211_v7 = vunpack.c.l.bf16 %v297_v56 }
  0x10   :  { %308 = vst [vmem:[%s459_s4 + $0x10] sm:$0xff] %v266_v62   ;;  %v143_v10 = vmax.f32 %v127_v63, 0.0  ;;  %v212_v11 = vunpack.c.h.bf16 %v297_v56  ;;  %v243_v12 = vunpack.c.l.bf16 %v304_v61  ;;  %v244_v13 = vunpack.c.h.bf16 %v304_v61 }
  0x11   :  { %v144_v14 = vmax.f32 %v128_v3, 0.0  ;;  %v81_v15 = vadd.f32 %v352_v4, %v61_v5  ;;  %v82_v16 = vadd.f32 %v352_v4, %v62_v6  ;;  %v63_v17 = vmul.f32 %v347_v1, %v211_v7 }
  0x12   :  { %v64_v18 = vmul.f32 %v347_v1, %v212_v11  ;;  %v215_v19 = vunpack.c.l.bf16 %v298_v8  ;;  %v216_v20 = vunpack.c.h.bf16 %v298_v8  ;;  %v247_v21 = vunpack.c.l.bf16 %v305_v9 }
  0x13   :  { %v271_v23 = vpack.c.bf16 %v144_v14, %v143_v10  ;;  %v129_v24 = vadd.f32 %v239_v0, %v81_v15  ;;  %v130_v25 = vadd.f32 %v240_v2, %v82_v16  ;;  %v83_v26 = vadd.f32 %v352_v4, %v63_v17 }
  0x14   :  { %v84_v27 = vadd.f32 %v352_v4, %v64_v18  ;;  %v65_v28 = vmul.f32 %v347_v1, %v215_v19  ;;  %v66_v29 = vmul.f32 %v347_v1, %v216_v20  ;;  %v248_v30 = vunpack.c.h.bf16 %v305_v9 }
  0x15   :  { %309 = vst [vmem:[%s459_s4 + $0x18] sm:$0xff] %v271_v23   ;;  %v145_v32 = vmax.f32 %v129_v24, 0.0  ;;  %v146_v33 = vmax.f32 %v130_v25, 0.0  ;;  %v131_v34 = vadd.f32 %v243_v12, %v83_v26  ;;  %v219_v35 = vunpack.c.l.bf16 %v299_v22 }
  0x16   :  { %v132_v36 = vadd.f32 %v244_v13, %v84_v27  ;;  %v85_v37 = vadd.f32 %v352_v4, %v65_v28  ;;  %v86_v38 = vadd.f32 %v352_v4, %v66_v29  ;;  %v220_v39 = vunpack.c.h.bf16 %v299_v22 }
  0x17   :  { %v276_v40 = vpack.c.bf16 %v146_v33, %v145_v32  ;;  %v147_v41 = vmax.f32 %v131_v34, 0.0  ;;  %v67_v42 = vmul.f32 %v347_v1, %v219_v35  ;;  %v251_v43 = vunpack.c.l.bf16 %v306_v31 }
  0x18   :  { %v148_v44 = vmax.f32 %v132_v36, 0.0  ;;  %v133_v45 = vadd.f32 %v247_v21, %v85_v37  ;;  %v134_v46 = vadd.f32 %v248_v30, %v86_v38  ;;  %v68_v47 = vmul.f32 %v347_v1, %v220_v39 }
  0x19   :  { %310 = vst [vmem:[%s459_s4 + $0x20] sm:$0xff] %v276_v40   ;;  %v87_v48 = vadd.f32 %v352_v4, %v67_v42  ;;  %v252_v49 = vunpack.c.h.bf16 %v306_v31 }
  0x1a   :  { %v281_v50 = vpack.c.bf16 %v148_v44, %v147_v41  ;;  %v149_v51 = vmax.f32 %v133_v45, 0.0  ;;  %v150_v52 = vmax.f32 %v134_v46, 0.0  ;;  %v88_v53 = vadd.f32 %v352_v4, %v68_v47 }
  0x1b   :  { %v135_v54 = vadd.f32 %v251_v43, %v87_v48 }
  0x1c   :  { %311 = vst [vmem:[%s459_s4 + $0x28] sm:$0xff] %v281_v50   ;;  %v286_v55 = vpack.c.bf16 %v150_v52, %v149_v51  ;;  %v136_v56 = vadd.f32 %v252_v49, %v88_v53 }
  0x1d   :  { %v151_v1 = vmax.f32 %v135_v54, 0.0 }
  0x1e   :  { %312 = vst [vmem:[%s459_s4 + $0x30] sm:$0xff] %v286_v55   ;;  %v152_v57 = vmax.f32 %v136_v56, 0.0 }
  0x20   :  { %v291_v58 = vpack.c.bf16 %v152_v57, %v151_v1 }
  0x22   :  { %313 = vst [vmem:[%s459_s4 + $0x38] sm:$0xff] %v291_v58  }

// kernel: _lambda_.36
= control target key start
LH: loop header
LB: loop body
LE: loop exit
PB: predicated region body
PF: predicated region fallthrough
CT: control target
= control target key end

     0   :  { %s114_s0 = inlined_call_operand.vmem [shape: bf16[32,128], index: 0, kind: input, shape index: {}]   ;;  %s115_s1 = inlined_call_operand.vmem [shape: f32[1,128], index: 1, kind: input, shape index: {}]   ;;  %s116_s2 = inlined_call_operand.vmem [shape: f32[1,128], index: 2, kind: input, shape index: {}]   ;;  %s117_s3 = inlined_call_operand.vmem [shape: bf16[32,128], index: 3, kind: output, shape index: {}]  }
   0x1   :  { %v55_v0 = vld [vmem:[%s114_s0] sm:$0xff]   ;;  %v72_v5 = vld [vmem:[%s114_s0 + $0x8] sm:$0xff]  }
   0x2   :  { %v74_v1 = vld [vmem:[%s115_s1] ss:$0 sm:$0xff]  ;;  %v56_v2 = vunpack.c.l.bf16 %v55_v0  ;;  %v57_v3 = vunpack.c.h.bf16 %v55_v0  ;;  %v60_v6 = vunpack.c.l.bf16 %v72_v5  ;;  %v61_v7 = vunpack.c.h.bf16 %v72_v5 }
   0x3   :  { %v75_v4 = vld [vmem:[%s116_s2] ss:$0 sm:$0xff] }
   0x4   :  { %v26_v8 = vmul.f32 %v74_v1, %v56_v2  ;;  %v27_v9 = vmul.f32 %v74_v1, %v57_v3  ;;  %v28_v10 = vmul.f32 %v74_v1, %v60_v6  ;;  %v29_v11 = vmul.f32 %v74_v1, %v61_v7 }
   0x6   :  { %v34_v12 = vadd.f32 %v75_v4, %v26_v8  ;;  %v35_v13 = vadd.f32 %v75_v4, %v27_v9  ;;  %v36_v14 = vadd.f32 %v75_v4, %v28_v10  ;;  %v37_v15 = vadd.f32 %v75_v4, %v29_v11 }
   0x8   :  { %v38_v16 = vmax.f32 %v34_v12, 0.0  ;;  %v39_v17 = vmax.f32 %v35_v13, 0.0  ;;  %v40_v18 = vmax.f32 %v36_v14, 0.0  ;;  %v41_v19 = vmax.f32 %v37_v15, 0.0 }
   0xa   :  { %v65_v20 = vpack.c.bf16 %v39_v17, %v38_v16  ;;  %v70_v21 = vpack.c.bf16 %v41_v19, %v40_v18 }
   0xc   :  { %66 = vst [vmem:[%s117_s3] sm:$0xff] %v65_v20  }
   0xd   :  { %73 = vst [vmem:[%s117_s3 + $0x8] sm:$0xff] %v70_v21  }

// kernel: _lambda_.35
= control target key start
LH: loop header
LB: loop body
LE: loop exit
PB: predicated region body
PF: predicated region fallthrough
CT: control target
= control target key end

     0   :  { %s1088_s12 = smov 0   ;;  %s1090_s13 = smov 0   ;;  %s1204_s0 = inlined_call_operand.vmem [shape: bf16[32,1152], index: 0, kind: input, shape index: {}]   ;;  %s1205_s1 = inlined_call_operand.vmem [shape: bf16[1152,128], index: 1, kind: input, shape index: {}]   ;;  %s1206_s2 = inlined_call_operand.vmem [shape: bf16[32,128], index: 2, kind: output, shape index: {0}]   ;;  %s1207_s3 = inlined_call_operand.vmem [shape: f32[1,2,128], index: 3, kind: output, shape index: {1}]  }
   0x1   :  { %s1092_s14 = smov 0   ;;  %s1094_s15 = smov 0  }
   0x2   :  { %s1096_s16 = smov 0  }
   0x3 LB: > { %s26_s17 = sadd.s32 1, %s1061_s15  ;;  %p49_p1 = scmp.ne.s32.totalorder %s1053_s13, %s1049_s12  ;;  %s1065_s16 = sphi %s1096_s16, %s14_s16   ;;  %s1061_s15 = sphi %s1094_s15, %s1211_s15   ;;  %s1057_s14 = sphi %s1092_s14, %s1210_s14   ;;  %s1053_s13 = sphi %s1090_s13, %s1209_s13   ;;  %s1049_s12 = sphi %s1088_s12, %s1208_s12  }
   0x4   : > { %p27_p0 = scmp.ge.s32.totalorder %s26_s17, 3  ;;  %p50_p2 = scmp.eq.s32.totalorder %s1065_s16, 0 }
   0x5   : > { %s42_s19 = sadd.s32 1, %s1053_s13  ;;  %p795_p5 = scmp.ge.s32.totalorder %s1065_s16, 3 }
   0x6   : > { %s1213_s17 = smov (%p27_p0, %s26_s17), 0  ;;  %p51_p3 = por %p50_p2, %p49_p1 }
   0x7   : > { %s38_s18 = ssub.s32 %s1061_s15, %s1213_s17  ;;  %159 = sbr.rel (%p795_p5) target bundleno = 25 (0x19), region = 16 }
   0x8   : > { %p40_p4 = scmp.eq.s32.totalorder %s38_s18, 0 }
   0xa   : > { %s1123_s20 = scalar_select %p40_p4, %s1053_s13, %s42_s19  }
   0xc   : > { %162 = sbr.rel (!%p51_p3) target bundleno = 25 (0x19), region = 20  ;;  %s164_s21 = sand.u32 (%p51_p3), 1, %s1053_s13  }
   0xd   : > { %s934_s22 = smul.u32 (%p51_p3), 12, %s1061_s15 }
   0xe   : > { %s984_s23 = smul.u32 (%p51_p3), 48, %s164_s21 }
   0xf   : > { %s172_s26 = scalar_lea.vmem (%p51_p3), %s1204_s0, %s934_s22 }
  0x10   : > { %v187_v0 = vld [vmem:[%s172_s26] sm:$0xff] (%p51_p3)  ;;  %v191_v2 = vld [vmem:[%s172_s26 + $0x48] sm:$0xff] (%p51_p3)  ;;  %s166_s27 = scalar_lea.vmem (%p51_p3), [#allocation3], %s984_s23  ;;  %v801_v6 = vld [vmem:[%s172_s26 + $0x50] sm:$0xf] (%p51_p3) }
  0x11   : > { %v189_v1 = vld [vmem:[%s172_s26 + $0x24] sm:$0xff]  ;;  %188 = vst [vmem:[%s166_s27] sm:$0xff] %v187_v0  ;;  %v193_v3 = vld [vmem:[%s172_s26 + $0x6c] sm:$0xff]  ;;  %v803_v7 = vld [vmem:[%s172_s26 + $0x74] sm:$0xf] }
  0x12   : > { %190 = vst [vmem:[%s166_s27 + $0xc] sm:$0xff] %v189_v1  ;;  %v797_v4 = vld [vmem:[%s172_s26 + $0x8] sm:$0xf]  ;;  %v799_v5 = vld [vmem:[%s172_s26 + $0x2c] sm:$0xf] }
  0x13   : > { %192 = vst [vmem:[%s166_s27 + $0x18] sm:$0xff] %v191_v2 }
  0x14   : > { %194 = vst [vmem:[%s166_s27 + $0x24] sm:$0xff] %v193_v3 }
  0x15   : > { %798 = vst [vmem:[%s166_s27 + $0x8] sm:$0xf] %v797_v4 }
  0x16   : > { %800 = vst [vmem:[%s166_s27 + $0x14] sm:$0xf] %v799_v5 }
  0x17   : > { %802 = vst [vmem:[%s166_s27 + $0x20] sm:$0xf] %v801_v6 }
  0x18   : > { %804 = vst [vmem:[%s166_s27 + $0x2c] sm:$0xf] %v803_v7 }
  0x19 PF: > { %p805_p6 = scmp.ge.s32.totalorder %s1065_s16, 1  ;;  %p227_p7 = scmp.lt.s32.totalorder %s1065_s16, 4 }
  0x1b   : > { %p228_p8 = pnand %p805_p6, %p227_p7 }
  0x1c   : > { %s234_s28 = sand.u32 (!%p228_p8), 1, %s1049_s12   ;;  %s277_s29 = smul.u32 (!%p228_p8), 48, %s1057_s14 }
  0x1d   : > { %231 = sbr.rel (%p228_p8) target bundleno = 264 (0x108), region = 50  ;;  %p807_p10 = scmp.ne.s32.totalorder (!%p228_p8), %s1057_s14, 0 }
  0x1e   : > { %s985_s30 = smul.u32 (!%p228_p8), 48, %s234_s28  ;;  %p278_p9 = scmp.lt.s32.totalorder (!%p228_p8), %s277_s29, 143 }
  0x20   : > { %s1140_s8 = scalar_lea.vmem (!%p228_p8), [#allocation3], %s985_s30 }
  0x22   : > { %s1215_s29 = smov (!%p278_p9, %s277_s29), 143  ;;  %305 = sbr.rel (%p807_p10) target bundleno = 44 (0x2c), region = 58 }
  0x23   : > { %s806_s4 = sshll.u32 %s1215_s29, 2 }
  0x24   : > { %s1138_s7 = scalar_lea.vmem %s1205_s1, %s806_s4 }
  0x27   : > { %v1067_v8 = vmov 0.0  }
  0x28   : > { %306 = vst [vmem:[#allocation2 + $0x10] sm:$0xff] %v1067_v8 }
  0x29   : > { %307 = vst [vmem:[#allocation2] sm:$0xff] %v1067_v8 }
  0x2a   : > { %308 = vst [vmem:[#allocation2 + $0x18] sm:$0xff] %v1067_v8 }
  0x2b   : > { %309 = vst [vmem:[#allocation2 + $0x8] sm:$0xff] %v1067_v8 }
  0x2c PF: > { %v948_v9 = vld [vmem:[%s1138_s7 + $0x38] sm:$0xff]  ;;  %v947_v12 = vld [vmem:[%s1138_s7 + $0x30] sm:$0xff]  ;;  %v946_v15 = vld [vmem:[%s1138_s7 + $0x28] sm:$0xff]  ;;  %p928_p11 = scmp.ne.s32.totalorder %s1057_s14, 2 }
  0x2d   : > { %v956_v10 = vld [vmem:[%s1138_s7 + $0x78] sm:$0xff]  ;;  %546 = vmatpush.bf16.msra.mxu0 %v948_v9  ;;  %v955_v13 = vld [vmem:[%s1138_s7 + $0x70] sm:$0xff]  ;;  %976 = vmatpush.bf16.msra.mxu3 %v948_v9  ;;  %v954_v16 = vld [vmem:[%s1138_s7 + $0x68] sm:$0xff] }
  0x2e   : > { %v964_v11 = vld [vmem:[%s1138_s7 + $0xb8] sm:$0xff]  ;;  %565 = vmatpush.bf16.msra.mxu1 %v956_v10  ;;  %v963_v14 = vld [vmem:[%s1138_s7 + $0xb0] sm:$0xff]  ;;  %v962_v17 = vld [vmem:[%s1138_s7 + $0xa8] sm:$0xff] }
  0x2f   : > { %584 = vmatpush.bf16.msra.mxu2 %v964_v11  ;;  %v945_v18 = vld [vmem:[%s1138_s7 + $0x20] sm:$0xff]  ;;  %v944_v21 = vld [vmem:[%s1138_s7 + $0x18] sm:$0xff]  ;;  %v943_v24 = vld [vmem:[%s1138_s7 + $0x10] sm:$0xff] }
  0x30   : > { %v953_v19 = vld [vmem:[%s1138_s7 + $0x60] sm:$0xff]  ;;  %v952_v22 = vld [vmem:[%s1138_s7 + $0x58] sm:$0xff]  ;;  %v951_v25 = vld [vmem:[%s1138_s7 + $0x50] sm:$0xff] }
  0x31   : > { %547 = vmatpush.bf16.msra.mxu0 %v947_v12  ;;  %977 = vmatpush.bf16.msra.mxu3 %v947_v12  ;;  %v961_v20 = vld [vmem:[%s1138_s7 + $0xa0] sm:$0xff]  ;;  %v960_v23 = vld [vmem:[%s1138_s7 + $0x98] sm:$0xff]  ;;  %v959_v26 = vld [vmem:[%s1138_s7 + $0x90] sm:$0xff] }
  0x32   : > { %566 = vmatpush.bf16.msra.mxu1 %v955_v13  ;;  %v942_v27 = vld [vmem:[%s1138_s7 + $0x8] sm:$0xff]  ;;  %v941_v30 = vld [vmem:[%s1138_s7] sm:$0xff]  ;;  %v310_v54 = vld [vmem:[#allocation2 + $0x10] sm:$0xff] }
  0x33   : > { %585 = vmatpush.bf16.msra.mxu2 %v963_v14  ;;  %v950_v28 = vld [vmem:[%s1138_s7 + $0x48] sm:$0xff]  ;;  %v949_v31 = vld [vmem:[%s1138_s7 + $0x40] sm:$0xff]  ;;  %v312_v4 = vld [vmem:[#allocation2 + $0x18] sm:$0xff] }
  0x34   : > { %v958_v29 = vld [vmem:[%s1138_s7 + $0x88] sm:$0xff]  ;;  %v957_v32 = vld [vmem:[%s1138_s7 + $0x80] sm:$0xff] }
  0x35   : > { %548 = vmatpush.bf16.msra.mxu0 %v946_v15  ;;  %978 = vmatpush.bf16.msra.mxu3 %v946_v15  ;;  %v810_v33 = vld [vmem:[%s1140_s8] sm:$0xf]  ;;  %v936_v34 = vld [vmem:[%s1140_s8 + $0x8] sm:$0xf0]  ;;  %v935_v35 = vld [vmem:[%s1140_s8 + $0x4] sm:$0xf] }
  0x36   : > { %567 = vmatpush.bf16.msra.mxu1 %v954_v16  ;;  %v812_v36 = vld [vmem:[%s1140_s8 + $0xc] sm:$0xf0]  ;;  %v818_v37 = vld [vmem:[%s1140_s8 + $0x8] sm:$0xf]  ;;  %v937_v38 = vld [vmem:[%s1140_s8 + $0x10] sm:$0xf0]  ;;  %v811_v41 = vor.u32 %v936_v34, %v810_v33 }
  0x37   : > { %586 = vmatpush.bf16.msra.mxu2 %v962_v17  ;;  %v822_v39 = vld [vmem:[%s1140_s8 + $0x18] sm:$0xf]  ;;  %v939_v40 = vld [vmem:[%s1140_s8 + $0x20] sm:$0xf0]  ;;  %v815_v42 = vor.u32 %v935_v35, %v812_v36  ;;  %v819_v43 = vor.u32 %v937_v38, %v818_v37  ;;  %v938_v45 = vld [vmem:[%s1140_s8 + $0x1c] sm:$0xf] }
  0x38   : > { %v823_v44 = vor.u32 %v939_v40, %v822_v39  ;;  %v824_v46 = vld [vmem:[%s1140_s8 + $0x24] sm:$0xf0]  ;;  %v830_v47 = vld [vmem:[%s1140_s8 + $0x20] sm:$0xf]  ;;  %v940_v48 = vld [vmem:[%s1140_s8 + $0x28] sm:$0xf0] }
  0x39   : > { %549 = vmatpush.bf16.msra.mxu0 %v945_v18  ;;  %979 = vmatpush.bf16.msra.mxu3 %v945_v18  ;;  %v827_v49 = vor.u32 %v938_v45, %v824_v46  ;;  %v831_v50 = vor.u32 %v940_v48, %v830_v47  ;;  %v311_v61 = vld [vmem:[#allocation2] sm:$0xff]  ;;  %v313_v11 = vld [vmem:[#allocation2 + $0x8] sm:$0xff] }
  0x3a   : > { %568 = vmatpush.bf16.msra.mxu1 %v953_v19 }
  0x3b   : > { %587 = vmatpush.bf16.msra.mxu2 %v961_v20 }
  0x3d   : > { %550 = vmatpush.bf16.msra.mxu0 %v944_v21  ;;  %980 = vmatpush.bf16.msra.mxu3 %v944_v21 }
  0x3e   : > { %569 = vmatpush.bf16.msra.mxu1 %v952_v22 }
  0x3f   : > { %588 = vmatpush.bf16.msra.mxu2 %v960_v23 }
  0x41   : > { %551 = vmatpush.bf16.msra.mxu0 %v943_v24  ;;  %981 = vmatpush.bf16.msra.mxu3 %v943_v24 }
  0x42   : > { %570 = vmatpush.bf16.msra.mxu1 %v951_v25 }
  0x43   : > { %589 = vmatpush.bf16.msra.mxu2 %v959_v26 }
  0x45   : > { %552 = vmatpush.bf16.msra.mxu0 %v942_v27  ;;  %982 = vmatpush.bf16.msra.mxu3 %v942_v27 }
  0x46   : > { %571 = vmatpush.bf16.msra.mxu1 %v950_v28 }
  0x47   : > { %590 = vmatpush.bf16.msra.mxu2 %v958_v29 }
  0x49   : > { %553 = vmatpush.bf16.msra.mxu0 %v941_v30  ;;  %983 = vmatpush.bf16.msra.mxu3 %v941_v30 }
  0x4a   : > { %572 = vmatpush.bf16.msra.mxu1 %v949_v31 }
  0x4b   : > { %591 = vmatpush.bf16.msra.mxu2 %v957_v32 }
  0x4c   : > { %554 = vmatmul.bf16.vlgmr.msra.gmra.mxu0 %v811_v41  ;;  %559 = vmatmul.bf16.vlgmr.msra.gmra.mxu3 %v823_v44 }
  0x4d   : > { %573 = vmatmul.bf16.vlgmr.msra.gmra.mxu1 %v815_v42 }
  0x4e   : > { %592 = vmatmul.bf16.vlgmr.msra.gmra.mxu2 %v819_v43 }
  0x5d   : > { %578 = vmatmul.bf16.gmra.mxu1 %v827_v49 }
  0x5e   : > { %597 = vmatmul.bf16.gmra.mxu2 %v831_v50 }
  0xc9   : > { %v555_v52 = vpop.f32.mrf.mxu0 }
  0xca   : > { %v574_v51 = vpop.f32.mrf.mxu1 }
  0xcb   : > { %v575_v53 = vadd.f32 %v574_v51, %v555_v52 }
  0xcf   : > { %v560_v2 = vpop.f32.mrf.mxu3 }
  0xd1   : > { %v593_v55 = vpop.f32.mrf.mxu2  ;;  %v557_v59 = vpop.f32.mrf.mxu0 }
  0xd2   : > { %v594_v56 = vadd.f32 %v593_v55, %v575_v53  ;;  %v576_v57 = vpop.f32.mrf.mxu1 }
  0xd3   : > { %v577_v60 = vadd.f32 %v576_v57, %v557_v59 }
  0xd4   : > { %v603_v58 = vadd.f32 %v594_v56, %v310_v54 }
  0xd6   : > { %607 = vst [vmem:[#allocation2 + $0x10] sm:$0xff] %v603_v58 }
  0xd7   : > { %v562_v9 = vpop.f32.mrf.mxu3 }
  0xd9   : > { %v595_v62 = vpop.f32.mrf.mxu2 }
  0xda   : > { %v596_v63 = vadd.f32 %v595_v62, %v577_v60  ;;  %v579_v0 = vpop.f32.mrf.mxu1 }
  0xdb   : > { %v580_v3 = vadd.f32 %v579_v0, %v560_v2 }
  0xdc   : > { %v604_v1 = vadd.f32 %v596_v63, %v311_v61 }
  0xde   : > { %608 = vst [vmem:[#allocation2] sm:$0xff] %v604_v1 }
  0xe1   : > { %v598_v5 = vpop.f32.mrf.mxu2 }
  0xe2   : > { %v599_v6 = vadd.f32 %v598_v5, %v580_v3  ;;  %v581_v8 = vpop.f32.mrf.mxu1 }
  0xe3   : > { %v582_v10 = vadd.f32 %v581_v8, %v562_v9 }
  0xe4   : > { %v605_v7 = vadd.f32 %v599_v6, %v312_v4 }
  0xe6   : > { %609 = vst [vmem:[#allocation2 + $0x18] sm:$0xff] %v605_v7 }
  0xe9   : > { %v600_v12 = vpop.f32.mrf.mxu2 }
  0xea   : > { %v601_v13 = vadd.f32 %v600_v12, %v582_v10  ;;  %614 = sbr.rel (%p928_p11) target bundleno = 264 (0x108), region = 62 }
  0xec   : > { %v606_v14 = vadd.f32 %v601_v13, %v313_v11 }
  0xee   : > { %610 = vst [vmem:[#allocation2 + $0x8] sm:$0xff] %v606_v14 }
  0xef   : > { %v615_v15 = vld [vmem:[#allocation2 + $0x10] sm:$0xff]  ;;  %v616_v16 = vld [vmem:[#allocation2] sm:$0xff]  ;;  %v617_v17 = vld [vmem:[#allocation2 + $0x18] sm:$0xff]  ;;  %vm649_vm0 = vcmask 1040384  }
  0xf0   : > { %v968_v18 = vpack.c.bf16 %v616_v16, %v615_v15  ;;  %v627_v19 = vadd.f32 %v616_v16, %v615_v15  ;;  %v636_v20 = vmul.f32 %v615_v15, %v615_v15  ;;  %v637_v21 = vmul.f32 %v616_v16, %v616_v16 }
  0xf1   : > { %v638_v24 = vmul.f32 %v617_v17, %v617_v17 }
  0xf2   : > { %969 = vst [vmem:[%s1206_s2] sm:$0xff] %v968_v18   ;;  %v640_v25 = vadd.f32 %v637_v21, %v636_v20  ;;  %v628_v26 = vadd.f32 %v627_v19, %v617_v17 }
  0xf4   : > { %v641_v29 = vadd.f32 %v640_v25, %v638_v24 }
  0xf5   : > { %v618_v22 = vld [vmem:[#allocation2 + $0x8] sm:$0xff] }
  0xf6   : > { %v973_v23 = vpack.c.bf16 %v618_v22, %v617_v17  ;;  %v639_v27 = vmul.f32 %v618_v22, %v618_v22  ;;  %v629_v28 = vadd.f32 %v628_v26, %v618_v22 }
  0xf8   : > { %975 = vst [vmem:[%s1206_s2 + $0x8] sm:$0xff] %v973_v23   ;;  %v630_v30 = vrot.slane %v629_v28, 4  ;;  %v642_v31 = vadd.f32 %v641_v29, %v639_v27 }
  0xfa   : > { %v631_v32 = vadd.f32 %v630_v30, %v629_v28  ;;  %v643_v33 = vrot.slane %v642_v31, 4 }
  0xfc   : > { %v632_v34 = vrot.slane %v631_v32, 2  ;;  %v644_v35 = vadd.f32 %v643_v33, %v642_v31 }
  0xfe   : > { %v633_v36 = vadd.f32 %v632_v34, %v631_v32  ;;  %v645_v37 = vrot.slane %v644_v35, 2 }
 0x100   : > { %v634_v38 = vrot.slane %v633_v36, 1  ;;  %v646_v39 = vadd.f32 %v645_v37, %v644_v35 }
 0x102   : > { %v635_v40 = vadd.f32 %v634_v38, %v633_v36  ;;  %v647_v41 = vrot.slane %v646_v39, 1 }
 0x104   : > { %v648_v42 = vadd.f32 %v647_v41, %v646_v39 }
 0x106   : > { %v650_v43 = vsel %vm649_vm0, %v635_v40, %v648_v42 }
 0x107   : > { %651 = vst [vmem:[%s1207_s3] sm:$0x3] %v650_v43 }
 0x108 PF: > { %s14_s16 = sadd.s32 1, %s1065_s16   ;;  %s1208_s12 = smov %s1053_s13 }
 0x109   : > { %p11_p12 = scmp.ge.s32.totalorder %s14_s16, 5   ;;  %s1209_s13 = smov %s1123_s20 }
 0x10a   : > { %s1210_s14 = smov %s1061_s15  ;;  %s1211_s15 = smov %s1213_s17 }
 0x10b   :  { %13 = sbr.rel (!%p11_p12) target bundleno = 3 (0x3), region = 118 }

// kernel: _lambda_.33
= control target key start
LH: loop header
LB: loop body
LE: loop exit
PB: predicated region body
PF: predicated region fallthrough
CT: control target
= control target key end

     0   :  { %vm169_vm0 = vcmask 1040384   ;;  %s308_s1 = inlined_call_operand.vmem [shape: bf16[128,128], index: 1, kind: input, shape index: {}]   ;;  %s309_s0 = inlined_call_operand.vmem [shape: bf16[32,128], index: 0, kind: input, shape index: {}]   ;;  %s310_s2 = inlined_call_operand.vmem [shape: bf16[32,128], index: 2, kind: output, shape index: {0}]   ;;  %s311_s3 = inlined_call_operand.vmem [shape: f32[1,2,128], index: 3, kind: output, shape index: {1}]  }
   0x1   :  { %v229_v0 = vld [vmem:[%s308_s1 + $0x38] sm:$0xff]  ;;  %v228_v1 = vld [vmem:[%s308_s1 + $0x30] sm:$0xff]  ;;  %v227_v2 = vld [vmem:[%s308_s1 + $0x28] sm:$0xff] }
   0x2   :  { %105 = vmatpush.bf16.msra.mxu0 %v229_v0  ;;  %241 = vmatpush.bf16.msra.mxu1 %v229_v0  ;;  %v226_v3 = vld [vmem:[%s308_s1 + $0x20] sm:$0xff]  ;;  %v225_v4 = vld [vmem:[%s308_s1 + $0x18] sm:$0xff]  ;;  %v224_v5 = vld [vmem:[%s308_s1 + $0x10] sm:$0xff] }
   0x3   :  { %v223_v6 = vld [vmem:[%s308_s1 + $0x8] sm:$0xff]  ;;  %v222_v7 = vld [vmem:[%s308_s1] sm:$0xff] }
   0x4   :  { %v220_v8 = vld [vmem:[%s309_s0] sm:$0xff]  ;;  %v221_v9 = vld [vmem:[%s309_s0 + $0x8] sm:$0xff] }
   0x6   :  { %106 = vmatpush.bf16.msra.mxu0 %v228_v1  ;;  %242 = vmatpush.bf16.msra.mxu1 %v228_v1 }
   0xa   :  { %107 = vmatpush.bf16.msra.mxu0 %v227_v2  ;;  %243 = vmatpush.bf16.msra.mxu1 %v227_v2 }
   0xe   :  { %108 = vmatpush.bf16.msra.mxu0 %v226_v3  ;;  %244 = vmatpush.bf16.msra.mxu1 %v226_v3 }
  0x12   :  { %109 = vmatpush.bf16.msra.mxu0 %v225_v4  ;;  %245 = vmatpush.bf16.msra.mxu1 %v225_v4 }
  0x16   :  { %110 = vmatpush.bf16.msra.mxu0 %v224_v5  ;;  %246 = vmatpush.bf16.msra.mxu1 %v224_v5 }
  0x1a   :  { %111 = vmatpush.bf16.msra.mxu0 %v223_v6  ;;  %247 = vmatpush.bf16.msra.mxu1 %v223_v6 }
  0x1e   :  { %112 = vmatpush.bf16.msra.mxu0 %v222_v7  ;;  %248 = vmatpush.bf16.msra.mxu1 %v222_v7 }
  0x21   :  { %113 = vmatmul.bf16.vlgmr.msra.gmra.mxu0 %v220_v8  ;;  %118 = vmatmul.bf16.vlgmr.msra.gmra.mxu1 %v221_v9 }
  0x9e   :  { %v114_v10 = vpop.f32.mrf.mxu0  ;;  %v119_v11 = vpop.f32.mrf.mxu1 }
  0x9f   :  { %v156_v12 = vmul.f32 %v114_v10, %v114_v10  ;;  %v158_v19 = vmul.f32 %v119_v11, %v119_v11 }
  0xa6   :  { %v116_v13 = vpop.f32.mrf.mxu0  ;;  %v121_v14 = vpop.f32.mrf.mxu1 }
  0xa7   :  { %v233_v15 = vpack.c.bf16 %v116_v13, %v114_v10  ;;  %v147_v16 = vadd.f32 %v116_v13, %v114_v10  ;;  %v157_v17 = vmul.f32 %v116_v13, %v116_v13  ;;  %v238_v18 = vpack.c.bf16 %v121_v14, %v119_v11 }
  0xa8   :  { %v159_v23 = vmul.f32 %v121_v14, %v121_v14 }
  0xa9   :  { %234 = vst [vmem:[%s310_s2] sm:$0xff] %v233_v15   ;;  %v160_v20 = vadd.f32 %v157_v17, %v156_v12  ;;  %v148_v21 = vadd.f32 %v147_v16, %v119_v11 }
  0xaa   :  { %240 = vst [vmem:[%s310_s2 + $0x8] sm:$0xff] %v238_v18  }
  0xab   :  { %v149_v22 = vadd.f32 %v148_v21, %v121_v14  ;;  %v161_v24 = vadd.f32 %v160_v20, %v158_v19 }
  0xad   :  { %v150_v25 = vrot.slane %v149_v22, 4  ;;  %v162_v26 = vadd.f32 %v161_v24, %v159_v23 }
  0xaf   :  { %v151_v27 = vadd.f32 %v150_v25, %v149_v22  ;;  %v163_v28 = vrot.slane %v162_v26, 4 }
  0xb1   :  { %v152_v29 = vrot.slane %v151_v27, 2  ;;  %v164_v30 = vadd.f32 %v163_v28, %v162_v26 }
  0xb3   :  { %v153_v31 = vadd.f32 %v152_v29, %v151_v27  ;;  %v165_v32 = vrot.slane %v164_v30, 2 }
  0xb5   :  { %v154_v33 = vrot.slane %v153_v31, 1  ;;  %v166_v34 = vadd.f32 %v165_v32, %v164_v30 }
  0xb7   :  { %v167_v35 = vrot.slane %v166_v34, 1  ;;  %v155_v36 = vadd.f32 %v154_v33, %v153_v31 }
  0xb9   :  { %v168_v37 = vadd.f32 %v167_v35, %v166_v34 }
  0xbb   :  { %v170_v38 = vsel %vm169_vm0, %v155_v36, %v168_v37 }
  0xbc   :  { %171 = vst [vmem:[%s311_s3] sm:$0x3] %v170_v38 }

// kernel: _lambda_.34
= control target key start
LH: loop header
LB: loop body
LE: loop exit
PB: predicated region body
PF: predicated region fallthrough
CT: control target
= control target key end

     0   :  { %s110_s0 = inlined_call_operand.vmem [shape: bf16[32,128], index: 0, kind: input, shape index: {}]   ;;  %s111_s1 = inlined_call_operand.vmem [shape: f32[1,128], index: 1, kind: input, shape index: {}]   ;;  %s112_s2 = inlined_call_operand.vmem [shape: f32[1,128], index: 2, kind: input, shape index: {}]   ;;  %s113_s3 = inlined_call_operand.vmem [shape: bf16[32,128], index: 3, kind: output, shape index: {}]  }
   0x1   :  { %v51_v0 = vld [vmem:[%s110_s0] sm:$0xff]   ;;  %v68_v5 = vld [vmem:[%s110_s0 + $0x8] sm:$0xff]  }
   0x2   :  { %v70_v1 = vld [vmem:[%s111_s1] ss:$0 sm:$0xff]  ;;  %v52_v2 = vunpack.c.l.bf16 %v51_v0  ;;  %v53_v3 = vunpack.c.h.bf16 %v51_v0  ;;  %v56_v6 = vunpack.c.l.bf16 %v68_v5  ;;  %v57_v7 = vunpack.c.h.bf16 %v68_v5 }
   0x3   :  { %v71_v4 = vld [vmem:[%s112_s2] ss:$0 sm:$0xff] }
   0x4   :  { %v26_v8 = vmul.f32 %v70_v1, %v52_v2  ;;  %v27_v9 = vmul.f32 %v70_v1, %v53_v3  ;;  %v28_v10 = vmul.f32 %v70_v1, %v56_v6  ;;  %v29_v11 = vmul.f32 %v70_v1, %v57_v7 }
   0x6   :  { %v34_v12 = vadd.f32 %v71_v4, %v26_v8  ;;  %v35_v13 = vadd.f32 %v71_v4, %v27_v9  ;;  %v36_v14 = vadd.f32 %v71_v4, %v28_v10  ;;  %v37_v15 = vadd.f32 %v71_v4, %v29_v11 }
   0x8   :  { %v61_v16 = vpack.c.bf16 %v35_v13, %v34_v12  ;;  %v66_v17 = vpack.c.bf16 %v37_v15, %v36_v14 }
   0xa   :  { %62 = vst [vmem:[%s113_s3] sm:$0xff] %v61_v16  }
   0xb   :  { %69 = vst [vmem:[%s113_s3 + $0x8] sm:$0xff] %v66_v17  }

// kernel: _lambda_.38
= control target key start
LH: loop header
LB: loop body
LE: loop exit
PB: predicated region body
PF: predicated region fallthrough
CT: control target
= control target key end

     0   :  { %s149_s0 = inlined_call_operand.vmem [shape: bf16[32,128], index: 0, kind: input, shape index: {}]   ;;  %s150_s1 = inlined_call_operand.vmem [shape: bf16[32,128], index: 1, kind: input, shape index: {}]   ;;  %s151_s2 = inlined_call_operand.vmem [shape: f32[1,128], index: 2, kind: input, shape index: {}]   ;;  %s152_s3 = inlined_call_operand.vmem [shape: f32[1,128], index: 3, kind: input, shape index: {}]   ;;  %s153_s4 = inlined_call_operand.vmem [shape: bf16[32,128], index: 4, kind: output, shape index: {}]  }
   0x1   :  { %v70_v0 = vld [vmem:[%s149_s0] sm:$0xff]   ;;  %v95_v8 = vld [vmem:[%s149_s0 + $0x8] sm:$0xff]  }
   0x2   :  { %v98_v1 = vld [vmem:[%s151_s2] ss:$0 sm:$0xff]  ;;  %v71_v2 = vunpack.c.l.bf16 %v70_v0  ;;  %v72_v3 = vunpack.c.h.bf16 %v70_v0  ;;  %v96_v9 = vld [vmem:[%s150_s1 + $0x8] sm:$0xff]   ;;  %v75_v12 = vunpack.c.l.bf16 %v95_v8  ;;  %v76_v13 = vunpack.c.h.bf16 %v95_v8 }
   0x3   :  { %v99_v4 = vld [vmem:[%s152_s3] ss:$0 sm:$0xff]  ;;  %v83_v14 = vunpack.c.l.bf16 %v96_v9  ;;  %v84_v15 = vunpack.c.h.bf16 %v96_v9 }
   0x4   :  { %v78_v5 = vld [vmem:[%s150_s1] sm:$0xff]   ;;  %v29_v10 = vmul.f32 %v98_v1, %v71_v2  ;;  %v30_v11 = vmul.f32 %v98_v1, %v72_v3  ;;  %v31_v18 = vmul.f32 %v98_v1, %v75_v12  ;;  %v32_v19 = vmul.f32 %v98_v1, %v76_v13 }
   0x5   :  { %v79_v6 = vunpack.c.l.bf16 %v78_v5  ;;  %v80_v7 = vunpack.c.h.bf16 %v78_v5 }
   0x6   :  { %v37_v16 = vadd.f32 %v99_v4, %v29_v10  ;;  %v38_v17 = vadd.f32 %v99_v4, %v30_v11  ;;  %v39_v22 = vadd.f32 %v99_v4, %v31_v18  ;;  %v40_v23 = vadd.f32 %v99_v4, %v32_v19 }
   0x8   :  { %v49_v20 = vadd.f32 %v79_v6, %v37_v16  ;;  %v50_v21 = vadd.f32 %v80_v7, %v38_v17  ;;  %v51_v26 = vadd.f32 %v83_v14, %v39_v22  ;;  %v52_v27 = vadd.f32 %v84_v15, %v40_v23 }
   0xa   :  { %v53_v24 = vmax.f32 %v49_v20, 0.0  ;;  %v54_v25 = vmax.f32 %v50_v21, 0.0  ;;  %v55_v29 = vmax.f32 %v51_v26, 0.0  ;;  %v56_v30 = vmax.f32 %v52_v27, 0.0 }
   0xc   :  { %v88_v28 = vpack.c.bf16 %v54_v25, %v53_v24  ;;  %v93_v31 = vpack.c.bf16 %v56_v30, %v55_v29 }
   0xe   :  { %89 = vst [vmem:[%s153_s4] sm:$0xff] %v88_v28  }
   0xf   :  { %97 = vst [vmem:[%s153_s4 + $0x8] sm:$0xff] %v93_v31  }

// kernel: _lambda_.41
= control target key start
LH: loop header
LB: loop body
LE: loop exit
PB: predicated region body
PF: predicated region fallthrough
CT: control target
= control target key end

     0   :  { %s1320_s12 = smov 0   ;;  %s1322_s13 = smov 0   ;;  %s1510_s0 = inlined_call_operand.vmem [shape: bf16[16,1152], index: 0, kind: input, shape index: {}]   ;;  %s1511_s1 = inlined_call_operand.vmem [shape: bf16[1152,256], index: 1, kind: input, shape index: {}]   ;;  %s1512_s2 = inlined_call_operand.vmem [shape: bf16[16,256], index: 2, kind: output, shape index: {0}]   ;;  %s1513_s3 = inlined_call_operand.vmem [shape: f32[1,2,256], index: 3, kind: output, shape index: {1}]  }
   0x1   :  { %s1324_s14 = smov 0   ;;  %s1326_s15 = smov 0  }
   0x2   :  { %s1328_s16 = smov 0  }
   0x3 LB: > { %s26_s17 = sadd.s32 1, %s1293_s15  ;;  %p49_p1 = scmp.ne.s32.totalorder %s1285_s13, %s1281_s12  ;;  %s1297_s16 = sphi %s1328_s16, %s14_s16   ;;  %s1293_s15 = sphi %s1326_s15, %s1517_s15   ;;  %s1289_s14 = sphi %s1324_s14, %s1516_s14   ;;  %s1285_s13 = sphi %s1322_s13, %s1515_s13   ;;  %s1281_s12 = sphi %s1320_s12, %s1514_s12  }
   0x4   : > { %p27_p0 = scmp.ge.s32.totalorder %s26_s17, 3  ;;  %p50_p2 = scmp.eq.s32.totalorder %s1297_s16, 0 }
   0x5   : > { %s42_s19 = sadd.s32 1, %s1285_s13  ;;  %p942_p5 = scmp.ge.s32.totalorder %s1297_s16, 3 }
   0x6   : > { %s1519_s17 = smov (%p27_p0, %s26_s17), 0  ;;  %p51_p3 = por %p50_p2, %p49_p1 }
   0x7   : > { %s38_s18 = ssub.s32 %s1293_s15, %s1519_s17  ;;  %159 = sbr.rel (%p942_p5) target bundleno = 21 (0x15), region = 16 }
   0x8   : > { %p40_p4 = scmp.eq.s32.totalorder %s38_s18, 0 }
   0xa   : > { %s1355_s20 = scalar_select %p40_p4, %s1285_s13, %s42_s19  }
   0xc   : > { %162 = sbr.rel (!%p51_p3) target bundleno = 21 (0x15), region = 20  ;;  %s164_s21 = sand.u32 (%p51_p3), 1, %s1285_s13  }
   0xd   : > { %s1163_s22 = smul.u32 (%p51_p3), 12, %s1293_s15 }
   0xe   : > { %s1216_s23 = smul.u32 (%p51_p3), 24, %s164_s21 }
   0xf   : > { %s172_s26 = scalar_lea.vmem (%p51_p3), %s1510_s0, %s1163_s22 }
  0x10   : > { %v187_v0 = vld [vmem:[%s172_s26] sm:$0xff] (%p51_p3)  ;;  %v944_v2 = vld [vmem:[%s172_s26 + $0x8] sm:$0xf] (%p51_p3)  ;;  %s166_s27 = scalar_lea.vmem (%p51_p3), [#allocation3], %s1216_s23  ;;  %v946_v3 = vld [vmem:[%s172_s26 + $0x2c] sm:$0xf] (%p51_p3) }
  0x11   : > { %v189_v1 = vld [vmem:[%s172_s26 + $0x24] sm:$0xff]  ;;  %188 = vst [vmem:[%s166_s27] sm:$0xff] %v187_v0 }
  0x12   : > { %190 = vst [vmem:[%s166_s27 + $0xc] sm:$0xff] %v189_v1 }
  0x13   : > { %945 = vst [vmem:[%s166_s27 + $0x8] sm:$0xf] %v944_v2 }
  0x14   : > { %947 = vst [vmem:[%s166_s27 + $0x14] sm:$0xf] %v946_v3 }
  0x15 PF: > { %p948_p6 = scmp.ge.s32.totalorder %s1297_s16, 1  ;;  %p222_p7 = scmp.lt.s32.totalorder %s1297_s16, 4 }
  0x17   : > { %p223_p8 = pnand %p948_p6, %p222_p7 }
  0x18   : > { %s229_s28 = sand.u32 (!%p223_p8), 1, %s1281_s12   ;;  %s278_s29 = smul.u32 (!%p223_p8), 48, %s1289_s14 }
  0x19   : > { %226 = sbr.rel (%p223_p8) target bundleno = 275 (0x113), region = 50  ;;  %p951_p10 = scmp.ne.s32.totalorder (!%p223_p8), %s1289_s14, 0 }
  0x1a   : > { %s1217_s30 = smul.u32 (!%p223_p8), 24, %s229_s28  ;;  %p280_p9 = scmp.lt.s32.totalorder (!%p223_p8), %s278_s29, 143 }
  0x1c   : > { %s1372_s8 = scalar_lea.vmem (!%p223_p8), [#allocation3], %s1217_s30 }
  0x1e   : > { %s1521_s29 = smov (!%p280_p9, %s278_s29), 143  ;;  %315 = sbr.rel (%p951_p10) target bundleno = 40 (0x28), region = 58 }
  0x1f   : > { %s1164_s4 = sshll.u32 %s1521_s29, 3 }
  0x20   : > { %s1370_s7 = scalar_lea.vmem %s1511_s1, %s1164_s4 }
  0x23   : > { %v1299_v4 = vmov 0.0  }
  0x24   : > { %316 = vst [vmem:[#allocation2 + $0x10] sm:$0xff] %v1299_v4 }
  0x25   : > { %317 = vst [vmem:[#allocation2] sm:$0xff] %v1299_v4 }
  0x26   : > { %318 = vst [vmem:[#allocation2 + $0x18] sm:$0xff] %v1299_v4 }
  0x27   : > { %319 = vst [vmem:[#allocation2 + $0x8] sm:$0xff] %v1299_v4 }
  0x28 PF: > { %v1022_v5 = vld [vmem:[%s1370_s7 + $0x70] sm:$0xf]  ;;  %v1183_v6 = vld [vmem:[%s1370_s7 + $0x74] sm:$0xf0]  ;;  %v1014_v14 = vld [vmem:[%s1370_s7 + $0x60] sm:$0xf] }
  0x29   : > { %v1086_v7 = vld [vmem:[%s1370_s7 + $0xf0] sm:$0xf]  ;;  %v1023_v8 = vor.u32 %v1183_v6, %v1022_v5  ;;  %v1199_v9 = vld [vmem:[%s1370_s7 + $0xf4] sm:$0xf0]  ;;  %v1181_v15 = vld [vmem:[%s1370_s7 + $0x64] sm:$0xf0] }
  0x2a   : > { %v1150_v10 = vld [vmem:[%s1370_s7 + $0x170] sm:$0xf]  ;;  %v1215_v11 = vld [vmem:[%s1370_s7 + $0x174] sm:$0xf0]  ;;  %v1087_v12 = vor.u32 %v1199_v9, %v1086_v7  ;;  %v1078_v16 = vld [vmem:[%s1370_s7 + $0xe0] sm:$0xf]  ;;  %v1015_v17 = vor.u32 %v1181_v15, %v1014_v14 }
  0x2b   : > { %v1151_v13 = vor.u32 %v1215_v11, %v1150_v10  ;;  %632 = vmatpush.bf16.msra.mxu0 %v1023_v8  ;;  %v1197_v18 = vld [vmem:[%s1370_s7 + $0xe4] sm:$0xf0]  ;;  %v1142_v19 = vld [vmem:[%s1370_s7 + $0x160] sm:$0xf]  ;;  %v1006_v23 = vld [vmem:[%s1370_s7 + $0x50] sm:$0xf] }
  0x2c   : > { %v1213_v20 = vld [vmem:[%s1370_s7 + $0x164] sm:$0xf0]  ;;  %646 = vmatpush.bf16.msra.mxu1 %v1087_v12  ;;  %v1079_v21 = vor.u32 %v1197_v18, %v1078_v16  ;;  %v1179_v24 = vld [vmem:[%s1370_s7 + $0x54] sm:$0xf0]  ;;  %v1070_v25 = vld [vmem:[%s1370_s7 + $0xd0] sm:$0xf] }
  0x2d   : > { %660 = vmatpush.bf16.msra.mxu2 %v1151_v13  ;;  %v1143_v22 = vor.u32 %v1213_v20, %v1142_v19  ;;  %v1195_v26 = vld [vmem:[%s1370_s7 + $0xd4] sm:$0xf0]  ;;  %v1134_v27 = vld [vmem:[%s1370_s7 + $0x150] sm:$0xf]  ;;  %v1007_v29 = vor.u32 %v1179_v24, %v1006_v23  ;;  %v998_v30 = vld [vmem:[%s1370_s7 + $0x40] sm:$0xf] }
  0x2e   : > { %v1211_v28 = vld [vmem:[%s1370_s7 + $0x154] sm:$0xf0]  ;;  %v1177_v31 = vld [vmem:[%s1370_s7 + $0x44] sm:$0xf0]  ;;  %v1071_v32 = vor.u32 %v1195_v26, %v1070_v25  ;;  %v1062_v34 = vld [vmem:[%s1370_s7 + $0xc0] sm:$0xf] }
  0x2f   : > { %633 = vmatpush.bf16.msra.mxu0 %v1015_v17  ;;  %v1135_v33 = vor.u32 %v1211_v28, %v1134_v27  ;;  %v1182_v35 = vld [vmem:[%s1370_s7 + $0x74] sm:$0xf]  ;;  %v1024_v36 = vld [vmem:[%s1370_s7 + $0x78] sm:$0xf0]  ;;  %v1193_v37 = vld [vmem:[%s1370_s7 + $0xc4] sm:$0xf0]  ;;  %v999_v42 = vor.u32 %v1177_v31, %v998_v30 }
  0x30   : > { %647 = vmatpush.bf16.msra.mxu1 %v1079_v21  ;;  %v1126_v38 = vld [vmem:[%s1370_s7 + $0x140] sm:$0xf]  ;;  %v1209_v39 = vld [vmem:[%s1370_s7 + $0x144] sm:$0xf0]  ;;  %v1027_v40 = vor.u32 %v1182_v35, %v1024_v36  ;;  %v1180_v41 = vld [vmem:[%s1370_s7 + $0x64] sm:$0xf]  ;;  %v1063_v46 = vor.u32 %v1193_v37, %v1062_v34 }
  0x31   : > { %661 = vmatpush.bf16.msra.mxu2 %v1143_v22  ;;  %v990_v43 = vld [vmem:[%s1370_s7 + $0x30] sm:$0xf]  ;;  %v1175_v44 = vld [vmem:[%s1370_s7 + $0x34] sm:$0xf0]  ;;  %v1016_v45 = vld [vmem:[%s1370_s7 + $0x68] sm:$0xf0]  ;;  %v1127_v47 = vor.u32 %v1209_v39, %v1126_v38 }
  0x32   : > { %674 = vmatpush.bf16.msra.mxu3 %v1027_v40  ;;  %v1054_v48 = vld [vmem:[%s1370_s7 + $0xb0] sm:$0xf]  ;;  %v1191_v49 = vld [vmem:[%s1370_s7 + $0xb4] sm:$0xf0]  ;;  %v1019_v51 = vor.u32 %v1180_v41, %v1016_v45  ;;  %v1178_v53 = vld [vmem:[%s1370_s7 + $0x54] sm:$0xf]  ;;  %v991_v55 = vor.u32 %v1175_v44, %v990_v43 }
  0x33   : > { %634 = vmatpush.bf16.msra.mxu0 %v1007_v29  ;;  %v1118_v50 = vld [vmem:[%s1370_s7 + $0x130] sm:$0xf]  ;;  %v1207_v52 = vld [vmem:[%s1370_s7 + $0x134] sm:$0xf0]  ;;  %v1008_v54 = vld [vmem:[%s1370_s7 + $0x58] sm:$0xf0]  ;;  %v1055_v59 = vor.u32 %v1191_v49, %v1054_v48 }
  0x34   : > { %648 = vmatpush.bf16.msra.mxu1 %v1071_v32  ;;  %v982_v56 = vld [vmem:[%s1370_s7 + $0x20] sm:$0xf]  ;;  %v1173_v57 = vld [vmem:[%s1370_s7 + $0x24] sm:$0xf0]  ;;  %v1011_v58 = vor.u32 %v1178_v53, %v1008_v54  ;;  %v1119_v60 = vor.u32 %v1207_v52, %v1118_v50  ;;  %v1176_v62 = vld [vmem:[%s1370_s7 + $0x44] sm:$0xf] }
  0x35   : > { %662 = vmatpush.bf16.msra.mxu2 %v1135_v33  ;;  %v1046_v61 = vld [vmem:[%s1370_s7 + $0xa0] sm:$0xf]  ;;  %v1000_v63 = vld [vmem:[%s1370_s7 + $0x48] sm:$0xf0]  ;;  %v1189_v0 = vld [vmem:[%s1370_s7 + $0xa4] sm:$0xf0]  ;;  %v983_v3 = vor.u32 %v1173_v57, %v982_v56 }
  0x36   : > { %675 = vmatpush.bf16.msra.mxu3 %v1019_v51  ;;  %v1110_v1 = vld [vmem:[%s1370_s7 + $0x120] sm:$0xf]  ;;  %v1205_v2 = vld [vmem:[%s1370_s7 + $0x124] sm:$0xf0]  ;;  %v974_v4 = vld [vmem:[%s1370_s7 + $0x10] sm:$0xf]  ;;  %v1003_v6 = vor.u32 %v1176_v62, %v1000_v63  ;;  %v1047_v7 = vor.u32 %v1189_v0, %v1046_v61 }
  0x37   : > { %635 = vmatpush.bf16.msra.mxu0 %v999_v42  ;;  %v1171_v5 = vld [vmem:[%s1370_s7 + $0x14] sm:$0xf0]  ;;  %v1111_v8 = vor.u32 %v1205_v2, %v1110_v1  ;;  %v1038_v9 = vld [vmem:[%s1370_s7 + $0x90] sm:$0xf]  ;;  %v1174_v10 = vld [vmem:[%s1370_s7 + $0x34] sm:$0xf] }
  0x38   : > { %649 = vmatpush.bf16.msra.mxu1 %v1063_v46  ;;  %v992_v11 = vld [vmem:[%s1370_s7 + $0x38] sm:$0xf0]  ;;  %v1187_v12 = vld [vmem:[%s1370_s7 + $0x94] sm:$0xf0]  ;;  %v1102_v13 = vld [vmem:[%s1370_s7 + $0x110] sm:$0xf]  ;;  %v975_v15 = vor.u32 %v1171_v5, %v974_v4 }
  0x39   : > { %663 = vmatpush.bf16.msra.mxu2 %v1127_v47  ;;  %v1203_v14 = vld [vmem:[%s1370_s7 + $0x114] sm:$0xf0]  ;;  %v966_v16 = vld [vmem:[%s1370_s7] sm:$0xf]  ;;  %v1169_v17 = vld [vmem:[%s1370_s7 + $0x4] sm:$0xf0]  ;;  %v995_v19 = vor.u32 %v1174_v10, %v992_v11  ;;  %v1039_v20 = vor.u32 %v1187_v12, %v1038_v9 }
  0x3a   : > { %676 = vmatpush.bf16.msra.mxu3 %v1011_v58  ;;  %v1030_v18 = vld [vmem:[%s1370_s7 + $0x80] sm:$0xf]  ;;  %v1103_v21 = vor.u32 %v1203_v14, %v1102_v13  ;;  %v1185_v22 = vld [vmem:[%s1370_s7 + $0x84] sm:$0xf0]  ;;  %v1172_v23 = vld [vmem:[%s1370_s7 + $0x24] sm:$0xf]  ;;  %v967_v31 = vor.u32 %v1169_v17, %v966_v16 }
  0x3b   : > { %636 = vmatpush.bf16.msra.mxu0 %v991_v55  ;;  %v984_v24 = vld [vmem:[%s1370_s7 + $0x28] sm:$0xf0]  ;;  %v1094_v25 = vld [vmem:[%s1370_s7 + $0x100] sm:$0xf]  ;;  %v1201_v26 = vld [vmem:[%s1370_s7 + $0x104] sm:$0xf0]  ;;  %v1031_v36 = vor.u32 %v1185_v22, %v1030_v18 }
  0x3c   : > { %650 = vmatpush.bf16.msra.mxu1 %v1055_v59  ;;  %v1198_v27 = vld [vmem:[%s1370_s7 + $0xf4] sm:$0xf]  ;;  %v1088_v28 = vld [vmem:[%s1370_s7 + $0xf8] sm:$0xf0]  ;;  %v962_v32 = vld [vmem:[%s1372_s8 + $0x8] sm:$0xf]  ;;  %v987_v33 = vor.u32 %v1172_v23, %v984_v24  ;;  %v1095_v37 = vor.u32 %v1201_v26, %v1094_v25 }
  0x3d   : > { %664 = vmatpush.bf16.msra.mxu2 %v1119_v60  ;;  %v1214_v29 = vld [vmem:[%s1370_s7 + $0x174] sm:$0xf]  ;;  %v1152_v30 = vld [vmem:[%s1370_s7 + $0x178] sm:$0xf0]  ;;  %v954_v34 = vld [vmem:[%s1372_s8] sm:$0xf]  ;;  %v1091_v41 = vor.u32 %v1198_v27, %v1088_v28 }
  0x3e   : > { %677 = vmatpush.bf16.msra.mxu3 %v1003_v6  ;;  %v1166_v35 = vld [vmem:[%s1372_s8 + $0x8] sm:$0xf0]  ;;  %v1167_v38 = vld [vmem:[%s1372_s8 + $0x10] sm:$0xf0]  ;;  %v1165_v39 = vld [vmem:[%s1372_s8 + $0x4] sm:$0xf]  ;;  %v1155_v42 = vor.u32 %v1214_v29, %v1152_v30 }
  0x3f   : > { %637 = vmatpush.bf16.msra.mxu0 %v983_v3  ;;  %v956_v40 = vld [vmem:[%s1372_s8 + $0xc] sm:$0xf0]  ;;  %v1196_v43 = vld [vmem:[%s1370_s7 + $0xe4] sm:$0xf]  ;;  %v1170_v44 = vld [vmem:[%s1370_s7 + $0x14] sm:$0xf]  ;;  %v955_v49 = vor.u32 %v1166_v35, %v954_v34  ;;  %v1451_v50 = vor.u32 %v1167_v38, %v962_v32 }
  0x40   : > { %651 = vmatpush.bf16.msra.mxu1 %v1047_v7  ;;  %v976_v45 = vld [vmem:[%s1370_s7 + $0x18] sm:$0xf0]  ;;  %v1080_v46 = vld [vmem:[%s1370_s7 + $0xe8] sm:$0xf0]  ;;  %v1212_v47 = vld [vmem:[%s1370_s7 + $0x164] sm:$0xf]  ;;  %v1453_v51 = vor.u32 %v1165_v39, %v956_v40 }
  0x41   : > { %665 = vmatpush.bf16.msra.mxu2 %v1111_v8  ;;  %v1144_v48 = vld [vmem:[%s1370_s7 + $0x168] sm:$0xf0]  ;;  %v979_v52 = vor.u32 %v1170_v44, %v976_v45  ;;  %v1083_v53 = vor.u32 %v1196_v43, %v1080_v46  ;;  %v1194_v55 = vld [vmem:[%s1370_s7 + $0xd4] sm:$0xf]  ;;  %v1168_v56 = vld [vmem:[%s1370_s7 + $0x4] sm:$0xf] }
  0x42   : > { %678 = vmatpush.bf16.msra.mxu3 %v995_v19  ;;  %v1147_v54 = vor.u32 %v1212_v47, %v1144_v48  ;;  %v968_v57 = vld [vmem:[%s1370_s7 + $0x8] sm:$0xf0]  ;;  %v1072_v58 = vld [vmem:[%s1370_s7 + $0xd8] sm:$0xf0]  ;;  %v1210_v59 = vld [vmem:[%s1370_s7 + $0x154] sm:$0xf] }
  0x43   : > { %638 = vmatpush.bf16.msra.mxu0 %v975_v15  ;;  %v1136_v60 = vld [vmem:[%s1370_s7 + $0x158] sm:$0xf0]  ;;  %v971_v61 = vor.u32 %v1168_v56, %v968_v57  ;;  %v1075_v62 = vor.u32 %v1194_v55, %v1072_v58  ;;  %v1192_v0 = vld [vmem:[%s1370_s7 + $0xc4] sm:$0xf]  ;;  %v1064_v1 = vld [vmem:[%s1370_s7 + $0xc8] sm:$0xf0] }
  0x44   : > { %652 = vmatpush.bf16.msra.mxu1 %v1039_v20  ;;  %v1139_v63 = vor.u32 %v1210_v59, %v1136_v60  ;;  %v1208_v2 = vld [vmem:[%s1370_s7 + $0x144] sm:$0xf]  ;;  %v1128_v3 = vld [vmem:[%s1370_s7 + $0x148] sm:$0xf0]  ;;  %v1067_v4 = vor.u32 %v1192_v0, %v1064_v1  ;;  %v1190_v6 = vld [vmem:[%s1370_s7 + $0xb4] sm:$0xf] }
  0x45   : > { %666 = vmatpush.bf16.msra.mxu2 %v1103_v21  ;;  %v1131_v5 = vor.u32 %v1208_v2, %v1128_v3  ;;  %v1056_v7 = vld [vmem:[%s1370_s7 + $0xb8] sm:$0xf0]  ;;  %v1206_v8 = vld [vmem:[%s1370_s7 + $0x134] sm:$0xf]  ;;  %v1188_v12 = vld [vmem:[%s1370_s7 + $0xa4] sm:$0xf] }
  0x46   : > { %679 = vmatpush.bf16.msra.mxu3 %v987_v33  ;;  %v1120_v9 = vld [vmem:[%s1370_s7 + $0x138] sm:$0xf0]  ;;  %v1059_v10 = vor.u32 %v1190_v6, %v1056_v7  ;;  %v1048_v13 = vld [vmem:[%s1370_s7 + $0xa8] sm:$0xf0]  ;;  %v1204_v14 = vld [vmem:[%s1370_s7 + $0x124] sm:$0xf] }
  0x47   : > { %639 = vmatpush.bf16.msra.mxu0 %v967_v31  ;;  %v1123_v11 = vor.u32 %v1206_v8, %v1120_v9  ;;  %v1112_v15 = vld [vmem:[%s1370_s7 + $0x128] sm:$0xf0]  ;;  %v1051_v16 = vor.u32 %v1188_v12, %v1048_v13  ;;  %v1186_v18 = vld [vmem:[%s1370_s7 + $0x94] sm:$0xf]  ;;  %v1040_v19 = vld [vmem:[%s1370_s7 + $0x98] sm:$0xf0] }
  0x48   : > { %653 = vmatpush.bf16.msra.mxu1 %v1031_v36  ;;  %v1115_v17 = vor.u32 %v1204_v14, %v1112_v15  ;;  %v1202_v20 = vld [vmem:[%s1370_s7 + $0x114] sm:$0xf]  ;;  %v1104_v21 = vld [vmem:[%s1370_s7 + $0x118] sm:$0xf0]  ;;  %v1043_v22 = vor.u32 %v1186_v18, %v1040_v19  ;;  %v1184_v24 = vld [vmem:[%s1370_s7 + $0x84] sm:$0xf] }
  0x49   : > { %667 = vmatpush.bf16.msra.mxu2 %v1095_v37  ;;  %v1107_v23 = vor.u32 %v1202_v20, %v1104_v21  ;;  %v1032_v25 = vld [vmem:[%s1370_s7 + $0x88] sm:$0xf0]  ;;  %v1200_v26 = vld [vmem:[%s1370_s7 + $0x104] sm:$0xf]  ;;  %v320_v33 = vld [vmem:[#allocation2 + $0x10] sm:$0xff]  ;;  %p1156_p11 = scmp.ne.s32.totalorder %s1289_s14, 2 }
  0x4a   : > { %640 = vmatmul.bf16.vlgmr.msra.gmra.mxu0 %v955_v49  ;;  %680 = vmatpush.bf16.msra.mxu3 %v979_v52  ;;  %v1096_v27 = vld [vmem:[%s1370_s7 + $0x108] sm:$0xf0]  ;;  %v1035_v28 = vor.u32 %v1184_v24, %v1032_v25  ;;  %v322_v40 = vld [vmem:[#allocation2 + $0x18] sm:$0xff]  ;;  %v321_v48 = vld [vmem:[#allocation2] sm:$0xff] }
  0x4b   : > { %688 = vmatpush.bf16.msrb.mxu0 %v1091_v41  ;;  %654 = vmatmul.bf16.vlgmr.msra.gmra.mxu1 %v1453_v51  ;;  %v1099_v29 = vor.u32 %v1200_v26, %v1096_v27 }
  0x4c   : > { %702 = vmatpush.bf16.msrb.mxu1 %v1155_v42  ;;  %668 = vmatmul.bf16.vlgmr.msra.gmra.mxu2 %v1451_v50 }
  0x4e   : > { %681 = vmatpush.bf16.msra.mxu3 %v971_v61 }
  0x4f   : > { %689 = vmatpush.bf16.msrb.mxu0 %v1083_v53 }
  0x50   : > { %703 = vmatpush.bf16.msrb.mxu1 %v1147_v54  ;;  %v323_v54 = vld [vmem:[#allocation2 + $0x8] sm:$0xff] }
  0x51   : > { %682 = vmatmul.bf16.vlgmr.msra.gmra.mxu3 %v955_v49 }
  0x53   : > { %690 = vmatpush.bf16.msrb.mxu0 %v1075_v62 }
  0x54   : > { %704 = vmatpush.bf16.msrb.mxu1 %v1139_v63 }
  0x57   : > { %691 = vmatpush.bf16.msrb.mxu0 %v1067_v4 }
  0x58   : > { %705 = vmatpush.bf16.msrb.mxu1 %v1131_v5 }
  0x5b   : > { %692 = vmatpush.bf16.msrb.mxu0 %v1059_v10 }
  0x5c   : > { %706 = vmatpush.bf16.msrb.mxu1 %v1123_v11 }
  0x5f   : > { %693 = vmatpush.bf16.msrb.mxu0 %v1051_v16 }
  0x60   : > { %707 = vmatpush.bf16.msrb.mxu1 %v1115_v17 }
  0x63   : > { %694 = vmatpush.bf16.msrb.mxu0 %v1043_v22 }
  0x64   : > { %708 = vmatpush.bf16.msrb.mxu1 %v1107_v23 }
  0x67   : > { %695 = vmatpush.bf16.msrb.mxu0 %v1035_v28 }
  0x68   : > { %709 = vmatpush.bf16.msrb.mxu1 %v1099_v29 }
  0x6a   : > { %696 = vmatmul.bf16.vlgmr.msrb.gmra.mxu0 %v1453_v51 }
  0x6b   : > { %710 = vmatmul.bf16.vlgmr.msrb.gmra.mxu1 %v1451_v50 }
  0xc7   : > { %v641_v30 = vpop.f32.mrf.mxu0 }
  0xc8   : > { %v655_v31 = vpop.f32.mrf.mxu1 }
  0xc9   : > { %v656_v32 = vadd.f32 %v655_v31, %v641_v30 }
  0xcf   : > { %v669_v34 = vpop.f32.mrf.mxu2  ;;  %v643_v36 = vpop.f32.mrf.mxu0 }
  0xd0   : > { %v670_v35 = vadd.f32 %v669_v34, %v656_v32  ;;  %v657_v37 = vpop.f32.mrf.mxu1 }
  0xd1   : > { %v658_v39 = vadd.f32 %v657_v37, %v643_v36 }
  0xd2   : > { %v716_v38 = vadd.f32 %v670_v35, %v320_v33 }
  0xd4   : > { %720 = vst [vmem:[#allocation2 + $0x10] sm:$0xff] %v716_v38  ;;  %v683_v44 = vpop.f32.mrf.mxu3 }
  0xd7   : > { %v671_v41 = vpop.f32.mrf.mxu2 }
  0xd8   : > { %v672_v42 = vadd.f32 %v671_v41, %v658_v39 }
  0xda   : > { %v718_v43 = vadd.f32 %v672_v42, %v322_v40 }
  0xdc   : > { %722 = vst [vmem:[#allocation2 + $0x18] sm:$0xff] %v718_v43  ;;  %v685_v51 = vpop.f32.mrf.mxu3 }
  0xe7   : > { %v697_v45 = vpop.f32.mrf.mxu0 }
  0xe8   : > { %v711_v46 = vpop.f32.mrf.mxu1  ;;  %v698_v47 = vadd.f32 %v697_v45, %v683_v44 }
  0xea   : > { %v712_v49 = vadd.f32 %v711_v46, %v698_v47 }
  0xec   : > { %v717_v50 = vadd.f32 %v712_v49, %v321_v48 }
  0xee   : > { %721 = vst [vmem:[#allocation2] sm:$0xff] %v717_v50 }
  0xef   : > { %v699_v52 = vpop.f32.mrf.mxu0 }
  0xf0   : > { %v700_v53 = vadd.f32 %v699_v52, %v685_v51  ;;  %v713_v55 = vpop.f32.mrf.mxu1 }
  0xf2   : > { %v714_v56 = vadd.f32 %v713_v55, %v700_v53  ;;  %727 = sbr.rel (%p1156_p11) target bundleno = 275 (0x113), region = 62 }
  0xf4   : > { %v719_v57 = vadd.f32 %v714_v56, %v323_v54 }
  0xf6   : > { %723 = vst [vmem:[#allocation2 + $0x8] sm:$0xff] %v719_v57 }
  0xf7   : > { %v728_v58 = vld [vmem:[#allocation2 + $0x10] sm:$0xff]  ;;  %v729_v59 = vld [vmem:[#allocation2] sm:$0xff]  ;;  %v730_v60 = vld [vmem:[#allocation2 + $0x18] sm:$0xff]  ;;  %vm768_vm0 = vcmask 1040384   ;;  %vm774_vm1 = vcmask 1041408  }
  0xf8   : > { %v732_v61 = vpack.c.bf16 %v729_v59, %v728_v58  ;;  %v750_v62 = vmul.f32 %v728_v58, %v728_v58  ;;  %v751_v63 = vmul.f32 %v729_v59, %v729_v59  ;;  %v736_v1 = vadd.f32 %v730_v60, %v728_v58 }
  0xf9   : > { %v752_v4 = vmul.f32 %v730_v60, %v730_v60 }
  0xfa   : > { %734 = vst [vmem:[%s1512_s2] sm:$0xff] %v732_v61  ;;  %v737_v6 = vrot.slane %v736_v1, 4 }
  0xfb   : > { %v754_v8 = vadd.f32 %v752_v4, %v750_v62 }
  0xfc   : > { %v738_v10 = vadd.f32 %v737_v6, %v736_v1 }
  0xfd   : > { %v731_v0 = vld [vmem:[#allocation2 + $0x8] sm:$0xff]  ;;  %v755_v12 = vrot.slane %v754_v8, 4 }
  0xfe   : > { %v733_v2 = vpack.c.bf16 %v731_v0, %v730_v60  ;;  %v743_v3 = vadd.f32 %v731_v0, %v729_v59  ;;  %v753_v5 = vmul.f32 %v731_v0, %v731_v0  ;;  %v739_v14 = vrot.slane %v738_v10, 2 }
  0xff   : > { %v756_v16 = vadd.f32 %v755_v12, %v754_v8 }
 0x100   : > { %735 = vst [vmem:[%s1512_s2 + $0x8] sm:$0xff] %v733_v2  ;;  %v744_v7 = vrot.slane %v743_v3, 4  ;;  %v761_v9 = vadd.f32 %v753_v5, %v751_v63  ;;  %v740_v18 = vadd.f32 %v739_v14, %v738_v10 }
 0x101   : > { %v757_v21 = vrot.slane %v756_v16, 2 }
 0x102   : > { %v745_v11 = vadd.f32 %v744_v7, %v743_v3  ;;  %v762_v13 = vrot.slane %v761_v9, 4  ;;  %v741_v22 = vrot.slane %v740_v18, 1 }
 0x103   : > { %v758_v25 = vadd.f32 %v757_v21, %v756_v16 }
 0x104   : > { %v746_v15 = vrot.slane %v745_v11, 2  ;;  %v763_v17 = vadd.f32 %v762_v13, %v761_v9  ;;  %v742_v26 = vadd.f32 %v741_v22, %v740_v18 }
 0x105   : > { %v759_v28 = vrot.slane %v758_v25, 1 }
 0x106   : > { %v747_v19 = vadd.f32 %v746_v15, %v745_v11  ;;  %v764_v20 = vrot.slane %v763_v17, 2 }
 0x107   : > { %v760_v30 = vadd.f32 %v759_v28, %v758_v25 }
 0x108   : > { %v748_v23 = vrot.slane %v747_v19, 1  ;;  %v765_v24 = vadd.f32 %v764_v20, %v763_v17 }
 0x109   : > { %v769_v32 = vsel %vm768_vm0, %v742_v26, %v760_v30 }
 0x10a   : > { %v749_v27 = vadd.f32 %v748_v23, %v747_v19  ;;  %v766_v29 = vrot.slane %v765_v24, 1 }
 0x10c   : > { %v767_v31 = vadd.f32 %v766_v29, %v765_v24 }
 0x10e   : > { %v770_v33 = vsel %vm768_vm0, %v749_v27, %v767_v31 }
 0x10f   : > { %v773_v34 = vrot.slane %v770_v33, 6 }
 0x111   : > { %v775_v35 = vsel %vm774_vm1, %v769_v32, %v773_v34 }
 0x112   : > { %777 = vst [vmem:[%s1513_s3] sm:$0xf] %v775_v35 }
 0x113 PF: > { %s14_s16 = sadd.s32 1, %s1297_s16   ;;  %s1514_s12 = smov %s1285_s13 }
 0x114   : > { %p11_p12 = scmp.ge.s32.totalorder %s14_s16, 5   ;;  %s1515_s13 = smov %s1355_s20 }
 0x115   : > { %s1516_s14 = smov %s1293_s15  ;;  %s1517_s15 = smov %s1519_s17 }
 0x116   :  { %13 = sbr.rel (!%p11_p12) target bundleno = 3 (0x3), region = 118 }

// kernel: _lambda_.40
= control target key start
LH: loop header
LB: loop body
LE: loop exit
PB: predicated region body
PF: predicated region fallthrough
CT: control target
= control target key end

     0   :  { %s86_s0 = inlined_call_operand.vmem [shape: bf16[16,256], index: 0, kind: input, shape index: {}]   ;;  %s87_s1 = inlined_call_operand.vmem [shape: f32[1,256], index: 1, kind: input, shape index: {}]   ;;  %s88_s2 = inlined_call_operand.vmem [shape: f32[1,256], index: 2, kind: input, shape index: {}]   ;;  %s89_s3 = inlined_call_operand.vmem [shape: bf16[16,256], index: 3, kind: output, shape index: {}]  }
   0x1   :  { %v14_v0 = vld [vmem:[%s86_s0] sm:$0xff]  ;;  %v15_v7 = vld [vmem:[%s86_s0 + $0x8] sm:$0xff] }
   0x2   :  { %v20_v1 = vld [vmem:[%s87_s1] sm:$0x3]  ;;  %v16_v3 = vunpack.c.l.bf16 %v14_v0  ;;  %v17_v4 = vunpack.c.h.bf16 %v14_v0  ;;  %v18_v10 = vunpack.c.l.bf16 %v15_v7  ;;  %v19_v11 = vunpack.c.h.bf16 %v15_v7 }
   0x3   :  { %v30_v2 = vld [vmem:[%s88_s2] sm:$0x3]  ;;  %v22_v5 = vperm.slane %v20_v1, 0  ;;  %v23_v6 = vperm.slane %v20_v1, 1 }
   0x4   :  { %v32_v8 = vperm.slane %v30_v2, 0  ;;  %v33_v9 = vperm.slane %v30_v2, 1 }
   0x5   :  { %v26_v12 = vmul.f32 %v22_v5, %v16_v3  ;;  %v27_v13 = vmul.f32 %v23_v6, %v17_v4  ;;  %v28_v14 = vmul.f32 %v22_v5, %v18_v10  ;;  %v29_v15 = vmul.f32 %v23_v6, %v19_v11 }
   0x7   :  { %v36_v16 = vadd.f32 %v32_v8, %v26_v12  ;;  %v37_v17 = vadd.f32 %v33_v9, %v27_v13  ;;  %v38_v18 = vadd.f32 %v32_v8, %v28_v14  ;;  %v39_v19 = vadd.f32 %v33_v9, %v29_v15 }
   0x9   :  { %v40_v20 = vpack.c.bf16 %v37_v17, %v36_v16  ;;  %v41_v21 = vpack.c.bf16 %v39_v19, %v38_v18 }
   0xb   :  { %42 = vst [vmem:[%s89_s3] sm:$0xff] %v40_v20 }
   0xc   :  { %43 = vst [vmem:[%s89_s3 + $0x8] sm:$0xff] %v41_v21 }

// kernel: _lambda_.39
= control target key start
LH: loop header
LB: loop body
LE: loop exit
PB: predicated region body
PF: predicated region fallthrough
CT: control target
= control target key end

     0   :  { %vm208_vm0 = vcmask 1040384   ;;  %vm214_vm1 = vcmask 1041408   ;;  %s439_s1 = inlined_call_operand.vmem [shape: bf16[128,256], index: 1, kind: input, shape index: {}]   ;;  %s440_s0 = inlined_call_operand.vmem [shape: bf16[16,128], index: 0, kind: input, shape index: {}]   ;;  %s441_s2 = inlined_call_operand.vmem [shape: bf16[16,256], index: 2, kind: output, shape index: {0}]   ;;  %s442_s3 = inlined_call_operand.vmem [shape: f32[1,2,256], index: 3, kind: output, shape index: {1}]  }
   0x1   :  { %v288_v0 = vld [vmem:[%s439_s1 + $0x70] sm:$0xf]  ;;  %v310_v1 = vld [vmem:[%s439_s1 + $0x74] sm:$0xf0]  ;;  %v309_v2 = vld [vmem:[%s439_s1 + $0x74] sm:$0xf] }
   0x2   :  { %v289_v3 = vor.u32 %v310_v1, %v288_v0  ;;  %v290_v4 = vld [vmem:[%s439_s1 + $0x78] sm:$0xf0]  ;;  %v280_v5 = vld [vmem:[%s439_s1 + $0x60] sm:$0xf]  ;;  %v308_v6 = vld [vmem:[%s439_s1 + $0x64] sm:$0xf0] }
   0x3   :  { %v293_v7 = vor.u32 %v309_v2, %v290_v4  ;;  %v307_v8 = vld [vmem:[%s439_s1 + $0x64] sm:$0xf]  ;;  %v282_v9 = vld [vmem:[%s439_s1 + $0x68] sm:$0xf0]  ;;  %v281_v10 = vor.u32 %v308_v6, %v280_v5  ;;  %v272_v12 = vld [vmem:[%s439_s1 + $0x50] sm:$0xf] }
   0x4   :  { %129 = vmatpush.bf16.msra.mxu0 %v289_v3  ;;  %v285_v11 = vor.u32 %v307_v8, %v282_v9  ;;  %v306_v13 = vld [vmem:[%s439_s1 + $0x54] sm:$0xf0]  ;;  %v305_v14 = vld [vmem:[%s439_s1 + $0x54] sm:$0xf]  ;;  %v274_v15 = vld [vmem:[%s439_s1 + $0x58] sm:$0xf0] }
   0x5   :  { %143 = vmatpush.bf16.msra.mxu1 %v293_v7  ;;  %v273_v16 = vor.u32 %v306_v13, %v272_v12  ;;  %v277_v17 = vor.u32 %v305_v14, %v274_v15  ;;  %v264_v18 = vld [vmem:[%s439_s1 + $0x40] sm:$0xf]  ;;  %v304_v19 = vld [vmem:[%s439_s1 + $0x44] sm:$0xf0]  ;;  %v303_v20 = vld [vmem:[%s439_s1 + $0x44] sm:$0xf] }
   0x6   :  { %v266_v21 = vld [vmem:[%s439_s1 + $0x48] sm:$0xf0]  ;;  %v265_v22 = vor.u32 %v304_v19, %v264_v18  ;;  %v256_v24 = vld [vmem:[%s439_s1 + $0x30] sm:$0xf]  ;;  %v302_v25 = vld [vmem:[%s439_s1 + $0x34] sm:$0xf0] }
   0x7   :  { %v269_v23 = vor.u32 %v303_v20, %v266_v21  ;;  %v301_v26 = vld [vmem:[%s439_s1 + $0x34] sm:$0xf]  ;;  %v258_v27 = vld [vmem:[%s439_s1 + $0x38] sm:$0xf0]  ;;  %v257_v28 = vor.u32 %v302_v25, %v256_v24  ;;  %v248_v30 = vld [vmem:[%s439_s1 + $0x20] sm:$0xf] }
   0x8   :  { %130 = vmatpush.bf16.msra.mxu0 %v281_v10  ;;  %v261_v29 = vor.u32 %v301_v26, %v258_v27  ;;  %v300_v31 = vld [vmem:[%s439_s1 + $0x24] sm:$0xf0]  ;;  %v299_v32 = vld [vmem:[%s439_s1 + $0x24] sm:$0xf]  ;;  %v250_v33 = vld [vmem:[%s439_s1 + $0x28] sm:$0xf0] }
   0x9   :  { %144 = vmatpush.bf16.msra.mxu1 %v285_v11  ;;  %v249_v34 = vor.u32 %v300_v31, %v248_v30  ;;  %v253_v35 = vor.u32 %v299_v32, %v250_v33  ;;  %v240_v36 = vld [vmem:[%s439_s1 + $0x10] sm:$0xf]  ;;  %v298_v37 = vld [vmem:[%s439_s1 + $0x14] sm:$0xf0]  ;;  %v297_v38 = vld [vmem:[%s439_s1 + $0x14] sm:$0xf] }
   0xa   :  { %v242_v39 = vld [vmem:[%s439_s1 + $0x18] sm:$0xf0]  ;;  %v241_v40 = vor.u32 %v298_v37, %v240_v36  ;;  %v232_v42 = vld [vmem:[%s439_s1] sm:$0xf]  ;;  %v296_v43 = vld [vmem:[%s439_s1 + $0x4] sm:$0xf0] }
   0xb   :  { %v245_v41 = vor.u32 %v297_v38, %v242_v39  ;;  %v295_v44 = vld [vmem:[%s439_s1 + $0x4] sm:$0xf]  ;;  %v234_v45 = vld [vmem:[%s439_s1 + $0x8] sm:$0xf0]  ;;  %v233_v46 = vor.u32 %v296_v43, %v232_v42 }
   0xc   :  { %131 = vmatpush.bf16.msra.mxu0 %v273_v16  ;;  %v237_v47 = vor.u32 %v295_v44, %v234_v45  ;;  %v294_v48 = vld [vmem:[%s440_s0] sm:$0xff] }
   0xd   :  { %145 = vmatpush.bf16.msra.mxu1 %v277_v17 }
  0x10   :  { %132 = vmatpush.bf16.msra.mxu0 %v265_v22 }
  0x11   :  { %146 = vmatpush.bf16.msra.mxu1 %v269_v23 }
  0x14   :  { %133 = vmatpush.bf16.msra.mxu0 %v257_v28 }
  0x15   :  { %147 = vmatpush.bf16.msra.mxu1 %v261_v29 }
  0x18   :  { %134 = vmatpush.bf16.msra.mxu0 %v249_v34 }
  0x19   :  { %148 = vmatpush.bf16.msra.mxu1 %v253_v35 }
  0x1c   :  { %135 = vmatpush.bf16.msra.mxu0 %v241_v40 }
  0x1d   :  { %149 = vmatpush.bf16.msra.mxu1 %v245_v41 }
  0x20   :  { %136 = vmatpush.bf16.msra.mxu0 %v233_v46 }
  0x21   :  { %150 = vmatpush.bf16.msra.mxu1 %v237_v47 }
  0x23   :  { %137 = vmatmul.bf16.vlgmr.msra.gmra.mxu0 %v294_v48 }
  0x24   :  { %151 = vmatmul.bf16.vlgmr.msra.gmra.mxu1 %v294_v48 }
  0xa0   :  { %v138_v49 = vpop.f32.mrf.mxu0 }
  0xa1   :  { %v152_v50 = vpop.f32.mrf.mxu1  ;;  %v190_v53 = vmul.f32 %v138_v49, %v138_v49 }
  0xa2   :  { %v172_v51 = vpack.c.bf16 %v152_v50, %v138_v49  ;;  %v191_v57 = vmul.f32 %v152_v50, %v152_v50 }
  0xa4   :  { %174 = vst [vmem:[%s441_s2] sm:$0xff] %v172_v51 }
  0xa8   :  { %v140_v52 = vpop.f32.mrf.mxu0 }
  0xa9   :  { %v176_v54 = vadd.f32 %v140_v52, %v138_v49  ;;  %v192_v55 = vmul.f32 %v140_v52, %v140_v52  ;;  %v154_v56 = vpop.f32.mrf.mxu1 }
  0xaa   :  { %v173_v58 = vpack.c.bf16 %v154_v56, %v140_v52  ;;  %v183_v59 = vadd.f32 %v154_v56, %v152_v50  ;;  %v193_v60 = vmul.f32 %v154_v56, %v154_v56 }
  0xab   :  { %v177_v61 = vrot.slane %v176_v54, 4  ;;  %v194_v62 = vadd.f32 %v192_v55, %v190_v53 }
  0xac   :  { %175 = vst [vmem:[%s441_s2 + $0x8] sm:$0xff] %v173_v58  ;;  %v184_v63 = vrot.slane %v183_v59, 4  ;;  %v201_v0 = vadd.f32 %v193_v60, %v191_v57 }
  0xad   :  { %v178_v1 = vadd.f32 %v177_v61, %v176_v54  ;;  %v195_v2 = vrot.slane %v194_v62, 4 }
  0xae   :  { %v185_v3 = vadd.f32 %v184_v63, %v183_v59  ;;  %v202_v4 = vrot.slane %v201_v0, 4 }
  0xaf   :  { %v179_v5 = vrot.slane %v178_v1, 2  ;;  %v196_v6 = vadd.f32 %v195_v2, %v194_v62 }
  0xb0   :  { %v186_v7 = vrot.slane %v185_v3, 2  ;;  %v203_v8 = vadd.f32 %v202_v4, %v201_v0 }
  0xb1   :  { %v197_v9 = vrot.slane %v196_v6, 2  ;;  %v180_v10 = vadd.f32 %v179_v5, %v178_v1 }
  0xb2   :  { %v187_v11 = vadd.f32 %v186_v7, %v185_v3  ;;  %v204_v12 = vrot.slane %v203_v8, 2 }
  0xb3   :  { %v198_v13 = vadd.f32 %v197_v9, %v196_v6  ;;  %v181_v17 = vrot.slane %v180_v10, 1 }
  0xb4   :  { %v188_v14 = vrot.slane %v187_v11, 1  ;;  %v205_v15 = vadd.f32 %v204_v12, %v203_v8 }
  0xb5   :  { %v199_v16 = vrot.slane %v198_v13, 1  ;;  %v182_v22 = vadd.f32 %v181_v17, %v180_v10 }
  0xb6   :  { %v206_v18 = vrot.slane %v205_v15, 1  ;;  %v189_v20 = vadd.f32 %v188_v14, %v187_v11 }
  0xb7   :  { %v200_v19 = vadd.f32 %v199_v16, %v198_v13 }
  0xb8   :  { %v207_v21 = vadd.f32 %v206_v18, %v205_v15 }
  0xb9   :  { %v209_v25 = vsel %vm208_vm0, %v182_v22, %v200_v19 }
  0xba   :  { %v210_v23 = vsel %vm208_vm0, %v189_v20, %v207_v21 }
  0xbb   :  { %v213_v24 = vrot.slane %v210_v23, 6 }
  0xbd   :  { %v215_v26 = vsel %vm214_vm1, %v209_v25, %v213_v24 }
  0xbe   :  { %217 = vst [vmem:[%s442_s3] sm:$0xf] %v215_v26 }

// kernel: _lambda_.42
= control target key start
LH: loop header
LB: loop body
LE: loop exit
PB: predicated region body
PF: predicated region fallthrough
CT: control target
= control target key end

     0   :  { %s90_s0 = inlined_call_operand.vmem [shape: bf16[16,256], index: 0, kind: input, shape index: {}]   ;;  %s91_s1 = inlined_call_operand.vmem [shape: f32[1,256], index: 1, kind: input, shape index: {}]   ;;  %s92_s2 = inlined_call_operand.vmem [shape: f32[1,256], index: 2, kind: input, shape index: {}]   ;;  %s93_s3 = inlined_call_operand.vmem [shape: bf16[16,256], index: 3, kind: output, shape index: {}]  }
   0x1   :  { %v14_v0 = vld [vmem:[%s90_s0] sm:$0xff]  ;;  %v15_v7 = vld [vmem:[%s90_s0 + $0x8] sm:$0xff] }
   0x2   :  { %v20_v1 = vld [vmem:[%s91_s1] sm:$0x3]  ;;  %v16_v3 = vunpack.c.l.bf16 %v14_v0  ;;  %v17_v4 = vunpack.c.h.bf16 %v14_v0  ;;  %v18_v10 = vunpack.c.l.bf16 %v15_v7  ;;  %v19_v11 = vunpack.c.h.bf16 %v15_v7 }
   0x3   :  { %v30_v2 = vld [vmem:[%s92_s2] sm:$0x3]  ;;  %v22_v5 = vperm.slane %v20_v1, 0  ;;  %v23_v6 = vperm.slane %v20_v1, 1 }
   0x4   :  { %v32_v8 = vperm.slane %v30_v2, 0  ;;  %v33_v9 = vperm.slane %v30_v2, 1 }
   0x5   :  { %v26_v12 = vmul.f32 %v22_v5, %v16_v3  ;;  %v27_v13 = vmul.f32 %v23_v6, %v17_v4  ;;  %v28_v14 = vmul.f32 %v22_v5, %v18_v10  ;;  %v29_v15 = vmul.f32 %v23_v6, %v19_v11 }
   0x7   :  { %v36_v16 = vadd.f32 %v32_v8, %v26_v12  ;;  %v37_v17 = vadd.f32 %v33_v9, %v27_v13  ;;  %v38_v18 = vadd.f32 %v32_v8, %v28_v14  ;;  %v39_v19 = vadd.f32 %v33_v9, %v29_v15 }
   0x9   :  { %v40_v20 = vmax.f32 %v36_v16, 0.0  ;;  %v41_v21 = vmax.f32 %v37_v17, 0.0  ;;  %v42_v22 = vmax.f32 %v38_v18, 0.0  ;;  %v43_v23 = vmax.f32 %v39_v19, 0.0 }
   0xb   :  { %v44_v24 = vpack.c.bf16 %v41_v21, %v40_v20  ;;  %v45_v25 = vpack.c.bf16 %v43_v23, %v42_v22 }
   0xd   :  { %46 = vst [vmem:[%s93_s3] sm:$0xff] %v44_v24 }
   0xe   :  { %47 = vst [vmem:[%s93_s3 + $0x8] sm:$0xff] %v45_v25 }

// kernel: _lambda_.44
= control target key start
LH: loop header
LB: loop body
LE: loop exit
PB: predicated region body
PF: predicated region fallthrough
CT: control target
= control target key end

     0   :  { %s114_s0 = inlined_call_operand.vmem [shape: bf16[16,256], index: 0, kind: input, shape index: {}]   ;;  %s115_s1 = inlined_call_operand.vmem [shape: bf16[16,256], index: 1, kind: input, shape index: {}]   ;;  %s116_s2 = inlined_call_operand.vmem [shape: f32[1,256], index: 2, kind: input, shape index: {}]   ;;  %s117_s3 = inlined_call_operand.vmem [shape: f32[1,256], index: 3, kind: input, shape index: {}]   ;;  %s118_s4 = inlined_call_operand.vmem [shape: bf16[16,256], index: 4, kind: output, shape index: {}]  }
   0x1   :  { %v17_v0 = vld [vmem:[%s114_s0] sm:$0xff]  ;;  %v18_v8 = vld [vmem:[%s114_s0 + $0x8] sm:$0xff] }
   0x2   :  { %v23_v1 = vld [vmem:[%s116_s2] sm:$0x3]  ;;  %v19_v3 = vunpack.c.l.bf16 %v17_v0  ;;  %v20_v4 = vunpack.c.h.bf16 %v17_v0  ;;  %v44_v9 = vld [vmem:[%s115_s1 + $0x8] sm:$0xff]  ;;  %v21_v16 = vunpack.c.l.bf16 %v18_v8  ;;  %v22_v17 = vunpack.c.h.bf16 %v18_v8 }
   0x3   :  { %v33_v2 = vld [vmem:[%s117_s3] sm:$0x3]  ;;  %v25_v5 = vperm.slane %v23_v1, 0  ;;  %v26_v6 = vperm.slane %v23_v1, 1  ;;  %v47_v18 = vunpack.c.l.bf16 %v44_v9  ;;  %v48_v19 = vunpack.c.h.bf16 %v44_v9 }
   0x4   :  { %v43_v7 = vld [vmem:[%s115_s1] sm:$0xff]  ;;  %v35_v10 = vperm.slane %v33_v2, 0  ;;  %v36_v11 = vperm.slane %v33_v2, 1 }
   0x5   :  { %v45_v12 = vunpack.c.l.bf16 %v43_v7  ;;  %v46_v13 = vunpack.c.h.bf16 %v43_v7  ;;  %v29_v14 = vmul.f32 %v25_v5, %v19_v3  ;;  %v30_v15 = vmul.f32 %v26_v6, %v20_v4 }
   0x6   :  { %v31_v22 = vmul.f32 %v25_v5, %v21_v16  ;;  %v32_v23 = vmul.f32 %v26_v6, %v22_v17 }
   0x7   :  { %v39_v20 = vadd.f32 %v35_v10, %v29_v14  ;;  %v40_v21 = vadd.f32 %v36_v11, %v30_v15 }
   0x8   :  { %v41_v26 = vadd.f32 %v35_v10, %v31_v22  ;;  %v42_v27 = vadd.f32 %v36_v11, %v32_v23 }
   0x9   :  { %v49_v24 = vadd.f32 %v45_v12, %v39_v20  ;;  %v50_v25 = vadd.f32 %v46_v13, %v40_v21 }
   0xa   :  { %v51_v30 = vadd.f32 %v47_v18, %v41_v26  ;;  %v52_v31 = vadd.f32 %v48_v19, %v42_v27 }
   0xb   :  { %v53_v28 = vmax.f32 %v49_v24, 0.0  ;;  %v54_v29 = vmax.f32 %v50_v25, 0.0 }
   0xc   :  { %v55_v33 = vmax.f32 %v51_v30, 0.0  ;;  %v56_v34 = vmax.f32 %v52_v31, 0.0 }
   0xd   :  { %v57_v32 = vpack.c.bf16 %v54_v29, %v53_v28 }
   0xe   :  { %v58_v35 = vpack.c.bf16 %v56_v34, %v55_v33 }
   0xf   :  { %59 = vst [vmem:[%s118_s4] sm:$0xff] %v57_v32 }
  0x10   :  { %60 = vst [vmem:[%s118_s4 + $0x8] sm:$0xff] %v58_v35 }

// kernel: _lambda_.43
= control target key start
LH: loop header
LB: loop body
LE: loop exit
PB: predicated region body
PF: predicated region fallthrough
CT: control target
= control target key end

     0   :  { %s1320_s12 = smov 0   ;;  %s1322_s13 = smov 0   ;;  %s1510_s0 = inlined_call_operand.vmem [shape: bf16[16,2304], index: 0, kind: input, shape index: {}]   ;;  %s1511_s1 = inlined_call_operand.vmem [shape: bf16[2304,256], index: 1, kind: input, shape index: {}]   ;;  %s1512_s2 = inlined_call_operand.vmem [shape: bf16[16,256], index: 2, kind: output, shape index: {0}]   ;;  %s1513_s3 = inlined_call_operand.vmem [shape: f32[1,2,256], index: 3, kind: output, shape index: {1}]  }
   0x1   :  { %s1324_s14 = smov 0   ;;  %s1326_s15 = smov 0  }
   0x2   :  { %s1328_s16 = smov 0  }
   0x3 LB: > { %s26_s17 = sadd.s32 1, %s1293_s15  ;;  %p49_p1 = scmp.ne.s32.totalorder %s1285_s13, %s1281_s12  ;;  %s1297_s16 = sphi %s1328_s16, %s14_s16   ;;  %s1293_s15 = sphi %s1326_s15, %s1517_s15   ;;  %s1289_s14 = sphi %s1324_s14, %s1516_s14   ;;  %s1285_s13 = sphi %s1322_s13, %s1515_s13   ;;  %s1281_s12 = sphi %s1320_s12, %s1514_s12  }
   0x4   : > { %p27_p0 = scmp.ge.s32.totalorder %s26_s17, 6  ;;  %p50_p2 = scmp.eq.s32.totalorder %s1297_s16, 0 }
   0x5   : > { %s42_s19 = sadd.s32 1, %s1285_s13  ;;  %p942_p5 = scmp.ge.s32.totalorder %s1297_s16, 6 }
   0x6   : > { %s1519_s17 = smov (%p27_p0, %s26_s17), 0  ;;  %p51_p3 = por %p50_p2, %p49_p1 }
   0x7   : > { %s38_s18 = ssub.s32 %s1293_s15, %s1519_s17  ;;  %159 = sbr.rel (%p942_p5) target bundleno = 21 (0x15), region = 16 }
   0x8   : > { %p40_p4 = scmp.eq.s32.totalorder %s38_s18, 0 }
   0xa   : > { %s1355_s20 = scalar_select %p40_p4, %s1285_s13, %s42_s19  }
   0xc   : > { %162 = sbr.rel (!%p51_p3) target bundleno = 21 (0x15), region = 20  ;;  %s164_s21 = sand.u32 (%p51_p3), 1, %s1285_s13  }
   0xd   : > { %s1163_s22 = smul.u32 (%p51_p3), 12, %s1293_s15 }
   0xe   : > { %s1216_s23 = smul.u32 (%p51_p3), 24, %s164_s21 }
   0xf   : > { %s172_s26 = scalar_lea.vmem (%p51_p3), %s1510_s0, %s1163_s22 }
  0x10   : > { %v187_v0 = vld [vmem:[%s172_s26] sm:$0xff] (%p51_p3)  ;;  %v189_v1 = vld [vmem:[%s172_s26 + $0x48] sm:$0xff] (%p51_p3)  ;;  %s166_s27 = scalar_lea.vmem (%p51_p3), [#allocation3], %s1216_s23  ;;  %v946_v3 = vld [vmem:[%s172_s26 + $0x50] sm:$0xf] (%p51_p3) }
  0x11   : > { %v944_v2 = vld [vmem:[%s172_s26 + $0x8] sm:$0xf]  ;;  %188 = vst [vmem:[%s166_s27] sm:$0xff] %v187_v0 }
  0x12   : > { %190 = vst [vmem:[%s166_s27 + $0xc] sm:$0xff] %v189_v1 }
  0x13   : > { %945 = vst [vmem:[%s166_s27 + $0x8] sm:$0xf] %v944_v2 }
  0x14   : > { %947 = vst [vmem:[%s166_s27 + $0x14] sm:$0xf] %v946_v3 }
  0x15 PF: > { %p948_p6 = scmp.ge.s32.totalorder %s1297_s16, 1  ;;  %p222_p7 = scmp.lt.s32.totalorder %s1297_s16, 7 }
  0x17   : > { %p223_p8 = pnand %p948_p6, %p222_p7 }
  0x18   : > { %s229_s28 = sand.u32 (!%p223_p8), 1, %s1281_s12   ;;  %s278_s29 = smul.u32 (!%p223_p8), 48, %s1289_s14 }
  0x19   : > { %226 = sbr.rel (%p223_p8) target bundleno = 275 (0x113), region = 50  ;;  %p951_p10 = scmp.ne.s32.totalorder (!%p223_p8), %s1289_s14, 0 }
  0x1a   : > { %s1217_s30 = smul.u32 (!%p223_p8), 24, %s229_s28  ;;  %p280_p9 = scmp.lt.s32.totalorder (!%p223_p8), %s278_s29, 287 }
  0x1c   : > { %s1372_s8 = scalar_lea.vmem (!%p223_p8), [#allocation3], %s1217_s30 }
  0x1e   : > { %s1521_s29 = smov (!%p280_p9, %s278_s29), 287  ;;  %315 = sbr.rel (%p951_p10) target bundleno = 40 (0x28), region = 58 }
  0x1f   : > { %s1164_s4 = sshll.u32 %s1521_s29, 3 }
  0x20   : > { %s1370_s7 = scalar_lea.vmem %s1511_s1, %s1164_s4 }
  0x23   : > { %v1299_v4 = vmov 0.0  }
  0x24   : > { %316 = vst [vmem:[#allocation2 + $0x10] sm:$0xff] %v1299_v4 }
  0x25   : > { %317 = vst [vmem:[#allocation2] sm:$0xff] %v1299_v4 }
  0x26   : > { %318 = vst [vmem:[#allocation2 + $0x18] sm:$0xff] %v1299_v4 }
  0x27   : > { %319 = vst [vmem:[#allocation2 + $0x8] sm:$0xff] %v1299_v4 }
  0x28 PF: > { %v1022_v5 = vld [vmem:[%s1370_s7 + $0x70] sm:$0xf]  ;;  %v1183_v6 = vld [vmem:[%s1370_s7 + $0x74] sm:$0xf0]  ;;  %v1014_v14 = vld [vmem:[%s1370_s7 + $0x60] sm:$0xf] }
  0x29   : > { %v1086_v7 = vld [vmem:[%s1370_s7 + $0xf0] sm:$0xf]  ;;  %v1023_v8 = vor.u32 %v1183_v6, %v1022_v5  ;;  %v1199_v9 = vld [vmem:[%s1370_s7 + $0xf4] sm:$0xf0]  ;;  %v1181_v15 = vld [vmem:[%s1370_s7 + $0x64] sm:$0xf0] }
  0x2a   : > { %v1150_v10 = vld [vmem:[%s1370_s7 + $0x170] sm:$0xf]  ;;  %v1215_v11 = vld [vmem:[%s1370_s7 + $0x174] sm:$0xf0]  ;;  %v1087_v12 = vor.u32 %v1199_v9, %v1086_v7  ;;  %v1078_v16 = vld [vmem:[%s1370_s7 + $0xe0] sm:$0xf]  ;;  %v1015_v17 = vor.u32 %v1181_v15, %v1014_v14 }
  0x2b   : > { %v1151_v13 = vor.u32 %v1215_v11, %v1150_v10  ;;  %632 = vmatpush.bf16.msra.mxu0 %v1023_v8  ;;  %v1197_v18 = vld [vmem:[%s1370_s7 + $0xe4] sm:$0xf0]  ;;  %v1142_v19 = vld [vmem:[%s1370_s7 + $0x160] sm:$0xf]  ;;  %v1006_v23 = vld [vmem:[%s1370_s7 + $0x50] sm:$0xf] }
  0x2c   : > { %v1213_v20 = vld [vmem:[%s1370_s7 + $0x164] sm:$0xf0]  ;;  %646 = vmatpush.bf16.msra.mxu1 %v1087_v12  ;;  %v1079_v21 = vor.u32 %v1197_v18, %v1078_v16  ;;  %v1179_v24 = vld [vmem:[%s1370_s7 + $0x54] sm:$0xf0]  ;;  %v1070_v25 = vld [vmem:[%s1370_s7 + $0xd0] sm:$0xf] }
  0x2d   : > { %660 = vmatpush.bf16.msra.mxu2 %v1151_v13  ;;  %v1143_v22 = vor.u32 %v1213_v20, %v1142_v19  ;;  %v1195_v26 = vld [vmem:[%s1370_s7 + $0xd4] sm:$0xf0]  ;;  %v1134_v27 = vld [vmem:[%s1370_s7 + $0x150] sm:$0xf]  ;;  %v1007_v29 = vor.u32 %v1179_v24, %v1006_v23  ;;  %v998_v30 = vld [vmem:[%s1370_s7 + $0x40] sm:$0xf] }
  0x2e   : > { %v1211_v28 = vld [vmem:[%s1370_s7 + $0x154] sm:$0xf0]  ;;  %v1177_v31 = vld [vmem:[%s1370_s7 + $0x44] sm:$0xf0]  ;;  %v1071_v32 = vor.u32 %v1195_v26, %v1070_v25  ;;  %v1062_v34 = vld [vmem:[%s1370_s7 + $0xc0] sm:$0xf] }
  0x2f   : > { %633 = vmatpush.bf16.msra.mxu0 %v1015_v17  ;;  %v1135_v33 = vor.u32 %v1211_v28, %v1134_v27  ;;  %v1182_v35 = vld [vmem:[%s1370_s7 + $0x74] sm:$0xf]  ;;  %v1024_v36 = vld [vmem:[%s1370_s7 + $0x78] sm:$0xf0]  ;;  %v1193_v37 = vld [vmem:[%s1370_s7 + $0xc4] sm:$0xf0]  ;;  %v999_v42 = vor.u32 %v1177_v31, %v998_v30 }
  0x30   : > { %647 = vmatpush.bf16.msra.mxu1 %v1079_v21  ;;  %v1126_v38 = vld [vmem:[%s1370_s7 + $0x140] sm:$0xf]  ;;  %v1209_v39 = vld [vmem:[%s1370_s7 + $0x144] sm:$0xf0]  ;;  %v1027_v40 = vor.u32 %v1182_v35, %v1024_v36  ;;  %v1180_v41 = vld [vmem:[%s1370_s7 + $0x64] sm:$0xf]  ;;  %v1063_v46 = vor.u32 %v1193_v37, %v1062_v34 }
  0x31   : > { %661 = vmatpush.bf16.msra.mxu2 %v1143_v22  ;;  %v990_v43 = vld [vmem:[%s1370_s7 + $0x30] sm:$0xf]  ;;  %v1175_v44 = vld [vmem:[%s1370_s7 + $0x34] sm:$0xf0]  ;;  %v1016_v45 = vld [vmem:[%s1370_s7 + $0x68] sm:$0xf0]  ;;  %v1127_v47 = vor.u32 %v1209_v39, %v1126_v38 }
  0x32   : > { %674 = vmatpush.bf16.msra.mxu3 %v1027_v40  ;;  %v1054_v48 = vld [vmem:[%s1370_s7 + $0xb0] sm:$0xf]  ;;  %v1191_v49 = vld [vmem:[%s1370_s7 + $0xb4] sm:$0xf0]  ;;  %v1019_v51 = vor.u32 %v1180_v41, %v1016_v45  ;;  %v1178_v53 = vld [vmem:[%s1370_s7 + $0x54] sm:$0xf]  ;;  %v991_v55 = vor.u32 %v1175_v44, %v990_v43 }
  0x33   : > { %634 = vmatpush.bf16.msra.mxu0 %v1007_v29  ;;  %v1118_v50 = vld [vmem:[%s1370_s7 + $0x130] sm:$0xf]  ;;  %v1207_v52 = vld [vmem:[%s1370_s7 + $0x134] sm:$0xf0]  ;;  %v1008_v54 = vld [vmem:[%s1370_s7 + $0x58] sm:$0xf0]  ;;  %v1055_v59 = vor.u32 %v1191_v49, %v1054_v48 }
  0x34   : > { %648 = vmatpush.bf16.msra.mxu1 %v1071_v32  ;;  %v982_v56 = vld [vmem:[%s1370_s7 + $0x20] sm:$0xf]  ;;  %v1173_v57 = vld [vmem:[%s1370_s7 + $0x24] sm:$0xf0]  ;;  %v1011_v58 = vor.u32 %v1178_v53, %v1008_v54  ;;  %v1119_v60 = vor.u32 %v1207_v52, %v1118_v50  ;;  %v1176_v62 = vld [vmem:[%s1370_s7 + $0x44] sm:$0xf] }
  0x35   : > { %662 = vmatpush.bf16.msra.mxu2 %v1135_v33  ;;  %v1046_v61 = vld [vmem:[%s1370_s7 + $0xa0] sm:$0xf]  ;;  %v1000_v63 = vld [vmem:[%s1370_s7 + $0x48] sm:$0xf0]  ;;  %v1189_v0 = vld [vmem:[%s1370_s7 + $0xa4] sm:$0xf0]  ;;  %v983_v3 = vor.u32 %v1173_v57, %v982_v56 }
  0x36   : > { %675 = vmatpush.bf16.msra.mxu3 %v1019_v51  ;;  %v1110_v1 = vld [vmem:[%s1370_s7 + $0x120] sm:$0xf]  ;;  %v1205_v2 = vld [vmem:[%s1370_s7 + $0x124] sm:$0xf0]  ;;  %v974_v4 = vld [vmem:[%s1370_s7 + $0x10] sm:$0xf]  ;;  %v1003_v6 = vor.u32 %v1176_v62, %v1000_v63  ;;  %v1047_v7 = vor.u32 %v1189_v0, %v1046_v61 }
  0x37   : > { %635 = vmatpush.bf16.msra.mxu0 %v999_v42  ;;  %v1171_v5 = vld [vmem:[%s1370_s7 + $0x14] sm:$0xf0]  ;;  %v1111_v8 = vor.u32 %v1205_v2, %v1110_v1  ;;  %v1038_v9 = vld [vmem:[%s1370_s7 + $0x90] sm:$0xf]  ;;  %v1174_v10 = vld [vmem:[%s1370_s7 + $0x34] sm:$0xf] }
  0x38   : > { %649 = vmatpush.bf16.msra.mxu1 %v1063_v46  ;;  %v992_v11 = vld [vmem:[%s1370_s7 + $0x38] sm:$0xf0]  ;;  %v1187_v12 = vld [vmem:[%s1370_s7 + $0x94] sm:$0xf0]  ;;  %v1102_v13 = vld [vmem:[%s1370_s7 + $0x110] sm:$0xf]  ;;  %v975_v15 = vor.u32 %v1171_v5, %v974_v4 }
  0x39   : > { %663 = vmatpush.bf16.msra.mxu2 %v1127_v47  ;;  %v1203_v14 = vld [vmem:[%s1370_s7 + $0x114] sm:$0xf0]  ;;  %v966_v16 = vld [vmem:[%s1370_s7] sm:$0xf]  ;;  %v1169_v17 = vld [vmem:[%s1370_s7 + $0x4] sm:$0xf0]  ;;  %v995_v19 = vor.u32 %v1174_v10, %v992_v11  ;;  %v1039_v20 = vor.u32 %v1187_v12, %v1038_v9 }
  0x3a   : > { %676 = vmatpush.bf16.msra.mxu3 %v1011_v58  ;;  %v1030_v18 = vld [vmem:[%s1370_s7 + $0x80] sm:$0xf]  ;;  %v1103_v21 = vor.u32 %v1203_v14, %v1102_v13  ;;  %v1185_v22 = vld [vmem:[%s1370_s7 + $0x84] sm:$0xf0]  ;;  %v1172_v23 = vld [vmem:[%s1370_s7 + $0x24] sm:$0xf]  ;;  %v967_v31 = vor.u32 %v1169_v17, %v966_v16 }
  0x3b   : > { %636 = vmatpush.bf16.msra.mxu0 %v991_v55  ;;  %v984_v24 = vld [vmem:[%s1370_s7 + $0x28] sm:$0xf0]  ;;  %v1094_v25 = vld [vmem:[%s1370_s7 + $0x100] sm:$0xf]  ;;  %v1201_v26 = vld [vmem:[%s1370_s7 + $0x104] sm:$0xf0]  ;;  %v1031_v36 = vor.u32 %v1185_v22, %v1030_v18 }
  0x3c   : > { %650 = vmatpush.bf16.msra.mxu1 %v1055_v59  ;;  %v1198_v27 = vld [vmem:[%s1370_s7 + $0xf4] sm:$0xf]  ;;  %v1088_v28 = vld [vmem:[%s1370_s7 + $0xf8] sm:$0xf0]  ;;  %v962_v32 = vld [vmem:[%s1372_s8 + $0x8] sm:$0xf]  ;;  %v987_v33 = vor.u32 %v1172_v23, %v984_v24  ;;  %v1095_v37 = vor.u32 %v1201_v26, %v1094_v25 }
  0x3d   : > { %664 = vmatpush.bf16.msra.mxu2 %v1119_v60  ;;  %v1214_v29 = vld [vmem:[%s1370_s7 + $0x174] sm:$0xf]  ;;  %v1152_v30 = vld [vmem:[%s1370_s7 + $0x178] sm:$0xf0]  ;;  %v954_v34 = vld [vmem:[%s1372_s8] sm:$0xf]  ;;  %v1091_v41 = vor.u32 %v1198_v27, %v1088_v28 }
  0x3e   : > { %677 = vmatpush.bf16.msra.mxu3 %v1003_v6  ;;  %v1166_v35 = vld [vmem:[%s1372_s8 + $0x8] sm:$0xf0]  ;;  %v1167_v38 = vld [vmem:[%s1372_s8 + $0x10] sm:$0xf0]  ;;  %v1165_v39 = vld [vmem:[%s1372_s8 + $0x4] sm:$0xf]  ;;  %v1155_v42 = vor.u32 %v1214_v29, %v1152_v30 }
  0x3f   : > { %637 = vmatpush.bf16.msra.mxu0 %v983_v3  ;;  %v956_v40 = vld [vmem:[%s1372_s8 + $0xc] sm:$0xf0]  ;;  %v1196_v43 = vld [vmem:[%s1370_s7 + $0xe4] sm:$0xf]  ;;  %v1170_v44 = vld [vmem:[%s1370_s7 + $0x14] sm:$0xf]  ;;  %v955_v49 = vor.u32 %v1166_v35, %v954_v34  ;;  %v1451_v50 = vor.u32 %v1167_v38, %v962_v32 }
  0x40   : > { %651 = vmatpush.bf16.msra.mxu1 %v1047_v7  ;;  %v976_v45 = vld [vmem:[%s1370_s7 + $0x18] sm:$0xf0]  ;;  %v1080_v46 = vld [vmem:[%s1370_s7 + $0xe8] sm:$0xf0]  ;;  %v1212_v47 = vld [vmem:[%s1370_s7 + $0x164] sm:$0xf]  ;;  %v1453_v51 = vor.u32 %v1165_v39, %v956_v40 }
  0x41   : > { %665 = vmatpush.bf16.msra.mxu2 %v1111_v8  ;;  %v1144_v48 = vld [vmem:[%s1370_s7 + $0x168] sm:$0xf0]  ;;  %v979_v52 = vor.u32 %v1170_v44, %v976_v45  ;;  %v1083_v53 = vor.u32 %v1196_v43, %v1080_v46  ;;  %v1194_v55 = vld [vmem:[%s1370_s7 + $0xd4] sm:$0xf]  ;;  %v1168_v56 = vld [vmem:[%s1370_s7 + $0x4] sm:$0xf] }
  0x42   : > { %678 = vmatpush.bf16.msra.mxu3 %v995_v19  ;;  %v1147_v54 = vor.u32 %v1212_v47, %v1144_v48  ;;  %v968_v57 = vld [vmem:[%s1370_s7 + $0x8] sm:$0xf0]  ;;  %v1072_v58 = vld [vmem:[%s1370_s7 + $0xd8] sm:$0xf0]  ;;  %v1210_v59 = vld [vmem:[%s1370_s7 + $0x154] sm:$0xf] }
  0x43   : > { %638 = vmatpush.bf16.msra.mxu0 %v975_v15  ;;  %v1136_v60 = vld [vmem:[%s1370_s7 + $0x158] sm:$0xf0]  ;;  %v971_v61 = vor.u32 %v1168_v56, %v968_v57  ;;  %v1075_v62 = vor.u32 %v1194_v55, %v1072_v58  ;;  %v1192_v0 = vld [vmem:[%s1370_s7 + $0xc4] sm:$0xf]  ;;  %v1064_v1 = vld [vmem:[%s1370_s7 + $0xc8] sm:$0xf0] }
  0x44   : > { %652 = vmatpush.bf16.msra.mxu1 %v1039_v20  ;;  %v1139_v63 = vor.u32 %v1210_v59, %v1136_v60  ;;  %v1208_v2 = vld [vmem:[%s1370_s7 + $0x144] sm:$0xf]  ;;  %v1128_v3 = vld [vmem:[%s1370_s7 + $0x148] sm:$0xf0]  ;;  %v1067_v4 = vor.u32 %v1192_v0, %v1064_v1  ;;  %v1190_v6 = vld [vmem:[%s1370_s7 + $0xb4] sm:$0xf] }
  0x45   : > { %666 = vmatpush.bf16.msra.mxu2 %v1103_v21  ;;  %v1131_v5 = vor.u32 %v1208_v2, %v1128_v3  ;;  %v1056_v7 = vld [vmem:[%s1370_s7 + $0xb8] sm:$0xf0]  ;;  %v1206_v8 = vld [vmem:[%s1370_s7 + $0x134] sm:$0xf]  ;;  %v1188_v12 = vld [vmem:[%s1370_s7 + $0xa4] sm:$0xf] }
  0x46   : > { %679 = vmatpush.bf16.msra.mxu3 %v987_v33  ;;  %v1120_v9 = vld [vmem:[%s1370_s7 + $0x138] sm:$0xf0]  ;;  %v1059_v10 = vor.u32 %v1190_v6, %v1056_v7  ;;  %v1048_v13 = vld [vmem:[%s1370_s7 + $0xa8] sm:$0xf0]  ;;  %v1204_v14 = vld [vmem:[%s1370_s7 + $0x124] sm:$0xf] }
  0x47   : > { %639 = vmatpush.bf16.msra.mxu0 %v967_v31  ;;  %v1123_v11 = vor.u32 %v1206_v8, %v1120_v9  ;;  %v1112_v15 = vld [vmem:[%s1370_s7 + $0x128] sm:$0xf0]  ;;  %v1051_v16 = vor.u32 %v1188_v12, %v1048_v13  ;;  %v1186_v18 = vld [vmem:[%s1370_s7 + $0x94] sm:$0xf]  ;;  %v1040_v19 = vld [vmem:[%s1370_s7 + $0x98] sm:$0xf0] }
  0x48   : > { %653 = vmatpush.bf16.msra.mxu1 %v1031_v36  ;;  %v1115_v17 = vor.u32 %v1204_v14, %v1112_v15  ;;  %v1202_v20 = vld [vmem:[%s1370_s7 + $0x114] sm:$0xf]  ;;  %v1104_v21 = vld [vmem:[%s1370_s7 + $0x118] sm:$0xf0]  ;;  %v1043_v22 = vor.u32 %v1186_v18, %v1040_v19  ;;  %v1184_v24 = vld [vmem:[%s1370_s7 + $0x84] sm:$0xf] }
  0x49   : > { %667 = vmatpush.bf16.msra.mxu2 %v1095_v37  ;;  %v1107_v23 = vor.u32 %v1202_v20, %v1104_v21  ;;  %v1032_v25 = vld [vmem:[%s1370_s7 + $0x88] sm:$0xf0]  ;;  %v1200_v26 = vld [vmem:[%s1370_s7 + $0x104] sm:$0xf]  ;;  %v320_v33 = vld [vmem:[#allocation2 + $0x10] sm:$0xff]  ;;  %p1156_p11 = scmp.ne.s32.totalorder %s1289_s14, 5 }
  0x4a   : > { %640 = vmatmul.bf16.vlgmr.msra.gmra.mxu0 %v955_v49  ;;  %680 = vmatpush.bf16.msra.mxu3 %v979_v52  ;;  %v1096_v27 = vld [vmem:[%s1370_s7 + $0x108] sm:$0xf0]  ;;  %v1035_v28 = vor.u32 %v1184_v24, %v1032_v25  ;;  %v322_v40 = vld [vmem:[#allocation2 + $0x18] sm:$0xff]  ;;  %v321_v48 = vld [vmem:[#allocation2] sm:$0xff] }
  0x4b   : > { %688 = vmatpush.bf16.msrb.mxu0 %v1091_v41  ;;  %654 = vmatmul.bf16.vlgmr.msra.gmra.mxu1 %v1453_v51  ;;  %v1099_v29 = vor.u32 %v1200_v26, %v1096_v27 }
  0x4c   : > { %702 = vmatpush.bf16.msrb.mxu1 %v1155_v42  ;;  %668 = vmatmul.bf16.vlgmr.msra.gmra.mxu2 %v1451_v50 }
  0x4e   : > { %681 = vmatpush.bf16.msra.mxu3 %v971_v61 }
  0x4f   : > { %689 = vmatpush.bf16.msrb.mxu0 %v1083_v53 }
  0x50   : > { %703 = vmatpush.bf16.msrb.mxu1 %v1147_v54  ;;  %v323_v54 = vld [vmem:[#allocation2 + $0x8] sm:$0xff] }
  0x51   : > { %682 = vmatmul.bf16.vlgmr.msra.gmra.mxu3 %v955_v49 }
  0x53   : > { %690 = vmatpush.bf16.msrb.mxu0 %v1075_v62 }
  0x54   : > { %704 = vmatpush.bf16.msrb.mxu1 %v1139_v63 }
  0x57   : > { %691 = vmatpush.bf16.msrb.mxu0 %v1067_v4 }
  0x58   : > { %705 = vmatpush.bf16.msrb.mxu1 %v1131_v5 }
  0x5b   : > { %692 = vmatpush.bf16.msrb.mxu0 %v1059_v10 }
  0x5c   : > { %706 = vmatpush.bf16.msrb.mxu1 %v1123_v11 }
  0x5f   : > { %693 = vmatpush.bf16.msrb.mxu0 %v1051_v16 }
  0x60   : > { %707 = vmatpush.bf16.msrb.mxu1 %v1115_v17 }
  0x63   : > { %694 = vmatpush.bf16.msrb.mxu0 %v1043_v22 }
  0x64   : > { %708 = vmatpush.bf16.msrb.mxu1 %v1107_v23 }
  0x67   : > { %695 = vmatpush.bf16.msrb.mxu0 %v1035_v28 }
  0x68   : > { %709 = vmatpush.bf16.msrb.mxu1 %v1099_v29 }
  0x6a   : > { %696 = vmatmul.bf16.vlgmr.msrb.gmra.mxu0 %v1453_v51 }
  0x6b   : > { %710 = vmatmul.bf16.vlgmr.msrb.gmra.mxu1 %v1451_v50 }
  0xc7   : > { %v641_v30 = vpop.f32.mrf.mxu0 }
  0xc8   : > { %v655_v31 = vpop.f32.mrf.mxu1 }
  0xc9   : > { %v656_v32 = vadd.f32 %v655_v31, %v641_v30 }
  0xcf   : > { %v669_v34 = vpop.f32.mrf.mxu2  ;;  %v643_v36 = vpop.f32.mrf.mxu0 }
  0xd0   : > { %v670_v35 = vadd.f32 %v669_v34, %v656_v32  ;;  %v657_v37 = vpop.f32.mrf.mxu1 }
  0xd1   : > { %v658_v39 = vadd.f32 %v657_v37, %v643_v36 }
  0xd2   : > { %v716_v38 = vadd.f32 %v670_v35, %v320_v33 }
  0xd4   : > { %720 = vst [vmem:[#allocation2 + $0x10] sm:$0xff] %v716_v38  ;;  %v683_v44 = vpop.f32.mrf.mxu3 }
  0xd7   : > { %v671_v41 = vpop.f32.mrf.mxu2 }
  0xd8   : > { %v672_v42 = vadd.f32 %v671_v41, %v658_v39 }
  0xda   : > { %v718_v43 = vadd.f32 %v672_v42, %v322_v40 }
  0xdc   : > { %722 = vst [vmem:[#allocation2 + $0x18] sm:$0xff] %v718_v43  ;;  %v685_v51 = vpop.f32.mrf.mxu3 }
  0xe7   : > { %v697_v45 = vpop.f32.mrf.mxu0 }
  0xe8   : > { %v711_v46 = vpop.f32.mrf.mxu1  ;;  %v698_v47 = vadd.f32 %v697_v45, %v683_v44 }
  0xea   : > { %v712_v49 = vadd.f32 %v711_v46, %v698_v47 }
  0xec   : > { %v717_v50 = vadd.f32 %v712_v49, %v321_v48 }
  0xee   : > { %721 = vst [vmem:[#allocation2] sm:$0xff] %v717_v50 }
  0xef   : > { %v699_v52 = vpop.f32.mrf.mxu0 }
  0xf0   : > { %v700_v53 = vadd.f32 %v699_v52, %v685_v51  ;;  %v713_v55 = vpop.f32.mrf.mxu1 }
  0xf2   : > { %v714_v56 = vadd.f32 %v713_v55, %v700_v53  ;;  %727 = sbr.rel (%p1156_p11) target bundleno = 275 (0x113), region = 62 }
  0xf4   : > { %v719_v57 = vadd.f32 %v714_v56, %v323_v54 }
  0xf6   : > { %723 = vst [vmem:[#allocation2 + $0x8] sm:$0xff] %v719_v57 }
  0xf7   : > { %v728_v58 = vld [vmem:[#allocation2 + $0x10] sm:$0xff]  ;;  %v729_v59 = vld [vmem:[#allocation2] sm:$0xff]  ;;  %v730_v60 = vld [vmem:[#allocation2 + $0x18] sm:$0xff]  ;;  %vm768_vm0 = vcmask 1040384   ;;  %vm774_vm1 = vcmask 1041408  }
  0xf8   : > { %v732_v61 = vpack.c.bf16 %v729_v59, %v728_v58  ;;  %v750_v62 = vmul.f32 %v728_v58, %v728_v58  ;;  %v751_v63 = vmul.f32 %v729_v59, %v729_v59  ;;  %v736_v1 = vadd.f32 %v730_v60, %v728_v58 }
  0xf9   : > { %v752_v4 = vmul.f32 %v730_v60, %v730_v60 }
  0xfa   : > { %734 = vst [vmem:[%s1512_s2] sm:$0xff] %v732_v61  ;;  %v737_v6 = vrot.slane %v736_v1, 4 }
  0xfb   : > { %v754_v8 = vadd.f32 %v752_v4, %v750_v62 }
  0xfc   : > { %v738_v10 = vadd.f32 %v737_v6, %v736_v1 }
  0xfd   : > { %v731_v0 = vld [vmem:[#allocation2 + $0x8] sm:$0xff]  ;;  %v755_v12 = vrot.slane %v754_v8, 4 }
  0xfe   : > { %v733_v2 = vpack.c.bf16 %v731_v0, %v730_v60  ;;  %v743_v3 = vadd.f32 %v731_v0, %v729_v59  ;;  %v753_v5 = vmul.f32 %v731_v0, %v731_v0  ;;  %v739_v14 = vrot.slane %v738_v10, 2 }
  0xff   : > { %v756_v16 = vadd.f32 %v755_v12, %v754_v8 }
 0x100   : > { %735 = vst [vmem:[%s1512_s2 + $0x8] sm:$0xff] %v733_v2  ;;  %v744_v7 = vrot.slane %v743_v3, 4  ;;  %v761_v9 = vadd.f32 %v753_v5, %v751_v63  ;;  %v740_v18 = vadd.f32 %v739_v14, %v738_v10 }
 0x101   : > { %v757_v21 = vrot.slane %v756_v16, 2 }
 0x102   : > { %v745_v11 = vadd.f32 %v744_v7, %v743_v3  ;;  %v762_v13 = vrot.slane %v761_v9, 4  ;;  %v741_v22 = vrot.slane %v740_v18, 1 }
 0x103   : > { %v758_v25 = vadd.f32 %v757_v21, %v756_v16 }
 0x104   : > { %v746_v15 = vrot.slane %v745_v11, 2  ;;  %v763_v17 = vadd.f32 %v762_v13, %v761_v9  ;;  %v742_v26 = vadd.f32 %v741_v22, %v740_v18 }
 0x105   : > { %v759_v28 = vrot.slane %v758_v25, 1 }
 0x106   : > { %v747_v19 = vadd.f32 %v746_v15, %v745_v11  ;;  %v764_v20 = vrot.slane %v763_v17, 2 }
 0x107   : > { %v760_v30 = vadd.f32 %v759_v28, %v758_v25 }
 0x108   : > { %v748_v23 = vrot.slane %v747_v19, 1  ;;  %v765_v24 = vadd.f32 %v764_v20, %v763_v17 }
 0x109   : > { %v769_v32 = vsel %vm768_vm0, %v742_v26, %v760_v30 }
 0x10a   : > { %v749_v27 = vadd.f32 %v748_v23, %v747_v19  ;;  %v766_v29 = vrot.slane %v765_v24, 1 }
 0x10c   : > { %v767_v31 = vadd.f32 %v766_v29, %v765_v24 }
 0x10e   : > { %v770_v33 = vsel %vm768_vm0, %v749_v27, %v767_v31 }
 0x10f   : > { %v773_v34 = vrot.slane %v770_v33, 6 }
 0x111   : > { %v775_v35 = vsel %vm774_vm1, %v769_v32, %v773_v34 }
 0x112   : > { %777 = vst [vmem:[%s1513_s3] sm:$0xf] %v775_v35 }
 0x113 PF: > { %s14_s16 = sadd.s32 1, %s1297_s16   ;;  %s1514_s12 = smov %s1285_s13 }
 0x114   : > { %p11_p12 = scmp.ge.s32.totalorder %s14_s16, 8   ;;  %s1515_s13 = smov %s1355_s20 }
 0x115   : > { %s1516_s14 = smov %s1293_s15  ;;  %s1517_s15 = smov %s1519_s17 }
 0x116   :  { %13 = sbr.rel (!%p11_p12) target bundleno = 3 (0x3), region = 118 }

// kernel: _lambda_.47
= control target key start
LH: loop header
LB: loop body
LE: loop exit
PB: predicated region body
PF: predicated region fallthrough
CT: control target
= control target key end

     0   :  { %s2044_s0 = inlined_call_operand.vmem [shape: bf16[16,2304], index: 0, kind: input, shape index: {}]   ;;  %s2045_s1 = inlined_call_operand.vmem [shape: bf16[2304,512], index: 1, kind: input, shape index: {}]   ;;  %s2046_s2 = inlined_call_operand.vmem [shape: bf16[16,512], index: 2, kind: output, shape index: {0}]   ;;  %s2047_s3 = inlined_call_operand.vmem [shape: f32[1,2,512], index: 3, kind: output, shape index: {1}]  }
   0x1   :  { %2050 = sst [smem:[#allocation8_spill]] %s2044_s0 }
   0x2   :  { %2051 = sst [smem:[#allocation9_spill]] %s2045_s1 }
   0x3   :  { %s1657_s12 = smov 0   ;;  %s1659_s13 = smov 0  }
   0x4   :  { %s1661_s14 = smov 0   ;;  %s1663_s15 = smov 0  }
   0x5   :  { %s1665_s16 = smov 0   ;;  %s1667_s17 = smov 0  }
   0x6   :  { %s1669_s18 = smov 0   ;;  %s1671_s19 = smov 0  }
   0x7   :  { %s1673_s20 = smov 0   ;;  %s1675_s21 = smov 0  }
   0x8   :  { %s1677_s22 = smov 0  }
   0x9 LB: > { %s1174_s23 = sadd.s32 4294967295, %s1634_s22   ;;  %s26_s24 = sadd.s32 1, %s1626_s20  ;;  %s1634_s22 = sphi %s1677_s22, %s14_s22   ;;  %s1630_s21 = sphi %s1675_s21, %s2070_s21   ;;  %s1626_s20 = sphi %s1673_s20, %s2069_s20   ;;  %s1622_s19 = sphi %s1671_s19, %s2068_s19   ;;  %s1618_s18 = sphi %s1669_s18, %s2067_s18   ;;  %s1614_s17 = sphi %s1667_s17, %s2066_s17   ;;  %s1610_s16 = sphi %s1665_s16, %s2065_s16   ;;  %s1606_s15 = sphi %s1663_s15, %s2064_s15   ;;  %s1602_s14 = sphi %s1661_s14, %s2063_s14   ;;  %s1598_s13 = sphi %s1659_s13, %s2062_s13   ;;  %s1594_s12 = sphi %s1657_s12, %s2061_s12  }
   0xa   : > { %p27_p0 = scmp.ge.s32.totalorder %s26_s24, 6  ;;  %s33_s25 = sadd.s32 1, %s1630_s21 }
   0xb   : > { %s42_s26 = sadd.s32 1, %s1614_s17  ;;  %p49_p1 = scmp.ne.s32.totalorder %s1614_s17, %s1610_s16 }
   0xc   : > { %s2072_s24 = smov (%p27_p0, %s26_s24), 0  ;;  %s2074_s25 = smov (!%p27_p0, %s33_s25), %s1630_s21 }
   0xd   : > { %2052 = sst [smem:[#allocation6_spill]] %s2072_s24  ;;  %s38_s27 = ssub.s32 %s1626_s20, %s2072_s24 }
   0xe   : > { %p50_p2 = scmp.eq.s32.totalorder %s1634_s22, 0  ;;  %p35_p3 = scmp.ge.s32.totalorder %s2074_s25, 2 }
   0xf   : > { %p40_p4 = scmp.eq.s32.totalorder %s38_s27, 0  ;;  %s70_s29 = sadd.s32 1, %s1606_s15 }
  0x10   : > { %p1724_p5 = por %p50_p2, %p49_p1  ;;  %s2076_s25 = smov (%p35_p3, %s2074_s25), 0 }
  0x11   : > { %2054 = sst [smem:[#allocation7_spill]] %s2076_s25  ;;  %s66_s4 = ssub.s32 %s1630_s21, %s2076_s25 }
  0x12   : > { %s1732_s30 = scalar_select %p40_p4, %s1614_s17, %s42_s26  }
  0x13   : > { %p77_p6 = scmp.ne.s32.totalorder %s1606_s15, %s1602_s14  ;;  %s67_s5 = sor.u32 %s66_s4, %s38_s27 }
  0x14   : > { %p96_p7 = scmp.eq.s32.totalorder %s66_s4, 0  ;;  %p68_p8 = scmp.eq.s32.totalorder %s67_s5, 0 }
  0x15   : > { %p1738_p9 = por %p77_p6, %p50_p2  ;;  %s98_s7 = sadd.s32 1, %s1598_s13 }
  0x16   : > { %p108_p10 = scmp.ne.s32.totalorder %s1598_s13, %s1594_s12  ;;  %p109_p11 = scmp.eq.s32.totalorder %s1174_s23, 11 }
  0x17   : > { %s1746_s8 = scalar_select %p68_p8, %s1606_s15, %s70_s29  }
  0x18   : > { %s1749_s9 = scalar_select %p96_p7, %s1598_s13, %s98_s7  }
  0x19   : > { %p1751_p12 = por %p109_p11, %p108_p10  ;;  %p1177_p13 = scmp.ge.s32.totalorder %s1634_s22, 12 }
  0x1b   : > { %159 = sbr.rel (%p1177_p13) target bundleno = 103 (0x67), region = 16 }
  0x20   : > { %162 = sbr.rel (!%p1724_p5) target bundleno = 45 (0x2d), region = 20  ;;  %s164_s11 = sand.u32 (%p1724_p5), 1, %s1614_s17  }
  0x21   : > { %s1401_s26 = smul.u32 (%p1724_p5), 12, %s1626_s20  ;;  %s2057_s0 = sld [smem:[#allocation8_spill]] (%p1724_p5) }
  0x22   : > { %s1455_s27 = smul.u32 (%p1724_p5), 24, %s164_s11 }
  0x24   : > { %s166_s23 = scalar_lea.vmem (%p1724_p5), [#allocation3], %s1455_s27 }
  0x27   : > { %s172_s5 = scalar_lea.vmem %s2057_s0, %s1401_s26 }
  0x28   : > { %v187_v0 = vld [vmem:[%s172_s5] sm:$0xff]  ;;  %v189_v1 = vld [vmem:[%s172_s5 + $0x48] sm:$0xff]  ;;  %v1181_v3 = vld [vmem:[%s172_s5 + $0x50] sm:$0xf] }
  0x29   : > { %v1179_v2 = vld [vmem:[%s172_s5 + $0x8] sm:$0xf]  ;;  %188 = vst [vmem:[%s166_s23] sm:$0xff] %v187_v0 }
  0x2a   : > { %190 = vst [vmem:[%s166_s23 + $0xc] sm:$0xff] %v189_v1 }
  0x2b   : > { %1180 = vst [vmem:[%s166_s23 + $0x8] sm:$0xf] %v1179_v2 }
  0x2c   : > { %1182 = vst [vmem:[%s166_s23 + $0x14] sm:$0xf] %v1181_v3 }
  0x2d PF: > { %208 = sbr.rel (!%p1738_p9) target bundleno = 103 (0x67), region = 46  ;;  %s210_s28 = sand.u32 (%p1738_p9), 1, %s1606_s15  }
  0x2e   : > { %s1456_s7 = smul.u32 (%p1738_p9), 384, %s210_s28  ;;  %s1183_s11 = sshll.u32 (%p1738_p9), %s1630_s21, 1 }
  0x2f   : > { %s1402_s26 = smul.u32 (%p1738_p9), 192, %s1626_s20  ;;  %s2058_s1 = sld [smem:[#allocation9_spill]] (%p1738_p9) }
  0x30   : > { %s1776_s6 = scalar_lea.vmem (%p1738_p9), [#allocation4], %s1456_s7 }
  0x31   : > { %s216_s29 = sadd.s32 (%p1738_p9), %s1402_s26, %s1183_s11 }
  0x32   : > { %s1185_s4 = sshll.u32 %s216_s29, 2 }
  0x35   : > { %s1771_s5 = scalar_lea.vmem %s2058_s1, %s1185_s4 }
  0x36   : > { %v341_v4 = vld [vmem:[%s1771_s5] sm:$0xff]  ;;  %v343_v5 = vld [vmem:[%s1771_s5 + $0x10] sm:$0xff] }
  0x37   : > { %v345_v6 = vld [vmem:[%s1771_s5 + $0x20] sm:$0xff]  ;;  %342 = vst [vmem:[%s1776_s6] sm:$0xff] %v341_v4  ;;  %v347_v7 = vld [vmem:[%s1771_s5 + $0x30] sm:$0xff] }
  0x38   : > { %344 = vst [vmem:[%s1776_s6 + $0x8] sm:$0xff] %v343_v5  ;;  %v349_v8 = vld [vmem:[%s1771_s5 + $0x40] sm:$0xff]  ;;  %v351_v9 = vld [vmem:[%s1771_s5 + $0x50] sm:$0xff] }
  0x39   : > { %346 = vst [vmem:[%s1776_s6 + $0x10] sm:$0xff] %v345_v6  ;;  %v353_v10 = vld [vmem:[%s1771_s5 + $0x60] sm:$0xff]  ;;  %v355_v11 = vld [vmem:[%s1771_s5 + $0x70] sm:$0xff] }
  0x3a   : > { %348 = vst [vmem:[%s1776_s6 + $0x18] sm:$0xff] %v347_v7  ;;  %v357_v12 = vld [vmem:[%s1771_s5 + $0x80] sm:$0xff]  ;;  %v359_v13 = vld [vmem:[%s1771_s5 + $0x90] sm:$0xff] }
  0x3b   : > { %350 = vst [vmem:[%s1776_s6 + $0x20] sm:$0xff] %v349_v8  ;;  %v361_v14 = vld [vmem:[%s1771_s5 + $0xa0] sm:$0xff]  ;;  %v363_v15 = vld [vmem:[%s1771_s5 + $0xb0] sm:$0xff] }
  0x3c   : > { %352 = vst [vmem:[%s1776_s6 + $0x28] sm:$0xff] %v351_v9  ;;  %v365_v16 = vld [vmem:[%s1771_s5 + $0xc0] sm:$0xff]  ;;  %v367_v17 = vld [vmem:[%s1771_s5 + $0xd0] sm:$0xff] }
  0x3d   : > { %354 = vst [vmem:[%s1776_s6 + $0x30] sm:$0xff] %v353_v10  ;;  %v369_v18 = vld [vmem:[%s1771_s5 + $0xe0] sm:$0xff]  ;;  %v371_v19 = vld [vmem:[%s1771_s5 + $0xf0] sm:$0xff] }
  0x3e   : > { %356 = vst [vmem:[%s1776_s6 + $0x38] sm:$0xff] %v355_v11  ;;  %v373_v20 = vld [vmem:[%s1771_s5 + $0x100] sm:$0xff]  ;;  %v375_v21 = vld [vmem:[%s1771_s5 + $0x110] sm:$0xff] }
  0x3f   : > { %358 = vst [vmem:[%s1776_s6 + $0x40] sm:$0xff] %v357_v12  ;;  %v377_v22 = vld [vmem:[%s1771_s5 + $0x120] sm:$0xff]  ;;  %v379_v23 = vld [vmem:[%s1771_s5 + $0x130] sm:$0xff] }
  0x40   : > { %360 = vst [vmem:[%s1776_s6 + $0x48] sm:$0xff] %v359_v13  ;;  %v381_v24 = vld [vmem:[%s1771_s5 + $0x140] sm:$0xff]  ;;  %v383_v25 = vld [vmem:[%s1771_s5 + $0x150] sm:$0xff] }
  0x41   : > { %362 = vst [vmem:[%s1776_s6 + $0x50] sm:$0xff] %v361_v14  ;;  %v385_v26 = vld [vmem:[%s1771_s5 + $0x160] sm:$0xff]  ;;  %v387_v27 = vld [vmem:[%s1771_s5 + $0x170] sm:$0xff] }
  0x42   : > { %364 = vst [vmem:[%s1776_s6 + $0x58] sm:$0xff] %v363_v15  ;;  %v389_v28 = vld [vmem:[%s1771_s5 + $0x180] sm:$0xff]  ;;  %v391_v29 = vld [vmem:[%s1771_s5 + $0x190] sm:$0xff] }
  0x43   : > { %366 = vst [vmem:[%s1776_s6 + $0x60] sm:$0xff] %v365_v16  ;;  %v393_v30 = vld [vmem:[%s1771_s5 + $0x1a0] sm:$0xff]  ;;  %v395_v31 = vld [vmem:[%s1771_s5 + $0x1b0] sm:$0xff] }
  0x44   : > { %368 = vst [vmem:[%s1776_s6 + $0x68] sm:$0xff] %v367_v17  ;;  %v397_v32 = vld [vmem:[%s1771_s5 + $0x1c0] sm:$0xff]  ;;  %v399_v33 = vld [vmem:[%s1771_s5 + $0x1d0] sm:$0xff] }
  0x45   : > { %370 = vst [vmem:[%s1776_s6 + $0x70] sm:$0xff] %v369_v18  ;;  %v401_v34 = vld [vmem:[%s1771_s5 + $0x1e0] sm:$0xff]  ;;  %v403_v35 = vld [vmem:[%s1771_s5 + $0x1f0] sm:$0xff] }
  0x46   : > { %372 = vst [vmem:[%s1776_s6 + $0x78] sm:$0xff] %v371_v19  ;;  %v405_v36 = vld [vmem:[%s1771_s5 + $0x200] sm:$0xff]  ;;  %v407_v37 = vld [vmem:[%s1771_s5 + $0x210] sm:$0xff] }
  0x47   : > { %374 = vst [vmem:[%s1776_s6 + $0x80] sm:$0xff] %v373_v20  ;;  %v409_v38 = vld [vmem:[%s1771_s5 + $0x220] sm:$0xff]  ;;  %v411_v39 = vld [vmem:[%s1771_s5 + $0x230] sm:$0xff] }
  0x48   : > { %376 = vst [vmem:[%s1776_s6 + $0x88] sm:$0xff] %v375_v21  ;;  %v413_v40 = vld [vmem:[%s1771_s5 + $0x240] sm:$0xff]  ;;  %v415_v41 = vld [vmem:[%s1771_s5 + $0x250] sm:$0xff] }
  0x49   : > { %378 = vst [vmem:[%s1776_s6 + $0x90] sm:$0xff] %v377_v22  ;;  %v417_v42 = vld [vmem:[%s1771_s5 + $0x260] sm:$0xff]  ;;  %v419_v43 = vld [vmem:[%s1771_s5 + $0x270] sm:$0xff] }
  0x4a   : > { %380 = vst [vmem:[%s1776_s6 + $0x98] sm:$0xff] %v379_v23  ;;  %v421_v44 = vld [vmem:[%s1771_s5 + $0x280] sm:$0xff]  ;;  %v423_v45 = vld [vmem:[%s1771_s5 + $0x290] sm:$0xff] }
  0x4b   : > { %382 = vst [vmem:[%s1776_s6 + $0xa0] sm:$0xff] %v381_v24  ;;  %v425_v46 = vld [vmem:[%s1771_s5 + $0x2a0] sm:$0xff]  ;;  %v427_v47 = vld [vmem:[%s1771_s5 + $0x2b0] sm:$0xff] }
  0x4c   : > { %384 = vst [vmem:[%s1776_s6 + $0xa8] sm:$0xff] %v383_v25  ;;  %v429_v48 = vld [vmem:[%s1771_s5 + $0x2c0] sm:$0xff]  ;;  %v431_v49 = vld [vmem:[%s1771_s5 + $0x2d0] sm:$0xff] }
  0x4d   : > { %386 = vst [vmem:[%s1776_s6 + $0xb0] sm:$0xff] %v385_v26  ;;  %v433_v50 = vld [vmem:[%s1771_s5 + $0x2e0] sm:$0xff]  ;;  %v435_v51 = vld [vmem:[%s1771_s5 + $0x2f0] sm:$0xff] }
  0x4e   : > { %388 = vst [vmem:[%s1776_s6 + $0xb8] sm:$0xff] %v387_v27 }
  0x4f   : > { %390 = vst [vmem:[%s1776_s6 + $0xc0] sm:$0xff] %v389_v28 }
  0x50   : > { %392 = vst [vmem:[%s1776_s6 + $0xc8] sm:$0xff] %v391_v29 }
  0x51   : > { %394 = vst [vmem:[%s1776_s6 + $0xd0] sm:$0xff] %v393_v30 }
  0x52   : > { %396 = vst [vmem:[%s1776_s6 + $0xd8] sm:$0xff] %v395_v31 }
  0x53   : > { %398 = vst [vmem:[%s1776_s6 + $0xe0] sm:$0xff] %v397_v32 }
  0x54   : > { %400 = vst [vmem:[%s1776_s6 + $0xe8] sm:$0xff] %v399_v33 }
  0x55   : > { %402 = vst [vmem:[%s1776_s6 + $0xf0] sm:$0xff] %v401_v34 }
  0x56   : > { %404 = vst [vmem:[%s1776_s6 + $0xf8] sm:$0xff] %v403_v35 }
  0x57   : > { %406 = vst [vmem:[%s1776_s6 + $0x100] sm:$0xff] %v405_v36 }
  0x58   : > { %408 = vst [vmem:[%s1776_s6 + $0x108] sm:$0xff] %v407_v37 }
  0x59   : > { %410 = vst [vmem:[%s1776_s6 + $0x110] sm:$0xff] %v409_v38 }
  0x5a   : > { %412 = vst [vmem:[%s1776_s6 + $0x118] sm:$0xff] %v411_v39 }
  0x5b   : > { %414 = vst [vmem:[%s1776_s6 + $0x120] sm:$0xff] %v413_v40 }
  0x5c   : > { %416 = vst [vmem:[%s1776_s6 + $0x128] sm:$0xff] %v415_v41 }
  0x5d   : > { %418 = vst [vmem:[%s1776_s6 + $0x130] sm:$0xff] %v417_v42 }
  0x5e   : > { %420 = vst [vmem:[%s1776_s6 + $0x138] sm:$0xff] %v419_v43 }
  0x5f   : > { %422 = vst [vmem:[%s1776_s6 + $0x140] sm:$0xff] %v421_v44 }
  0x60   : > { %424 = vst [vmem:[%s1776_s6 + $0x148] sm:$0xff] %v423_v45 }
  0x61   : > { %426 = vst [vmem:[%s1776_s6 + $0x150] sm:$0xff] %v425_v46 }
  0x62   : > { %428 = vst [vmem:[%s1776_s6 + $0x158] sm:$0xff] %v427_v47 }
  0x63   : > { %430 = vst [vmem:[%s1776_s6 + $0x160] sm:$0xff] %v429_v48 }
  0x64   : > { %432 = vst [vmem:[%s1776_s6 + $0x168] sm:$0xff] %v431_v49 }
  0x65   : > { %434 = vst [vmem:[%s1776_s6 + $0x170] sm:$0xff] %v433_v50 }
  0x66   : > { %436 = vst [vmem:[%s1776_s6 + $0x178] sm:$0xff] %v435_v51 }
  0x67 PF: > { %p1186_p0 = scmp.ge.s32.totalorder %s1634_s22, 1  ;;  %p441_p1 = scmp.lt.s32.totalorder %s1634_s22, 13 }
  0x69   : > { %p442_p2 = pnand %p1186_p0, %p441_p1 }
  0x6a   : > { %s448_s0 = sand.u32 (!%p442_p2), 1, %s1610_s16   ;;  %s455_s23 = sand.u32 (!%p442_p2), 1, %s1602_s14  }
  0x6b   : > { %445 = sbr.rel (%p442_p2) target bundleno = 364 (0x16c), region = 84  ;;  %s476_s7 = sand.u32 (!%p442_p2), 1, %s1594_s12  }
  0x6c   : > { %s1457_s28 = smul.u32 (!%p442_p2), 24, %s448_s0  ;;  %s1187_s26 = sshll.u32 (!%p442_p2), %s476_s7, 4 }
  0x6d   : > { %s1458_s11 = smul.u32 (!%p442_p2), 384, %s455_s23  ;;  %s1188_s29 = sshll.u32 (!%p442_p2), %s1622_s19, 1 }
  0x6e   : > { %p499_p3 = scmp.lt.s32.totalorder (!%p442_p2), %s1188_s29, 3  ;;  %s1882_s1 = scalar_lea.vmem (!%p442_p2), [#allocation3], %s1457_s28 }
  0x6f   : > { %s1884_s25 = scalar_lea.vmem (!%p442_p2), [#allocation4], %s1458_s11  ;;  %s1886_s24 = scalar_lea.vmem (!%p442_p2), [#allocation5], %s1187_s26 }
  0x70   : > { %s2078_s29 = smov (!%p499_p3, %s1188_s29), 3  ;;  %p1190_p4 = scmp.ne.s32.totalorder %s1618_s18, 0 }
  0x71   : > { %s1189_s4 = sshll.u32 %s2078_s29, 1 }
  0x72   : > { %s1880_s6 = scalar_lea.vmem %s2047_s3, %s1189_s4  ;;  %509 = sbr.rel (%p1190_p4) target bundleno = 124 (0x7c), region = 96 }
  0x77   : > { %v1636_v52 = vmov 0.0  }
  0x78   : > { %510 = vst [vmem:[#allocation2 + $0x10] sm:$0xff] %v1636_v52 }
  0x79   : > { %511 = vst [vmem:[#allocation2] sm:$0xff] %v1636_v52 }
  0x7a   : > { %512 = vst [vmem:[#allocation2 + $0x18] sm:$0xff] %v1636_v52 }
  0x7b   : > { %513 = vst [vmem:[#allocation2 + $0x8] sm:$0xff] %v1636_v52 }
  0x7c PF: > { %v1261_v53 = vld [vmem:[%s1884_s25 + $0x70] sm:$0xf]  ;;  %v1421_v54 = vld [vmem:[%s1884_s25 + $0x74] sm:$0xf0]  ;;  %v1253_v62 = vld [vmem:[%s1884_s25 + $0x60] sm:$0xf] }
  0x7d   : > { %v1325_v55 = vld [vmem:[%s1884_s25 + $0xf0] sm:$0xf]  ;;  %v1262_v56 = vor.u32 %v1421_v54, %v1261_v53  ;;  %v1437_v57 = vld [vmem:[%s1884_s25 + $0xf4] sm:$0xf0]  ;;  %v1419_v63 = vld [vmem:[%s1884_s25 + $0x64] sm:$0xf0] }
  0x7e   : > { %v1389_v58 = vld [vmem:[%s1884_s25 + $0x170] sm:$0xf]  ;;  %v1453_v59 = vld [vmem:[%s1884_s25 + $0x174] sm:$0xf0]  ;;  %v1326_v60 = vor.u32 %v1437_v57, %v1325_v55  ;;  %v1317_v0 = vld [vmem:[%s1884_s25 + $0xe0] sm:$0xf]  ;;  %v1254_v1 = vor.u32 %v1419_v63, %v1253_v62 }
  0x7f   : > { %v1390_v61 = vor.u32 %v1453_v59, %v1389_v58  ;;  %826 = vmatpush.bf16.msra.mxu0 %v1262_v56  ;;  %v1435_v2 = vld [vmem:[%s1884_s25 + $0xe4] sm:$0xf0]  ;;  %v1381_v3 = vld [vmem:[%s1884_s25 + $0x160] sm:$0xf]  ;;  %v1245_v7 = vld [vmem:[%s1884_s25 + $0x50] sm:$0xf] }
  0x80   : > { %v1451_v4 = vld [vmem:[%s1884_s25 + $0x164] sm:$0xf0]  ;;  %840 = vmatpush.bf16.msra.mxu1 %v1326_v60  ;;  %v1318_v5 = vor.u32 %v1435_v2, %v1317_v0  ;;  %v1417_v8 = vld [vmem:[%s1884_s25 + $0x54] sm:$0xf0]  ;;  %v1309_v9 = vld [vmem:[%s1884_s25 + $0xd0] sm:$0xf] }
  0x81   : > { %854 = vmatpush.bf16.msra.mxu2 %v1390_v61  ;;  %v1382_v6 = vor.u32 %v1451_v4, %v1381_v3  ;;  %v1433_v10 = vld [vmem:[%s1884_s25 + $0xd4] sm:$0xf0]  ;;  %v1373_v11 = vld [vmem:[%s1884_s25 + $0x150] sm:$0xf]  ;;  %v1246_v13 = vor.u32 %v1417_v8, %v1245_v7  ;;  %v1237_v14 = vld [vmem:[%s1884_s25 + $0x40] sm:$0xf] }
  0x82   : > { %v1449_v12 = vld [vmem:[%s1884_s25 + $0x154] sm:$0xf0]  ;;  %v1415_v15 = vld [vmem:[%s1884_s25 + $0x44] sm:$0xf0]  ;;  %v1310_v16 = vor.u32 %v1433_v10, %v1309_v9  ;;  %v1301_v18 = vld [vmem:[%s1884_s25 + $0xc0] sm:$0xf] }
  0x83   : > { %827 = vmatpush.bf16.msra.mxu0 %v1254_v1  ;;  %v1374_v17 = vor.u32 %v1449_v12, %v1373_v11  ;;  %v1420_v19 = vld [vmem:[%s1884_s25 + $0x74] sm:$0xf]  ;;  %v1263_v20 = vld [vmem:[%s1884_s25 + $0x78] sm:$0xf0]  ;;  %v1431_v21 = vld [vmem:[%s1884_s25 + $0xc4] sm:$0xf0]  ;;  %v1238_v26 = vor.u32 %v1415_v15, %v1237_v14 }
  0x84   : > { %841 = vmatpush.bf16.msra.mxu1 %v1318_v5  ;;  %v1365_v22 = vld [vmem:[%s1884_s25 + $0x140] sm:$0xf]  ;;  %v1447_v23 = vld [vmem:[%s1884_s25 + $0x144] sm:$0xf0]  ;;  %v1266_v24 = vor.u32 %v1420_v19, %v1263_v20  ;;  %v1418_v25 = vld [vmem:[%s1884_s25 + $0x64] sm:$0xf]  ;;  %v1302_v30 = vor.u32 %v1431_v21, %v1301_v18 }
  0x85   : > { %855 = vmatpush.bf16.msra.mxu2 %v1382_v6  ;;  %v1229_v27 = vld [vmem:[%s1884_s25 + $0x30] sm:$0xf]  ;;  %v1413_v28 = vld [vmem:[%s1884_s25 + $0x34] sm:$0xf0]  ;;  %v1255_v29 = vld [vmem:[%s1884_s25 + $0x68] sm:$0xf0]  ;;  %v1366_v31 = vor.u32 %v1447_v23, %v1365_v22 }
  0x86   : > { %868 = vmatpush.bf16.msra.mxu3 %v1266_v24  ;;  %v1293_v32 = vld [vmem:[%s1884_s25 + $0xb0] sm:$0xf]  ;;  %v1429_v33 = vld [vmem:[%s1884_s25 + $0xb4] sm:$0xf0]  ;;  %v1258_v35 = vor.u32 %v1418_v25, %v1255_v29  ;;  %v1416_v37 = vld [vmem:[%s1884_s25 + $0x54] sm:$0xf]  ;;  %v1230_v39 = vor.u32 %v1413_v28, %v1229_v27 }
  0x87   : > { %828 = vmatpush.bf16.msra.mxu0 %v1246_v13  ;;  %v1357_v34 = vld [vmem:[%s1884_s25 + $0x130] sm:$0xf]  ;;  %v1445_v36 = vld [vmem:[%s1884_s25 + $0x134] sm:$0xf0]  ;;  %v1247_v38 = vld [vmem:[%s1884_s25 + $0x58] sm:$0xf0]  ;;  %v1294_v43 = vor.u32 %v1429_v33, %v1293_v32 }
  0x88   : > { %842 = vmatpush.bf16.msra.mxu1 %v1310_v16  ;;  %v1221_v40 = vld [vmem:[%s1884_s25 + $0x20] sm:$0xf]  ;;  %v1411_v41 = vld [vmem:[%s1884_s25 + $0x24] sm:$0xf0]  ;;  %v1250_v42 = vor.u32 %v1416_v37, %v1247_v38  ;;  %v1358_v44 = vor.u32 %v1445_v36, %v1357_v34  ;;  %v1414_v46 = vld [vmem:[%s1884_s25 + $0x44] sm:$0xf] }
  0x89   : > { %856 = vmatpush.bf16.msra.mxu2 %v1374_v17  ;;  %v1285_v45 = vld [vmem:[%s1884_s25 + $0xa0] sm:$0xf]  ;;  %v1239_v47 = vld [vmem:[%s1884_s25 + $0x48] sm:$0xf0]  ;;  %v1427_v48 = vld [vmem:[%s1884_s25 + $0xa4] sm:$0xf0]  ;;  %v1222_v51 = vor.u32 %v1411_v41, %v1221_v40 }
  0x8a   : > { %869 = vmatpush.bf16.msra.mxu3 %v1258_v35  ;;  %v1349_v49 = vld [vmem:[%s1884_s25 + $0x120] sm:$0xf]  ;;  %v1443_v50 = vld [vmem:[%s1884_s25 + $0x124] sm:$0xf0]  ;;  %v1213_v52 = vld [vmem:[%s1884_s25 + $0x10] sm:$0xf]  ;;  %v1242_v54 = vor.u32 %v1414_v46, %v1239_v47  ;;  %v1286_v55 = vor.u32 %v1427_v48, %v1285_v45 }
  0x8b   : > { %829 = vmatpush.bf16.msra.mxu0 %v1238_v26  ;;  %v1409_v53 = vld [vmem:[%s1884_s25 + $0x14] sm:$0xf0]  ;;  %v1350_v56 = vor.u32 %v1443_v50, %v1349_v49  ;;  %v1277_v57 = vld [vmem:[%s1884_s25 + $0x90] sm:$0xf]  ;;  %v1412_v58 = vld [vmem:[%s1884_s25 + $0x34] sm:$0xf] }
  0x8c   : > { %843 = vmatpush.bf16.msra.mxu1 %v1302_v30  ;;  %v1231_v59 = vld [vmem:[%s1884_s25 + $0x38] sm:$0xf0]  ;;  %v1425_v60 = vld [vmem:[%s1884_s25 + $0x94] sm:$0xf0]  ;;  %v1341_v61 = vld [vmem:[%s1884_s25 + $0x110] sm:$0xf]  ;;  %v1214_v63 = vor.u32 %v1409_v53, %v1213_v52 }
  0x8d   : > { %857 = vmatpush.bf16.msra.mxu2 %v1366_v31  ;;  %v1441_v62 = vld [vmem:[%s1884_s25 + $0x114] sm:$0xf0]  ;;  %v1205_v0 = vld [vmem:[%s1884_s25] sm:$0xf]  ;;  %v1407_v1 = vld [vmem:[%s1884_s25 + $0x4] sm:$0xf0]  ;;  %v1234_v3 = vor.u32 %v1412_v58, %v1231_v59  ;;  %v1278_v4 = vor.u32 %v1425_v60, %v1277_v57 }
  0x8e   : > { %870 = vmatpush.bf16.msra.mxu3 %v1250_v42  ;;  %v1269_v2 = vld [vmem:[%s1884_s25 + $0x80] sm:$0xf]  ;;  %v1342_v5 = vor.u32 %v1441_v62, %v1341_v61  ;;  %v1423_v6 = vld [vmem:[%s1884_s25 + $0x84] sm:$0xf0]  ;;  %v1410_v7 = vld [vmem:[%s1884_s25 + $0x24] sm:$0xf]  ;;  %v1206_v15 = vor.u32 %v1407_v1, %v1205_v0 }
  0x8f   : > { %830 = vmatpush.bf16.msra.mxu0 %v1230_v39  ;;  %v1223_v8 = vld [vmem:[%s1884_s25 + $0x28] sm:$0xf0]  ;;  %v1333_v9 = vld [vmem:[%s1884_s25 + $0x100] sm:$0xf]  ;;  %v1439_v10 = vld [vmem:[%s1884_s25 + $0x104] sm:$0xf0]  ;;  %v1270_v20 = vor.u32 %v1423_v6, %v1269_v2 }
  0x90   : > { %844 = vmatpush.bf16.msra.mxu1 %v1294_v43  ;;  %v1436_v11 = vld [vmem:[%s1884_s25 + $0xf4] sm:$0xf]  ;;  %v1327_v12 = vld [vmem:[%s1884_s25 + $0xf8] sm:$0xf0]  ;;  %v1201_v16 = vld [vmem:[%s1882_s1 + $0x8] sm:$0xf]  ;;  %v1226_v17 = vor.u32 %v1410_v7, %v1223_v8  ;;  %v1334_v21 = vor.u32 %v1439_v10, %v1333_v9 }
  0x91   : > { %858 = vmatpush.bf16.msra.mxu2 %v1358_v44  ;;  %v1452_v13 = vld [vmem:[%s1884_s25 + $0x174] sm:$0xf]  ;;  %v1391_v14 = vld [vmem:[%s1884_s25 + $0x178] sm:$0xf0]  ;;  %v1193_v18 = vld [vmem:[%s1882_s1] sm:$0xf]  ;;  %v1330_v25 = vor.u32 %v1436_v11, %v1327_v12 }
  0x92   : > { %871 = vmatpush.bf16.msra.mxu3 %v1242_v54  ;;  %v1404_v19 = vld [vmem:[%s1882_s1 + $0x8] sm:$0xf0]  ;;  %v1405_v22 = vld [vmem:[%s1882_s1 + $0x10] sm:$0xf0]  ;;  %v1403_v23 = vld [vmem:[%s1882_s1 + $0x4] sm:$0xf]  ;;  %v1394_v26 = vor.u32 %v1452_v13, %v1391_v14 }
  0x93   : > { %831 = vmatpush.bf16.msra.mxu0 %v1222_v51  ;;  %v1195_v24 = vld [vmem:[%s1882_s1 + $0xc] sm:$0xf0]  ;;  %v1434_v27 = vld [vmem:[%s1884_s25 + $0xe4] sm:$0xf]  ;;  %v1408_v28 = vld [vmem:[%s1884_s25 + $0x14] sm:$0xf]  ;;  %v1194_v33 = vor.u32 %v1404_v19, %v1193_v18  ;;  %v1965_v34 = vor.u32 %v1405_v22, %v1201_v16 }
  0x94   : > { %845 = vmatpush.bf16.msra.mxu1 %v1286_v55  ;;  %v1215_v29 = vld [vmem:[%s1884_s25 + $0x18] sm:$0xf0]  ;;  %v1319_v30 = vld [vmem:[%s1884_s25 + $0xe8] sm:$0xf0]  ;;  %v1450_v31 = vld [vmem:[%s1884_s25 + $0x164] sm:$0xf]  ;;  %v1967_v35 = vor.u32 %v1403_v23, %v1195_v24 }
  0x95   : > { %859 = vmatpush.bf16.msra.mxu2 %v1350_v56  ;;  %v1383_v32 = vld [vmem:[%s1884_s25 + $0x168] sm:$0xf0]  ;;  %v1218_v36 = vor.u32 %v1408_v28, %v1215_v29  ;;  %v1322_v37 = vor.u32 %v1434_v27, %v1319_v30  ;;  %v1432_v39 = vld [vmem:[%s1884_s25 + $0xd4] sm:$0xf]  ;;  %v1406_v40 = vld [vmem:[%s1884_s25 + $0x4] sm:$0xf] }
  0x96   : > { %872 = vmatpush.bf16.msra.mxu3 %v1234_v3  ;;  %v1386_v38 = vor.u32 %v1450_v31, %v1383_v32  ;;  %v1207_v41 = vld [vmem:[%s1884_s25 + $0x8] sm:$0xf0]  ;;  %v1311_v42 = vld [vmem:[%s1884_s25 + $0xd8] sm:$0xf0]  ;;  %v1448_v43 = vld [vmem:[%s1884_s25 + $0x154] sm:$0xf] }
  0x97   : > { %832 = vmatpush.bf16.msra.mxu0 %v1214_v63  ;;  %v1375_v44 = vld [vmem:[%s1884_s25 + $0x158] sm:$0xf0]  ;;  %v1210_v45 = vor.u32 %v1406_v40, %v1207_v41  ;;  %v1314_v46 = vor.u32 %v1432_v39, %v1311_v42  ;;  %v1430_v48 = vld [vmem:[%s1884_s25 + $0xc4] sm:$0xf]  ;;  %v1303_v49 = vld [vmem:[%s1884_s25 + $0xc8] sm:$0xf0] }
  0x98   : > { %846 = vmatpush.bf16.msra.mxu1 %v1278_v4  ;;  %v1378_v47 = vor.u32 %v1448_v43, %v1375_v44  ;;  %v1446_v50 = vld [vmem:[%s1884_s25 + $0x144] sm:$0xf]  ;;  %v1367_v51 = vld [vmem:[%s1884_s25 + $0x148] sm:$0xf0]  ;;  %v1306_v52 = vor.u32 %v1430_v48, %v1303_v49  ;;  %v1428_v54 = vld [vmem:[%s1884_s25 + $0xb4] sm:$0xf] }
  0x99   : > { %860 = vmatpush.bf16.msra.mxu2 %v1342_v5  ;;  %v1370_v53 = vor.u32 %v1446_v50, %v1367_v51  ;;  %v1295_v55 = vld [vmem:[%s1884_s25 + $0xb8] sm:$0xf0]  ;;  %v1444_v56 = vld [vmem:[%s1884_s25 + $0x134] sm:$0xf]  ;;  %v1426_v60 = vld [vmem:[%s1884_s25 + $0xa4] sm:$0xf] }
  0x9a   : > { %873 = vmatpush.bf16.msra.mxu3 %v1226_v17  ;;  %v1359_v57 = vld [vmem:[%s1884_s25 + $0x138] sm:$0xf0]  ;;  %v1298_v58 = vor.u32 %v1428_v54, %v1295_v55  ;;  %v1287_v61 = vld [vmem:[%s1884_s25 + $0xa8] sm:$0xf0]  ;;  %v1442_v62 = vld [vmem:[%s1884_s25 + $0x124] sm:$0xf] }
  0x9b   : > { %833 = vmatpush.bf16.msra.mxu0 %v1206_v15  ;;  %v1362_v59 = vor.u32 %v1444_v56, %v1359_v57  ;;  %v1351_v63 = vld [vmem:[%s1884_s25 + $0x128] sm:$0xf0]  ;;  %v1290_v0 = vor.u32 %v1426_v60, %v1287_v61  ;;  %v1424_v2 = vld [vmem:[%s1884_s25 + $0x94] sm:$0xf]  ;;  %v1279_v3 = vld [vmem:[%s1884_s25 + $0x98] sm:$0xf0] }
  0x9c   : > { %847 = vmatpush.bf16.msra.mxu1 %v1270_v20  ;;  %v1354_v1 = vor.u32 %v1442_v62, %v1351_v63  ;;  %v1440_v4 = vld [vmem:[%s1884_s25 + $0x114] sm:$0xf]  ;;  %v1343_v5 = vld [vmem:[%s1884_s25 + $0x118] sm:$0xf0]  ;;  %v1282_v6 = vor.u32 %v1424_v2, %v1279_v3  ;;  %v1422_v8 = vld [vmem:[%s1884_s25 + $0x84] sm:$0xf] }
  0x9d   : > { %861 = vmatpush.bf16.msra.mxu2 %v1334_v21  ;;  %v1346_v7 = vor.u32 %v1440_v4, %v1343_v5  ;;  %v1271_v9 = vld [vmem:[%s1884_s25 + $0x88] sm:$0xf0]  ;;  %v1438_v10 = vld [vmem:[%s1884_s25 + $0x104] sm:$0xf]  ;;  %v515_v32 = vld [vmem:[#allocation2] sm:$0xff]  ;;  %p1395_p5 = scmp.ne.s32.totalorder %s1618_s18, 5 }
  0x9e   : > { %834 = vmatmul.bf16.vlgmr.msra.gmra.mxu0 %v1194_v33  ;;  %874 = vmatpush.bf16.msra.mxu3 %v1218_v36  ;;  %v1335_v11 = vld [vmem:[%s1884_s25 + $0x108] sm:$0xf0]  ;;  %v1274_v12 = vor.u32 %v1422_v8, %v1271_v9  ;;  %v514_v17 = vld [vmem:[#allocation2 + $0x10] sm:$0xff] }
  0x9f   : > { %882 = vmatpush.bf16.msrb.mxu0 %v1330_v25  ;;  %848 = vmatmul.bf16.vlgmr.msra.gmra.mxu1 %v1967_v35  ;;  %v1338_v13 = vor.u32 %v1438_v10, %v1335_v11  ;;  %v516_v24 = vld [vmem:[#allocation2 + $0x18] sm:$0xff] }
  0xa0   : > { %896 = vmatpush.bf16.msrb.mxu1 %v1394_v26  ;;  %862 = vmatmul.bf16.vlgmr.msra.gmra.mxu2 %v1965_v34 }
  0xa2   : > { %875 = vmatpush.bf16.msra.mxu3 %v1210_v45 }
  0xa3   : > { %883 = vmatpush.bf16.msrb.mxu0 %v1322_v37 }
  0xa4   : > { %897 = vmatpush.bf16.msrb.mxu1 %v1386_v38  ;;  %v517_v38 = vld [vmem:[#allocation2 + $0x8] sm:$0xff] }
  0xa5   : > { %876 = vmatmul.bf16.vlgmr.msra.gmra.mxu3 %v1194_v33 }
  0xa7   : > { %884 = vmatpush.bf16.msrb.mxu0 %v1314_v46 }
  0xa8   : > { %898 = vmatpush.bf16.msrb.mxu1 %v1378_v47 }
  0xab   : > { %885 = vmatpush.bf16.msrb.mxu0 %v1306_v52 }
  0xac   : > { %899 = vmatpush.bf16.msrb.mxu1 %v1370_v53 }
  0xaf   : > { %886 = vmatpush.bf16.msrb.mxu0 %v1298_v58 }
  0xb0   : > { %900 = vmatpush.bf16.msrb.mxu1 %v1362_v59 }
  0xb3   : > { %887 = vmatpush.bf16.msrb.mxu0 %v1290_v0 }
  0xb4   : > { %901 = vmatpush.bf16.msrb.mxu1 %v1354_v1 }
  0xb7   : > { %888 = vmatpush.bf16.msrb.mxu0 %v1282_v6 }
  0xb8   : > { %902 = vmatpush.bf16.msrb.mxu1 %v1346_v7 }
  0xbb   : > { %889 = vmatpush.bf16.msrb.mxu0 %v1274_v12 }
  0xbc   : > { %903 = vmatpush.bf16.msrb.mxu1 %v1338_v13 }
  0xbe   : > { %890 = vmatmul.bf16.vlgmr.msrb.gmra.mxu0 %v1967_v35 }
  0xbf   : > { %904 = vmatmul.bf16.vlgmr.msrb.gmra.mxu1 %v1965_v34 }
 0x11b   : > { %v835_v14 = vpop.f32.mrf.mxu0 }
 0x11c   : > { %v849_v15 = vpop.f32.mrf.mxu1 }
 0x11d   : > { %v850_v16 = vadd.f32 %v849_v15, %v835_v14 }
 0x123   : > { %v863_v18 = vpop.f32.mrf.mxu2  ;;  %v837_v20 = vpop.f32.mrf.mxu0 }
 0x124   : > { %v864_v19 = vadd.f32 %v863_v18, %v850_v16  ;;  %v851_v21 = vpop.f32.mrf.mxu1 }
 0x125   : > { %v852_v23 = vadd.f32 %v851_v21, %v837_v20 }
 0x126   : > { %v910_v22 = vadd.f32 %v864_v19, %v514_v17 }
 0x128   : > { %914 = vst [vmem:[#allocation2 + $0x10] sm:$0xff] %v910_v22  ;;  %v877_v28 = vpop.f32.mrf.mxu3 }
 0x12b   : > { %v865_v25 = vpop.f32.mrf.mxu2 }
 0x12c   : > { %v866_v26 = vadd.f32 %v865_v25, %v852_v23 }
 0x12e   : > { %v912_v27 = vadd.f32 %v866_v26, %v516_v24 }
 0x130   : > { %916 = vst [vmem:[#allocation2 + $0x18] sm:$0xff] %v912_v27  ;;  %v879_v35 = vpop.f32.mrf.mxu3 }
 0x13b   : > { %v891_v29 = vpop.f32.mrf.mxu0 }
 0x13c   : > { %v905_v30 = vpop.f32.mrf.mxu1  ;;  %v892_v31 = vadd.f32 %v891_v29, %v877_v28 }
 0x13e   : > { %v906_v33 = vadd.f32 %v905_v30, %v892_v31 }
 0x140   : > { %v911_v34 = vadd.f32 %v906_v33, %v515_v32 }
 0x142   : > { %915 = vst [vmem:[#allocation2] sm:$0xff] %v911_v34 }
 0x143   : > { %v893_v36 = vpop.f32.mrf.mxu0 }
 0x144   : > { %v894_v37 = vadd.f32 %v893_v36, %v879_v35  ;;  %v907_v39 = vpop.f32.mrf.mxu1 }
 0x146   : > { %v908_v40 = vadd.f32 %v907_v39, %v894_v37  ;;  %921 = sbr.rel (%p1395_p5) target bundleno = 359 (0x167), region = 100 }
 0x148   : > { %v913_v41 = vadd.f32 %v908_v40, %v517_v38 }
 0x14a   : > { %917 = vst [vmem:[#allocation2 + $0x8] sm:$0xff] %v913_v41 }
 0x14b   : > { %v922_v42 = vld [vmem:[#allocation2 + $0x10] sm:$0xff]  ;;  %v923_v43 = vld [vmem:[#allocation2] sm:$0xff]  ;;  %v924_v44 = vld [vmem:[#allocation2 + $0x18] sm:$0xff]  ;;  %vm962_vm0 = vcmask 1040384   ;;  %vm968_vm1 = vcmask 1041408  }
 0x14c   : > { %v926_v45 = vpack.c.bf16 %v923_v43, %v922_v42  ;;  %v944_v46 = vmul.f32 %v922_v42, %v922_v42  ;;  %v945_v47 = vmul.f32 %v923_v43, %v923_v43  ;;  %v930_v49 = vadd.f32 %v924_v44, %v922_v42 }
 0x14d   : > { %v946_v52 = vmul.f32 %v924_v44, %v924_v44 }
 0x14e   : > { %928 = vst [vmem:[%s1886_s24] sm:$0xff] %v926_v45  ;;  %v931_v54 = vrot.slane %v930_v49, 4 }
 0x14f   : > { %v948_v56 = vadd.f32 %v946_v52, %v944_v46 }
 0x150   : > { %v932_v58 = vadd.f32 %v931_v54, %v930_v49 }
 0x151   : > { %v925_v48 = vld [vmem:[#allocation2 + $0x8] sm:$0xff]  ;;  %v949_v60 = vrot.slane %v948_v56, 4 }
 0x152   : > { %v927_v50 = vpack.c.bf16 %v925_v48, %v924_v44  ;;  %v937_v51 = vadd.f32 %v925_v48, %v923_v43  ;;  %v947_v53 = vmul.f32 %v925_v48, %v925_v48  ;;  %v933_v62 = vrot.slane %v932_v58, 2 }
 0x153   : > { %v950_v0 = vadd.f32 %v949_v60, %v948_v56 }
 0x154   : > { %929 = vst [vmem:[%s1886_s24 + $0x8] sm:$0xff] %v927_v50  ;;  %v938_v55 = vrot.slane %v937_v51, 4  ;;  %v955_v57 = vadd.f32 %v947_v53, %v945_v47  ;;  %v934_v2 = vadd.f32 %v933_v62, %v932_v58 }
 0x155   : > { %v951_v5 = vrot.slane %v950_v0, 2 }
 0x156   : > { %v939_v59 = vadd.f32 %v938_v55, %v937_v51  ;;  %v956_v61 = vrot.slane %v955_v57, 4  ;;  %v935_v6 = vrot.slane %v934_v2, 1 }
 0x157   : > { %v952_v9 = vadd.f32 %v951_v5, %v950_v0 }
 0x158   : > { %v940_v63 = vrot.slane %v939_v59, 2  ;;  %v957_v1 = vadd.f32 %v956_v61, %v955_v57  ;;  %v936_v10 = vadd.f32 %v935_v6, %v934_v2 }
 0x159   : > { %v953_v12 = vrot.slane %v952_v9, 1 }
 0x15a   : > { %v941_v3 = vadd.f32 %v940_v63, %v939_v59  ;;  %v958_v4 = vrot.slane %v957_v1, 2 }
 0x15b   : > { %v954_v14 = vadd.f32 %v953_v12, %v952_v9 }
 0x15c   : > { %v942_v7 = vrot.slane %v941_v3, 1  ;;  %v959_v8 = vadd.f32 %v958_v4, %v957_v1 }
 0x15d   : > { %v963_v16 = vsel %vm962_vm0, %v936_v10, %v954_v14 }
 0x15e   : > { %v943_v11 = vadd.f32 %v942_v7, %v941_v3  ;;  %v960_v13 = vrot.slane %v959_v8, 1 }
 0x160   : > { %v961_v15 = vadd.f32 %v960_v13, %v959_v8 }
 0x162   : > { %v964_v17 = vsel %vm962_vm0, %v943_v11, %v961_v15 }
 0x163   : > { %v967_v18 = vrot.slane %v964_v17, 6 }
 0x165   : > { %v969_v19 = vsel %vm968_vm1, %v963_v16, %v967_v18 }
 0x166   : > { %971 = vst [vmem:[%s1880_s6] sm:$0xf] %v969_v19 }
 0x167 PF: > { %987 = sbr.rel (!%p1751_p12) target bundleno = 364 (0x16c), region = 104  ;;  %s1454_s1 = sshll.u32 (%p1751_p12), %s1622_s19, 3  ;;  %v1024_v20 = vld [vmem:[%s1886_s24] sm:$0xff] (%p1751_p12)  ;;  %v1026_v21 = vld [vmem:[%s1886_s24 + $0x8] sm:$0xff] (%p1751_p12) }
 0x168   : > { %s993_s16 = scalar_lea.vmem (%p1751_p12), %s2046_s2, %s1454_s1 }
 0x169   : > { %1025 = vst [vmem:[%s993_s16] sm:$0xff] (%p1751_p12), %v1024_v20 }
 0x16a   : > { %1027 = vst [vmem:[%s993_s16 + $0x10] sm:$0xff] (%p1751_p12), %v1026_v21 }
 0x16c PF: > { %s14_s22 = sadd.s32 1, %s1634_s22   ;;  %s2059_s24 = sld [smem:[#allocation6_spill]] }
 0x16d   : > { %p11_p6 = scmp.ge.s32.totalorder %s14_s22, 14   ;;  %s2060_s25 = sld [smem:[#allocation7_spill]] }
 0x16e   : > { %s2061_s12 = smov %s1598_s13  ;;  %s2062_s13 = smov %s1749_s9 }
 0x16f   : > { %s2063_s14 = smov %s1606_s15  ;;  %s2064_s15 = smov %s1746_s8 }
 0x170   : > { %s2065_s16 = smov %s1614_s17  ;;  %s2066_s17 = smov %s1732_s30 }
 0x171   : > { %s2067_s18 = smov %s1626_s20  ;;  %s2068_s19 = smov %s1630_s21 }
 0x172   : > { %s2069_s20 = smov %s2059_s24  ;;  %13 = sbr.rel (!%p11_p6) target bundleno = 9 (0x9), region = 199 }
 0x173   : > { %s2070_s21 = smov %s2060_s25 }

// kernel: _lambda_.45
= control target key start
LH: loop header
LB: loop body
LE: loop exit
PB: predicated region body
PF: predicated region fallthrough
CT: control target
= control target key end

     0   :  { %s1238_s12 = smov 0   ;;  %s1240_s13 = smov 0   ;;  %s1470_s0 = inlined_call_operand.vmem [shape: bf16[16,256], index: 0, kind: input, shape index: {}]   ;;  %s1471_s1 = inlined_call_operand.vmem [shape: bf16[256,512], index: 1, kind: input, shape index: {}]   ;;  %s1472_s2 = inlined_call_operand.vmem [shape: bf16[16,512], index: 2, kind: output, shape index: {0}]   ;;  %s1473_s3 = inlined_call_operand.vmem [shape: f32[1,2,512], index: 3, kind: output, shape index: {1}]  }
   0x1   :  { %s1242_s14 = smov 0   ;;  %s1244_s15 = smov 0  }
   0x2   :  { %s1246_s16 = smov 0  }
   0x3 LB: > { %s33_s17 = sadd.s32 1, %s1212_s15  ;;  %s948_s18 = sadd.s32 4294967295, %s1216_s16   ;;  %s1216_s16 = sphi %s1246_s16, %s14_s16   ;;  %s1212_s15 = sphi %s1244_s15, %s1478_s15   ;;  %s1208_s14 = sphi %s1242_s14, %s1477_s14   ;;  %s1204_s13 = sphi %s1240_s13, %s1476_s13   ;;  %s1200_s12 = sphi %s1238_s12, %s1475_s12  }
   0x4   : > { %p35_p0 = scmp.ge.s32.totalorder %s33_s17, 2  ;;  %p77_p1 = scmp.ne.s32.totalorder %s1204_s13, %s1200_s12 }
   0x5   : > { %p78_p2 = scmp.eq.s32.totalorder %s1216_s16, 0  ;;  %p109_p4 = scmp.eq.s32.totalorder %s948_s18, 1 }
   0x6   : > { %s1480_s17 = smov (%p35_p0, %s33_s17), 0  ;;  %s70_s20 = sadd.s32 1, %s1204_s13 }
   0x7   : > { %p79_p3 = por %p78_p2, %p77_p1  ;;  %s66_s19 = ssub.s32 %s1212_s15, %s1480_s17 }
   0x8   : > { %p68_p5 = scmp.eq.s32.totalorder %s66_s19, 0  ;;  %p1273_p6 = por %p109_p4, %p77_p1 }
   0x9   : > { %p952_p7 = scmp.ge.s32.totalorder %s1216_s16, 2 }
   0xa   : > { %s1278_s22 = scalar_select %p68_p5, %s1204_s13, %s70_s20  }
   0xb   : > { %174 = sbr.rel (%p952_p7) target bundleno = 52 (0x34), region = 20 }
  0x10   : > { %177 = sbr.rel (!%p79_p3) target bundleno = 52 (0x34), region = 24  ;;  %s179_s23 = sand.u32 (%p79_p3), 1, %s1204_s13  }
  0x11   : > { %s1102_s24 = sshll.u32 (%p79_p3), %s1212_s15, 3  ;;  %s953_s25 = sshll.u32 (%p79_p3), %s179_s23, 8 }
  0x12   : > { %s1286_s28 = scalar_lea.vmem (%p79_p3), %s1471_s1, %s1102_s24  ;;  %s1291_s29 = scalar_lea.vmem (%p79_p3), [#allocation3], %s953_s25 }
  0x13   : > { %v278_v0 = vld [vmem:[%s1286_s28] sm:$0xff] (%p79_p3)  ;;  %v280_v1 = vld [vmem:[%s1286_s28 + $0x10] sm:$0xff] (%p79_p3) }
  0x14   : > { %v282_v2 = vld [vmem:[%s1286_s28 + $0x20] sm:$0xff] (%p79_p3)  ;;  %279 = vst [vmem:[%s1291_s29] sm:$0xff] (%p79_p3), %v278_v0  ;;  %v284_v3 = vld [vmem:[%s1286_s28 + $0x30] sm:$0xff] (%p79_p3) }
  0x15   : > { %281 = vst [vmem:[%s1291_s29 + $0x8] sm:$0xff] %v280_v1  ;;  %v286_v4 = vld [vmem:[%s1286_s28 + $0x40] sm:$0xff]  ;;  %v288_v5 = vld [vmem:[%s1286_s28 + $0x50] sm:$0xff] }
  0x16   : > { %283 = vst [vmem:[%s1291_s29 + $0x10] sm:$0xff] %v282_v2  ;;  %v290_v6 = vld [vmem:[%s1286_s28 + $0x60] sm:$0xff]  ;;  %v292_v7 = vld [vmem:[%s1286_s28 + $0x70] sm:$0xff] }
  0x17   : > { %285 = vst [vmem:[%s1291_s29 + $0x18] sm:$0xff] %v284_v3  ;;  %v294_v8 = vld [vmem:[%s1286_s28 + $0x80] sm:$0xff]  ;;  %v296_v9 = vld [vmem:[%s1286_s28 + $0x90] sm:$0xff] }
  0x18   : > { %287 = vst [vmem:[%s1291_s29 + $0x20] sm:$0xff] %v286_v4  ;;  %v298_v10 = vld [vmem:[%s1286_s28 + $0xa0] sm:$0xff]  ;;  %v300_v11 = vld [vmem:[%s1286_s28 + $0xb0] sm:$0xff] }
  0x19   : > { %289 = vst [vmem:[%s1291_s29 + $0x28] sm:$0xff] %v288_v5  ;;  %v302_v12 = vld [vmem:[%s1286_s28 + $0xc0] sm:$0xff]  ;;  %v304_v13 = vld [vmem:[%s1286_s28 + $0xd0] sm:$0xff] }
  0x1a   : > { %291 = vst [vmem:[%s1291_s29 + $0x30] sm:$0xff] %v290_v6  ;;  %v306_v14 = vld [vmem:[%s1286_s28 + $0xe0] sm:$0xff]  ;;  %v308_v15 = vld [vmem:[%s1286_s28 + $0xf0] sm:$0xff] }
  0x1b   : > { %293 = vst [vmem:[%s1291_s29 + $0x38] sm:$0xff] %v292_v7  ;;  %v310_v16 = vld [vmem:[%s1286_s28 + $0x100] sm:$0xff]  ;;  %v312_v17 = vld [vmem:[%s1286_s28 + $0x110] sm:$0xff] }
  0x1c   : > { %295 = vst [vmem:[%s1291_s29 + $0x40] sm:$0xff] %v294_v8  ;;  %v314_v18 = vld [vmem:[%s1286_s28 + $0x120] sm:$0xff]  ;;  %v316_v19 = vld [vmem:[%s1286_s28 + $0x130] sm:$0xff] }
  0x1d   : > { %297 = vst [vmem:[%s1291_s29 + $0x48] sm:$0xff] %v296_v9  ;;  %v318_v20 = vld [vmem:[%s1286_s28 + $0x140] sm:$0xff]  ;;  %v320_v21 = vld [vmem:[%s1286_s28 + $0x150] sm:$0xff] }
  0x1e   : > { %299 = vst [vmem:[%s1291_s29 + $0x50] sm:$0xff] %v298_v10  ;;  %v322_v22 = vld [vmem:[%s1286_s28 + $0x160] sm:$0xff]  ;;  %v324_v23 = vld [vmem:[%s1286_s28 + $0x170] sm:$0xff] }
  0x1f   : > { %301 = vst [vmem:[%s1291_s29 + $0x58] sm:$0xff] %v300_v11  ;;  %v326_v24 = vld [vmem:[%s1286_s28 + $0x180] sm:$0xff]  ;;  %v328_v25 = vld [vmem:[%s1286_s28 + $0x190] sm:$0xff] }
  0x20   : > { %303 = vst [vmem:[%s1291_s29 + $0x60] sm:$0xff] %v302_v12  ;;  %v330_v26 = vld [vmem:[%s1286_s28 + $0x1a0] sm:$0xff]  ;;  %v332_v27 = vld [vmem:[%s1286_s28 + $0x1b0] sm:$0xff] }
  0x21   : > { %305 = vst [vmem:[%s1291_s29 + $0x68] sm:$0xff] %v304_v13  ;;  %v334_v28 = vld [vmem:[%s1286_s28 + $0x1c0] sm:$0xff]  ;;  %v336_v29 = vld [vmem:[%s1286_s28 + $0x1d0] sm:$0xff] }
  0x22   : > { %307 = vst [vmem:[%s1291_s29 + $0x70] sm:$0xff] %v306_v14  ;;  %v338_v30 = vld [vmem:[%s1286_s28 + $0x1e0] sm:$0xff]  ;;  %v340_v31 = vld [vmem:[%s1286_s28 + $0x1f0] sm:$0xff] }
  0x23   : > { %309 = vst [vmem:[%s1291_s29 + $0x78] sm:$0xff] %v308_v15 }
  0x24   : > { %311 = vst [vmem:[%s1291_s29 + $0x80] sm:$0xff] %v310_v16 }
  0x25   : > { %313 = vst [vmem:[%s1291_s29 + $0x88] sm:$0xff] %v312_v17 }
  0x26   : > { %315 = vst [vmem:[%s1291_s29 + $0x90] sm:$0xff] %v314_v18 }
  0x27   : > { %317 = vst [vmem:[%s1291_s29 + $0x98] sm:$0xff] %v316_v19 }
  0x28   : > { %319 = vst [vmem:[%s1291_s29 + $0xa0] sm:$0xff] %v318_v20 }
  0x29   : > { %321 = vst [vmem:[%s1291_s29 + $0xa8] sm:$0xff] %v320_v21 }
  0x2a   : > { %323 = vst [vmem:[%s1291_s29 + $0xb0] sm:$0xff] %v322_v22 }
  0x2b   : > { %325 = vst [vmem:[%s1291_s29 + $0xb8] sm:$0xff] %v324_v23 }
  0x2c   : > { %327 = vst [vmem:[%s1291_s29 + $0xc0] sm:$0xff] %v326_v24 }
  0x2d   : > { %329 = vst [vmem:[%s1291_s29 + $0xc8] sm:$0xff] %v328_v25 }
  0x2e   : > { %331 = vst [vmem:[%s1291_s29 + $0xd0] sm:$0xff] %v330_v26 }
  0x2f   : > { %333 = vst [vmem:[%s1291_s29 + $0xd8] sm:$0xff] %v332_v27 }
  0x30   : > { %335 = vst [vmem:[%s1291_s29 + $0xe0] sm:$0xff] %v334_v28 }
  0x31   : > { %337 = vst [vmem:[%s1291_s29 + $0xe8] sm:$0xff] %v336_v29 }
  0x32   : > { %339 = vst [vmem:[%s1291_s29 + $0xf0] sm:$0xff] %v338_v30 }
  0x33   : > { %341 = vst [vmem:[%s1291_s29 + $0xf8] sm:$0xff] %v340_v31 }
  0x34 PF: > { %p956_p8 = scmp.ge.s32.totalorder %s1216_s16, 1  ;;  %p346_p9 = scmp.lt.s32.totalorder %s1216_s16, 3 }
  0x36   : > { %p347_p10 = pnand %p956_p8, %p346_p9 }
  0x37   : > { %s353_s30 = sand.u32 (!%p347_p10), 1, %s1200_s12   ;;  %s959_s12 = sshll.u32 (!%p347_p10), %s1208_s14, 1 }
  0x38   : > { %350 = sbr.rel (%p347_p10) target bundleno = 260 (0x104), region = 62  ;;  %s957_s4 = sshll.u32 (!%p347_p10), %s353_s30, 8 }
  0x39   : > { %s1359_s5 = scalar_lea.vmem (!%p347_p10), [#allocation3], %s957_s4  ;;  %s958_s20 = sshll.u32 (!%p347_p10), %s353_s30, 4 }
  0x3a   : > { %s1439_s23 = scalar_lea.vmem (!%p347_p10), [#allocation4], %s958_s20  ;;  %p413_p11 = scmp.lt.s32.totalorder (!%p347_p10), %s959_s12, 3 }
  0x3d   : > { %v1027_v32 = vld [vmem:[%s1359_s5 + $0x70] sm:$0xf]  ;;  %v1120_v33 = vld [vmem:[%s1359_s5 + $0x74] sm:$0xf0]  ;;  %v1119_v37 = vld [vmem:[%s1359_s5 + $0x74] sm:$0xf] }
  0x3e   : > { %v1091_v34 = vld [vmem:[%s1359_s5 + $0xf0] sm:$0xf]  ;;  %v1028_v35 = vor.u32 %v1120_v33, %v1027_v32  ;;  %v1136_v36 = vld [vmem:[%s1359_s5 + $0xf4] sm:$0xf0]  ;;  %v1029_v38 = vld [vmem:[%s1359_s5 + $0x78] sm:$0xf0] }
  0x3f   : > { %v1092_v39 = vor.u32 %v1136_v36, %v1091_v34  ;;  %v1032_v40 = vor.u32 %v1119_v37, %v1029_v38  ;;  %v1135_v41 = vld [vmem:[%s1359_s5 + $0xf4] sm:$0xf]  ;;  %v1093_v42 = vld [vmem:[%s1359_s5 + $0xf8] sm:$0xf0]  ;;  %v1019_v43 = vld [vmem:[%s1359_s5 + $0x60] sm:$0xf] }
  0x40   : > { %636 = vmatpush.bf16.msra.mxu0 %v1028_v35  ;;  %v1096_v44 = vor.u32 %v1135_v41, %v1093_v42  ;;  %v1118_v45 = vld [vmem:[%s1359_s5 + $0x64] sm:$0xf0]  ;;  %v1083_v46 = vld [vmem:[%s1359_s5 + $0xe0] sm:$0xf]  ;;  %v1117_v50 = vld [vmem:[%s1359_s5 + $0x64] sm:$0xf] }
  0x41   : > { %v1134_v47 = vld [vmem:[%s1359_s5 + $0xe4] sm:$0xf0]  ;;  %650 = vmatpush.bf16.msra.mxu1 %v1092_v39  ;;  %664 = vmatpush.bf16.msra.mxu2 %v1032_v40  ;;  %v1020_v48 = vor.u32 %v1118_v45, %v1019_v43  ;;  %v1021_v51 = vld [vmem:[%s1359_s5 + $0x68] sm:$0xf0]  ;;  %v1133_v52 = vld [vmem:[%s1359_s5 + $0xe4] sm:$0xf] }
  0x42   : > { %v1084_v49 = vor.u32 %v1134_v47, %v1083_v46  ;;  %678 = vmatpush.bf16.msra.mxu3 %v1096_v44  ;;  %v1024_v53 = vor.u32 %v1117_v50, %v1021_v51  ;;  %v1085_v54 = vld [vmem:[%s1359_s5 + $0xe8] sm:$0xf0]  ;;  %v1011_v55 = vld [vmem:[%s1359_s5 + $0x50] sm:$0xf]  ;;  %v1116_v56 = vld [vmem:[%s1359_s5 + $0x54] sm:$0xf0] }
  0x43   : > { %v1088_v57 = vor.u32 %v1133_v52, %v1085_v54  ;;  %v1075_v58 = vld [vmem:[%s1359_s5 + $0xd0] sm:$0xf]  ;;  %v1132_v59 = vld [vmem:[%s1359_s5 + $0xd4] sm:$0xf0]  ;;  %v1115_v60 = vld [vmem:[%s1359_s5 + $0x54] sm:$0xf]  ;;  %v1012_v61 = vor.u32 %v1116_v56, %v1011_v55 }
  0x44   : > { %637 = vmatpush.bf16.msra.mxu0 %v1020_v48  ;;  %v1013_v62 = vld [vmem:[%s1359_s5 + $0x58] sm:$0xf0]  ;;  %v1131_v63 = vld [vmem:[%s1359_s5 + $0xd4] sm:$0xf]  ;;  %v1076_v1 = vor.u32 %v1132_v59, %v1075_v58  ;;  %v1003_v3 = vld [vmem:[%s1359_s5 + $0x40] sm:$0xf] }
  0x45   : > { %v1077_v0 = vld [vmem:[%s1359_s5 + $0xd8] sm:$0xf0]  ;;  %651 = vmatpush.bf16.msra.mxu1 %v1084_v49  ;;  %665 = vmatpush.bf16.msra.mxu2 %v1024_v53  ;;  %v1016_v2 = vor.u32 %v1115_v60, %v1013_v62  ;;  %v1114_v4 = vld [vmem:[%s1359_s5 + $0x44] sm:$0xf0]  ;;  %v1067_v5 = vld [vmem:[%s1359_s5 + $0xc0] sm:$0xf] }
  0x46   : > { %679 = vmatpush.bf16.msra.mxu3 %v1088_v57  ;;  %v1080_v6 = vor.u32 %v1131_v63, %v1077_v0  ;;  %v1130_v7 = vld [vmem:[%s1359_s5 + $0xc4] sm:$0xf0]  ;;  %v1113_v8 = vld [vmem:[%s1359_s5 + $0x44] sm:$0xf]  ;;  %v1005_v9 = vld [vmem:[%s1359_s5 + $0x48] sm:$0xf0]  ;;  %v1004_v12 = vor.u32 %v1114_v4, %v1003_v3 }
  0x47   : > { %v1129_v10 = vld [vmem:[%s1359_s5 + $0xc4] sm:$0xf]  ;;  %v1069_v11 = vld [vmem:[%s1359_s5 + $0xc8] sm:$0xf0]  ;;  %v1068_v13 = vor.u32 %v1130_v7, %v1067_v5  ;;  %v1008_v14 = vor.u32 %v1113_v8, %v1005_v9  ;;  %v995_v15 = vld [vmem:[%s1359_s5 + $0x30] sm:$0xf] }
  0x48   : > { %638 = vmatpush.bf16.msra.mxu0 %v1012_v61  ;;  %v1112_v16 = vld [vmem:[%s1359_s5 + $0x34] sm:$0xf0]  ;;  %v1059_v17 = vld [vmem:[%s1359_s5 + $0xb0] sm:$0xf]  ;;  %v1072_v18 = vor.u32 %v1129_v10, %v1069_v11  ;;  %v1111_v20 = vld [vmem:[%s1359_s5 + $0x34] sm:$0xf] }
  0x49   : > { %652 = vmatpush.bf16.msra.mxu1 %v1076_v1  ;;  %666 = vmatpush.bf16.msra.mxu2 %v1016_v2  ;;  %v1128_v19 = vld [vmem:[%s1359_s5 + $0xb4] sm:$0xf0]  ;;  %v997_v21 = vld [vmem:[%s1359_s5 + $0x38] sm:$0xf0]  ;;  %v1127_v22 = vld [vmem:[%s1359_s5 + $0xb4] sm:$0xf]  ;;  %v996_v24 = vor.u32 %v1112_v16, %v995_v15 }
  0x4a   : > { %680 = vmatpush.bf16.msra.mxu3 %v1080_v6  ;;  %v1061_v23 = vld [vmem:[%s1359_s5 + $0xb8] sm:$0xf0]  ;;  %v1060_v25 = vor.u32 %v1128_v19, %v1059_v17  ;;  %v1000_v26 = vor.u32 %v1111_v20, %v997_v21  ;;  %v987_v27 = vld [vmem:[%s1359_s5 + $0x20] sm:$0xf]  ;;  %v1110_v28 = vld [vmem:[%s1359_s5 + $0x24] sm:$0xf0] }
  0x4b   : > { %v1051_v29 = vld [vmem:[%s1359_s5 + $0xa0] sm:$0xf]  ;;  %v1064_v30 = vor.u32 %v1127_v22, %v1061_v23  ;;  %v1126_v31 = vld [vmem:[%s1359_s5 + $0xa4] sm:$0xf0]  ;;  %v1109_v32 = vld [vmem:[%s1359_s5 + $0x24] sm:$0xf]  ;;  %v988_v36 = vor.u32 %v1110_v28, %v987_v27 }
  0x4c   : > { %639 = vmatpush.bf16.msra.mxu0 %v1004_v12  ;;  %v989_v33 = vld [vmem:[%s1359_s5 + $0x28] sm:$0xf0]  ;;  %v1125_v34 = vld [vmem:[%s1359_s5 + $0xa4] sm:$0xf]  ;;  %v1052_v37 = vor.u32 %v1126_v31, %v1051_v29  ;;  %v979_v39 = vld [vmem:[%s1359_s5 + $0x10] sm:$0xf] }
  0x4d   : > { %653 = vmatpush.bf16.msra.mxu1 %v1068_v13  ;;  %667 = vmatpush.bf16.msra.mxu2 %v1008_v14  ;;  %v1053_v35 = vld [vmem:[%s1359_s5 + $0xa8] sm:$0xf0]  ;;  %v992_v38 = vor.u32 %v1109_v32, %v989_v33  ;;  %v1108_v40 = vld [vmem:[%s1359_s5 + $0x14] sm:$0xf0]  ;;  %v1043_v41 = vld [vmem:[%s1359_s5 + $0x90] sm:$0xf] }
  0x4e   : > { %681 = vmatpush.bf16.msra.mxu3 %v1072_v18  ;;  %v1056_v42 = vor.u32 %v1125_v34, %v1053_v35  ;;  %v1124_v43 = vld [vmem:[%s1359_s5 + $0x94] sm:$0xf0]  ;;  %v1107_v44 = vld [vmem:[%s1359_s5 + $0x14] sm:$0xf]  ;;  %v981_v45 = vld [vmem:[%s1359_s5 + $0x18] sm:$0xf0]  ;;  %v980_v48 = vor.u32 %v1108_v40, %v979_v39 }
  0x4f   : > { %v1123_v46 = vld [vmem:[%s1359_s5 + $0x94] sm:$0xf]  ;;  %v1045_v47 = vld [vmem:[%s1359_s5 + $0x98] sm:$0xf0]  ;;  %v1044_v49 = vor.u32 %v1124_v43, %v1043_v41  ;;  %v984_v50 = vor.u32 %v1107_v44, %v981_v45  ;;  %v971_v51 = vld [vmem:[%s1359_s5] sm:$0xf] }
  0x50   : > { %640 = vmatpush.bf16.msra.mxu0 %v996_v24  ;;  %v1106_v52 = vld [vmem:[%s1359_s5 + $0x4] sm:$0xf0]  ;;  %v1035_v53 = vld [vmem:[%s1359_s5 + $0x80] sm:$0xf]  ;;  %v1048_v54 = vor.u32 %v1123_v46, %v1045_v47  ;;  %v1105_v56 = vld [vmem:[%s1359_s5 + $0x4] sm:$0xf] }
  0x51   : > { %654 = vmatpush.bf16.msra.mxu1 %v1060_v25  ;;  %668 = vmatpush.bf16.msra.mxu2 %v1000_v26  ;;  %v1122_v55 = vld [vmem:[%s1359_s5 + $0x84] sm:$0xf0]  ;;  %v973_v57 = vld [vmem:[%s1359_s5 + $0x8] sm:$0xf0]  ;;  %v1121_v58 = vld [vmem:[%s1359_s5 + $0x84] sm:$0xf]  ;;  %v972_v60 = vor.u32 %v1106_v52, %v971_v51 }
  0x52   : > { %682 = vmatpush.bf16.msra.mxu3 %v1064_v30  ;;  %v1037_v59 = vld [vmem:[%s1359_s5 + $0x88] sm:$0xf0]  ;;  %v963_v61 = vld [vmem:[%s1470_s0] sm:$0xf]  ;;  %v1104_v62 = vld [vmem:[%s1470_s0 + $0x4] sm:$0xf0]  ;;  %v1036_v63 = vor.u32 %v1122_v55, %v1035_v53  ;;  %v976_v0 = vor.u32 %v1105_v56, %v973_v57 }
  0x53   : > { %v1103_v1 = vld [vmem:[%s1470_s0 + $0x4] sm:$0xf]  ;;  %v965_v2 = vld [vmem:[%s1470_s0 + $0x8] sm:$0xf0]  ;;  %v1040_v3 = vor.u32 %v1121_v58, %v1037_v59  ;;  %v964_v4 = vor.u32 %v1104_v62, %v963_v61  ;;  %s1482_s12 = smov (!%p413_p11, %s959_s12), 3  ;;  %vm743_vm0 = vcmask 1040384  }
  0x54   : > { %641 = vmatpush.bf16.msra.mxu0 %v988_v36  ;;  %v968_v5 = vor.u32 %v1103_v1, %v965_v2  ;;  %s960_s24 = sshll.u32 %s1482_s12, 1  ;;  %vm749_vm1 = vcmask 1041408   ;;  %s1137_s28 = sshll.u32 (%p1273_p6), %s1208_s14, 3 }
  0x55   : > { %655 = vmatpush.bf16.msra.mxu1 %v1052_v37  ;;  %669 = vmatpush.bf16.msra.mxu2 %v992_v38  ;;  %s418_s27 = scalar_lea.vmem %s1473_s3, %s960_s24  ;;  %s774_s4 = scalar_lea.vmem (%p1273_p6), %s1472_s2, %s1137_s28 }
  0x56   : > { %683 = vmatpush.bf16.msra.mxu3 %v1056_v42 }
  0x58   : > { %642 = vmatpush.bf16.msra.mxu0 %v980_v48 }
  0x59   : > { %656 = vmatpush.bf16.msra.mxu1 %v1044_v49  ;;  %670 = vmatpush.bf16.msra.mxu2 %v984_v50 }
  0x5a   : > { %684 = vmatpush.bf16.msra.mxu3 %v1048_v54 }
  0x5c   : > { %643 = vmatpush.bf16.msra.mxu0 %v972_v60 }
  0x5d   : > { %657 = vmatpush.bf16.msra.mxu1 %v1036_v63  ;;  %671 = vmatpush.bf16.msra.mxu2 %v976_v0 }
  0x5e   : > { %685 = vmatpush.bf16.msra.mxu3 %v1040_v3 }
  0x5f   : > { %644 = vmatmul.bf16.vlgmr.msra.gmra.mxu0 %v964_v4 }
  0x60   : > { %658 = vmatmul.bf16.vlgmr.msra.gmra.mxu1 %v968_v5  ;;  %672 = vmatmul.bf16.vlgmr.msra.gmra.mxu2 %v964_v4 }
  0x61   : > { %686 = vmatmul.bf16.vlgmr.msra.gmra.mxu3 %v968_v5 }
  0xdc   : > { %v645_v6 = vpop.f32.mrf.mxu0 }
  0xdd   : > { %v659_v7 = vpop.f32.mrf.mxu1 }
  0xde   : > { %v660_v8 = vadd.f32 %v659_v7, %v645_v6 }
  0xe0   : > { %v725_v14 = vmul.f32 %v660_v8, %v660_v8 }
  0xe3   : > { %v673_v9 = vpop.f32.mrf.mxu2 }
  0xe4   : > { %v687_v10 = vpop.f32.mrf.mxu3  ;;  %v647_v11 = vpop.f32.mrf.mxu0 }
  0xe5   : > { %v688_v12 = vadd.f32 %v687_v10, %v673_v9  ;;  %v661_v13 = vpop.f32.mrf.mxu1 }
  0xe6   : > { %v662_v15 = vadd.f32 %v661_v13, %v647_v11 }
  0xe7   : > { %v707_v16 = vpack.c.bf16 %v688_v12, %v660_v8  ;;  %v726_v25 = vmul.f32 %v688_v12, %v688_v12 }
  0xe8   : > { %v711_v17 = vadd.f32 %v662_v15, %v660_v8  ;;  %v727_v18 = vmul.f32 %v662_v15, %v662_v15 }
  0xe9   : > { %709 = vst [vmem:[%s1439_s23] sm:$0xff] %v707_v16 }
  0xea   : > { %v729_v19 = vadd.f32 %v727_v18, %v725_v14  ;;  %v712_v20 = vrot.slane %v711_v17, 4 }
  0xeb   : > { %v675_v21 = vpop.f32.mrf.mxu2 }
  0xec   : > { %v730_v22 = vrot.slane %v729_v19, 4  ;;  %v689_v23 = vpop.f32.mrf.mxu3  ;;  %v713_v27 = vadd.f32 %v712_v20, %v711_v17 }
  0xed   : > { %v690_v24 = vadd.f32 %v689_v23, %v675_v21 }
  0xee   : > { %v731_v26 = vadd.f32 %v730_v22, %v729_v19  ;;  %v714_v34 = vrot.slane %v713_v27, 2 }
  0xef   : > { %v708_v28 = vpack.c.bf16 %v690_v24, %v662_v15  ;;  %v718_v29 = vadd.f32 %v690_v24, %v688_v12  ;;  %v728_v30 = vmul.f32 %v690_v24, %v690_v24 }
  0xf0   : > { %v732_v31 = vrot.slane %v731_v26, 2  ;;  %v715_v40 = vadd.f32 %v714_v34, %v713_v27  ;;  %v805_v56 = vld [vmem:[%s1439_s23] sm:$0xff] (%p1273_p6) }
  0xf1   : > { %710 = vst [vmem:[%s1439_s23 + $0x8] sm:$0xff] %v708_v28  ;;  %v719_v32 = vrot.slane %v718_v29, 4  ;;  %v736_v33 = vadd.f32 %v728_v30, %v726_v25 }
  0xf2   : > { %v733_v37 = vadd.f32 %v732_v31, %v731_v26  ;;  %v716_v46 = vrot.slane %v715_v40, 1  ;;  %806 = vst [vmem:[%s774_s4] sm:$0xff] (%p1273_p6), %v805_v56 }
  0xf3   : > { %v720_v35 = vadd.f32 %v719_v32, %v718_v29  ;;  %v737_v36 = vrot.slane %v736_v33, 4 }
  0xf4   : > { %v734_v43 = vrot.slane %v733_v37, 1  ;;  %v717_v51 = vadd.f32 %v716_v46, %v715_v40 }
  0xf5   : > { %v721_v38 = vrot.slane %v720_v35, 2  ;;  %v738_v39 = vadd.f32 %v737_v36, %v736_v33 }
  0xf6   : > { %v735_v48 = vadd.f32 %v734_v43, %v733_v37 }
  0xf7   : > { %v722_v41 = vadd.f32 %v721_v38, %v720_v35  ;;  %v739_v42 = vrot.slane %v738_v39, 2 }
  0xf8   : > { %v744_v54 = vsel %vm743_vm0, %v717_v51, %v735_v48  ;;  %v807_v57 = vld [vmem:[%s1439_s23 + $0x8] sm:$0xff] (%p1273_p6) }
  0xf9   : > { %v723_v44 = vrot.slane %v722_v41, 1  ;;  %v740_v45 = vadd.f32 %v739_v42, %v738_v39  ;;  %808 = vst [vmem:[%s774_s4 + $0x10] sm:$0xff] (%p1273_p6), %v807_v57 }
  0xfb   : > { %v741_v47 = vrot.slane %v740_v45, 1  ;;  %v724_v49 = vadd.f32 %v723_v44, %v722_v41 }
  0xfd   : > { %v742_v50 = vadd.f32 %v741_v47, %v740_v45 }
  0xff   : > { %v745_v52 = vsel %vm743_vm0, %v724_v49, %v742_v50  ;;  %768 = sbr.rel (!%p1273_p6) target bundleno = 260 (0x104), region = 78 }
 0x100   : > { %v748_v53 = vrot.slane %v745_v52, 6 }
 0x102   : > { %v750_v55 = vsel %vm749_vm1, %v744_v54, %v748_v53 }
 0x103   : > { %752 = vst [vmem:[%s418_s27] sm:$0xf] %v750_v55 }
 0x104 PF: > { %s14_s16 = sadd.s32 1, %s1216_s16   ;;  %s1475_s12 = smov %s1204_s13 }
 0x105   : > { %p11_p12 = scmp.ge.s32.totalorder %s14_s16, 4   ;;  %s1476_s13 = smov %s1278_s22 }
 0x106   : > { %s1477_s14 = smov %s1212_s15  ;;  %s1478_s15 = smov %s1480_s17 }
 0x107   :  { %13 = sbr.rel (!%p11_p12) target bundleno = 3 (0x3), region = 162 }

// kernel: _lambda_.46
= control target key start
LH: loop header
LB: loop body
LE: loop exit
PB: predicated region body
PF: predicated region fallthrough
CT: control target
= control target key end

     0   :  { %s124_s0 = inlined_call_operand.vmem [shape: bf16[16,512], index: 0, kind: input, shape index: {}]   ;;  %s125_s1 = inlined_call_operand.vmem [shape: f32[1,512], index: 1, kind: input, shape index: {}]   ;;  %s126_s2 = inlined_call_operand.vmem [shape: f32[1,512], index: 2, kind: input, shape index: {}]   ;;  %s127_s3 = inlined_call_operand.vmem [shape: bf16[16,512], index: 3, kind: output, shape index: {}]  }
   0x1   :  { %v14_v0 = vld [vmem:[%s124_s0] sm:$0xff]  ;;  %v15_v7 = vld [vmem:[%s124_s0 + $0x8] sm:$0xff]  ;;  %v16_v8 = vld [vmem:[%s124_s0 + $0x10] sm:$0xff] }
   0x2   :  { %v26_v1 = vld [vmem:[%s125_s1] sm:$0xf]  ;;  %v18_v3 = vunpack.c.l.bf16 %v14_v0  ;;  %v19_v4 = vunpack.c.h.bf16 %v14_v0  ;;  %v20_v11 = vunpack.c.l.bf16 %v15_v7  ;;  %v21_v12 = vunpack.c.h.bf16 %v15_v7  ;;  %v17_v17 = vld [vmem:[%s124_s0 + $0x18] sm:$0xff] }
   0x3   :  { %v44_v2 = vld [vmem:[%s126_s2] sm:$0xf]  ;;  %v28_v5 = vperm.slane %v26_v1, 0  ;;  %v29_v6 = vperm.slane %v26_v1, 1  ;;  %v30_v15 = vperm.slane %v26_v1, 2  ;;  %v31_v16 = vperm.slane %v26_v1, 3 }
   0x4   :  { %v46_v9 = vperm.slane %v44_v2, 0  ;;  %v47_v10 = vperm.slane %v44_v2, 1  ;;  %v48_v18 = vperm.slane %v44_v2, 2  ;;  %v49_v19 = vperm.slane %v44_v2, 3 }
   0x5   :  { %v36_v13 = vmul.f32 %v28_v5, %v18_v3  ;;  %v37_v14 = vmul.f32 %v29_v6, %v19_v4  ;;  %v22_v20 = vunpack.c.l.bf16 %v16_v8  ;;  %v23_v21 = vunpack.c.h.bf16 %v16_v8 }
   0x6   :  { %v38_v24 = vmul.f32 %v30_v15, %v20_v11  ;;  %v39_v25 = vmul.f32 %v31_v16, %v21_v12  ;;  %v24_v28 = vunpack.c.l.bf16 %v17_v17  ;;  %v25_v29 = vunpack.c.h.bf16 %v17_v17 }
   0x7   :  { %v54_v22 = vadd.f32 %v46_v9, %v36_v13  ;;  %v55_v23 = vadd.f32 %v47_v10, %v37_v14  ;;  %v40_v26 = vmul.f32 %v28_v5, %v22_v20  ;;  %v41_v27 = vmul.f32 %v29_v6, %v23_v21 }
   0x8   :  { %v56_v31 = vadd.f32 %v48_v18, %v38_v24  ;;  %v57_v32 = vadd.f32 %v49_v19, %v39_v25  ;;  %v42_v35 = vmul.f32 %v30_v15, %v24_v28  ;;  %v43_v36 = vmul.f32 %v31_v16, %v25_v29 }
   0x9   :  { %v62_v30 = vpack.c.bf16 %v55_v23, %v54_v22  ;;  %v58_v33 = vadd.f32 %v46_v9, %v40_v26  ;;  %v59_v34 = vadd.f32 %v47_v10, %v41_v27 }
   0xa   :  { %v63_v37 = vpack.c.bf16 %v57_v32, %v56_v31  ;;  %v60_v39 = vadd.f32 %v48_v18, %v42_v35  ;;  %v61_v40 = vadd.f32 %v49_v19, %v43_v36 }
   0xb   :  { %66 = vst [vmem:[%s127_s3] sm:$0xff] %v62_v30  ;;  %v64_v38 = vpack.c.bf16 %v59_v34, %v58_v33 }
   0xc   :  { %67 = vst [vmem:[%s127_s3 + $0x8] sm:$0xff] %v63_v37  ;;  %v65_v41 = vpack.c.bf16 %v61_v40, %v60_v39 }
   0xd   :  { %68 = vst [vmem:[%s127_s3 + $0x10] sm:$0xff] %v64_v38 }
   0xe   :  { %69 = vst [vmem:[%s127_s3 + $0x18] sm:$0xff] %v65_v41 }

// kernel: _lambda_.48
= control target key start
LH: loop header
LB: loop body
LE: loop exit
PB: predicated region body
PF: predicated region fallthrough
CT: control target
= control target key end

     0   :  { %s132_s0 = inlined_call_operand.vmem [shape: bf16[16,512], index: 0, kind: input, shape index: {}]   ;;  %s133_s1 = inlined_call_operand.vmem [shape: f32[1,512], index: 1, kind: input, shape index: {}]   ;;  %s134_s2 = inlined_call_operand.vmem [shape: f32[1,512], index: 2, kind: input, shape index: {}]   ;;  %s135_s3 = inlined_call_operand.vmem [shape: bf16[16,512], index: 3, kind: output, shape index: {}]  }
   0x1   :  { %v14_v0 = vld [vmem:[%s132_s0] sm:$0xff]  ;;  %v15_v7 = vld [vmem:[%s132_s0 + $0x8] sm:$0xff]  ;;  %v16_v8 = vld [vmem:[%s132_s0 + $0x10] sm:$0xff] }
   0x2   :  { %v26_v1 = vld [vmem:[%s133_s1] sm:$0xf]  ;;  %v18_v3 = vunpack.c.l.bf16 %v14_v0  ;;  %v19_v4 = vunpack.c.h.bf16 %v14_v0  ;;  %v20_v11 = vunpack.c.l.bf16 %v15_v7  ;;  %v21_v12 = vunpack.c.h.bf16 %v15_v7  ;;  %v17_v17 = vld [vmem:[%s132_s0 + $0x18] sm:$0xff] }
   0x3   :  { %v44_v2 = vld [vmem:[%s134_s2] sm:$0xf]  ;;  %v28_v5 = vperm.slane %v26_v1, 0  ;;  %v29_v6 = vperm.slane %v26_v1, 1  ;;  %v30_v15 = vperm.slane %v26_v1, 2  ;;  %v31_v16 = vperm.slane %v26_v1, 3 }
   0x4   :  { %v46_v9 = vperm.slane %v44_v2, 0  ;;  %v47_v10 = vperm.slane %v44_v2, 1  ;;  %v48_v18 = vperm.slane %v44_v2, 2  ;;  %v49_v19 = vperm.slane %v44_v2, 3 }
   0x5   :  { %v36_v13 = vmul.f32 %v28_v5, %v18_v3  ;;  %v37_v14 = vmul.f32 %v29_v6, %v19_v4  ;;  %v22_v20 = vunpack.c.l.bf16 %v16_v8  ;;  %v23_v21 = vunpack.c.h.bf16 %v16_v8 }
   0x6   :  { %v38_v24 = vmul.f32 %v30_v15, %v20_v11  ;;  %v39_v25 = vmul.f32 %v31_v16, %v21_v12  ;;  %v24_v28 = vunpack.c.l.bf16 %v17_v17  ;;  %v25_v29 = vunpack.c.h.bf16 %v17_v17 }
   0x7   :  { %v54_v22 = vadd.f32 %v46_v9, %v36_v13  ;;  %v55_v23 = vadd.f32 %v47_v10, %v37_v14  ;;  %v40_v26 = vmul.f32 %v28_v5, %v22_v20  ;;  %v41_v27 = vmul.f32 %v29_v6, %v23_v21 }
   0x8   :  { %v56_v32 = vadd.f32 %v48_v18, %v38_v24  ;;  %v57_v33 = vadd.f32 %v49_v19, %v39_v25  ;;  %v42_v36 = vmul.f32 %v30_v15, %v24_v28  ;;  %v43_v37 = vmul.f32 %v31_v16, %v25_v29 }
   0x9   :  { %v62_v30 = vmax.f32 %v54_v22, 0.0  ;;  %v63_v31 = vmax.f32 %v55_v23, 0.0  ;;  %v58_v34 = vadd.f32 %v46_v9, %v40_v26  ;;  %v59_v35 = vadd.f32 %v47_v10, %v41_v27 }
   0xa   :  { %v64_v39 = vmax.f32 %v56_v32, 0.0  ;;  %v65_v40 = vmax.f32 %v57_v33, 0.0  ;;  %v60_v43 = vadd.f32 %v48_v18, %v42_v36  ;;  %v61_v44 = vadd.f32 %v49_v19, %v43_v37 }
   0xb   :  { %v70_v38 = vpack.c.bf16 %v63_v31, %v62_v30  ;;  %v66_v41 = vmax.f32 %v58_v34, 0.0  ;;  %v67_v42 = vmax.f32 %v59_v35, 0.0 }
   0xc   :  { %v71_v45 = vpack.c.bf16 %v65_v40, %v64_v39  ;;  %v68_v47 = vmax.f32 %v60_v43, 0.0  ;;  %v69_v48 = vmax.f32 %v61_v44, 0.0 }
   0xd   :  { %74 = vst [vmem:[%s135_s3] sm:$0xff] %v70_v38  ;;  %v72_v46 = vpack.c.bf16 %v67_v42, %v66_v41 }
   0xe   :  { %75 = vst [vmem:[%s135_s3 + $0x8] sm:$0xff] %v71_v45  ;;  %v73_v49 = vpack.c.bf16 %v69_v48, %v68_v47 }
   0xf   :  { %76 = vst [vmem:[%s135_s3 + $0x10] sm:$0xff] %v72_v46 }
  0x10   :  { %77 = vst [vmem:[%s135_s3 + $0x18] sm:$0xff] %v73_v49 }

// kernel: _lambda_.50
= control target key start
LH: loop header
LB: loop body
LE: loop exit
PB: predicated region body
PF: predicated region fallthrough
CT: control target
= control target key end

     0   :  { %s172_s0 = inlined_call_operand.vmem [shape: bf16[16,512], index: 0, kind: input, shape index: {}]   ;;  %s173_s1 = inlined_call_operand.vmem [shape: bf16[16,512], index: 1, kind: input, shape index: {}]   ;;  %s174_s2 = inlined_call_operand.vmem [shape: f32[1,512], index: 2, kind: input, shape index: {}]   ;;  %s175_s3 = inlined_call_operand.vmem [shape: f32[1,512], index: 3, kind: input, shape index: {}]   ;;  %s176_s4 = inlined_call_operand.vmem [shape: bf16[16,512], index: 4, kind: output, shape index: {}]  }
   0x1   :  { %v17_v0 = vld [vmem:[%s172_s0] sm:$0xff]  ;;  %v18_v8 = vld [vmem:[%s172_s0 + $0x8] sm:$0xff]  ;;  %v19_v18 = vld [vmem:[%s172_s0 + $0x10] sm:$0xff] }
   0x2   :  { %v29_v1 = vld [vmem:[%s174_s2] sm:$0xf]  ;;  %v21_v3 = vunpack.c.l.bf16 %v17_v0  ;;  %v22_v4 = vunpack.c.h.bf16 %v17_v0  ;;  %v66_v13 = vld [vmem:[%s173_s1 + $0x8] sm:$0xff]  ;;  %v23_v16 = vunpack.c.l.bf16 %v18_v8  ;;  %v24_v17 = vunpack.c.h.bf16 %v18_v8  ;;  %v67_v23 = vld [vmem:[%s173_s1 + $0x10] sm:$0xff] }
   0x3   :  { %v47_v2 = vld [vmem:[%s175_s3] sm:$0xf]  ;;  %v31_v5 = vperm.slane %v29_v1, 0  ;;  %v32_v6 = vperm.slane %v29_v1, 1  ;;  %v33_v19 = vperm.slane %v29_v1, 2  ;;  %v34_v20 = vperm.slane %v29_v1, 3 }
   0x4   :  { %v65_v7 = vld [vmem:[%s173_s1] sm:$0xff]  ;;  %v49_v9 = vperm.slane %v47_v2, 0  ;;  %v50_v10 = vperm.slane %v47_v2, 1  ;;  %v51_v21 = vperm.slane %v47_v2, 2  ;;  %v52_v22 = vperm.slane %v47_v2, 3  ;;  %v20_v32 = vld [vmem:[%s172_s0 + $0x18] sm:$0xff] }
   0x5   :  { %v69_v11 = vunpack.c.l.bf16 %v65_v7  ;;  %v70_v12 = vunpack.c.h.bf16 %v65_v7  ;;  %v39_v14 = vmul.f32 %v31_v5, %v21_v3  ;;  %v40_v15 = vmul.f32 %v32_v6, %v22_v4  ;;  %v68_v41 = vld [vmem:[%s173_s1 + $0x18] sm:$0xff] }
   0x6   :  { %v71_v26 = vunpack.c.l.bf16 %v66_v13  ;;  %v72_v27 = vunpack.c.h.bf16 %v66_v13  ;;  %v41_v28 = vmul.f32 %v33_v19, %v23_v16  ;;  %v42_v29 = vmul.f32 %v34_v20, %v24_v17 }
   0x7   :  { %v57_v24 = vadd.f32 %v49_v9, %v39_v14  ;;  %v58_v25 = vadd.f32 %v50_v10, %v40_v15  ;;  %v25_v30 = vunpack.c.l.bf16 %v19_v18  ;;  %v26_v31 = vunpack.c.h.bf16 %v19_v18 }
   0x8   :  { %v73_v35 = vunpack.c.l.bf16 %v67_v23  ;;  %v74_v36 = vunpack.c.h.bf16 %v67_v23  ;;  %v59_v37 = vadd.f32 %v51_v21, %v41_v28  ;;  %v60_v38 = vadd.f32 %v52_v22, %v42_v29 }
   0x9   :  { %v77_v33 = vadd.f32 %v69_v11, %v57_v24  ;;  %v78_v34 = vadd.f32 %v70_v12, %v58_v25  ;;  %v43_v39 = vmul.f32 %v31_v5, %v25_v30  ;;  %v44_v40 = vmul.f32 %v32_v6, %v26_v31 }
   0xa   :  { %v27_v44 = vunpack.c.l.bf16 %v20_v32  ;;  %v28_v45 = vunpack.c.h.bf16 %v20_v32  ;;  %v79_v46 = vadd.f32 %v71_v26, %v59_v37  ;;  %v80_v47 = vadd.f32 %v72_v27, %v60_v38 }
   0xb   :  { %v85_v42 = vmax.f32 %v77_v33, 0.0  ;;  %v86_v43 = vmax.f32 %v78_v34, 0.0  ;;  %v61_v48 = vadd.f32 %v49_v9, %v43_v39  ;;  %v62_v49 = vadd.f32 %v50_v10, %v44_v40 }
   0xc   :  { %v45_v51 = vmul.f32 %v33_v19, %v27_v44  ;;  %v46_v52 = vmul.f32 %v34_v20, %v28_v45  ;;  %v75_v53 = vunpack.c.l.bf16 %v68_v41  ;;  %v87_v54 = vmax.f32 %v79_v46, 0.0 }
   0xd   :  { %v93_v50 = vpack.c.bf16 %v86_v43, %v85_v42  ;;  %v88_v55 = vmax.f32 %v80_v47, 0.0  ;;  %v81_v56 = vadd.f32 %v73_v35, %v61_v48  ;;  %v82_v57 = vadd.f32 %v74_v36, %v62_v49 }
   0xe   :  { %v63_v58 = vadd.f32 %v51_v21, %v45_v51  ;;  %v64_v59 = vadd.f32 %v52_v22, %v46_v52  ;;  %v76_v60 = vunpack.c.h.bf16 %v68_v41 }
   0xf   :  { %97 = vst [vmem:[%s176_s4] sm:$0xff] %v93_v50  ;;  %v94_v61 = vpack.c.bf16 %v88_v55, %v87_v54  ;;  %v89_v62 = vmax.f32 %v81_v56, 0.0  ;;  %v90_v63 = vmax.f32 %v82_v57, 0.0 }
  0x10   :  { %v83_v0 = vadd.f32 %v75_v53, %v63_v58  ;;  %v84_v1 = vadd.f32 %v76_v60, %v64_v59 }
  0x11   :  { %98 = vst [vmem:[%s176_s4 + $0x8] sm:$0xff] %v94_v61  ;;  %v95_v2 = vpack.c.bf16 %v90_v63, %v89_v62 }
  0x12   :  { %v91_v3 = vmax.f32 %v83_v0, 0.0  ;;  %v92_v4 = vmax.f32 %v84_v1, 0.0 }
  0x13   :  { %99 = vst [vmem:[%s176_s4 + $0x10] sm:$0xff] %v95_v2 }
  0x14   :  { %v96_v5 = vpack.c.bf16 %v92_v4, %v91_v3 }
  0x16   :  { %100 = vst [vmem:[%s176_s4 + $0x18] sm:$0xff] %v96_v5 }

// kernel: _lambda_.49
= control target key start
LH: loop header
LB: loop body
LE: loop exit
PB: predicated region body
PF: predicated region fallthrough
CT: control target
= control target key end

     0   :  { %s2379_s0 = inlined_call_operand.vmem [shape: bf16[16,4608], index: 0, kind: input, shape index: {}]   ;;  %s2380_s1 = inlined_call_operand.vmem [shape: bf16[4608,512], index: 1, kind: input, shape index: {}]   ;;  %s2381_s2 = inlined_call_operand.vmem [shape: bf16[16,512], index: 2, kind: output, shape index: {0}]   ;;  %s2382_s3 = inlined_call_operand.vmem [shape: f32[1,2,512], index: 3, kind: output, shape index: {1}]  }
   0x1   :  { %2385 = sst [smem:[#allocation8_spill]] %s2379_s0 }
   0x2   :  { %2386 = sst [smem:[#allocation9_spill]] %s2380_s1 }
   0x3   :  { %s1918_s12 = smov 0   ;;  %s1920_s13 = smov 0  }
   0x4   :  { %s1922_s14 = smov 0   ;;  %s1924_s15 = smov 0  }
   0x5   :  { %s1926_s16 = smov 0   ;;  %s1928_s17 = smov 0  }
   0x6   :  { %s1930_s18 = smov 0   ;;  %s1932_s19 = smov 0  }
   0x7   :  { %s1934_s20 = smov 0   ;;  %s1936_s21 = smov 0  }
   0x8   :  { %s1938_s22 = smov 0  }
   0x9 LB: > { %s1352_s23 = sadd.s32 4294967295, %s1895_s22   ;;  %s26_s24 = sadd.s32 1, %s1887_s20  ;;  %s1895_s22 = sphi %s1938_s22, %s14_s22   ;;  %s1891_s21 = sphi %s1936_s21, %s2405_s21   ;;  %s1887_s20 = sphi %s1934_s20, %s2404_s20   ;;  %s1883_s19 = sphi %s1932_s19, %s2403_s19   ;;  %s1879_s18 = sphi %s1930_s18, %s2402_s18   ;;  %s1875_s17 = sphi %s1928_s17, %s2401_s17   ;;  %s1871_s16 = sphi %s1926_s16, %s2400_s16   ;;  %s1867_s15 = sphi %s1924_s15, %s2399_s15   ;;  %s1863_s14 = sphi %s1922_s14, %s2398_s14   ;;  %s1859_s13 = sphi %s1920_s13, %s2397_s13   ;;  %s1855_s12 = sphi %s1918_s12, %s2396_s12  }
   0xa   : > { %p27_p0 = scmp.ge.s32.totalorder %s26_s24, 9  ;;  %s33_s25 = sadd.s32 1, %s1891_s21 }
   0xb   : > { %s42_s26 = sadd.s32 1, %s1875_s17  ;;  %p49_p1 = scmp.ne.s32.totalorder %s1875_s17, %s1871_s16 }
   0xc   : > { %s2407_s24 = smov (%p27_p0, %s26_s24), 0  ;;  %s2409_s25 = smov (!%p27_p0, %s33_s25), %s1891_s21 }
   0xd   : > { %2387 = sst [smem:[#allocation6_spill]] %s2407_s24  ;;  %s38_s27 = ssub.s32 %s1887_s20, %s2407_s24 }
   0xe   : > { %p50_p2 = scmp.eq.s32.totalorder %s1895_s22, 0  ;;  %p35_p3 = scmp.ge.s32.totalorder %s2409_s25, 2 }
   0xf   : > { %p40_p4 = scmp.eq.s32.totalorder %s38_s27, 0  ;;  %s70_s29 = sadd.s32 1, %s1867_s15 }
  0x10   : > { %p1985_p5 = por %p50_p2, %p49_p1  ;;  %s2411_s25 = smov (%p35_p3, %s2409_s25), 0 }
  0x11   : > { %2389 = sst [smem:[#allocation7_spill]] %s2411_s25  ;;  %s66_s4 = ssub.s32 %s1891_s21, %s2411_s25 }
  0x12   : > { %s1993_s30 = scalar_select %p40_p4, %s1875_s17, %s42_s26  }
  0x13   : > { %p77_p6 = scmp.ne.s32.totalorder %s1867_s15, %s1863_s14  ;;  %s67_s5 = sor.u32 %s66_s4, %s38_s27 }
  0x14   : > { %p96_p7 = scmp.eq.s32.totalorder %s66_s4, 0  ;;  %p68_p8 = scmp.eq.s32.totalorder %s67_s5, 0 }
  0x15   : > { %p1999_p9 = por %p77_p6, %p50_p2  ;;  %s98_s7 = sadd.s32 1, %s1859_s13 }
  0x16   : > { %p108_p10 = scmp.ne.s32.totalorder %s1859_s13, %s1855_s12  ;;  %p109_p11 = scmp.eq.s32.totalorder %s1352_s23, 17 }
  0x17   : > { %s2007_s8 = scalar_select %p68_p8, %s1867_s15, %s70_s29  }
  0x18   : > { %s2010_s9 = scalar_select %p96_p7, %s1859_s13, %s98_s7  }
  0x19   : > { %p2012_p12 = por %p109_p11, %p108_p10  ;;  %p1355_p13 = scmp.ge.s32.totalorder %s1895_s22, 18 }
  0x1b   : > { %159 = sbr.rel (%p1355_p13) target bundleno = 120 (0x78), region = 16 }
  0x20   : > { %162 = sbr.rel (!%p1985_p5) target bundleno = 46 (0x2e), region = 20  ;;  %s164_s11 = sand.u32 (%p1985_p5), 1, %s1875_s17  }
  0x21   : > { %s1649_s26 = sshll.u32 (%p1985_p5), %s1887_s20, 4  ;;  %s1356_s27 = sshll.u32 (%p1985_p5), %s164_s11, 5 }
  0x22   : > { %s2392_s0 = sld [smem:[#allocation8_spill]] (%p1985_p5)  ;;  %s166_s23 = scalar_lea.vmem (%p1985_p5), [#allocation3], %s1356_s27 }
  0x28   : > { %s172_s5 = scalar_lea.vmem %s2392_s0, %s1649_s26 }
  0x29   : > { %v185_v0 = vld [vmem:[%s172_s5] sm:$0xff]  ;;  %v187_v1 = vld [vmem:[%s172_s5 + $0x8] sm:$0xff]  ;;  %v189_v2 = vld [vmem:[%s172_s5 + $0x90] sm:$0xff] }
  0x2a   : > { %186 = vst [vmem:[%s166_s23] sm:$0xff] %v185_v0  ;;  %v191_v3 = vld [vmem:[%s172_s5 + $0x98] sm:$0xff] }
  0x2b   : > { %188 = vst [vmem:[%s166_s23 + $0x8] sm:$0xff] %v187_v1 }
  0x2c   : > { %190 = vst [vmem:[%s166_s23 + $0x10] sm:$0xff] %v189_v2 }
  0x2d   : > { %192 = vst [vmem:[%s166_s23 + $0x18] sm:$0xff] %v191_v3 }
  0x2e PF: > { %198 = sbr.rel (!%p1999_p9) target bundleno = 120 (0x78), region = 43  ;;  %s200_s28 = sand.u32 (%p1999_p9), 1, %s1867_s15  }
  0x2f   : > { %s1361_s7 = sshll.u32 (%p1999_p9), %s1891_s21, 1  ;;  %s1359_s11 = sshll.u32 (%p1999_p9), %s200_s28, 9 }
  0x30   : > { %s1650_s26 = sshll.u32 (%p1999_p9), %s1887_s20, 8  ;;  %s2393_s1 = sld [smem:[#allocation9_spill]] (%p1999_p9) }
  0x31   : > { %s206_s29 = sadd.s32 (%p1999_p9), %s1650_s26, %s1361_s7  ;;  %s2037_s6 = scalar_lea.vmem (%p1999_p9), [#allocation4], %s1359_s11 }
  0x32   : > { %s1363_s4 = sshll.u32 (%p1999_p9), %s206_s29, 2 }
  0x36   : > { %s2032_s5 = scalar_lea.vmem %s2393_s1, %s1363_s4 }
  0x37   : > { %v363_v4 = vld [vmem:[%s2032_s5] sm:$0xff]  ;;  %v365_v5 = vld [vmem:[%s2032_s5 + $0x10] sm:$0xff] }
  0x38   : > { %v367_v6 = vld [vmem:[%s2032_s5 + $0x20] sm:$0xff]  ;;  %364 = vst [vmem:[%s2037_s6] sm:$0xff] %v363_v4  ;;  %v369_v7 = vld [vmem:[%s2032_s5 + $0x30] sm:$0xff] }
  0x39   : > { %366 = vst [vmem:[%s2037_s6 + $0x8] sm:$0xff] %v365_v5  ;;  %v371_v8 = vld [vmem:[%s2032_s5 + $0x40] sm:$0xff]  ;;  %v373_v9 = vld [vmem:[%s2032_s5 + $0x50] sm:$0xff] }
  0x3a   : > { %368 = vst [vmem:[%s2037_s6 + $0x10] sm:$0xff] %v367_v6  ;;  %v375_v10 = vld [vmem:[%s2032_s5 + $0x60] sm:$0xff]  ;;  %v377_v11 = vld [vmem:[%s2032_s5 + $0x70] sm:$0xff] }
  0x3b   : > { %370 = vst [vmem:[%s2037_s6 + $0x18] sm:$0xff] %v369_v7  ;;  %v379_v12 = vld [vmem:[%s2032_s5 + $0x80] sm:$0xff]  ;;  %v381_v13 = vld [vmem:[%s2032_s5 + $0x90] sm:$0xff] }
  0x3c   : > { %372 = vst [vmem:[%s2037_s6 + $0x20] sm:$0xff] %v371_v8  ;;  %v383_v14 = vld [vmem:[%s2032_s5 + $0xa0] sm:$0xff]  ;;  %v385_v15 = vld [vmem:[%s2032_s5 + $0xb0] sm:$0xff] }
  0x3d   : > { %374 = vst [vmem:[%s2037_s6 + $0x28] sm:$0xff] %v373_v9  ;;  %v387_v16 = vld [vmem:[%s2032_s5 + $0xc0] sm:$0xff]  ;;  %v389_v17 = vld [vmem:[%s2032_s5 + $0xd0] sm:$0xff] }
  0x3e   : > { %376 = vst [vmem:[%s2037_s6 + $0x30] sm:$0xff] %v375_v10  ;;  %v391_v18 = vld [vmem:[%s2032_s5 + $0xe0] sm:$0xff]  ;;  %v393_v19 = vld [vmem:[%s2032_s5 + $0xf0] sm:$0xff] }
  0x3f   : > { %378 = vst [vmem:[%s2037_s6 + $0x38] sm:$0xff] %v377_v11  ;;  %v395_v20 = vld [vmem:[%s2032_s5 + $0x100] sm:$0xff]  ;;  %v397_v21 = vld [vmem:[%s2032_s5 + $0x110] sm:$0xff] }
  0x40   : > { %380 = vst [vmem:[%s2037_s6 + $0x40] sm:$0xff] %v379_v12  ;;  %v399_v22 = vld [vmem:[%s2032_s5 + $0x120] sm:$0xff]  ;;  %v401_v23 = vld [vmem:[%s2032_s5 + $0x130] sm:$0xff] }
  0x41   : > { %382 = vst [vmem:[%s2037_s6 + $0x48] sm:$0xff] %v381_v13  ;;  %v403_v24 = vld [vmem:[%s2032_s5 + $0x140] sm:$0xff]  ;;  %v405_v25 = vld [vmem:[%s2032_s5 + $0x150] sm:$0xff] }
  0x42   : > { %384 = vst [vmem:[%s2037_s6 + $0x50] sm:$0xff] %v383_v14  ;;  %v407_v26 = vld [vmem:[%s2032_s5 + $0x160] sm:$0xff]  ;;  %v409_v27 = vld [vmem:[%s2032_s5 + $0x170] sm:$0xff] }
  0x43   : > { %386 = vst [vmem:[%s2037_s6 + $0x58] sm:$0xff] %v385_v15  ;;  %v411_v28 = vld [vmem:[%s2032_s5 + $0x180] sm:$0xff]  ;;  %v413_v29 = vld [vmem:[%s2032_s5 + $0x190] sm:$0xff] }
  0x44   : > { %388 = vst [vmem:[%s2037_s6 + $0x60] sm:$0xff] %v387_v16  ;;  %v415_v30 = vld [vmem:[%s2032_s5 + $0x1a0] sm:$0xff]  ;;  %v417_v31 = vld [vmem:[%s2032_s5 + $0x1b0] sm:$0xff] }
  0x45   : > { %390 = vst [vmem:[%s2037_s6 + $0x68] sm:$0xff] %v389_v17  ;;  %v419_v32 = vld [vmem:[%s2032_s5 + $0x1c0] sm:$0xff]  ;;  %v421_v33 = vld [vmem:[%s2032_s5 + $0x1d0] sm:$0xff] }
  0x46   : > { %392 = vst [vmem:[%s2037_s6 + $0x70] sm:$0xff] %v391_v18  ;;  %v423_v34 = vld [vmem:[%s2032_s5 + $0x1e0] sm:$0xff]  ;;  %v425_v35 = vld [vmem:[%s2032_s5 + $0x1f0] sm:$0xff] }
  0x47   : > { %394 = vst [vmem:[%s2037_s6 + $0x78] sm:$0xff] %v393_v19  ;;  %v427_v36 = vld [vmem:[%s2032_s5 + $0x200] sm:$0xff]  ;;  %v429_v37 = vld [vmem:[%s2032_s5 + $0x210] sm:$0xff] }
  0x48   : > { %396 = vst [vmem:[%s2037_s6 + $0x80] sm:$0xff] %v395_v20  ;;  %v431_v38 = vld [vmem:[%s2032_s5 + $0x220] sm:$0xff]  ;;  %v433_v39 = vld [vmem:[%s2032_s5 + $0x230] sm:$0xff] }
  0x49   : > { %398 = vst [vmem:[%s2037_s6 + $0x88] sm:$0xff] %v397_v21  ;;  %v435_v40 = vld [vmem:[%s2032_s5 + $0x240] sm:$0xff]  ;;  %v437_v41 = vld [vmem:[%s2032_s5 + $0x250] sm:$0xff] }
  0x4a   : > { %400 = vst [vmem:[%s2037_s6 + $0x90] sm:$0xff] %v399_v22  ;;  %v439_v42 = vld [vmem:[%s2032_s5 + $0x260] sm:$0xff]  ;;  %v441_v43 = vld [vmem:[%s2032_s5 + $0x270] sm:$0xff] }
  0x4b   : > { %402 = vst [vmem:[%s2037_s6 + $0x98] sm:$0xff] %v401_v23  ;;  %v443_v44 = vld [vmem:[%s2032_s5 + $0x280] sm:$0xff]  ;;  %v445_v45 = vld [vmem:[%s2032_s5 + $0x290] sm:$0xff] }
  0x4c   : > { %404 = vst [vmem:[%s2037_s6 + $0xa0] sm:$0xff] %v403_v24  ;;  %v447_v46 = vld [vmem:[%s2032_s5 + $0x2a0] sm:$0xff]  ;;  %v449_v47 = vld [vmem:[%s2032_s5 + $0x2b0] sm:$0xff] }
  0x4d   : > { %406 = vst [vmem:[%s2037_s6 + $0xa8] sm:$0xff] %v405_v25  ;;  %v451_v48 = vld [vmem:[%s2032_s5 + $0x2c0] sm:$0xff]  ;;  %v453_v49 = vld [vmem:[%s2032_s5 + $0x2d0] sm:$0xff] }
  0x4e   : > { %408 = vst [vmem:[%s2037_s6 + $0xb0] sm:$0xff] %v407_v26  ;;  %v455_v50 = vld [vmem:[%s2032_s5 + $0x2e0] sm:$0xff]  ;;  %v457_v51 = vld [vmem:[%s2032_s5 + $0x2f0] sm:$0xff] }
  0x4f   : > { %410 = vst [vmem:[%s2037_s6 + $0xb8] sm:$0xff] %v409_v27  ;;  %v459_v52 = vld [vmem:[%s2032_s5 + $0x300] sm:$0xff]  ;;  %v461_v53 = vld [vmem:[%s2032_s5 + $0x310] sm:$0xff] }
  0x50   : > { %412 = vst [vmem:[%s2037_s6 + $0xc0] sm:$0xff] %v411_v28  ;;  %v463_v54 = vld [vmem:[%s2032_s5 + $0x320] sm:$0xff]  ;;  %v465_v55 = vld [vmem:[%s2032_s5 + $0x330] sm:$0xff] }
  0x51   : > { %414 = vst [vmem:[%s2037_s6 + $0xc8] sm:$0xff] %v413_v29  ;;  %v467_v56 = vld [vmem:[%s2032_s5 + $0x340] sm:$0xff]  ;;  %v469_v57 = vld [vmem:[%s2032_s5 + $0x350] sm:$0xff] }
  0x52   : > { %416 = vst [vmem:[%s2037_s6 + $0xd0] sm:$0xff] %v415_v30  ;;  %v471_v58 = vld [vmem:[%s2032_s5 + $0x360] sm:$0xff]  ;;  %v473_v59 = vld [vmem:[%s2032_s5 + $0x370] sm:$0xff] }
  0x53   : > { %418 = vst [vmem:[%s2037_s6 + $0xd8] sm:$0xff] %v417_v31  ;;  %v475_v60 = vld [vmem:[%s2032_s5 + $0x380] sm:$0xff]  ;;  %v477_v61 = vld [vmem:[%s2032_s5 + $0x390] sm:$0xff] }
  0x54   : > { %420 = vst [vmem:[%s2037_s6 + $0xe0] sm:$0xff] %v419_v32  ;;  %v479_v62 = vld [vmem:[%s2032_s5 + $0x3a0] sm:$0xff]  ;;  %v481_v63 = vld [vmem:[%s2032_s5 + $0x3b0] sm:$0xff] }
  0x55   : > { %422 = vst [vmem:[%s2037_s6 + $0xe8] sm:$0xff] %v421_v33  ;;  %v483_v0 = vld [vmem:[%s2032_s5 + $0x3c0] sm:$0xff]  ;;  %v485_v1 = vld [vmem:[%s2032_s5 + $0x3d0] sm:$0xff] }
  0x56   : > { %424 = vst [vmem:[%s2037_s6 + $0xf0] sm:$0xff] %v423_v34  ;;  %v487_v2 = vld [vmem:[%s2032_s5 + $0x3e0] sm:$0xff]  ;;  %v489_v3 = vld [vmem:[%s2032_s5 + $0x3f0] sm:$0xff] }
  0x57   : > { %426 = vst [vmem:[%s2037_s6 + $0xf8] sm:$0xff] %v425_v35 }
  0x58   : > { %428 = vst [vmem:[%s2037_s6 + $0x100] sm:$0xff] %v427_v36 }
  0x59   : > { %430 = vst [vmem:[%s2037_s6 + $0x108] sm:$0xff] %v429_v37 }
  0x5a   : > { %432 = vst [vmem:[%s2037_s6 + $0x110] sm:$0xff] %v431_v38 }
  0x5b   : > { %434 = vst [vmem:[%s2037_s6 + $0x118] sm:$0xff] %v433_v39 }
  0x5c   : > { %436 = vst [vmem:[%s2037_s6 + $0x120] sm:$0xff] %v435_v40 }
  0x5d   : > { %438 = vst [vmem:[%s2037_s6 + $0x128] sm:$0xff] %v437_v41 }
  0x5e   : > { %440 = vst [vmem:[%s2037_s6 + $0x130] sm:$0xff] %v439_v42 }
  0x5f   : > { %442 = vst [vmem:[%s2037_s6 + $0x138] sm:$0xff] %v441_v43 }
  0x60   : > { %444 = vst [vmem:[%s2037_s6 + $0x140] sm:$0xff] %v443_v44 }
  0x61   : > { %446 = vst [vmem:[%s2037_s6 + $0x148] sm:$0xff] %v445_v45 }
  0x62   : > { %448 = vst [vmem:[%s2037_s6 + $0x150] sm:$0xff] %v447_v46 }
  0x63   : > { %450 = vst [vmem:[%s2037_s6 + $0x158] sm:$0xff] %v449_v47 }
  0x64   : > { %452 = vst [vmem:[%s2037_s6 + $0x160] sm:$0xff] %v451_v48 }
  0x65   : > { %454 = vst [vmem:[%s2037_s6 + $0x168] sm:$0xff] %v453_v49 }
  0x66   : > { %456 = vst [vmem:[%s2037_s6 + $0x170] sm:$0xff] %v455_v50 }
  0x67   : > { %458 = vst [vmem:[%s2037_s6 + $0x178] sm:$0xff] %v457_v51 }
  0x68   : > { %460 = vst [vmem:[%s2037_s6 + $0x180] sm:$0xff] %v459_v52 }
  0x69   : > { %462 = vst [vmem:[%s2037_s6 + $0x188] sm:$0xff] %v461_v53 }
  0x6a   : > { %464 = vst [vmem:[%s2037_s6 + $0x190] sm:$0xff] %v463_v54 }
  0x6b   : > { %466 = vst [vmem:[%s2037_s6 + $0x198] sm:$0xff] %v465_v55 }
  0x6c   : > { %468 = vst [vmem:[%s2037_s6 + $0x1a0] sm:$0xff] %v467_v56 }
  0x6d   : > { %470 = vst [vmem:[%s2037_s6 + $0x1a8] sm:$0xff] %v469_v57 }
  0x6e   : > { %472 = vst [vmem:[%s2037_s6 + $0x1b0] sm:$0xff] %v471_v58 }
  0x6f   : > { %474 = vst [vmem:[%s2037_s6 + $0x1b8] sm:$0xff] %v473_v59 }
  0x70   : > { %476 = vst [vmem:[%s2037_s6 + $0x1c0] sm:$0xff] %v475_v60 }
  0x71   : > { %478 = vst [vmem:[%s2037_s6 + $0x1c8] sm:$0xff] %v477_v61 }
  0x72   : > { %480 = vst [vmem:[%s2037_s6 + $0x1d0] sm:$0xff] %v479_v62 }
  0x73   : > { %482 = vst [vmem:[%s2037_s6 + $0x1d8] sm:$0xff] %v481_v63 }
  0x74   : > { %484 = vst [vmem:[%s2037_s6 + $0x1e0] sm:$0xff] %v483_v0 }
  0x75   : > { %486 = vst [vmem:[%s2037_s6 + $0x1e8] sm:$0xff] %v485_v1 }
  0x76   : > { %488 = vst [vmem:[%s2037_s6 + $0x1f0] sm:$0xff] %v487_v2 }
  0x77   : > { %490 = vst [vmem:[%s2037_s6 + $0x1f8] sm:$0xff] %v489_v3 }
  0x78 PF: > { %p1364_p0 = scmp.ge.s32.totalorder %s1895_s22, 1  ;;  %p495_p1 = scmp.lt.s32.totalorder %s1895_s22, 19 }
  0x7a   : > { %p496_p2 = pnand %p1364_p0, %p495_p1 }
  0x7b   : > { %s502_s0 = sand.u32 (!%p496_p2), 1, %s1871_s16   ;;  %s509_s23 = sand.u32 (!%p496_p2), 1, %s1863_s14  }
  0x7c   : > { %499 = sbr.rel (%p496_p2) target bundleno = 389 (0x185), region = 81  ;;  %s1365_s28 = sshll.u32 (!%p496_p2), %s502_s0, 5 }
  0x7d   : > { %s1366_s7 = sshll.u32 (!%p496_p2), %s509_s23, 9  ;;  %s530_s11 = sand.u32 (!%p496_p2), 1, %s1855_s12  }
  0x7e   : > { %s1368_s26 = sshll.u32 (!%p496_p2), %s1883_s19, 1  ;;  %s1367_s29 = sshll.u32 (!%p496_p2), %s530_s11, 4 }
  0x7f   : > { %p553_p3 = scmp.lt.s32.totalorder (!%p496_p2), %s1368_s26, 3  ;;  %s2175_s1 = scalar_lea.vmem (!%p496_p2), [#allocation3], %s1365_s28 }
  0x80   : > { %s2177_s25 = scalar_lea.vmem (!%p496_p2), [#allocation4], %s1366_s7  ;;  %s2179_s24 = scalar_lea.vmem (!%p496_p2), [#allocation5], %s1367_s29 }
  0x81   : > { %s2413_s26 = smov (!%p553_p3, %s1368_s26), 3  ;;  %p1370_p4 = scmp.ne.s32.totalorder %s1879_s18, 0 }
  0x82   : > { %s1369_s4 = sshll.u32 %s2413_s26, 1 }
  0x83   : > { %s2173_s6 = scalar_lea.vmem %s2382_s3, %s1369_s4  ;;  %563 = sbr.rel (%p1370_p4) target bundleno = 141 (0x8d), region = 93 }
  0x88   : > { %v1897_v4 = vmov 0.0  }
  0x89   : > { %564 = vst [vmem:[#allocation2 + $0x10] sm:$0xff] %v1897_v4 }
  0x8a   : > { %565 = vst [vmem:[#allocation2] sm:$0xff] %v1897_v4 }
  0x8b   : > { %566 = vst [vmem:[#allocation2 + $0x18] sm:$0xff] %v1897_v4 }
  0x8c   : > { %567 = vst [vmem:[#allocation2 + $0x8] sm:$0xff] %v1897_v4 }
  0x8d PF: > { %v1445_v5 = vld [vmem:[%s2177_s25 + $0x70] sm:$0xf]  ;;  %v1670_v6 = vld [vmem:[%s2177_s25 + $0x74] sm:$0xf0]  ;;  %v1437_v16 = vld [vmem:[%s2177_s25 + $0x60] sm:$0xf] }
  0x8e   : > { %v1509_v7 = vld [vmem:[%s2177_s25 + $0xf0] sm:$0xf]  ;;  %v1446_v8 = vor.u32 %v1670_v6, %v1445_v5  ;;  %v1686_v9 = vld [vmem:[%s2177_s25 + $0xf4] sm:$0xf0]  ;;  %v1668_v18 = vld [vmem:[%s2177_s25 + $0x64] sm:$0xf0] }
  0x8f   : > { %v1573_v10 = vld [vmem:[%s2177_s25 + $0x170] sm:$0xf]  ;;  %v1702_v11 = vld [vmem:[%s2177_s25 + $0x174] sm:$0xf0]  ;;  %v1510_v12 = vor.u32 %v1686_v9, %v1509_v7  ;;  %v1501_v19 = vld [vmem:[%s2177_s25 + $0xe0] sm:$0xf]  ;;  %v1438_v21 = vor.u32 %v1668_v18, %v1437_v16 }
  0x90   : > { %v1574_v13 = vor.u32 %v1702_v11, %v1573_v10  ;;  %v1637_v14 = vld [vmem:[%s2177_s25 + $0x1f0] sm:$0xf]  ;;  %v1718_v15 = vld [vmem:[%s2177_s25 + $0x1f4] sm:$0xf0]  ;;  %980 = vmatpush.bf16.msra.mxu0 %v1446_v8  ;;  %v1684_v20 = vld [vmem:[%s2177_s25 + $0xe4] sm:$0xf0] }
  0x91   : > { %v1638_v17 = vor.u32 %v1718_v15, %v1637_v14  ;;  %994 = vmatpush.bf16.msra.mxu1 %v1510_v12  ;;  %v1502_v22 = vor.u32 %v1684_v20, %v1501_v19  ;;  %v1565_v23 = vld [vmem:[%s2177_s25 + $0x160] sm:$0xf]  ;;  %v1700_v24 = vld [vmem:[%s2177_s25 + $0x164] sm:$0xf0]  ;;  %v1429_v28 = vld [vmem:[%s2177_s25 + $0x50] sm:$0xf] }
  0x92   : > { %1008 = vmatpush.bf16.msra.mxu2 %v1574_v13  ;;  %v1629_v25 = vld [vmem:[%s2177_s25 + $0x1e0] sm:$0xf]  ;;  %v1566_v26 = vor.u32 %v1700_v24, %v1565_v23  ;;  %v1716_v27 = vld [vmem:[%s2177_s25 + $0x1e4] sm:$0xf0]  ;;  %v1666_v29 = vld [vmem:[%s2177_s25 + $0x54] sm:$0xf0] }
  0x93   : > { %1022 = vmatpush.bf16.msra.mxu3 %v1638_v17  ;;  %v1630_v30 = vor.u32 %v1716_v27, %v1629_v25  ;;  %v1493_v31 = vld [vmem:[%s2177_s25 + $0xd0] sm:$0xf]  ;;  %v1682_v32 = vld [vmem:[%s2177_s25 + $0xd4] sm:$0xf0]  ;;  %v1430_v34 = vor.u32 %v1666_v29, %v1429_v28  ;;  %v1421_v40 = vld [vmem:[%s2177_s25 + $0x40] sm:$0xf] }
  0x94   : > { %v1557_v33 = vld [vmem:[%s2177_s25 + $0x150] sm:$0xf]  ;;  %981 = vmatpush.bf16.msra.mxu0 %v1438_v21  ;;  %v1698_v35 = vld [vmem:[%s2177_s25 + $0x154] sm:$0xf0]  ;;  %v1494_v38 = vor.u32 %v1682_v32, %v1493_v31  ;;  %v1664_v41 = vld [vmem:[%s2177_s25 + $0x44] sm:$0xf0] }
  0x95   : > { %v1621_v36 = vld [vmem:[%s2177_s25 + $0x1d0] sm:$0xf]  ;;  %v1714_v37 = vld [vmem:[%s2177_s25 + $0x1d4] sm:$0xf0]  ;;  %995 = vmatpush.bf16.msra.mxu1 %v1502_v22  ;;  %v1558_v39 = vor.u32 %v1698_v35, %v1557_v33  ;;  %v1485_v42 = vld [vmem:[%s2177_s25 + $0xc0] sm:$0xf]  ;;  %v1422_v49 = vor.u32 %v1664_v41, %v1421_v40 }
  0x96   : > { %1009 = vmatpush.bf16.msra.mxu2 %v1566_v26  ;;  %v1622_v43 = vor.u32 %v1714_v37, %v1621_v36  ;;  %v1680_v44 = vld [vmem:[%s2177_s25 + $0xc4] sm:$0xf0]  ;;  %v1549_v45 = vld [vmem:[%s2177_s25 + $0x140] sm:$0xf]  ;;  %v1413_v52 = vld [vmem:[%s2177_s25 + $0x30] sm:$0xf] }
  0x97   : > { %1023 = vmatpush.bf16.msra.mxu3 %v1630_v30  ;;  %v1696_v46 = vld [vmem:[%s2177_s25 + $0x144] sm:$0xf0]  ;;  %v1613_v47 = vld [vmem:[%s2177_s25 + $0x1c0] sm:$0xf]  ;;  %v1486_v50 = vor.u32 %v1680_v44, %v1485_v42  ;;  %v1662_v53 = vld [vmem:[%s2177_s25 + $0x34] sm:$0xf0] }
  0x98   : > { %v1712_v48 = vld [vmem:[%s2177_s25 + $0x1c4] sm:$0xf0]  ;;  %982 = vmatpush.bf16.msra.mxu0 %v1430_v34  ;;  %v1550_v51 = vor.u32 %v1696_v46, %v1549_v45  ;;  %v1477_v54 = vld [vmem:[%s2177_s25 + $0xb0] sm:$0xf]  ;;  %v1678_v56 = vld [vmem:[%s2177_s25 + $0xb4] sm:$0xf0]  ;;  %v1414_v61 = vor.u32 %v1662_v53, %v1413_v52 }
  0x99   : > { %996 = vmatpush.bf16.msra.mxu1 %v1494_v38  ;;  %v1614_v55 = vor.u32 %v1712_v48, %v1613_v47  ;;  %v1541_v57 = vld [vmem:[%s2177_s25 + $0x130] sm:$0xf]  ;;  %v1694_v58 = vld [vmem:[%s2177_s25 + $0x134] sm:$0xf0]  ;;  %v1478_v62 = vor.u32 %v1678_v56, %v1477_v54  ;;  %v1405_v0 = vld [vmem:[%s2177_s25 + $0x20] sm:$0xf] }
  0x9a   : > { %1010 = vmatpush.bf16.msra.mxu2 %v1558_v39  ;;  %v1605_v59 = vld [vmem:[%s2177_s25 + $0x1b0] sm:$0xf]  ;;  %v1710_v60 = vld [vmem:[%s2177_s25 + $0x1b4] sm:$0xf0]  ;;  %v1542_v63 = vor.u32 %v1694_v58, %v1541_v57  ;;  %v1660_v1 = vld [vmem:[%s2177_s25 + $0x24] sm:$0xf0] }
  0x9b   : > { %1024 = vmatpush.bf16.msra.mxu3 %v1622_v43  ;;  %v1469_v2 = vld [vmem:[%s2177_s25 + $0xa0] sm:$0xf]  ;;  %v1606_v3 = vor.u32 %v1710_v60, %v1605_v59  ;;  %v1676_v4 = vld [vmem:[%s2177_s25 + $0xa4] sm:$0xf0]  ;;  %v1406_v9 = vor.u32 %v1660_v1, %v1405_v0  ;;  %v1397_v12 = vld [vmem:[%s2177_s25 + $0x10] sm:$0xf] }
  0x9c   : > { %983 = vmatpush.bf16.msra.mxu0 %v1422_v49  ;;  %v1533_v5 = vld [vmem:[%s2177_s25 + $0x120] sm:$0xf]  ;;  %v1692_v6 = vld [vmem:[%s2177_s25 + $0x124] sm:$0xf0]  ;;  %v1470_v10 = vor.u32 %v1676_v4, %v1469_v2  ;;  %v1658_v13 = vld [vmem:[%s2177_s25 + $0x14] sm:$0xf0] }
  0x9d   : > { %997 = vmatpush.bf16.msra.mxu1 %v1486_v50  ;;  %v1597_v7 = vld [vmem:[%s2177_s25 + $0x1a0] sm:$0xf]  ;;  %v1708_v8 = vld [vmem:[%s2177_s25 + $0x1a4] sm:$0xf0]  ;;  %v1534_v11 = vor.u32 %v1692_v6, %v1533_v5  ;;  %v1461_v14 = vld [vmem:[%s2177_s25 + $0x90] sm:$0xf]  ;;  %v1398_v22 = vor.u32 %v1658_v13, %v1397_v12 }
  0x9e   : > { %1011 = vmatpush.bf16.msra.mxu2 %v1550_v51  ;;  %v1598_v15 = vor.u32 %v1708_v8, %v1597_v7  ;;  %v1674_v16 = vld [vmem:[%s2177_s25 + $0x94] sm:$0xf0]  ;;  %v1525_v17 = vld [vmem:[%s2177_s25 + $0x110] sm:$0xf]  ;;  %v1389_v21 = vld [vmem:[%s2177_s25] sm:$0xf] }
  0x9f   : > { %1025 = vmatpush.bf16.msra.mxu3 %v1614_v55  ;;  %v1690_v18 = vld [vmem:[%s2177_s25 + $0x114] sm:$0xf0]  ;;  %v1589_v19 = vld [vmem:[%s2177_s25 + $0x190] sm:$0xf]  ;;  %v1656_v23 = vld [vmem:[%s2177_s25 + $0x4] sm:$0xf0]  ;;  %v1462_v26 = vor.u32 %v1674_v16, %v1461_v14 }
  0xa0   : > { %984 = vmatpush.bf16.msra.mxu0 %v1414_v61  ;;  %v1706_v20 = vld [vmem:[%s2177_s25 + $0x194] sm:$0xf0]  ;;  %v1453_v24 = vld [vmem:[%s2177_s25 + $0x80] sm:$0xf]  ;;  %v1672_v25 = vld [vmem:[%s2177_s25 + $0x84] sm:$0xf0]  ;;  %v1526_v27 = vor.u32 %v1690_v18, %v1525_v17  ;;  %v1390_v38 = vor.u32 %v1656_v23, %v1389_v21 }
  0xa1   : > { %998 = vmatpush.bf16.msra.mxu1 %v1478_v62  ;;  %v1517_v28 = vld [vmem:[%s2177_s25 + $0x100] sm:$0xf]  ;;  %v1688_v29 = vld [vmem:[%s2177_s25 + $0x104] sm:$0xf0]  ;;  %v1590_v31 = vor.u32 %v1706_v20, %v1589_v19  ;;  %v1669_v33 = vld [vmem:[%s2177_s25 + $0x74] sm:$0xf]  ;;  %v1454_v42 = vor.u32 %v1672_v25, %v1453_v24 }
  0xa2   : > { %1012 = vmatpush.bf16.msra.mxu2 %v1542_v63  ;;  %v1581_v30 = vld [vmem:[%s2177_s25 + $0x180] sm:$0xf]  ;;  %v1704_v32 = vld [vmem:[%s2177_s25 + $0x184] sm:$0xf0]  ;;  %v1447_v34 = vld [vmem:[%s2177_s25 + $0x78] sm:$0xf0]  ;;  %v1518_v43 = vor.u32 %v1688_v29, %v1517_v28 }
  0xa3   : > { %1026 = vmatpush.bf16.msra.mxu3 %v1606_v3  ;;  %v1685_v35 = vld [vmem:[%s2177_s25 + $0xf4] sm:$0xf]  ;;  %v1511_v36 = vld [vmem:[%s2177_s25 + $0xf8] sm:$0xf0]  ;;  %v1667_v44 = vld [vmem:[%s2177_s25 + $0x64] sm:$0xf]  ;;  %v1582_v48 = vor.u32 %v1704_v32, %v1581_v30  ;;  %v1450_v49 = vor.u32 %v1669_v33, %v1447_v34 }
  0xa4   : > { %985 = vmatpush.bf16.msra.mxu0 %v1406_v9  ;;  %v1701_v37 = vld [vmem:[%s2177_s25 + $0x174] sm:$0xf]  ;;  %v1575_v39 = vld [vmem:[%s2177_s25 + $0x178] sm:$0xf0]  ;;  %v1439_v45 = vld [vmem:[%s2177_s25 + $0x68] sm:$0xf0]  ;;  %v1514_v54 = vor.u32 %v1685_v35, %v1511_v36 }
  0xa5   : > { %999 = vmatpush.bf16.msra.mxu1 %v1470_v10  ;;  %v1717_v40 = vld [vmem:[%s2177_s25 + $0x1f4] sm:$0xf]  ;;  %v1639_v41 = vld [vmem:[%s2177_s25 + $0x1f8] sm:$0xf0]  ;;  %v1381_v46 = vld [vmem:[%s2175_s1 + $0x8] sm:$0xf]  ;;  %v1578_v55 = vor.u32 %v1701_v37, %v1575_v39  ;;  %v1442_v4 = vor.u32 %v1667_v44, %v1439_v45 }
  0xa6   : > { %1013 = vmatpush.bf16.msra.mxu2 %v1534_v11  ;;  %v1654_v47 = vld [vmem:[%s2175_s1 + $0x14] sm:$0xf0]  ;;  %v1683_v50 = vld [vmem:[%s2177_s25 + $0xe4] sm:$0xf]  ;;  %v1503_v51 = vld [vmem:[%s2177_s25 + $0xe8] sm:$0xf0]  ;;  %v1642_v59 = vor.u32 %v1717_v40, %v1639_v41 }
  0xa7   : > { %1027 = vmatpush.bf16.msra.mxu3 %v1598_v15  ;;  %v1699_v52 = vld [vmem:[%s2177_s25 + $0x164] sm:$0xf]  ;;  %v1567_v53 = vld [vmem:[%s2177_s25 + $0x168] sm:$0xf0]  ;;  %v1383_v57 = vld [vmem:[%s2175_s1 + $0x18] sm:$0xf0]  ;;  %v2265_v60 = vor.u32 %v1654_v47, %v1381_v46  ;;  %v1506_v6 = vor.u32 %v1683_v50, %v1503_v51 }
  0xa8   : > { %986 = vmatpush.bf16.msra.mxu0 %v1398_v22  ;;  %v1652_v56 = vld [vmem:[%s2175_s1 + $0xc] sm:$0xf]  ;;  %v1373_v58 = vld [vmem:[%s2175_s1] sm:$0xf]  ;;  %v1653_v61 = vld [vmem:[%s2175_s1 + $0xc] sm:$0xf0]  ;;  %v1570_v7 = vor.u32 %v1699_v52, %v1567_v53 }
  0xa9   : > { %1000 = vmatpush.bf16.msra.mxu1 %v1462_v26  ;;  %v1651_v62 = vld [vmem:[%s2175_s1 + $0x4] sm:$0xf]  ;;  %v1375_v63 = vld [vmem:[%s2175_s1 + $0x10] sm:$0xf0]  ;;  %v1631_v1 = vld [vmem:[%s2177_s25 + $0x1e8] sm:$0xf0]  ;;  %v2272_v2 = vor.u32 %v1652_v56, %v1383_v57  ;;  %v2274_v3 = vor.u32 %v1653_v61, %v1373_v58 }
  0xaa   : > { %1014 = vmatpush.bf16.msra.mxu2 %v1526_v27  ;;  %v1715_v0 = vld [vmem:[%s2177_s25 + $0x1e4] sm:$0xf]  ;;  %v2276_v5 = vor.u32 %v1651_v62, %v1375_v63  ;;  %v1665_v8 = vld [vmem:[%s2177_s25 + $0x54] sm:$0xf]  ;;  %v1431_v9 = vld [vmem:[%s2177_s25 + $0x58] sm:$0xf0] }
  0xab   : > { %1028 = vmatpush.bf16.msra.mxu3 %v1590_v31  ;;  %v1681_v10 = vld [vmem:[%s2177_s25 + $0xd4] sm:$0xf]  ;;  %v1634_v11 = vor.u32 %v1715_v0, %v1631_v1  ;;  %v1495_v12 = vld [vmem:[%s2177_s25 + $0xd8] sm:$0xf0]  ;;  %v1434_v17 = vor.u32 %v1665_v8, %v1431_v9  ;;  %v1663_v20 = vld [vmem:[%s2177_s25 + $0x44] sm:$0xf] }
  0xac   : > { %987 = vmatpush.bf16.msra.mxu0 %v1390_v38  ;;  %v1697_v13 = vld [vmem:[%s2177_s25 + $0x154] sm:$0xf]  ;;  %v1559_v14 = vld [vmem:[%s2177_s25 + $0x158] sm:$0xf0]  ;;  %v1498_v18 = vor.u32 %v1681_v10, %v1495_v12  ;;  %v1423_v21 = vld [vmem:[%s2177_s25 + $0x48] sm:$0xf0] }
  0xad   : > { %1001 = vmatpush.bf16.msra.mxu1 %v1454_v42  ;;  %v1713_v15 = vld [vmem:[%s2177_s25 + $0x1d4] sm:$0xf]  ;;  %v1623_v16 = vld [vmem:[%s2177_s25 + $0x1d8] sm:$0xf0]  ;;  %v1562_v19 = vor.u32 %v1697_v13, %v1559_v14  ;;  %v1679_v22 = vld [vmem:[%s2177_s25 + $0xc4] sm:$0xf]  ;;  %v1426_v29 = vor.u32 %v1663_v20, %v1423_v21 }
  0xae   : > { %1015 = vmatpush.bf16.msra.mxu2 %v1518_v43  ;;  %v1626_v23 = vor.u32 %v1713_v15, %v1623_v16  ;;  %v1487_v24 = vld [vmem:[%s2177_s25 + $0xc8] sm:$0xf0]  ;;  %v1695_v25 = vld [vmem:[%s2177_s25 + $0x144] sm:$0xf]  ;;  %v1661_v32 = vld [vmem:[%s2177_s25 + $0x34] sm:$0xf] }
  0xaf   : > { %1029 = vmatpush.bf16.msra.mxu3 %v1582_v48  ;;  %988 = vmatmul.bf16.vlgmr.msra.gmra.mxu0 %v2274_v3  ;;  %v1551_v26 = vld [vmem:[%s2177_s25 + $0x148] sm:$0xf0]  ;;  %v1711_v27 = vld [vmem:[%s2177_s25 + $0x1c4] sm:$0xf]  ;;  %v1490_v30 = vor.u32 %v1679_v22, %v1487_v24  ;;  %v1415_v33 = vld [vmem:[%s2177_s25 + $0x38] sm:$0xf0] }
  0xb0   : > { %1036 = vmatpush.bf16.msrb.mxu0 %v1450_v49  ;;  %1002 = vmatmul.bf16.vlgmr.msra.gmra.mxu1 %v2276_v5  ;;  %v1615_v28 = vld [vmem:[%s2177_s25 + $0x1c8] sm:$0xf0]  ;;  %v1554_v31 = vor.u32 %v1695_v25, %v1551_v26  ;;  %v1677_v34 = vld [vmem:[%s2177_s25 + $0xb4] sm:$0xf]  ;;  %v1479_v36 = vld [vmem:[%s2177_s25 + $0xb8] sm:$0xf0]  ;;  %v1418_v41 = vor.u32 %v1661_v32, %v1415_v33 }
  0xb1   : > { %1050 = vmatpush.bf16.msrb.mxu1 %v1514_v54  ;;  %1016 = vmatmul.bf16.vlgmr.msra.gmra.mxu2 %v2265_v60  ;;  %v1618_v35 = vor.u32 %v1711_v27, %v1615_v28  ;;  %v1693_v37 = vld [vmem:[%s2177_s25 + $0x134] sm:$0xf]  ;;  %v1543_v38 = vld [vmem:[%s2177_s25 + $0x138] sm:$0xf0]  ;;  %v1482_v42 = vor.u32 %v1677_v34, %v1479_v36  ;;  %v1659_v44 = vld [vmem:[%s2177_s25 + $0x24] sm:$0xf] }
  0xb2   : > { %1064 = vmatpush.bf16.msrb.mxu2 %v1578_v55  ;;  %1030 = vmatmul.bf16.vlgmr.msra.gmra.mxu3 %v2272_v2  ;;  %v1709_v39 = vld [vmem:[%s2177_s25 + $0x1b4] sm:$0xf]  ;;  %v1607_v40 = vld [vmem:[%s2177_s25 + $0x1b8] sm:$0xf0]  ;;  %v1546_v43 = vor.u32 %v1693_v37, %v1543_v38  ;;  %v1407_v45 = vld [vmem:[%s2177_s25 + $0x28] sm:$0xf0] }
  0xb3   : > { %1078 = vmatpush.bf16.msrb.mxu3 %v1642_v59  ;;  %v1675_v46 = vld [vmem:[%s2177_s25 + $0xa4] sm:$0xf]  ;;  %v1610_v47 = vor.u32 %v1709_v39, %v1607_v40  ;;  %v1471_v48 = vld [vmem:[%s2177_s25 + $0xa8] sm:$0xf0]  ;;  %v1410_v53 = vor.u32 %v1659_v44, %v1407_v45  ;;  %v1657_v56 = vld [vmem:[%s2177_s25 + $0x14] sm:$0xf] }
  0xb4   : > { %1037 = vmatpush.bf16.msrb.mxu0 %v1442_v4  ;;  %v1691_v49 = vld [vmem:[%s2177_s25 + $0x124] sm:$0xf]  ;;  %v1535_v50 = vld [vmem:[%s2177_s25 + $0x128] sm:$0xf0]  ;;  %v1474_v54 = vor.u32 %v1675_v46, %v1471_v48  ;;  %v1399_v57 = vld [vmem:[%s2177_s25 + $0x18] sm:$0xf0] }
  0xb5   : > { %1051 = vmatpush.bf16.msrb.mxu1 %v1506_v6  ;;  %v1707_v51 = vld [vmem:[%s2177_s25 + $0x1a4] sm:$0xf]  ;;  %v1599_v52 = vld [vmem:[%s2177_s25 + $0x1a8] sm:$0xf0]  ;;  %v1538_v55 = vor.u32 %v1691_v49, %v1535_v50  ;;  %v1673_v58 = vld [vmem:[%s2177_s25 + $0x94] sm:$0xf]  ;;  %v1402_v4 = vor.u32 %v1657_v56, %v1399_v57 }
  0xb6   : > { %1065 = vmatpush.bf16.msrb.mxu2 %v1570_v7  ;;  %v1602_v59 = vor.u32 %v1707_v51, %v1599_v52  ;;  %v1463_v61 = vld [vmem:[%s2177_s25 + $0x98] sm:$0xf0]  ;;  %v1689_v62 = vld [vmem:[%s2177_s25 + $0x114] sm:$0xf]  ;;  %v1655_v8 = vld [vmem:[%s2177_s25 + $0x4] sm:$0xf] }
  0xb7   : > { %1079 = vmatpush.bf16.msrb.mxu3 %v1634_v11  ;;  %v1527_v63 = vld [vmem:[%s2177_s25 + $0x118] sm:$0xf0]  ;;  %v1705_v0 = vld [vmem:[%s2177_s25 + $0x194] sm:$0xf]  ;;  %v1466_v6 = vor.u32 %v1673_v58, %v1463_v61  ;;  %v1391_v9 = vld [vmem:[%s2177_s25 + $0x8] sm:$0xf0] }
  0xb8   : > { %1038 = vmatpush.bf16.msrb.mxu0 %v1434_v17  ;;  %v1591_v1 = vld [vmem:[%s2177_s25 + $0x198] sm:$0xf0]  ;;  %v1530_v7 = vor.u32 %v1689_v62, %v1527_v63  ;;  %v1671_v10 = vld [vmem:[%s2177_s25 + $0x84] sm:$0xf]  ;;  %v1455_v12 = vld [vmem:[%s2177_s25 + $0x88] sm:$0xf0]  ;;  %v1394_v17 = vor.u32 %v1655_v8, %v1391_v9 }
  0xb9   : > { %1052 = vmatpush.bf16.msrb.mxu1 %v1498_v18  ;;  %v1594_v11 = vor.u32 %v1705_v0, %v1591_v1  ;;  %v1687_v13 = vld [vmem:[%s2177_s25 + $0x104] sm:$0xf]  ;;  %v1519_v14 = vld [vmem:[%s2177_s25 + $0x108] sm:$0xf0]  ;;  %v1458_v18 = vor.u32 %v1671_v10, %v1455_v12  ;;  %v568_v27 = vld [vmem:[#allocation2 + $0x10] sm:$0xff]  ;;  %p1643_p5 = scmp.ne.s32.totalorder %s1879_s18, 8 }
  0xba   : > { %1066 = vmatpush.bf16.msrb.mxu2 %v1562_v19  ;;  %v1703_v15 = vld [vmem:[%s2177_s25 + $0x184] sm:$0xf]  ;;  %v1583_v16 = vld [vmem:[%s2177_s25 + $0x188] sm:$0xf0]  ;;  %v1522_v19 = vor.u32 %v1687_v13, %v1519_v14  ;;  %v570_v34 = vld [vmem:[#allocation2 + $0x18] sm:$0xff] }
  0xbb   : > { %1080 = vmatpush.bf16.msrb.mxu3 %v1626_v23  ;;  %v1586_v20 = vor.u32 %v1703_v15, %v1583_v16  ;;  %v571_v49 = vld [vmem:[#allocation2 + $0x8] sm:$0xff] }
  0xbc   : > { %1039 = vmatpush.bf16.msrb.mxu0 %v1426_v29 }
  0xbd   : > { %1053 = vmatpush.bf16.msrb.mxu1 %v1490_v30 }
  0xbe   : > { %1067 = vmatpush.bf16.msrb.mxu2 %v1554_v31 }
  0xbf   : > { %1081 = vmatpush.bf16.msrb.mxu3 %v1618_v35 }
  0xc0   : > { %1040 = vmatpush.bf16.msrb.mxu0 %v1418_v41  ;;  %v569_v41 = vld [vmem:[#allocation2] sm:$0xff] }
  0xc1   : > { %1054 = vmatpush.bf16.msrb.mxu1 %v1482_v42 }
  0xc2   : > { %1068 = vmatpush.bf16.msrb.mxu2 %v1546_v43 }
  0xc3   : > { %1082 = vmatpush.bf16.msrb.mxu3 %v1610_v47 }
  0xc4   : > { %1041 = vmatpush.bf16.msrb.mxu0 %v1410_v53 }
  0xc5   : > { %1055 = vmatpush.bf16.msrb.mxu1 %v1474_v54 }
  0xc6   : > { %1069 = vmatpush.bf16.msrb.mxu2 %v1538_v55 }
  0xc7   : > { %1083 = vmatpush.bf16.msrb.mxu3 %v1602_v59 }
  0xc8   : > { %1042 = vmatpush.bf16.msrb.mxu0 %v1402_v4 }
  0xc9   : > { %1056 = vmatpush.bf16.msrb.mxu1 %v1466_v6 }
  0xca   : > { %1070 = vmatpush.bf16.msrb.mxu2 %v1530_v7 }
  0xcb   : > { %1084 = vmatpush.bf16.msrb.mxu3 %v1594_v11 }
  0xcc   : > { %1043 = vmatpush.bf16.msrb.mxu0 %v1394_v17 }
  0xcd   : > { %1057 = vmatpush.bf16.msrb.mxu1 %v1458_v18 }
  0xce   : > { %1071 = vmatpush.bf16.msrb.mxu2 %v1522_v19 }
  0xcf   : > { %1085 = vmatpush.bf16.msrb.mxu3 %v1586_v20  ;;  %1044 = vmatmul.bf16.vlgmr.msrb.gmra.mxu0 %v2274_v3 }
  0xd0   : > { %1058 = vmatmul.bf16.vlgmr.msrb.gmra.mxu1 %v2276_v5 }
  0xd1   : > { %1072 = vmatmul.bf16.vlgmr.msrb.gmra.mxu2 %v2265_v60 }
  0xd2   : > { %1086 = vmatmul.bf16.vlgmr.msrb.gmra.mxu3 %v2272_v2 }
 0x12c   : > { %v989_v21 = vpop.f32.mrf.mxu0 }
 0x12d   : > { %v1003_v22 = vpop.f32.mrf.mxu1 }
 0x12e   : > { %v1004_v23 = vadd.f32 %v1003_v22, %v989_v21 }
 0x134   : > { %v1017_v24 = vpop.f32.mrf.mxu2  ;;  %v991_v29 = vpop.f32.mrf.mxu0 }
 0x135   : > { %v1018_v25 = vadd.f32 %v1017_v24, %v1004_v23  ;;  %v1031_v26 = vpop.f32.mrf.mxu3  ;;  %v1005_v30 = vpop.f32.mrf.mxu1 }
 0x136   : > { %v1006_v32 = vadd.f32 %v1005_v30, %v991_v29 }
 0x137   : > { %v1032_v28 = vadd.f32 %v1031_v26, %v1018_v25 }
 0x139   : > { %v1092_v31 = vadd.f32 %v1032_v28, %v568_v27 }
 0x13b   : > { %1096 = vst [vmem:[#allocation2 + $0x10] sm:$0xff] %v1092_v31 }
 0x13c   : > { %v1019_v3 = vpop.f32.mrf.mxu2 }
 0x13d   : > { %v1020_v33 = vadd.f32 %v1019_v3, %v1006_v32  ;;  %v1033_v5 = vpop.f32.mrf.mxu3 }
 0x13f   : > { %v1034_v60 = vadd.f32 %v1033_v5, %v1020_v33 }
 0x141   : > { %v1094_v35 = vadd.f32 %v1034_v60, %v570_v34 }
 0x143   : > { %1098 = vst [vmem:[#allocation2 + $0x18] sm:$0xff] %v1094_v35 }
 0x14c   : > { %v1045_v2 = vpop.f32.mrf.mxu0 }
 0x14d   : > { %v1059_v36 = vpop.f32.mrf.mxu1 }
 0x14e   : > { %v1060_v37 = vadd.f32 %v1059_v36, %v1045_v2 }
 0x154   : > { %v1073_v38 = vpop.f32.mrf.mxu2  ;;  %v1047_v43 = vpop.f32.mrf.mxu0 }
 0x155   : > { %v1074_v39 = vadd.f32 %v1073_v38, %v1060_v37  ;;  %v1087_v40 = vpop.f32.mrf.mxu3  ;;  %v1061_v44 = vpop.f32.mrf.mxu1 }
 0x156   : > { %v1062_v46 = vadd.f32 %v1061_v44, %v1047_v43 }
 0x157   : > { %v1088_v42 = vadd.f32 %v1087_v40, %v1074_v39 }
 0x159   : > { %v1093_v45 = vadd.f32 %v1088_v42, %v569_v41 }
 0x15b   : > { %1097 = vst [vmem:[#allocation2] sm:$0xff] %v1093_v45 }
 0x15c   : > { %v1075_v47 = vpop.f32.mrf.mxu2 }
 0x15d   : > { %v1076_v48 = vadd.f32 %v1075_v47, %v1062_v46  ;;  %v1089_v50 = vpop.f32.mrf.mxu3 }
 0x15f   : > { %v1090_v51 = vadd.f32 %v1089_v50, %v1076_v48  ;;  %1103 = sbr.rel (%p1643_p5) target bundleno = 384 (0x180), region = 97 }
 0x161   : > { %v1095_v52 = vadd.f32 %v1090_v51, %v571_v49 }
 0x163   : > { %1099 = vst [vmem:[#allocation2 + $0x8] sm:$0xff] %v1095_v52 }
 0x164   : > { %v1104_v53 = vld [vmem:[#allocation2 + $0x10] sm:$0xff]  ;;  %v1105_v54 = vld [vmem:[#allocation2] sm:$0xff]  ;;  %v1106_v55 = vld [vmem:[#allocation2 + $0x18] sm:$0xff]  ;;  %vm1144_vm0 = vcmask 1040384   ;;  %vm1150_vm1 = vcmask 1041408  }
 0x165   : > { %v1108_v56 = vpack.c.bf16 %v1105_v54, %v1104_v53  ;;  %v1126_v57 = vmul.f32 %v1104_v53, %v1104_v53  ;;  %v1127_v58 = vmul.f32 %v1105_v54, %v1105_v54  ;;  %v1112_v61 = vadd.f32 %v1106_v55, %v1104_v53 }
 0x166   : > { %v1128_v0 = vmul.f32 %v1106_v55, %v1106_v55 }
 0x167   : > { %1110 = vst [vmem:[%s2179_s24] sm:$0xff] %v1108_v56  ;;  %v1113_v4 = vrot.slane %v1112_v61, 4 }
 0x168   : > { %v1130_v7 = vadd.f32 %v1128_v0, %v1126_v57 }
 0x169   : > { %v1114_v9 = vadd.f32 %v1113_v4, %v1112_v61 }
 0x16a   : > { %v1107_v59 = vld [vmem:[#allocation2 + $0x8] sm:$0xff]  ;;  %v1131_v11 = vrot.slane %v1130_v7, 4 }
 0x16b   : > { %v1109_v62 = vpack.c.bf16 %v1107_v59, %v1106_v55  ;;  %v1119_v63 = vadd.f32 %v1107_v59, %v1105_v54  ;;  %v1129_v1 = vmul.f32 %v1107_v59, %v1107_v59  ;;  %v1115_v13 = vrot.slane %v1114_v9, 2 }
 0x16c   : > { %v1132_v15 = vadd.f32 %v1131_v11, %v1130_v7 }
 0x16d   : > { %1111 = vst [vmem:[%s2179_s24 + $0x8] sm:$0xff] %v1109_v62  ;;  %v1120_v6 = vrot.slane %v1119_v63, 4  ;;  %v1137_v8 = vadd.f32 %v1129_v1, %v1127_v58  ;;  %v1116_v17 = vadd.f32 %v1115_v13, %v1114_v9 }
 0x16e   : > { %v1133_v20 = vrot.slane %v1132_v15, 2 }
 0x16f   : > { %v1121_v10 = vadd.f32 %v1120_v6, %v1119_v63  ;;  %v1138_v12 = vrot.slane %v1137_v8, 4  ;;  %v1117_v21 = vrot.slane %v1116_v17, 1 }
 0x170   : > { %v1134_v24 = vadd.f32 %v1133_v20, %v1132_v15 }
 0x171   : > { %v1122_v14 = vrot.slane %v1121_v10, 2  ;;  %v1139_v16 = vadd.f32 %v1138_v12, %v1137_v8  ;;  %v1118_v25 = vadd.f32 %v1117_v21, %v1116_v17 }
 0x172   : > { %v1135_v27 = vrot.slane %v1134_v24, 1 }
 0x173   : > { %v1123_v18 = vadd.f32 %v1122_v14, %v1121_v10  ;;  %v1140_v19 = vrot.slane %v1139_v16, 2 }
 0x174   : > { %v1136_v29 = vadd.f32 %v1135_v27, %v1134_v24 }
 0x175   : > { %v1124_v22 = vrot.slane %v1123_v18, 1  ;;  %v1141_v23 = vadd.f32 %v1140_v19, %v1139_v16 }
 0x176   : > { %v1145_v31 = vsel %vm1144_vm0, %v1118_v25, %v1136_v29 }
 0x177   : > { %v1125_v26 = vadd.f32 %v1124_v22, %v1123_v18  ;;  %v1142_v28 = vrot.slane %v1141_v23, 1 }
 0x179   : > { %v1143_v30 = vadd.f32 %v1142_v28, %v1141_v23 }
 0x17b   : > { %v1146_v32 = vsel %vm1144_vm0, %v1125_v26, %v1143_v30 }
 0x17c   : > { %v1149_v3 = vrot.slane %v1146_v32, 6 }
 0x17e   : > { %v1151_v33 = vsel %vm1150_vm1, %v1145_v31, %v1149_v3 }
 0x17f   : > { %1153 = vst [vmem:[%s2173_s6] sm:$0xf] %v1151_v33 }
 0x180 PF: > { %1169 = sbr.rel (!%p2012_p12) target bundleno = 389 (0x185), region = 101  ;;  %s1719_s1 = sshll.u32 (%p2012_p12), %s1883_s19, 3  ;;  %v1206_v5 = vld [vmem:[%s2179_s24] sm:$0xff] (%p2012_p12)  ;;  %v1208_v34 = vld [vmem:[%s2179_s24 + $0x8] sm:$0xff] (%p2012_p12) }
 0x181   : > { %s1175_s16 = scalar_lea.vmem (%p2012_p12), %s2381_s2, %s1719_s1 }
 0x182   : > { %1207 = vst [vmem:[%s1175_s16] sm:$0xff] (%p2012_p12), %v1206_v5 }
 0x183   : > { %1209 = vst [vmem:[%s1175_s16 + $0x10] sm:$0xff] (%p2012_p12), %v1208_v34 }
 0x185 PF: > { %s14_s22 = sadd.s32 1, %s1895_s22   ;;  %s2394_s24 = sld [smem:[#allocation6_spill]] }
 0x186   : > { %p11_p6 = scmp.ge.s32.totalorder %s14_s22, 20   ;;  %s2395_s25 = sld [smem:[#allocation7_spill]] }
 0x187   : > { %s2396_s12 = smov %s1859_s13  ;;  %s2397_s13 = smov %s2010_s9 }
 0x188   : > { %s2398_s14 = smov %s1867_s15  ;;  %s2399_s15 = smov %s2007_s8 }
 0x189   : > { %s2400_s16 = smov %s1875_s17  ;;  %s2401_s17 = smov %s1993_s30 }
 0x18a   : > { %s2402_s18 = smov %s1887_s20  ;;  %s2403_s19 = smov %s1891_s21 }
 0x18b   : > { %s2404_s20 = smov %s2394_s24  ;;  %13 = sbr.rel (!%p11_p6) target bundleno = 9 (0x9), region = 190 }
 0x18c   : > { %s2405_s21 = smov %s2395_s25 }

// kernel: _lambda_.51
= control target key start
LH: loop header
LB: loop body
LE: loop exit
PB: predicated region body
PF: predicated region fallthrough
CT: control target
= control target key end

     0   :  { %9 = vsyncpa [#allocation3], 0  ;;  %s1177_s0 = inlined_call_operand.vmem [shape: bf16[2,1,512], index: 0, kind: input, shape index: {}]   ;;  %s1178_s1 = inlined_call_operand.vmem [shape: f32[2,1,512], index: 1, kind: input, shape index: {}]   ;;  %s1179_s2 = inlined_call_operand.vmem [shape: bf16[512,128], index: 2, kind: input, shape index: {}]   ;;  %s1180_s3 = inlined_call_operand.vmem [shape: f32[1,128], index: 3, kind: input, shape index: {}]   ;;  %s1181_s4 = inlined_call_operand.hbm [shape: f32[2,1,128], index: 4, kind: output, shape index: {}]  }
   0x1   :  { %11 = vsyncpa [#allocation3 + $0x1], 0  ;;  %s983_s15 = smov 0   ;;  %s985_s16 = smov 0  }
   0x2   :  { %s987_s17 = smov 0   ;;  %s989_s18 = smov 0  }
   0x3 LB: > { %s1004_s19 = sadd.s32 4294967295, %s953_s18   ;;  %s668_s20 = sadd.s32 4294967294, %s953_s18   ;;  %s953_s18 = sphi %s989_s18, %s1187_s18   ;;  %s949_s17 = sphi %s987_s17, %s1186_s17   ;;  %s945_s16 = sphi %s985_s16, %s1185_s16   ;;  %s941_s15 = sphi %s983_s15, %s1184_s15  }
   0x4   : > { %s1008_s21 = sadd.s32 1, %s953_s18   ;;  %s118_s22 = sadd.s32 1, %s949_s17 }
   0x5   : > { %s115_s23 = ssub.s32 %s953_s18, %s1008_s21  ;;  %p128_p0 = scmp.ne.s32.totalorder %s949_s17, %s945_s16 }
   0x6   : > { %p116_p1 = scmp.eq.s32.totalorder %s115_s23, 0  ;;  %p129_p2 = scmp.eq.s32.totalorder %s1004_s19, 1 }
   0x7   : > { %p134_p3 = scmp.ne.s32.totalorder %s945_s16, %s941_s15  ;;  %p135_p4 = scmp.eq.s32.totalorder %s668_s20, 1 }
   0x8   : > { %s1019_s24 = scalar_select %p116_p1, %s949_s17, %s118_s22  }
   0x9   : > { %p1021_p5 = por %p129_p2, %p128_p0  ;;  %p1025_p6 = por %p135_p4, %p134_p3 }
   0xa   : > { %p671_p7 = scmp.ge.s32.totalorder %s953_s18, 1  ;;  %p173_p8 = scmp.lt.s32.totalorder %s953_s18, 3 }
   0xc   : > { %p174_p9 = pnand %p671_p7, %p173_p8 }
   0xd   : > { %p201_p10 = scmp.lt.s32.totalorder (!%p174_p9), %s1004_s19, 1  ;;  %s199_s11 = sand.u32 (!%p174_p9), 1, %s945_s16  }
   0xe   : > { %177 = sbr.rel (%p174_p9) target bundleno = 226 (0xe2), region = 36  ;;  %s597_s20 = scalar_lea.hbm (!%p174_p9), %s1181_s4, %s1004_s19 }
   0xf   : > { %s200_s22 = scalar_lea.vmem (!%p174_p9), [#allocation2], %s199_s11  ;;  %s601_s28 = sshll.u32 (!%p174_p9), %s597_s20, 4  ;;  %s602_s28 = int_to_ptr.hbm [resolvable:$true] %s601_s28 }
  0x10   : > { %s599_s23 = sshll.u32 (!%p174_p9), %s200_s22, 4  ;;  %s589_s29 = scalar_lea.sflag (!%p174_p9), [#allocation3], %s199_s11  ;;  %s600_s23 = int_to_ptr.vmem [resolvable:$true] %s599_s23 }
  0x11   : > { %s905_s30 = sshra.s32 (!%p174_p9), %s602_s28, 4  ;;  %s911_s7 = scalar_lea.hbm (!%p174_p9), %s1181_s4, 2  ;;  %s906_s30 = int_to_ptr.hbm [resolvable:$true] %s905_s30 }
  0x12   : > { %s907_s5 = scalar_lea.hbm (!%p174_p9), %s906_s30, 1  ;;  %p912_p0 = scmp.lt.s32.totalorder (!%p174_p9), %s906_s30, %s1181_s4 }
  0x13   : > { %v812_v0 = vld [vmem:[%s1179_s2 + $0x38] sm:$0xff]  ;;  %v955_v4 = vmov 0.1   ;;  %v811_v5 = vld [vmem:[%s1179_s2 + $0x30] sm:$0xff]  ;;  %s1051_s13 = scalar_select %p201_p10, %s1004_s19, 1  ;;  %v810_v9 = vld [vmem:[%s1179_s2 + $0x28] sm:$0xff] }
  0x14   : > { %v820_v1 = vld [vmem:[%s1179_s2 + $0x78] sm:$0xff]  ;;  %879 = vrcp.f32 %v955_v4  ;;  %535 = vmatpush.bf16.msra.mxu0 %v812_v0  ;;  %v819_v6 = vld [vmem:[%s1179_s2 + $0x70] sm:$0xff]  ;;  %v818_v10 = vld [vmem:[%s1179_s2 + $0x68] sm:$0xff]  ;;  %v956_v51 = vmov 0.9   ;;  %p908_p11 = scmp.ne.s32.totalorder %s906_s30, %s907_s5  ;;  %p913_p1 = scmp.lt.s32.totalorder %s911_s7, %s907_s5 }
  0x15   : > { %v828_v2 = vld [vmem:[%s1179_s2 + $0xb8] sm:$0xff]  ;;  %548 = vmatpush.bf16.msra.mxu1 %v820_v1  ;;  %v827_v7 = vld [vmem:[%s1179_s2 + $0xb0] sm:$0xff]  ;;  %s672_s27 = sshll.u32 %s1051_s13, 2  ;;  %v826_v12 = vld [vmem:[%s1179_s2 + $0xa8] sm:$0xff]  ;;  %v957_v63 = vmov 857870592  }
  0x16   : > { %v836_v3 = vld [vmem:[%s1179_s2 + $0xf8] sm:$0xff]  ;;  %561 = vmatpush.bf16.msra.mxu2 %v828_v2  ;;  %v835_v8 = vld [vmem:[%s1179_s2 + $0xf0] sm:$0xff]  ;;  %v834_v13 = vld [vmem:[%s1179_s2 + $0xe8] sm:$0xff]  ;;  %s208_s12 = scalar_lea.vmem %s1178_s1, %s672_s27  ;;  %s204_s10 = scalar_lea.vmem %s1177_s0, %s672_s27  ;;  %v252_v0 = vunpack.c.l.s4 %v957_v63 }
  0x17   : > { %574 = vmatpush.bf16.msra.mxu3 %v836_v3  ;;  %v809_v15 = vld [vmem:[%s1179_s2 + $0x20] sm:$0xff]  ;;  %v808_v23 = vld [vmem:[%s1179_s2 + $0x18] sm:$0xff]  ;;  %v807_v29 = vld [vmem:[%s1179_s2 + $0x10] sm:$0xff]  ;;  %p909_p12 = pnand %p908_p11, %p1021_p5  ;;  %p914_p2 = por %p913_p1, %p912_p0 }
  0x18   : > { %536 = vmatpush.bf16.msra.mxu0 %v811_v5  ;;  %v817_v16 = vld [vmem:[%s1179_s2 + $0x60] sm:$0xff]  ;;  %v816_v24 = vld [vmem:[%s1179_s2 + $0x58] sm:$0xff]  ;;  %v815_v30 = vld [vmem:[%s1179_s2 + $0x50] sm:$0xff] }
  0x19   : > { %549 = vmatpush.bf16.msra.mxu1 %v819_v6  ;;  %v825_v17 = vld [vmem:[%s1179_s2 + $0xa0] sm:$0xff]  ;;  %v824_v26 = vld [vmem:[%s1179_s2 + $0x98] sm:$0xff]  ;;  %v823_v31 = vld [vmem:[%s1179_s2 + $0x90] sm:$0xff]  ;;  %v253_v6 = vunpack.c.0.s8 %v252_v0  ;;  %p910_p13 = pneg %p909_p12 }
  0x1a   : > { %v880_v11 = vpop.eup %879  ;;  %562 = vmatpush.bf16.msra.mxu2 %v827_v7  ;;  %v833_v18 = vld [vmem:[%s1179_s2 + $0xe0] sm:$0xff]  ;;  %v832_v27 = vld [vmem:[%s1179_s2 + $0xd8] sm:$0xff]  ;;  %v831_v32 = vld [vmem:[%s1179_s2 + $0xd0] sm:$0xff] }
  0x1b   : > { %575 = vmatpush.bf16.msra.mxu3 %v835_v8  ;;  %v223_v14 = vmul.f32 0.1, %v880_v11  ;;  %v212_v19 = vld [vmem:[%s208_s12] sm:$0xf]  ;;  %vm227_vm0 = vweird.f32 %v880_v11  ;;  %v806_v37 = vld [vmem:[%s1179_s2 + $0x8] sm:$0xff]  ;;  %p915_p3 = pnand %p914_p2, %p910_p13 }
  0x1c   : > { %537 = vmatpush.bf16.msra.mxu0 %v810_v9  ;;  %v213_v20 = vadd.f32 1e-07, %v212_v19  ;;  %v217_v21 = vsub.f32 1.0, %v212_v19  ;;  %v814_v38 = vld [vmem:[%s1179_s2 + $0x48] sm:$0xff]  ;;  %v805_v45 = vld [vmem:[%s1179_s2] sm:$0xff] }
  0x1d   : > { %550 = vmatpush.bf16.msra.mxu1 %v818_v10  ;;  %v224_v22 = vsub.f32 1.0, %v223_v14  ;;  %v822_v39 = vld [vmem:[%s1179_s2 + $0x88] sm:$0xff]  ;;  %v813_v46 = vld [vmem:[%s1179_s2 + $0x40] sm:$0xff] }
  0x1e   : > { %563 = vmatpush.bf16.msra.mxu2 %v826_v12  ;;  %881 = vlog2.f32 %v213_v20  ;;  %v218_v25 = vadd.f32 1e-07, %v217_v21  ;;  %v830_v40 = vld [vmem:[%s1179_s2 + $0xc8] sm:$0xff]  ;;  %v821_v47 = vld [vmem:[%s1179_s2 + $0x80] sm:$0xff] }
  0x1f   : > { %576 = vmatpush.bf16.msra.mxu3 %v834_v13  ;;  %v225_v28 = vmul.f32 %v880_v11, %v224_v22  ;;  %v829_v48 = vld [vmem:[%s1179_s2 + $0xc0] sm:$0xff] }
  0x20   : > { %538 = vmatpush.bf16.msra.mxu0 %v809_v15  ;;  %883 = vlog2.f32 %v218_v25  ;;  %v209_v4 = vld [vmem:[%s204_s10] sm:$0xf] }
  0x21   : > { %551 = vmatpush.bf16.msra.mxu1 %v817_v16  ;;  %v226_v34 = vadd.f32 %v880_v11, %v225_v28  ;;  %v210_v9 = vunpack.c.l.bf16 %v209_v4 }
  0x22   : > { %564 = vmatpush.bf16.msra.mxu2 %v825_v17 }
  0x23   : > { %577 = vmatpush.bf16.msra.mxu3 %v833_v18  ;;  %v228_v43 = vsel %vm227_vm0, %v880_v11, %v226_v34 }
  0x24   : > { %539 = vmatpush.bf16.msra.mxu0 %v808_v23  ;;  %v882_v33 = vpop.eup %881  ;;  %v342_v23 = vld [vmem:[%s1180_s3] sm:$0x1] }
  0x25   : > { %552 = vmatpush.bf16.msra.mxu1 %v816_v24  ;;  %v215_v35 = vmul.f32 0.6931472, %v882_v33 }
  0x26   : > { %565 = vmatpush.bf16.msra.mxu2 %v824_v26  ;;  %v884_v36 = vpop.eup %883 }
  0x27   : > { %578 = vmatpush.bf16.msra.mxu3 %v832_v27  ;;  %v216_v41 = vadd.f32 -2.1972237, %v215_v35  ;;  %v220_v42 = vmul.f32 0.6931472, %v884_v36 }
  0x28   : > { %540 = vmatpush.bf16.msra.mxu0 %v807_v29 }
  0x29   : > { %553 = vmatpush.bf16.msra.mxu1 %v815_v30  ;;  %v221_v44 = vsub.f32 %v216_v41, %v220_v42 }
  0x2a   : > { %566 = vmatpush.bf16.msra.mxu2 %v823_v31 }
  0x2b   : > { %579 = vmatpush.bf16.msra.mxu3 %v831_v32  ;;  %v229_v49 = vmul.f32 %v228_v43, %v221_v44 }
  0x2c   : > { %541 = vmatpush.bf16.msra.mxu0 %v806_v37 }
  0x2d   : > { %554 = vmatpush.bf16.msra.mxu1 %v814_v38  ;;  %v674_v50 = vmul.f32 -1.442695, %v229_v49 }
  0x2e   : > { %567 = vmatpush.bf16.msra.mxu2 %v822_v39 }
  0x2f   : > { %580 = vmatpush.bf16.msra.mxu3 %v830_v40  ;;  %885 = vpow2.f32 %v674_v50 }
  0x30   : > { %542 = vmatpush.bf16.msra.mxu0 %v805_v45  ;;  %887 = vrcp.f32 %v956_v51 }
  0x31   : > { %555 = vmatpush.bf16.msra.mxu1 %v813_v46 }
  0x32   : > { %568 = vmatpush.bf16.msra.mxu2 %v821_v47 }
  0x33   : > { %581 = vmatpush.bf16.msra.mxu3 %v829_v48 }
  0x35   : > { %v886_v52 = vpop.eup %885 }
  0x36   : > { %v233_v53 = vadd.f32 1.0, %v886_v52  ;;  %v888_v54 = vpop.eup %887 }
  0x37   : > { %v258_v55 = vmul.f32 0.9, %v888_v54  ;;  %vm262_vm5 = vweird.f32 %v888_v54 }
  0x38   : > { %889 = vrcp.f32 %v233_v53  ;;  %v245_v58 = vand.u32 2147483648, %v233_v53  ;;  %vm239_vm1 = vweird.f32 %v233_v53  ;;  %v243_v61 = vand.u32 2147483647, %v233_v53 }
  0x39   : > { %v259_v59 = vsub.f32 1.0, %v258_v55 }
  0x3a   : > { %v246_v1 = vor.u32 1.1754944e-38, %v245_v58  ;;  %vm244_vm4 = vcmp.eq.f32.partialorder %v243_v61, 8.507059e+37 }
  0x3b   : > { %v260_v2 = vmul.f32 %v888_v54, %v259_v59 }
  0x3d   : > { %v261_v8 = vadd.f32 %v888_v54, %v260_v2 }
  0x3e   : > { %v890_v56 = vpop.eup %889 }
  0x3f   : > { %v235_v57 = vmul.f32 %v890_v56, %v233_v53  ;;  %vm240_vm2 = vweird.f32 %v890_v56  ;;  %v263_v12 = vsel %vm262_vm5, %v888_v54, %v261_v8 }
  0x40   : > { %vm241_vm3 = vmor %vm239_vm1, %vm240_vm2 }
  0x41   : > { %v236_v60 = vsub.f32 1.0, %v235_v57 }
  0x43   : > { %v237_v62 = vmul.f32 %v890_v56, %v236_v60 }
  0x45   : > { %v238_v3 = vadd.f32 %v890_v56, %v237_v62 }
  0x47   : > { %v242_v5 = vsel %vm241_vm3, %v890_v56, %v238_v3 }
  0x48   : > { %v247_v7 = vsel %vm244_vm4, %v246_v1, %v242_v5 }
  0x49   : > { %v249_v10 = vsub.f32 1.0, %v247_v7 }
  0x4b   : > { %v254_v11 = vperm.slane %v249_v10, %v253_v6 }
  0x4d   : > { %v256_v13 = vmul.f32 %v254_v11, %v210_v9 }
  0x4f   : > { %v264_v14 = vmul.f32 %v263_v12, %v256_v13 }
  0x51   : > { %v266_v15 = vperm.slane %v264_v14, 0  ;;  %v267_v16 = vperm.slane %v264_v14, 2  ;;  %v268_v17 = vperm.slane %v264_v14, 4  ;;  %v269_v18 = vperm.slane %v264_v14, 6 }
  0x53   : > { %v274_v19 = vpack.c.bf16 %v266_v15, %v266_v15  ;;  %v275_v20 = vpack.c.bf16 %v267_v16, %v267_v16  ;;  %v276_v21 = vpack.c.bf16 %v268_v17, %v268_v17  ;;  %v277_v22 = vpack.c.bf16 %v269_v18, %v269_v18 }
  0x55   : > { %543 = vmatmul.bf16.vlgmr.msra.gmra.mxu0 %v274_v19  ;;  %556 = vmatmul.bf16.vlgmr.msra.gmra.mxu1 %v275_v20 }
  0x56   : > { %569 = vmatmul.bf16.vlgmr.msra.gmra.mxu2 %v276_v21  ;;  %582 = vmatmul.bf16.vlgmr.msra.gmra.mxu3 %v277_v22 }
  0xd2   : > { %v544_v24 = vpop.f32.mrf.mxu0  ;;  %v557_v25 = vpop.f32.mrf.mxu1 }
  0xd3   : > { %v545_v26 = vadd.f32 %v544_v24, %v342_v23 }
  0xd5   : > { %v558_v27 = vadd.f32 %v557_v25, %v545_v26 }
  0xd9   : > { %v570_v28 = vpop.f32.mrf.mxu2  ;;  %v583_v29 = vpop.f32.mrf.mxu3 }
  0xda   : > { %v571_v30 = vadd.f32 %v570_v28, %v558_v27  ;;  %v546_v31 = vpop.f32.mrf.mxu0  ;;  %v559_v32 = vpop.f32.mrf.mxu1 }
  0xdc   : > { %v584_v33 = vadd.f32 %v583_v29, %v571_v30 }
  0xde   : > { %587 = vst [vmem:[%s200_s22] sm:$0x1] %v584_v33 }
  0xdf   : > { %918 = shalt.err (!%p915_p3)
}
  0xe0   : > { %837 = dma.vmem_to_hbm [thread:$0]  (%p1021_p5), %s600_s23, 16, %s602_s28, %s589_s29  }
  0xe1   : > { %v572_v34 = vpop.f32.mrf.mxu2  ;;  %v585_v35 = vpop.f32.mrf.mxu3 }
  0xe2 PF: > { %p843_p4 = scmp.ge.s32.totalorder %s953_s18, 2  ;;  %s613_s10 = sand.u32 1, %s941_s15  }
  0xe3   : > { %s614_s13 = scalar_lea.sflag [#allocation3], %s613_s10 }
  0xe4   : > { %p840_p7 = pnand %p843_p4, %p1025_p6 }
  0xe6   : > { %p841_p8 = pneg %p840_p7 }
  0xe8   : > { %936 = dma.done.wait (%p841_p8), %s614_s13, 16  }
  0xe9   : > { %938 = vsyncadd (%p841_p8), %s614_s13, 4294967280  ;;  %p14_p5 = scmp.ge.s32.totalorder %s1008_s21, 4   ;;  %s1184_s15 = smov %s945_s16 }
  0xea   : > { %s1185_s16 = smov %s949_s17  ;;  %s1186_s17 = smov %s1019_s24 }
  0xeb   : > { %s1187_s18 = smov %s1008_s21  ;;  %16 = sbr.rel (!%p14_p5) target bundleno = 3 (0x3), region = 74 }
  0xf0   :  { %619 = vsyncpa [#allocation3], 1 }
  0xf1   :  { %621 = vsyncpa [#allocation3 + $0x1], 1 }

</bundles_post_ra>
